<compile_context>
chip_gen: v5e
topology: v5e:2x2
jax: 0.10.0
libtpu: 0.0.40
codegen_flags: <defaults>
</compile_context>

<pallas_src>
import functools

import jax
import jax.numpy as jnp
import numpy as np
from jax import lax
from jax.experimental import pallas as pl
from jax.experimental.pallas import tpu as pltpu

CP = 128          # lane width carried for conv outputs / residuals
BM_MAX = 256      # max rows per GEMM M tile (f32 scratch accumulator = 128 KB)


def _round_up(x, m):
    return -(-x // m) * m


# ----------------------------- Pallas kernels -------------------------------

def _gemm_bn_act_kernel(p_ref, w_ref, shift_ref, *rest, relu, add_res):
    """One (bm,bk)x(bk,CP) MXU step of conv-as-GEMM with f32 scratch
    accumulation; BN shift / residual / ReLU fused on the last K step."""
    if add_res:
        res_ref, o_ref, acc_ref = rest
    else:
        o_ref, acc_ref = rest
    k = pl.program_id(1)

    @pl.when(k == 0)
    def _():
        acc_ref[...] = jnp.zeros_like(acc_ref)

    acc_ref[...] += jnp.dot(p_ref[...], w_ref[...],
                            preferred_element_type=jnp.float32)

    @pl.when(k == pl.num_programs(1) - 1)
    def _():
        out = acc_ref[...] + shift_ref[...]
        if add_res:
            out = out + res_ref[...].astype(jnp.float32)
        if relu:
            out = jnp.maximum(out, 0.0)
        o_ref[...] = out.astype(o_ref.dtype)


def _maxpool_kernel(p00_ref, p01_ref, p10_ref, p11_ref, o_ref, *, Ho, Wo):
    """3x3 stride-2 pad-1 max pool over a 2x2 stride-phase decomposition."""
    ph = {(0, 0): p00_ref[0], (0, 1): p01_ref[0],
          (1, 0): p10_ref[0], (1, 1): p11_ref[0]}
    out = None
    for a, di in ((0, 0), (1, 0), (0, 1)):        # kh = 0, 1, 2
        for b, dj in ((0, 0), (1, 0), (0, 1)):    # kw = 0, 1, 2
            s = ph[(a, b)][di:di + Ho, dj:dj + Wo, :]
            out = s if out is None else jnp.maximum(out, s)
    o_ref[0] = out


def _avgpool_kernel(x_ref, o_ref):
    # x_ref: (N, H*W, CP) bf16 -> mean over spatial axis, f32 output
    o_ref[...] = jnp.mean(x_ref[...].astype(jnp.float32), axis=1)


# ------------------------------ kernel wrappers ------------------------------

def _im2col(x, cin, kh, kw, stride, padding):
    """Dense-K im2col: (N,H,W,C>=cin) -> (N*Ho*Wo, kh*kw*cin) patches.  Only
    the *real* input channels enter the contraction (no zero-padded lanes)."""
    N, H, W, _ = x.shape
    Ho = (H + 2 * padding - kh) // stride + 1
    Wo = (W + 2 * padding - kw) // stride + 1
    xp = x[..., :cin]
    if padding:
        xp = jnp.pad(xp, ((0, 0), (padding, padding), (padding, padding), (0, 0)))
    cols = []
    for i in range(kh):
        for j in range(kw):
            cols.append(lax.slice(
                xp, (0, i, j, 0),
                (N, i + (Ho - 1) * stride + 1, j + (Wo - 1) * stride + 1, cin),
                (1, stride, stride, 1)))
    p = cols[0] if len(cols) == 1 else jnp.concatenate(cols, axis=-1)
    return p.reshape(N * Ho * Wo, kh * kw * cin), Ho, Wo


def conv_bn_act(x, cw, *, stride, padding, relu, residual=None, use_pallas=True):
    """conv2d (eval BN scale pre-folded into weights) + BN shift
    [+ residual] [+ ReLU] as one M/K-tiled Pallas GEMM (batch folded into M)."""
    N = x.shape[0]
    cin, kh, kw = cw['cin'], cw['kh'], cw['kw']
    w, shift = cw['w'], cw['shift']                  # (Kp, CP) bf16, (1, CP) f32
    Kp = w.shape[0]
    K = kh * kw * cin

    patches, Ho, Wo = _im2col(x, cin, kh, kw, stride, padding)
    M = N * Ho * Wo
    bk = 256 if Kp % 256 == 0 else 128               # fill 256-wide MXU when possible
    bm = min(BM_MAX, _round_up(M, 16))
    Mp = _round_up(M, bm)
    patches = jnp.pad(patches, ((0, Mp - M), (0, Kp - K)))

    res = None
    if residual is not None:
        assert residual.shape == (N, Ho, Wo, CP), (residual.shape, (N, Ho, Wo, CP))
        res = jnp.pad(residual.reshape(M, CP), ((0, Mp - M), (0, 0)))

    nm, nk = Mp // bm, Kp // bk

    if use_pallas:
        kernel = functools.partial(_gemm_bn_act_kernel, relu=relu,
                                   add_res=res is not None)
        in_specs = [
            pl.BlockSpec((bm, bk), lambda m, k: (m, k)),
            pl.BlockSpec((bk, CP), lambda m, k: (k, 0)),
            pl.BlockSpec((1, CP), lambda m, k: (0, 0)),
        ]
        args = [patches, w, shift]
        if res is not None:
            in_specs.append(pl.BlockSpec((bm, CP), lambda m, k: (m, 0)))
            args.append(res)
        bytes_accessed = 2 * (Mp * Kp + Kp * CP + Mp * CP) + 4 * CP
        if res is not None:
            bytes_accessed += 2 * Mp * CP
        out = pl.pallas_call(
            kernel,
            out_shape=jax.ShapeDtypeStruct((Mp, CP), jnp.bfloat16),
            grid=(nm, nk),
            in_specs=in_specs,
            out_specs=pl.BlockSpec((bm, CP), lambda m, k: (m, 0)),
            scratch_shapes=[pltpu.VMEM((bm, CP), jnp.float32)],
            compiler_params=pltpu.CompilerParams(
                dimension_semantics=("parallel", "arbitrary"),
                vmem_limit_bytes=32 * 1024 * 1024),
            cost_estimate=pl.CostEstimate(flops=2 * Mp * Kp * CP,
                                          transcendentals=0,
                                          bytes_accessed=bytes_accessed),
        )(*args)
    else:
        # pure-JAX reference with IDENTICAL math (same bf16 patches, same K
        # blocking, f32 accumulation, f32 epilogue).
        acc = jnp.zeros((Mp, CP), jnp.float32)
        for k in range(nk):
            acc = acc + jnp.dot(patches[:, k * bk:(k + 1) * bk],
                                w[k * bk:(k + 1) * bk],
                                preferred_element_type=jnp.float32)
        out = acc + shift
        if res is not None:
            out = out + res.astype(jnp.float32)
        if relu:
            out = jnp.maximum(out, 0.0)
        out = out.astype(jnp.bfloat16)

    return out[:M].reshape(N, Ho, Wo, CP)


def maxpool_3x3_s2_p1(x, use_pallas=True):
    """MaxPool2d(kernel=3, stride=2, padding=1).  Input is post-ReLU (>= 0),
    so zero spatial padding is equivalent to -inf padding for the max."""
    N, H, W, C = x.shape
    Ho = (H - 1) // 2 + 1
    Wo = (W - 1) // 2 + 1
    xp = jnp.pad(x, ((0, 0), (1, 1 + H % 2), (1, 1 + W % 2), (0, 0)))
    phases = [xp[:, a::2, b::2, :] for a in (0, 1) for b in (0, 1)]
    Hh, Wh = phases[0].shape[1], phases[0].shape[2]
    assert Hh >= Ho + 1 and Wh >= Wo + 1
    if use_pallas:
        return pl.pallas_call(
            functools.partial(_maxpool_kernel, Ho=Ho, Wo=Wo),
            out_shape=jax.ShapeDtypeStruct((N, Ho, Wo, C), x.dtype),
            grid=(N,),
            in_specs=[pl.BlockSpec((1, Hh, Wh, C), lambda n: (n, 0, 0, 0))] * 4,
            out_specs=pl.BlockSpec((1, Ho, Wo, C), lambda n: (n, 0, 0, 0)),
            compiler_params=pltpu.CompilerParams(
                dimension_semantics=("parallel",)),
        )(*phases)
    out = None
    for a, di in ((0, 0), (1, 0), (0, 1)):
        for b, dj in ((0, 0), (1, 0), (0, 1)):
            s = phases[a * 2 + b][:, di:di + Ho, dj:dj + Wo, :]
            out = s if out is None else jnp.maximum(out, s)
    return out


def global_avgpool(x, use_pallas=True):
    """AdaptiveAvgPool2d((1,1)) + flatten(1): NHWC -> (N, CP) f32."""
    N, H, W, C = x.shape
    xr = x.reshape(N, H * W, C)
    if use_pallas:
        return pl.pallas_call(
            _avgpool_kernel,
            out_shape=jax.ShapeDtypeStruct((N, C), jnp.float32),
        )(xr)
    return jnp.mean(xr.astype(jnp.float32), axis=1)


# ------------------------------ model definition -----------------------------

def _init_bn(key, c, eps=1e-5):
    k1, k2, k3, k4 = jax.random.split(key, 4)
    gamma = jax.random.uniform(k1, (c,), jnp.float32, 0.5, 1.5)
    beta = 0.1 * jax.random.normal(k2, (c,), jnp.float32)
    running_mean = 0.1 * jax.random.normal(k3, (c,), jnp.float32)
    running_var = jax.random.uniform(k4, (c,), jnp.float32, 0.5, 1.5)
    scale = gamma / jnp.sqrt(running_var + eps)   # eval-mode BN == affine
    shift = beta - running_mean * scale
    return scale, shift


def _prep_conv(key, cout, cin, kh, kw):
    """Random PyTorch-layout conv (OIHW) + eval BN, pre-packed once for the GEMM
    kernel: OIHW -> (KH*KW*Cin, Cout) with BN scale folded in, contraction axis
    zero-padded to a multiple of 128, output axis padded to CP lanes, bf16."""
    k_w, k_bn = jax.random.split(key)
    w = 0.05 * jax.random.normal(k_w, (cout, cin, kh, kw), jnp.float32)
    scale, shift = _init_bn(k_bn, cout)
    K = kh * kw * cin
    Kp = _round_up(K, 128)
    wm = jnp.transpose(w, (2, 3, 1, 0)).reshape(K, cout) * scale[None, :]
    wm = jnp.pad(wm, ((0, Kp - K), (0, CP - cout)))
    sh = jnp.pad(shift, (0, CP - cout)).reshape(1, CP).astype(jnp.float32)
    return {'w': wm.astype(jnp.bfloat16), 'shift': sh,
            'kh': kh, 'kw': kw, 'cin': cin, 'cout': cout}


def make_params(key):
    keys = jax.random.split(key, 32)
    ki = iter(keys)
    p = {'conv1': _prep_conv(next(ki), 16, 3, 7, 7)}      # 7x7 /2, pad 3
    in_c = 16
    layer_cfg = [('layer1', 16, 1, 2), ('layer2', 32, 2, 2),
                 ('layer3', 64, 2, 2), ('layer4', 128, 2, 2)]
    for name, out_c, stride, nblocks in layer_cfg:
        blocks = []
        for b in range(nblocks):
            s = stride if b == 0 else 1
            blk = {'stride': s,
                   'conv1': _prep_conv(next(ki), out_c, in_c, 3, 3),
                   'conv2': _prep_conv(next(ki), out_c, out_c, 3, 3)}
            if s != 1 or in_c != out_c:
                blk['down'] = _prep_conv(next(ki), out_c, in_c, 1, 1)
            blocks.append(blk)
            in_c = out_c
        p[name] = blocks
    p['out_channels'] = in_c
    return p


def basic_block(x, blk, use_pallas):
    identity = x
    out = conv_bn_act(x, blk['conv1'], stride=blk['stride'], padding=1,
                      relu=True, use_pallas=use_pallas)
    if 'down' in blk:
        identity = conv_bn_act(x, blk['down'], stride=blk['stride'], padding=0,
                               relu=False, use_pallas=use_pallas)
    # relu(bn2(conv2(out)) + identity): residual add fused into the GEMM epilogue
    out = conv_bn_act(out, blk['conv2'], stride=1, padding=1,
                      relu=True, residual=identity, use_pallas=use_pallas)
    return out


def resnet_embedder_forward(x_nchw, params, pool=True, use_pallas=True):
    """Mirrors ResNetEmbedder.forward (eval mode, no grad)."""
    x = jnp.transpose(x_nchw, (0, 2, 3, 1)).astype(jnp.bfloat16)   # NCHW -> NHWC
    x = conv_bn_act(x, params['conv1'], stride=2, padding=3, relu=True,
                    use_pallas=use_pallas)
    x = maxpool_3x3_s2_p1(x, use_pallas=use_pallas)
    for name in ('layer1', 'layer2', 'layer3', 'layer4'):
        for blk in params[name]:
            x = basic_block(x, blk, use_pallas)
    c = params['out_channels']
    if not pool:
        return jnp.transpose(x[..., :c], (0, 3, 1, 2)).astype(jnp.float32)
    feat = global_avgpool(x, use_pallas=use_pallas)    # avgpool + flatten(1)
    return feat[:, :c]


# ----------------------------------- main ------------------------------------

if __name__ == "__main__":
    key = jax.random.PRNGKey(0)
    kp, kx = jax.random.split(key)
    params = make_params(kp)

    # small, ResNet-consistent input: N=2, C=3 (RGB), 64x64 spatial
    x = jax.random.normal(kx, (2, 3, 64, 64), jnp.float32)

    fwd = jax.jit(functools.partial(resnet_embedder_forward, params=params,
                                    pool=True, use_pallas=True))
    out = jax.block_until_ready(fwd(x))
    assert out.shape == (2, 128), out.shape

    # pure-JAX reference with identical math (same bf16 quantization, same K
    # blocking, f32 accumulation)
    ref_fn = jax.jit(functools.partial(resnet_embedder_forward, params=params,
                                       pool=True, use_pallas=False))
    ref = jax.block_until_ready(ref_fn(x))
    np.testing.assert_allclose(np.asarray(out), np.asarray(ref),
                               rtol=2e-2, atol=2e-3)

    print("KERNEL_OK")
</pallas_src>

<mosaic_0001>
module attributes {stable_mosaic.version = 11 : i64} {
  func.func @_gemm_bn_act_kernel(%arg0: i32, %arg1: i32, %arg2: memref<256x256xbf16, #tpu.memory_space<vmem>>, %arg3: memref<256x128xbf16, #tpu.memory_space<vmem>>, %arg4: memref<1x128xf32, #tpu.memory_space<vmem>>, %arg5: memref<256x128xbf16, #tpu.memory_space<vmem>>, %arg6: memref<256x128xf32, #tpu.memory_space<vmem>>) attributes {dimension_semantics = [#tpu.dimension_semantics<parallel>, #tpu.dimension_semantics<arbitrary>], iteration_bounds = array<i64: 8, 1>, scalar_prefetch = 0 : i64, scratch_operands = 1 : i64, tpu.core_type = #tpu.core_type<tc>, window_params = [{transform_indices = @transform_0, window_bounds = array<i64: 256, 256>}, {transform_indices = @transform_1, window_bounds = array<i64: 256, 128>}, {pipeline_mode = #tpu.pipeline_mode<synchronous>, transform_indices = @transform_2, window_bounds = array<i64: 1, 128>}, {transform_indices = @transform_3, window_bounds = array<i64: 256, 128>}]} {
    %c0_i32 = arith.constant 0 : i32
    %0 = arith.cmpi eq, %arg1, %c0_i32 : i32
    %1 = arith.extui %0 : i1 to i32
    %c0_i32_0 = arith.constant 0 : i32
    %2 = arith.cmpi ne, %1, %c0_i32_0 : i32
    scf.if %2 {
      %cst_10 = arith.constant 0.000000e+00 : f32
      %12 = vector.broadcast %cst_10 : f32 to vector<256x128xf32>
      %c0_11 = arith.constant 0 : index
      %c0_12 = arith.constant 0 : index
      %13 = vector.load %arg6[%c0_11, %c0_12] : memref<256x128xf32, #tpu.memory_space<vmem>>, vector<256x128xf32>
      tpu.vector_store %arg6[%c0_11, %c0_12], %12 {strides = array<i32>} : memref<256x128xf32, #tpu.memory_space<vmem>>, vector<256x128xf32>,
    } else {
    }
    %c0 = arith.constant 0 : index
    %c0_1 = arith.constant 0 : index
    %3 = vector.load %arg6[%c0, %c0_1] : memref<256x128xf32, #tpu.memory_space<vmem>>, vector<256x128xf32>
    %c0_2 = arith.constant 0 : index
    %c0_3 = arith.constant 0 : index
    %4 = vector.load %arg2[%c0_2, %c0_3] : memref<256x256xbf16, #tpu.memory_space<vmem>>, vector<256x256xbf16>
    %c0_4 = arith.constant 0 : index
    %c0_5 = arith.constant 0 : index
    %5 = vector.load %arg3[%c0_4, %c0_5] : memref<256x128xbf16, #tpu.memory_space<vmem>>, vector<256x128xbf16>
    %cst = arith.constant dense<0.000000e+00> : vector<256x128xf32>
    %6 = tpu.matmul %4, %5, %cst {dimension_numbers = #tpu.dot_dimension_numbers<[1], [0], [0], [1], [0, 0, 1, 1], [], []>} : vector<256x256xbf16>, vector<256x128xbf16>, vector<256x128xf32> -> vector<256x128xf32>
    %7 = arith.addf %3, %6 : vector<256x128xf32>
    %c0_6 = arith.constant 0 : index
    %c0_7 = arith.constant 0 : index
    %8 = vector.load %arg6[%c0_6, %c0_7] : memref<256x128xf32, #tpu.memory_space<vmem>>, vector<256x128xf32>
    tpu.vector_store %arg6[%c0_6, %c0_7], %7 {strides = array<i32>} : memref<256x128xf32, #tpu.memory_space<vmem>>, vector<256x128xf32>,
    %c0_i32_8 = arith.constant 0 : i32
    %9 = arith.cmpi eq, %arg1, %c0_i32_8 : i32
    %10 = arith.extui %9 : i1 to i32
    %c0_i32_9 = arith.constant 0 : i32
    %11 = arith.cmpi ne, %10, %c0_i32_9 : i32
    scf.if %11 {
      %c0_10 = arith.constant 0 : index
      %c0_11 = arith.constant 0 : index
      %12 = vector.load %arg6[%c0_10, %c0_11] : memref<256x128xf32, #tpu.memory_space<vmem>>, vector<256x128xf32>
      %c0_12 = arith.constant 0 : index
      %c0_13 = arith.constant 0 : index
      %13 = vector.load %arg4[%c0_12, %c0_13] : memref<1x128xf32, #tpu.memory_space<vmem>>, vector<1x128xf32>
      %14 = vector.broadcast %13 : vector<1x128xf32> to vector<256x128xf32>
      %15 = arith.addf %12, %14 : vector<256x128xf32>
      %cst_14 = arith.constant 0.000000e+00 : f32
      %16 = vector.broadcast %cst_14 : f32 to vector<256x128xf32>
      %17 = arith.maximumf %15, %16 : vector<256x128xf32>
      %18 = arith.truncf %17 : vector<256x128xf32> to vector<256x128xbf16>
      %c0_15 = arith.constant 0 : index
      %c0_16 = arith.constant 0 : index
      %19 = vector.load %arg5[%c0_15, %c0_16] : memref<256x128xbf16, #tpu.memory_space<vmem>>, vector<256x128xbf16>
      tpu.vector_store %arg5[%c0_15, %c0_16], %18 {strides = array<i32>} : memref<256x128xbf16, #tpu.memory_space<vmem>>, vector<256x128xbf16>,
    } else {
    }
    return
  }
  func.func @transform_0(%arg0: i32, %arg1: i32) -> (i32, i32) {
    %c0_i32 = arith.constant 0 : i32
    return %arg0, %arg1 : i32, i32
  }
  func.func @transform_1(%arg0: i32, %arg1: i32) -> (i32, i32) {
    %c0_i32 = arith.constant 0 : i32
    %c0_i32_0 = arith.constant 0 : i32
    return %arg1, %c0_i32 : i32, i32
  }
  func.func @transform_2(%arg0: i32, %arg1: i32) -> (i32, i32) {
    %c0_i32 = arith.constant 0 : i32
    %c0_i32_0 = arith.constant 0 : i32
    %c0_i32_1 = arith.constant 0 : i32
    return %c0_i32, %c0_i32_0 : i32, i32
  }
  func.func @transform_3(%arg0: i32, %arg1: i32) -> (i32, i32) {
    %c0_i32 = arith.constant 0 : i32
    %c0_i32_0 = arith.constant 0 : i32
    return %arg0, %c0_i32 : i32, i32
  }
}

module attributes {stable_mosaic.version = 11 : i64} {
  func.func @_maxpool_kernel(%arg0: i32, %arg1: memref<1x17x17x128xbf16, #tpu.memory_space<vmem>>, %arg2: memref<1x17x17x128xbf16, #tpu.memory_space<vmem>>, %arg3: memref<1x17x17x128xbf16, #tpu.memory_space<vmem>>, %arg4: memref<1x17x17x128xbf16, #tpu.memory_space<vmem>>, %arg5: memref<1x16x16x128xbf16, #tpu.memory_space<vmem>>) attributes {dimension_semantics = [#tpu.dimension_semantics<parallel>], iteration_bounds = array<i64: 2>, scalar_prefetch = 0 : i64, scratch_operands = 0 : i64, tpu.core_type = #tpu.core_type<tc>, window_params = [{transform_indices = @transform_0, window_bounds = array<i64: 1, 17, 17, 128>}, {transform_indices = @transform_1, window_bounds = array<i64: 1, 17, 17, 128>}, {transform_indices = @transform_2, window_bounds = array<i64: 1, 17, 17, 128>}, {transform_indices = @transform_3, window_bounds = array<i64: 1, 17, 17, 128>}, {transform_indices = @transform_4, window_bounds = array<i64: 1, 16, 16, 128>}]} {
    %c0 = arith.constant 0 : index
    %c0_0 = arith.constant 0 : index
    %c0_1 = arith.constant 0 : index
    %c0_2 = arith.constant 0 : index
    %0 = vector.load %arg1[%c0, %c0_0, %c0_1, %c0_2] : memref<1x17x17x128xbf16, #tpu.memory_space<vmem>>, vector<1x17x17x128xbf16>
    %1 = vector.shape_cast %0 : vector<1x17x17x128xbf16> to vector<17x17x128xbf16>
    %c0_3 = arith.constant 0 : index
    %c0_4 = arith.constant 0 : index
    %c0_5 = arith.constant 0 : index
    %c0_6 = arith.constant 0 : index
    %2 = vector.load %arg2[%c0_3, %c0_4, %c0_5, %c0_6] : memref<1x17x17x128xbf16, #tpu.memory_space<vmem>>, vector<1x17x17x128xbf16>
    %3 = vector.shape_cast %2 : vector<1x17x17x128xbf16> to vector<17x17x128xbf16>
    %c0_7 = arith.constant 0 : index
    %c0_8 = arith.constant 0 : index
    %c0_9 = arith.constant 0 : index
    %c0_10 = arith.constant 0 : index
    %4 = vector.load %arg3[%c0_7, %c0_8, %c0_9, %c0_10] : memref<1x17x17x128xbf16, #tpu.memory_space<vmem>>, vector<1x17x17x128xbf16>
    %5 = vector.shape_cast %4 : vector<1x17x17x128xbf16> to vector<17x17x128xbf16>
    %c0_11 = arith.constant 0 : index
    %c0_12 = arith.constant 0 : index
    %c0_13 = arith.constant 0 : index
    %c0_14 = arith.constant 0 : index
    %6 = vector.load %arg4[%c0_11, %c0_12, %c0_13, %c0_14] : memref<1x17x17x128xbf16, #tpu.memory_space<vmem>>, vector<1x17x17x128xbf16>
    %7 = vector.shape_cast %6 : vector<1x17x17x128xbf16> to vector<17x17x128xbf16>
    %8 = vector.extract_strided_slice %1 {offsets = [0, 0, 0], sizes = [16, 16, 128], strides = [1, 1, 1]} : vector<17x17x128xbf16> to vector<16x16x128xbf16>
    %9 = vector.extract_strided_slice %3 {offsets = [0, 0, 0], sizes = [16, 16, 128], strides = [1, 1, 1]} : vector<17x17x128xbf16> to vector<16x16x128xbf16>
    %10 = arith.maximumf %8, %9 : vector<16x16x128xbf16>
    %11 = vector.extract_strided_slice %1 {offsets = [0, 1, 0], sizes = [16, 16, 128], strides = [1, 1, 1]} : vector<17x17x128xbf16> to vector<16x16x128xbf16>
    %12 = arith.maximumf %10, %11 : vector<16x16x128xbf16>
    %13 = vector.extract_strided_slice %5 {offsets = [0, 0, 0], sizes = [16, 16, 128], strides = [1, 1, 1]} : vector<17x17x128xbf16> to vector<16x16x128xbf16>
    %14 = arith.maximumf %12, %13 : vector<16x16x128xbf16>
    %15 = vector.extract_strided_slice %7 {offsets = [0, 0, 0], sizes = [16, 16, 128], strides = [1, 1, 1]} : vector<17x17x128xbf16> to vector<16x16x128xbf16>
    %16 = arith.maximumf %14, %15 : vector<16x16x128xbf16>
    %17 = vector.extract_strided_slice %5 {offsets = [0, 1, 0], sizes = [16, 16, 128], strides = [1, 1, 1]} : vector<17x17x128xbf16> to vector<16x16x128xbf16>
    %18 = arith.maximumf %16, %17 : vector<16x16x128xbf16>
    %19 = vector.extract_strided_slice %1 {offsets = [1, 0, 0], sizes = [16, 16, 128], strides = [1, 1, 1]} : vector<17x17x128xbf16> to vector<16x16x128xbf16>
    %20 = arith.maximumf %18, %19 : vector<16x16x128xbf16>
    %21 = vector.extract_strided_slice %3 {offsets = [1, 0, 0], sizes = [16, 16, 128], strides = [1, 1, 1]} : vector<17x17x128xbf16> to vector<16x16x128xbf16>
    %22 = arith.maximumf %20, %21 : vector<16x16x128xbf16>
    %23 = vector.extract_strided_slice %1 {offsets = [1, 1, 0], sizes = [16, 16, 128], strides = [1, 1, 1]} : vector<17x17x128xbf16> to vector<16x16x128xbf16>
    %24 = arith.maximumf %22, %23 : vector<16x16x128xbf16>
    %c0_15 = arith.constant 0 : index
    %c0_16 = arith.constant 0 : index
    %c0_17 = arith.constant 0 : index
    %c0_18 = arith.constant 0 : index
    %25 = vector.load %arg5[%c0_15, %c0_16, %c0_17, %c0_18] : memref<1x16x16x128xbf16, #tpu.memory_space<vmem>>, vector<1x16x16x128xbf16>
    %26 = vector.shape_cast %25 : vector<1x16x16x128xbf16> to vector<16x16x128xbf16>
    %27 = vector.shape_cast %24 : vector<16x16x128xbf16> to vector<1x16x16x128xbf16>
    tpu.vector_store %arg5[%c0_15, %c0_16, %c0_17, %c0_18], %27 {strides = array<i32>} : memref<1x16x16x128xbf16, #tpu.memory_space<vmem>>, vector<1x16x16x128xbf16>,
    return
  }
  func.func @transform_0(%arg0: i32) -> (i32, i32, i32, i32) {
    %c0_i32 = arith.constant 0 : i32
    %c0_i32_0 = arith.constant 0 : i32
    %c0_i32_1 = arith.constant 0 : i32
    %c0_i32_2 = arith.constant 0 : i32
    return %arg0, %c0_i32, %c0_i32_0, %c0_i32_1 : i32, i32, i32, i32
  }
  func.func @transform_1(%arg0: i32) -> (i32, i32, i32, i32) {
    %c0_i32 = arith.constant 0 : i32
    %c0_i32_0 = arith.constant 0 : i32
    %c0_i32_1 = arith.constant 0 : i32
    %c0_i32_2 = arith.constant 0 : i32
    return %arg0, %c0_i32, %c0_i32_0, %c0_i32_1 : i32, i32, i32, i32
  }
  func.func @transform_2(%arg0: i32) -> (i32, i32, i32, i32) {
    %c0_i32 = arith.constant 0 : i32
    %c0_i32_0 = arith.constant 0 : i32
    %c0_i32_1 = arith.constant 0 : i32
    %c0_i32_2 = arith.constant 0 : i32
    return %arg0, %c0_i32, %c0_i32_0, %c0_i32_1 : i32, i32, i32, i32
  }
  func.func @transform_3(%arg0: i32) -> (i32, i32, i32, i32) {
    %c0_i32 = arith.constant 0 : i32
    %c0_i32_0 = arith.constant 0 : i32
    %c0_i32_1 = arith.constant 0 : i32
    %c0_i32_2 = arith.constant 0 : i32
    return %arg0, %c0_i32, %c0_i32_0, %c0_i32_1 : i32, i32, i32, i32
  }
  func.func @transform_4(%arg0: i32) -> (i32, i32, i32, i32) {
    %c0_i32 = arith.constant 0 : i32
    %c0_i32_0 = arith.constant 0 : i32
    %c0_i32_1 = arith.constant 0 : i32
    %c0_i32_2 = arith.constant 0 : i32
    return %arg0, %c0_i32, %c0_i32_0, %c0_i32_1 : i32, i32, i32, i32
  }
}

module attributes {stable_mosaic.version = 11 : i64} {
  func.func @_gemm_bn_act_kernel(%arg0: i32, %arg1: i32, %arg2: memref<256x256xbf16, #tpu.memory_space<vmem>>, %arg3: memref<256x128xbf16, #tpu.memory_space<vmem>>, %arg4: memref<1x128xf32, #tpu.memory_space<vmem>>, %arg5: memref<256x128xbf16, #tpu.memory_space<vmem>>, %arg6: memref<256x128xf32, #tpu.memory_space<vmem>>) attributes {dimension_semantics = [#tpu.dimension_semantics<parallel>, #tpu.dimension_semantics<arbitrary>], iteration_bounds = array<i64: 2, 1>, scalar_prefetch = 0 : i64, scratch_operands = 1 : i64, tpu.core_type = #tpu.core_type<tc>, window_params = [{transform_indices = @transform_0, window_bounds = array<i64: 256, 256>}, {transform_indices = @transform_1, window_bounds = array<i64: 256, 128>}, {pipeline_mode = #tpu.pipeline_mode<synchronous>, transform_indices = @transform_2, window_bounds = array<i64: 1, 128>}, {transform_indices = @transform_3, window_bounds = array<i64: 256, 128>}]} {
    %c0_i32 = arith.constant 0 : i32
    %0 = arith.cmpi eq, %arg1, %c0_i32 : i32
    %1 = arith.extui %0 : i1 to i32
    %c0_i32_0 = arith.constant 0 : i32
    %2 = arith.cmpi ne, %1, %c0_i32_0 : i32
    scf.if %2 {
      %cst_10 = arith.constant 0.000000e+00 : f32
      %12 = vector.broadcast %cst_10 : f32 to vector<256x128xf32>
      %c0_11 = arith.constant 0 : index
      %c0_12 = arith.constant 0 : index
      %13 = vector.load %arg6[%c0_11, %c0_12] : memref<256x128xf32, #tpu.memory_space<vmem>>, vector<256x128xf32>
      tpu.vector_store %arg6[%c0_11, %c0_12], %12 {strides = array<i32>} : memref<256x128xf32, #tpu.memory_space<vmem>>, vector<256x128xf32>,
    } else {
    }
    %c0 = arith.constant 0 : index
    %c0_1 = arith.constant 0 : index
    %3 = vector.load %arg6[%c0, %c0_1] : memref<256x128xf32, #tpu.memory_space<vmem>>, vector<256x128xf32>
    %c0_2 = arith.constant 0 : index
    %c0_3 = arith.constant 0 : index
    %4 = vector.load %arg2[%c0_2, %c0_3] : memref<256x256xbf16, #tpu.memory_space<vmem>>, vector<256x256xbf16>
    %c0_4 = arith.constant 0 : index
    %c0_5 = arith.constant 0 : index
    %5 = vector.load %arg3[%c0_4, %c0_5] : memref<256x128xbf16, #tpu.memory_space<vmem>>, vector<256x128xbf16>
    %cst = arith.constant dense<0.000000e+00> : vector<256x128xf32>
    %6 = tpu.matmul %4, %5, %cst {dimension_numbers = #tpu.dot_dimension_numbers<[1], [0], [0], [1], [0, 0, 1, 1], [], []>} : vector<256x256xbf16>, vector<256x128xbf16>, vector<256x128xf32> -> vector<256x128xf32>
    %7 = arith.addf %3, %6 : vector<256x128xf32>
    %c0_6 = arith.constant 0 : index
    %c0_7 = arith.constant 0 : index
    %8 = vector.load %arg6[%c0_6, %c0_7] : memref<256x128xf32, #tpu.memory_space<vmem>>, vector<256x128xf32>
    tpu.vector_store %arg6[%c0_6, %c0_7], %7 {strides = array<i32>} : memref<256x128xf32, #tpu.memory_space<vmem>>, vector<256x128xf32>,
    %c0_i32_8 = arith.constant 0 : i32
    %9 = arith.cmpi eq, %arg1, %c0_i32_8 : i32
    %10 = arith.extui %9 : i1 to i32
    %c0_i32_9 = arith.constant 0 : i32
    %11 = arith.cmpi ne, %10, %c0_i32_9 : i32
    scf.if %11 {
      %c0_10 = arith.constant 0 : index
      %c0_11 = arith.constant 0 : index
      %12 = vector.load %arg6[%c0_10, %c0_11] : memref<256x128xf32, #tpu.memory_space<vmem>>, vector<256x128xf32>
      %c0_12 = arith.constant 0 : index
      %c0_13 = arith.constant 0 : index
      %13 = vector.load %arg4[%c0_12, %c0_13] : memref<1x128xf32, #tpu.memory_space<vmem>>, vector<1x128xf32>
      %14 = vector.broadcast %13 : vector<1x128xf32> to vector<256x128xf32>
      %15 = arith.addf %12, %14 : vector<256x128xf32>
      %cst_14 = arith.constant 0.000000e+00 : f32
      %16 = vector.broadcast %cst_14 : f32 to vector<256x128xf32>
      %17 = arith.maximumf %15, %16 : vector<256x128xf32>
      %18 = arith.truncf %17 : vector<256x128xf32> to vector<256x128xbf16>
      %c0_15 = arith.constant 0 : index
      %c0_16 = arith.constant 0 : index
      %19 = vector.load %arg5[%c0_15, %c0_16] : memref<256x128xbf16, #tpu.memory_space<vmem>>, vector<256x128xbf16>
      tpu.vector_store %arg5[%c0_15, %c0_16], %18 {strides = array<i32>} : memref<256x128xbf16, #tpu.memory_space<vmem>>, vector<256x128xbf16>,
    } else {
    }
    return
  }
  func.func @transform_0(%arg0: i32, %arg1: i32) -> (i32, i32) {
    %c0_i32 = arith.constant 0 : i32
    return %arg0, %arg1 : i32, i32
  }
  func.func @transform_1(%arg0: i32, %arg1: i32) -> (i32, i32) {
    %c0_i32 = arith.constant 0 : i32
    %c0_i32_0 = arith.constant 0 : i32
    return %arg1, %c0_i32 : i32, i32
  }
  func.func @transform_2(%arg0: i32, %arg1: i32) -> (i32, i32) {
    %c0_i32 = arith.constant 0 : i32
    %c0_i32_0 = arith.constant 0 : i32
    %c0_i32_1 = arith.constant 0 : i32
    return %c0_i32, %c0_i32_0 : i32, i32
  }
  func.func @transform_3(%arg0: i32, %arg1: i32) -> (i32, i32) {
    %c0_i32 = arith.constant 0 : i32
    %c0_i32_0 = arith.constant 0 : i32
    return %arg0, %c0_i32 : i32, i32
  }
}

module attributes {stable_mosaic.version = 11 : i64} {
  func.func @_gemm_bn_act_kernel(%arg0: i32, %arg1: i32, %arg2: memref<256x256xbf16, #tpu.memory_space<vmem>>, %arg3: memref<256x128xbf16, #tpu.memory_space<vmem>>, %arg4: memref<1x128xf32, #tpu.memory_space<vmem>>, %arg5: memref<256x128xbf16, #tpu.memory_space<vmem>>, %arg6: memref<256x128xbf16, #tpu.memory_space<vmem>>, %arg7: memref<256x128xf32, #tpu.memory_space<vmem>>) attributes {dimension_semantics = [#tpu.dimension_semantics<parallel>, #tpu.dimension_semantics<arbitrary>], iteration_bounds = array<i64: 2, 1>, scalar_prefetch = 0 : i64, scratch_operands = 1 : i64, tpu.core_type = #tpu.core_type<tc>, window_params = [{transform_indices = @transform_0, window_bounds = array<i64: 256, 256>}, {transform_indices = @transform_1, window_bounds = array<i64: 256, 128>}, {pipeline_mode = #tpu.pipeline_mode<synchronous>, transform_indices = @transform_2, window_bounds = array<i64: 1, 128>}, {transform_indices = @transform_3, window_bounds = array<i64: 256, 128>}, {transform_indices = @transform_4, window_bounds = array<i64: 256, 128>}]} {
    %c0_i32 = arith.constant 0 : i32
    %0 = arith.cmpi eq, %arg1, %c0_i32 : i32
    %1 = arith.extui %0 : i1 to i32
    %c0_i32_0 = arith.constant 0 : i32
    %2 = arith.cmpi ne, %1, %c0_i32_0 : i32
    scf.if %2 {
      %cst_10 = arith.constant 0.000000e+00 : f32
      %12 = vector.broadcast %cst_10 : f32 to vector<256x128xf32>
      %c0_11 = arith.constant 0 : index
      %c0_12 = arith.constant 0 : index
      %13 = vector.load %arg7[%c0_11, %c0_12] : memref<256x128xf32, #tpu.memory_space<vmem>>, vector<256x128xf32>
      tpu.vector_store %arg7[%c0_11, %c0_12], %12 {strides = array<i32>} : memref<256x128xf32, #tpu.memory_space<vmem>>, vector<256x128xf32>,
    } else {
    }
    %c0 = arith.constant 0 : index
    %c0_1 = arith.constant 0 : index
    %3 = vector.load %arg7[%c0, %c0_1] : memref<256x128xf32, #tpu.memory_space<vmem>>, vector<256x128xf32>
    %c0_2 = arith.constant 0 : index
    %c0_3 = arith.constant 0 : index
    %4 = vector.load %arg2[%c0_2, %c0_3] : memref<256x256xbf16, #tpu.memory_space<vmem>>, vector<256x256xbf16>
    %c0_4 = arith.constant 0 : index
    %c0_5 = arith.constant 0 : index
    %5 = vector.load %arg3[%c0_4, %c0_5] : memref<256x128xbf16, #tpu.memory_space<vmem>>, vector<256x128xbf16>
    %cst = arith.constant dense<0.000000e+00> : vector<256x128xf32>
    %6 = tpu.matmul %4, %5, %cst {dimension_numbers = #tpu.dot_dimension_numbers<[1], [0], [0], [1], [0, 0, 1, 1], [], []>} : vector<256x256xbf16>, vector<256x128xbf16>, vector<256x128xf32> -> vector<256x128xf32>
    %7 = arith.addf %3, %6 : vector<256x128xf32>
    %c0_6 = arith.constant 0 : index
    %c0_7 = arith.constant 0 : index
    %8 = vector.load %arg7[%c0_6, %c0_7] : memref<256x128xf32, #tpu.memory_space<vmem>>, vector<256x128xf32>
    tpu.vector_store %arg7[%c0_6, %c0_7], %7 {strides = array<i32>} : memref<256x128xf32, #tpu.memory_space<vmem>>, vector<256x128xf32>,
    %c0_i32_8 = arith.constant 0 : i32
    %9 = arith.cmpi eq, %arg1, %c0_i32_8 : i32
    %10 = arith.extui %9 : i1 to i32
    %c0_i32_9 = arith.constant 0 : i32
    %11 = arith.cmpi ne, %10, %c0_i32_9 : i32
    scf.if %11 {
      %c0_10 = arith.constant 0 : index
      %c0_11 = arith.constant 0 : index
      %12 = vector.load %arg7[%c0_10, %c0_11] : memref<256x128xf32, #tpu.memory_space<vmem>>, vector<256x128xf32>
      %c0_12 = arith.constant 0 : index
      %c0_13 = arith.constant 0 : index
      %13 = vector.load %arg4[%c0_12, %c0_13] : memref<1x128xf32, #tpu.memory_space<vmem>>, vector<1x128xf32>
      %14 = vector.broadcast %13 : vector<1x128xf32> to vector<256x128xf32>
      %15 = arith.addf %12, %14 : vector<256x128xf32>
      %c0_14 = arith.constant 0 : index
      %c0_15 = arith.constant 0 : index
      %16 = vector.load %arg5[%c0_14, %c0_15] : memref<256x128xbf16, #tpu.memory_space<vmem>>, vector<256x128xbf16>
      %17 = arith.extf %16 : vector<256x128xbf16> to vector<256x128xf32>
      %18 = arith.addf %15, %17 : vector<256x128xf32>
      %cst_16 = arith.constant 0.000000e+00 : f32
      %19 = vector.broadcast %cst_16 : f32 to vector<256x128xf32>
      %20 = arith.maximumf %18, %19 : vector<256x128xf32>
      %21 = arith.truncf %20 : vector<256x128xf32> to vector<256x128xbf16>
      %c0_17 = arith.constant 0 : index
      %c0_18 = arith.constant 0 : index
      %22 = vector.load %arg6[%c0_17, %c0_18] : memref<256x128xbf16, #tpu.memory_space<vmem>>, vector<256x128xbf16>
      tpu.vector_store %arg6[%c0_17, %c0_18], %21 {strides = array<i32>} : memref<256x128xbf16, #tpu.memory_space<vmem>>, vector<256x128xbf16>,
    } else {
    }
    return
  }
  func.func @transform_0(%arg0: i32, %arg1: i32) -> (i32, i32) {
    %c0_i32 = arith.constant 0 : i32
    return %arg0, %arg1 : i32, i32
  }
  func.func @transform_1(%arg0: i32, %arg1: i32) -> (i32, i32) {
    %c0_i32 = arith.constant 0 : i32
    %c0_i32_0 = arith.constant 0 : i32
    return %arg1, %c0_i32 : i32, i32
  }
  func.func @transform_2(%arg0: i32, %arg1: i32) -> (i32, i32) {
    %c0_i32 = arith.constant 0 : i32
    %c0_i32_0 = arith.constant 0 : i32
    %c0_i32_1 = arith.constant 0 : i32
    return %c0_i32, %c0_i32_0 : i32, i32
  }
  func.func @transform_3(%arg0: i32, %arg1: i32) -> (i32, i32) {
    %c0_i32 = arith.constant 0 : i32
    %c0_i32_0 = arith.constant 0 : i32
    return %arg0, %c0_i32 : i32, i32
  }
  func.func @transform_4(%arg0: i32, %arg1: i32) -> (i32, i32) {
    %c0_i32 = arith.constant 0 : i32
    %c0_i32_0 = arith.constant 0 : i32
    return %arg0, %c0_i32 : i32, i32
  }
}

module attributes {stable_mosaic.version = 11 : i64} {
  func.func @_gemm_bn_act_kernel(%arg0: i32, %arg1: i32, %arg2: memref<128x128xbf16, #tpu.memory_space<vmem>>, %arg3: memref<128x128xbf16, #tpu.memory_space<vmem>>, %arg4: memref<1x128xf32, #tpu.memory_space<vmem>>, %arg5: memref<128x128xbf16, #tpu.memory_space<vmem>>, %arg6: memref<128x128xf32, #tpu.memory_space<vmem>>) attributes {dimension_semantics = [#tpu.dimension_semantics<parallel>, #tpu.dimension_semantics<arbitrary>], iteration_bounds = array<i64: 1, 1>, scalar_prefetch = 0 : i64, scratch_operands = 1 : i64, tpu.core_type = #tpu.core_type<tc>, window_params = [{transform_indices = @transform_0, window_bounds = array<i64: 128, 128>}, {transform_indices = @transform_1, window_bounds = array<i64: 128, 128>}, {pipeline_mode = #tpu.pipeline_mode<synchronous>, transform_indices = @transform_2, window_bounds = array<i64: 1, 128>}, {transform_indices = @transform_3, window_bounds = array<i64: 128, 128>}]} {
    %c0_i32 = arith.constant 0 : i32
    %0 = arith.cmpi eq, %arg1, %c0_i32 : i32
    %1 = arith.extui %0 : i1 to i32
    %c0_i32_0 = arith.constant 0 : i32
    %2 = arith.cmpi ne, %1, %c0_i32_0 : i32
    scf.if %2 {
      %cst_10 = arith.constant 0.000000e+00 : f32
      %12 = vector.broadcast %cst_10 : f32 to vector<128x128xf32>
      %c0_11 = arith.constant 0 : index
      %c0_12 = arith.constant 0 : index
      %13 = vector.load %arg6[%c0_11, %c0_12] : memref<128x128xf32, #tpu.memory_space<vmem>>, vector<128x128xf32>
      tpu.vector_store %arg6[%c0_11, %c0_12], %12 {strides = array<i32>} : memref<128x128xf32, #tpu.memory_space<vmem>>, vector<128x128xf32>,
    } else {
    }
    %c0 = arith.constant 0 : index
    %c0_1 = arith.constant 0 : index
    %3 = vector.load %arg6[%c0, %c0_1] : memref<128x128xf32, #tpu.memory_space<vmem>>, vector<128x128xf32>
    %c0_2 = arith.constant 0 : index
    %c0_3 = arith.constant 0 : index
    %4 = vector.load %arg2[%c0_2, %c0_3] : memref<128x128xbf16, #tpu.memory_space<vmem>>, vector<128x128xbf16>
    %c0_4 = arith.constant 0 : index
    %c0_5 = arith.constant 0 : index
    %5 = vector.load %arg3[%c0_4, %c0_5] : memref<128x128xbf16, #tpu.memory_space<vmem>>, vector<128x128xbf16>
    %cst = arith.constant dense<0.000000e+00> : vector<128x128xf32>
    %6 = tpu.matmul %4, %5, %cst {dimension_numbers = #tpu.dot_dimension_numbers<[1], [0], [0], [1], [0, 0, 1, 1], [], []>} : vector<128x128xbf16>, vector<128x128xbf16>, vector<128x128xf32> -> vector<128x128xf32>
    %7 = arith.addf %3, %6 : vector<128x128xf32>
    %c0_6 = arith.constant 0 : index
    %c0_7 = arith.constant 0 : index
    %8 = vector.load %arg6[%c0_6, %c0_7] : memref<128x128xf32, #tpu.memory_space<vmem>>, vector<128x128xf32>
    tpu.vector_store %arg6[%c0_6, %c0_7], %7 {strides = array<i32>} : memref<128x128xf32, #tpu.memory_space<vmem>>, vector<128x128xf32>,
    %c0_i32_8 = arith.constant 0 : i32
    %9 = arith.cmpi eq, %arg1, %c0_i32_8 : i32
    %10 = arith.extui %9 : i1 to i32
    %c0_i32_9 = arith.constant 0 : i32
    %11 = arith.cmpi ne, %10, %c0_i32_9 : i32
    scf.if %11 {
      %c0_10 = arith.constant 0 : index
      %c0_11 = arith.constant 0 : index
      %12 = vector.load %arg6[%c0_10, %c0_11] : memref<128x128xf32, #tpu.memory_space<vmem>>, vector<128x128xf32>
      %c0_12 = arith.constant 0 : index
      %c0_13 = arith.constant 0 : index
      %13 = vector.load %arg4[%c0_12, %c0_13] : memref<1x128xf32, #tpu.memory_space<vmem>>, vector<1x128xf32>
      %14 = vector.broadcast %13 : vector<1x128xf32> to vector<128x128xf32>
      %15 = arith.addf %12, %14 : vector<128x128xf32>
      %16 = arith.truncf %15 : vector<128x128xf32> to vector<128x128xbf16>
      %c0_14 = arith.constant 0 : index
      %c0_15 = arith.constant 0 : index
      %17 = vector.load %arg5[%c0_14, %c0_15] : memref<128x128xbf16, #tpu.memory_space<vmem>>, vector<128x128xbf16>
      tpu.vector_store %arg5[%c0_14, %c0_15], %16 {strides = array<i32>} : memref<128x128xbf16, #tpu.memory_space<vmem>>, vector<128x128xbf16>,
    } else {
    }
    return
  }
  func.func @transform_0(%arg0: i32, %arg1: i32) -> (i32, i32) {
    %c0_i32 = arith.constant 0 : i32
    return %arg0, %arg1 : i32, i32
  }
  func.func @transform_1(%arg0: i32, %arg1: i32) -> (i32, i32) {
    %c0_i32 = arith.constant 0 : i32
    %c0_i32_0 = arith.constant 0 : i32
    return %arg1, %c0_i32 : i32, i32
  }
  func.func @transform_2(%arg0: i32, %arg1: i32) -> (i32, i32) {
    %c0_i32 = arith.constant 0 : i32
    %c0_i32_0 = arith.constant 0 : i32
    %c0_i32_1 = arith.constant 0 : i32
    return %c0_i32, %c0_i32_0 : i32, i32
  }
  func.func @transform_3(%arg0: i32, %arg1: i32) -> (i32, i32) {
    %c0_i32 = arith.constant 0 : i32
    %c0_i32_0 = arith.constant 0 : i32
    return %arg0, %c0_i32 : i32, i32
  }
}

module attributes {stable_mosaic.version = 11 : i64} {
  func.func @_gemm_bn_act_kernel(%arg0: i32, %arg1: i32, %arg2: memref<128x256xbf16, #tpu.memory_space<vmem>>, %arg3: memref<256x128xbf16, #tpu.memory_space<vmem>>, %arg4: memref<1x128xf32, #tpu.memory_space<vmem>>, %arg5: memref<128x128xbf16, #tpu.memory_space<vmem>>, %arg6: memref<128x128xf32, #tpu.memory_space<vmem>>) attributes {dimension_semantics = [#tpu.dimension_semantics<parallel>, #tpu.dimension_semantics<arbitrary>], iteration_bounds = array<i64: 1, 1>, scalar_prefetch = 0 : i64, scratch_operands = 1 : i64, tpu.core_type = #tpu.core_type<tc>, window_params = [{transform_indices = @transform_0, window_bounds = array<i64: 128, 256>}, {transform_indices = @transform_1, window_bounds = array<i64: 256, 128>}, {pipeline_mode = #tpu.pipeline_mode<synchronous>, transform_indices = @transform_2, window_bounds = array<i64: 1, 128>}, {transform_indices = @transform_3, window_bounds = array<i64: 128, 128>}]} {
    %c0_i32 = arith.constant 0 : i32
    %0 = arith.cmpi eq, %arg1, %c0_i32 : i32
    %1 = arith.extui %0 : i1 to i32
    %c0_i32_0 = arith.constant 0 : i32
    %2 = arith.cmpi ne, %1, %c0_i32_0 : i32
    scf.if %2 {
      %cst_10 = arith.constant 0.000000e+00 : f32
      %12 = vector.broadcast %cst_10 : f32 to vector<128x128xf32>
      %c0_11 = arith.constant 0 : index
      %c0_12 = arith.constant 0 : index
      %13 = vector.load %arg6[%c0_11, %c0_12] : memref<128x128xf32, #tpu.memory_space<vmem>>, vector<128x128xf32>
      tpu.vector_store %arg6[%c0_11, %c0_12], %12 {strides = array<i32>} : memref<128x128xf32, #tpu.memory_space<vmem>>, vector<128x128xf32>,
    } else {
    }
    %c0 = arith.constant 0 : index
    %c0_1 = arith.constant 0 : index
    %3 = vector.load %arg6[%c0, %c0_1] : memref<128x128xf32, #tpu.memory_space<vmem>>, vector<128x128xf32>
    %c0_2 = arith.constant 0 : index
    %c0_3 = arith.constant 0 : index
    %4 = vector.load %arg2[%c0_2, %c0_3] : memref<128x256xbf16, #tpu.memory_space<vmem>>, vector<128x256xbf16>
    %c0_4 = arith.constant 0 : index
    %c0_5 = arith.constant 0 : index
    %5 = vector.load %arg3[%c0_4, %c0_5] : memref<256x128xbf16, #tpu.memory_space<vmem>>, vector<256x128xbf16>
    %cst = arith.constant dense<0.000000e+00> : vector<128x128xf32>
    %6 = tpu.matmul %4, %5, %cst {dimension_numbers = #tpu.dot_dimension_numbers<[1], [0], [0], [1], [0, 0, 1, 1], [], []>} : vector<128x256xbf16>, vector<256x128xbf16>, vector<128x128xf32> -> vector<128x128xf32>
    %7 = arith.addf %3, %6 : vector<128x128xf32>
    %c0_6 = arith.constant 0 : index
    %c0_7 = arith.constant 0 : index
    %8 = vector.load %arg6[%c0_6, %c0_7] : memref<128x128xf32, #tpu.memory_space<vmem>>, vector<128x128xf32>
    tpu.vector_store %arg6[%c0_6, %c0_7], %7 {strides = array<i32>} : memref<128x128xf32, #tpu.memory_space<vmem>>, vector<128x128xf32>,
    %c0_i32_8 = arith.constant 0 : i32
    %9 = arith.cmpi eq, %arg1, %c0_i32_8 : i32
    %10 = arith.extui %9 : i1 to i32
    %c0_i32_9 = arith.constant 0 : i32
    %11 = arith.cmpi ne, %10, %c0_i32_9 : i32
    scf.if %11 {
      %c0_10 = arith.constant 0 : index
      %c0_11 = arith.constant 0 : index
      %12 = vector.load %arg6[%c0_10, %c0_11] : memref<128x128xf32, #tpu.memory_space<vmem>>, vector<128x128xf32>
      %c0_12 = arith.constant 0 : index
      %c0_13 = arith.constant 0 : index
      %13 = vector.load %arg4[%c0_12, %c0_13] : memref<1x128xf32, #tpu.memory_space<vmem>>, vector<1x128xf32>
      %14 = vector.broadcast %13 : vector<1x128xf32> to vector<128x128xf32>
      %15 = arith.addf %12, %14 : vector<128x128xf32>
      %cst_14 = arith.constant 0.000000e+00 : f32
      %16 = vector.broadcast %cst_14 : f32 to vector<128x128xf32>
      %17 = arith.maximumf %15, %16 : vector<128x128xf32>
      %18 = arith.truncf %17 : vector<128x128xf32> to vector<128x128xbf16>
      %c0_15 = arith.constant 0 : index
      %c0_16 = arith.constant 0 : index
      %19 = vector.load %arg5[%c0_15, %c0_16] : memref<128x128xbf16, #tpu.memory_space<vmem>>, vector<128x128xbf16>
      tpu.vector_store %arg5[%c0_15, %c0_16], %18 {strides = array<i32>} : memref<128x128xbf16, #tpu.memory_space<vmem>>, vector<128x128xbf16>,
    } else {
    }
    return
  }
  func.func @transform_0(%arg0: i32, %arg1: i32) -> (i32, i32) {
    %c0_i32 = arith.constant 0 : i32
    return %arg0, %arg1 : i32, i32
  }
  func.func @transform_1(%arg0: i32, %arg1: i32) -> (i32, i32) {
    %c0_i32 = arith.constant 0 : i32
    %c0_i32_0 = arith.constant 0 : i32
    return %arg1, %c0_i32 : i32, i32
  }
  func.func @transform_2(%arg0: i32, %arg1: i32) -> (i32, i32) {
    %c0_i32 = arith.constant 0 : i32
    %c0_i32_0 = arith.constant 0 : i32
    %c0_i32_1 = arith.constant 0 : i32
    return %c0_i32, %c0_i32_0 : i32, i32
  }
  func.func @transform_3(%arg0: i32, %arg1: i32) -> (i32, i32) {
    %c0_i32 = arith.constant 0 : i32
    %c0_i32_0 = arith.constant 0 : i32
    return %arg0, %c0_i32 : i32, i32
  }
}

module attributes {stable_mosaic.version = 11 : i64} {
  func.func @_gemm_bn_act_kernel(%arg0: i32, %arg1: i32, %arg2: memref<128x128xbf16, #tpu.memory_space<vmem>>, %arg3: memref<128x128xbf16, #tpu.memory_space<vmem>>, %arg4: memref<1x128xf32, #tpu.memory_space<vmem>>, %arg5: memref<128x128xbf16, #tpu.memory_space<vmem>>, %arg6: memref<128x128xbf16, #tpu.memory_space<vmem>>, %arg7: memref<128x128xf32, #tpu.memory_space<vmem>>) attributes {dimension_semantics = [#tpu.dimension_semantics<parallel>, #tpu.dimension_semantics<arbitrary>], iteration_bounds = array<i64: 1, 3>, scalar_prefetch = 0 : i64, scratch_operands = 1 : i64, tpu.core_type = #tpu.core_type<tc>, window_params = [{transform_indices = @transform_0, window_bounds = array<i64: 128, 128>}, {transform_indices = @transform_1, window_bounds = array<i64: 128, 128>}, {pipeline_mode = #tpu.pipeline_mode<synchronous>, transform_indices = @transform_2, window_bounds = array<i64: 1, 128>}, {transform_indices = @transform_3, window_bounds = array<i64: 128, 128>}, {transform_indices = @transform_4, window_bounds = array<i64: 128, 128>}]} {
    %c0_i32 = arith.constant 0 : i32
    %0 = arith.cmpi eq, %arg1, %c0_i32 : i32
    %1 = arith.extui %0 : i1 to i32
    %c0_i32_0 = arith.constant 0 : i32
    %2 = arith.cmpi ne, %1, %c0_i32_0 : i32
    scf.if %2 {
      %cst_9 = arith.constant 0.000000e+00 : f32
      %12 = vector.broadcast %cst_9 : f32 to vector<128x128xf32>
      %c0_10 = arith.constant 0 : index
      %c0_11 = arith.constant 0 : index
      %13 = vector.load %arg7[%c0_10, %c0_11] : memref<128x128xf32, #tpu.memory_space<vmem>>, vector<128x128xf32>
      tpu.vector_store %arg7[%c0_10, %c0_11], %12 {strides = array<i32>} : memref<128x128xf32, #tpu.memory_space<vmem>>, vector<128x128xf32>,
    } else {
    }
    %c0 = arith.constant 0 : index
    %c0_1 = arith.constant 0 : index
    %3 = vector.load %arg7[%c0, %c0_1] : memref<128x128xf32, #tpu.memory_space<vmem>>, vector<128x128xf32>
    %c0_2 = arith.constant 0 : index
    %c0_3 = arith.constant 0 : index
    %4 = vector.load %arg2[%c0_2, %c0_3] : memref<128x128xbf16, #tpu.memory_space<vmem>>, vector<128x128xbf16>
    %c0_4 = arith.constant 0 : index
    %c0_5 = arith.constant 0 : index
    %5 = vector.load %arg3[%c0_4, %c0_5] : memref<128x128xbf16, #tpu.memory_space<vmem>>, vector<128x128xbf16>
    %cst = arith.constant dense<0.000000e+00> : vector<128x128xf32>
    %6 = tpu.matmul %4, %5, %cst {dimension_numbers = #tpu.dot_dimension_numbers<[1], [0], [0], [1], [0, 0, 1, 1], [], []>} : vector<128x128xbf16>, vector<128x128xbf16>, vector<128x128xf32> -> vector<128x128xf32>
    %7 = arith.addf %3, %6 : vector<128x128xf32>
    %c0_6 = arith.constant 0 : index
    %c0_7 = arith.constant 0 : index
    %8 = vector.load %arg7[%c0_6, %c0_7] : memref<128x128xf32, #tpu.memory_space<vmem>>, vector<128x128xf32>
    tpu.vector_store %arg7[%c0_6, %c0_7], %7 {strides = array<i32>} : memref<128x128xf32, #tpu.memory_space<vmem>>, vector<128x128xf32>,
    %c2_i32 = arith.constant 2 : i32
    %9 = arith.cmpi eq, %arg1, %c2_i32 : i32
    %10 = arith.extui %9 : i1 to i32
    %c0_i32_8 = arith.constant 0 : i32
    %11 = arith.cmpi ne, %10, %c0_i32_8 : i32
    scf.if %11 {
      %c0_9 = arith.constant 0 : index
      %c0_10 = arith.constant 0 : index
      %12 = vector.load %arg7[%c0_9, %c0_10] : memref<128x128xf32, #tpu.memory_space<vmem>>, vector<128x128xf32>
      %c0_11 = arith.constant 0 : index
      %c0_12 = arith.constant 0 : index
      %13 = vector.load %arg4[%c0_11, %c0_12] : memref<1x128xf32, #tpu.memory_space<vmem>>, vector<1x128xf32>
      %14 = vector.broadcast %13 : vector<1x128xf32> to vector<128x128xf32>
      %15 = arith.addf %12, %14 : vector<128x128xf32>
      %c0_13 = arith.constant 0 : index
      %c0_14 = arith.constant 0 : index
      %16 = vector.load %arg5[%c0_13, %c0_14] : memref<128x128xbf16, #tpu.memory_space<vmem>>, vector<128x128xbf16>
      %17 = arith.extf %16 : vector<128x128xbf16> to vector<128x128xf32>
      %18 = arith.addf %15, %17 : vector<128x128xf32>
      %cst_15 = arith.constant 0.000000e+00 : f32
      %19 = vector.broadcast %cst_15 : f32 to vector<128x128xf32>
      %20 = arith.maximumf %18, %19 : vector<128x128xf32>
      %21 = arith.truncf %20 : vector<128x128xf32> to vector<128x128xbf16>
      %c0_16 = arith.constant 0 : index
      %c0_17 = arith.constant 0 : index
      %22 = vector.load %arg6[%c0_16, %c0_17] : memref<128x128xbf16, #tpu.memory_space<vmem>>, vector<128x128xbf16>
      tpu.vector_store %arg6[%c0_16, %c0_17], %21 {strides = array<i32>} : memref<128x128xbf16, #tpu.memory_space<vmem>>, vector<128x128xbf16>,
    } else {
    }
    return
  }
  func.func @transform_0(%arg0: i32, %arg1: i32) -> (i32, i32) {
    %c0_i32 = arith.constant 0 : i32
    return %arg0, %arg1 : i32, i32
  }
  func.func @transform_1(%arg0: i32, %arg1: i32) -> (i32, i32) {
    %c0_i32 = arith.constant 0 : i32
    %c0_i32_0 = arith.constant 0 : i32
    return %arg1, %c0_i32 : i32, i32
  }
  func.func @transform_2(%arg0: i32, %arg1: i32) -> (i32, i32) {
    %c0_i32 = arith.constant 0 : i32
    %c0_i32_0 = arith.constant 0 : i32
    %c0_i32_1 = arith.constant 0 : i32
    return %c0_i32, %c0_i32_0 : i32, i32
  }
  func.func @transform_3(%arg0: i32, %arg1: i32) -> (i32, i32) {
    %c0_i32 = arith.constant 0 : i32
    %c0_i32_0 = arith.constant 0 : i32
    return %arg0, %c0_i32 : i32, i32
  }
  func.func @transform_4(%arg0: i32, %arg1: i32) -> (i32, i32) {
    %c0_i32 = arith.constant 0 : i32
    %c0_i32_0 = arith.constant 0 : i32
    return %arg0, %c0_i32 : i32, i32
  }
}

module attributes {stable_mosaic.version = 11 : i64} {
  func.func @_gemm_bn_act_kernel(%arg0: i32, %arg1: i32, %arg2: memref<32x128xbf16, #tpu.memory_space<vmem>>, %arg3: memref<128x128xbf16, #tpu.memory_space<vmem>>, %arg4: memref<1x128xf32, #tpu.memory_space<vmem>>, %arg5: memref<32x128xbf16, #tpu.memory_space<vmem>>, %arg6: memref<32x128xf32, #tpu.memory_space<vmem>>) attributes {dimension_semantics = [#tpu.dimension_semantics<parallel>, #tpu.dimension_semantics<arbitrary>], iteration_bounds = array<i64: 1, 1>, scalar_prefetch = 0 : i64, scratch_operands = 1 : i64, tpu.core_type = #tpu.core_type<tc>, window_params = [{transform_indices = @transform_0, window_bounds = array<i64: 32, 128>}, {transform_indices = @transform_1, window_bounds = array<i64: 128, 128>}, {pipeline_mode = #tpu.pipeline_mode<synchronous>, transform_indices = @transform_2, window_bounds = array<i64: 1, 128>}, {transform_indices = @transform_3, window_bounds = array<i64: 32, 128>}]} {
    %c0_i32 = arith.constant 0 : i32
    %0 = arith.cmpi eq, %arg1, %c0_i32 : i32
    %1 = arith.extui %0 : i1 to i32
    %c0_i32_0 = arith.constant 0 : i32
    %2 = arith.cmpi ne, %1, %c0_i32_0 : i32
    scf.if %2 {
      %cst_10 = arith.constant 0.000000e+00 : f32
      %12 = vector.broadcast %cst_10 : f32 to vector<32x128xf32>
      %c0_11 = arith.constant 0 : index
      %c0_12 = arith.constant 0 : index
      %13 = vector.load %arg6[%c0_11, %c0_12] : memref<32x128xf32, #tpu.memory_space<vmem>>, vector<32x128xf32>
      tpu.vector_store %arg6[%c0_11, %c0_12], %12 {strides = array<i32>} : memref<32x128xf32, #tpu.memory_space<vmem>>, vector<32x128xf32>,
    } else {
    }
    %c0 = arith.constant 0 : index
    %c0_1 = arith.constant 0 : index
    %3 = vector.load %arg6[%c0, %c0_1] : memref<32x128xf32, #tpu.memory_space<vmem>>, vector<32x128xf32>
    %c0_2 = arith.constant 0 : index
    %c0_3 = arith.constant 0 : index
    %4 = vector.load %arg2[%c0_2, %c0_3] : memref<32x128xbf16, #tpu.memory_space<vmem>>, vector<32x128xbf16>
    %c0_4 = arith.constant 0 : index
    %c0_5 = arith.constant 0 : index
    %5 = vector.load %arg3[%c0_4, %c0_5] : memref<128x128xbf16, #tpu.memory_space<vmem>>, vector<128x128xbf16>
    %cst = arith.constant dense<0.000000e+00> : vector<32x128xf32>
    %6 = tpu.matmul %4, %5, %cst {dimension_numbers = #tpu.dot_dimension_numbers<[1], [0], [0], [1], [0, 0, 1, 1], [], []>} : vector<32x128xbf16>, vector<128x128xbf16>, vector<32x128xf32> -> vector<32x128xf32>
    %7 = arith.addf %3, %6 : vector<32x128xf32>
    %c0_6 = arith.constant 0 : index
    %c0_7 = arith.constant 0 : index
    %8 = vector.load %arg6[%c0_6, %c0_7] : memref<32x128xf32, #tpu.memory_space<vmem>>, vector<32x128xf32>
    tpu.vector_store %arg6[%c0_6, %c0_7], %7 {strides = array<i32>} : memref<32x128xf32, #tpu.memory_space<vmem>>, vector<32x128xf32>,
    %c0_i32_8 = arith.constant 0 : i32
    %9 = arith.cmpi eq, %arg1, %c0_i32_8 : i32
    %10 = arith.extui %9 : i1 to i32
    %c0_i32_9 = arith.constant 0 : i32
    %11 = arith.cmpi ne, %10, %c0_i32_9 : i32
    scf.if %11 {
      %c0_10 = arith.constant 0 : index
      %c0_11 = arith.constant 0 : index
      %12 = vector.load %arg6[%c0_10, %c0_11] : memref<32x128xf32, #tpu.memory_space<vmem>>, vector<32x128xf32>
      %c0_12 = arith.constant 0 : index
      %c0_13 = arith.constant 0 : index
      %13 = vector.load %arg4[%c0_12, %c0_13] : memref<1x128xf32, #tpu.memory_space<vmem>>, vector<1x128xf32>
      %14 = vector.broadcast %13 : vector<1x128xf32> to vector<32x128xf32>
      %15 = arith.addf %12, %14 : vector<32x128xf32>
      %16 = arith.truncf %15 : vector<32x128xf32> to vector<32x128xbf16>
      %c0_14 = arith.constant 0 : index
      %c0_15 = arith.constant 0 : index
      %17 = vector.load %arg5[%c0_14, %c0_15] : memref<32x128xbf16, #tpu.memory_space<vmem>>, vector<32x128xbf16>
      tpu.vector_store %arg5[%c0_14, %c0_15], %16 {strides = array<i32>} : memref<32x128xbf16, #tpu.memory_space<vmem>>, vector<32x128xbf16>,
    } else {
    }
    return
  }
  func.func @transform_0(%arg0: i32, %arg1: i32) -> (i32, i32) {
    %c0_i32 = arith.constant 0 : i32
    return %arg0, %arg1 : i32, i32
  }
  func.func @transform_1(%arg0: i32, %arg1: i32) -> (i32, i32) {
    %c0_i32 = arith.constant 0 : i32
    %c0_i32_0 = arith.constant 0 : i32
    return %arg1, %c0_i32 : i32, i32
  }
  func.func @transform_2(%arg0: i32, %arg1: i32) -> (i32, i32) {
    %c0_i32 = arith.constant 0 : i32
    %c0_i32_0 = arith.constant 0 : i32
    %c0_i32_1 = arith.constant 0 : i32
    return %c0_i32, %c0_i32_0 : i32, i32
  }
  func.func @transform_3(%arg0: i32, %arg1: i32) -> (i32, i32) {
    %c0_i32 = arith.constant 0 : i32
    %c0_i32_0 = arith.constant 0 : i32
    return %arg0, %c0_i32 : i32, i32
  }
}

module attributes {stable_mosaic.version = 11 : i64} {
  func.func @_gemm_bn_act_kernel(%arg0: i32, %arg1: i32, %arg2: memref<128x128xbf16, #tpu.memory_space<vmem>>, %arg3: memref<128x128xbf16, #tpu.memory_space<vmem>>, %arg4: memref<1x128xf32, #tpu.memory_space<vmem>>, %arg5: memref<128x128xbf16, #tpu.memory_space<vmem>>, %arg6: memref<128x128xf32, #tpu.memory_space<vmem>>) attributes {dimension_semantics = [#tpu.dimension_semantics<parallel>, #tpu.dimension_semantics<arbitrary>], iteration_bounds = array<i64: 1, 3>, scalar_prefetch = 0 : i64, scratch_operands = 1 : i64, tpu.core_type = #tpu.core_type<tc>, window_params = [{transform_indices = @transform_0, window_bounds = array<i64: 128, 128>}, {transform_indices = @transform_1, window_bounds = array<i64: 128, 128>}, {pipeline_mode = #tpu.pipeline_mode<synchronous>, transform_indices = @transform_2, window_bounds = array<i64: 1, 128>}, {transform_indices = @transform_3, window_bounds = array<i64: 128, 128>}]} {
    %c0_i32 = arith.constant 0 : i32
    %0 = arith.cmpi eq, %arg1, %c0_i32 : i32
    %1 = arith.extui %0 : i1 to i32
    %c0_i32_0 = arith.constant 0 : i32
    %2 = arith.cmpi ne, %1, %c0_i32_0 : i32
    scf.if %2 {
      %cst_9 = arith.constant 0.000000e+00 : f32
      %12 = vector.broadcast %cst_9 : f32 to vector<128x128xf32>
      %c0_10 = arith.constant 0 : index
      %c0_11 = arith.constant 0 : index
      %13 = vector.load %arg6[%c0_10, %c0_11] : memref<128x128xf32, #tpu.memory_space<vmem>>, vector<128x128xf32>
      tpu.vector_store %arg6[%c0_10, %c0_11], %12 {strides = array<i32>} : memref<128x128xf32, #tpu.memory_space<vmem>>, vector<128x128xf32>,
    } else {
    }
    %c0 = arith.constant 0 : index
    %c0_1 = arith.constant 0 : index
    %3 = vector.load %arg6[%c0, %c0_1] : memref<128x128xf32, #tpu.memory_space<vmem>>, vector<128x128xf32>
    %c0_2 = arith.constant 0 : index
    %c0_3 = arith.constant 0 : index
    %4 = vector.load %arg2[%c0_2, %c0_3] : memref<128x128xbf16, #tpu.memory_space<vmem>>, vector<128x128xbf16>
    %c0_4 = arith.constant 0 : index
    %c0_5 = arith.constant 0 : index
    %5 = vector.load %arg3[%c0_4, %c0_5] : memref<128x128xbf16, #tpu.memory_space<vmem>>, vector<128x128xbf16>
    %cst = arith.constant dense<0.000000e+00> : vector<128x128xf32>
    %6 = tpu.matmul %4, %5, %cst {dimension_numbers = #tpu.dot_dimension_numbers<[1], [0], [0], [1], [0, 0, 1, 1], [], []>} : vector<128x128xbf16>, vector<128x128xbf16>, vector<128x128xf32> -> vector<128x128xf32>
    %7 = arith.addf %3, %6 : vector<128x128xf32>
    %c0_6 = arith.constant 0 : index
    %c0_7 = arith.constant 0 : index
    %8 = vector.load %arg6[%c0_6, %c0_7] : memref<128x128xf32, #tpu.memory_space<vmem>>, vector<128x128xf32>
    tpu.vector_store %arg6[%c0_6, %c0_7], %7 {strides = array<i32>} : memref<128x128xf32, #tpu.memory_space<vmem>>, vector<128x128xf32>,
    %c2_i32 = arith.constant 2 : i32
    %9 = arith.cmpi eq, %arg1, %c2_i32 : i32
    %10 = arith.extui %9 : i1 to i32
    %c0_i32_8 = arith.constant 0 : i32
    %11 = arith.cmpi ne, %10, %c0_i32_8 : i32
    scf.if %11 {
      %c0_9 = arith.constant 0 : index
      %c0_10 = arith.constant 0 : index
      %12 = vector.load %arg6[%c0_9, %c0_10] : memref<128x128xf32, #tpu.memory_space<vmem>>, vector<128x128xf32>
      %c0_11 = arith.constant 0 : index
      %c0_12 = arith.constant 0 : index
      %13 = vector.load %arg4[%c0_11, %c0_12] : memref<1x128xf32, #tpu.memory_space<vmem>>, vector<1x128xf32>
      %14 = vector.broadcast %13 : vector<1x128xf32> to vector<128x128xf32>
      %15 = arith.addf %12, %14 : vector<128x128xf32>
      %cst_13 = arith.constant 0.000000e+00 : f32
      %16 = vector.broadcast %cst_13 : f32 to vector<128x128xf32>
      %17 = arith.maximumf %15, %16 : vector<128x128xf32>
      %18 = arith.truncf %17 : vector<128x128xf32> to vector<128x128xbf16>
      %c0_14 = arith.constant 0 : index
      %c0_15 = arith.constant 0 : index
      %19 = vector.load %arg5[%c0_14, %c0_15] : memref<128x128xbf16, #tpu.memory_space<vmem>>, vector<128x128xbf16>
      tpu.vector_store %arg5[%c0_14, %c0_15], %18 {strides = array<i32>} : memref<128x128xbf16, #tpu.memory_space<vmem>>, vector<128x128xbf16>,
    } else {
    }
    return
  }
  func.func @transform_0(%arg0: i32, %arg1: i32) -> (i32, i32) {
    %c0_i32 = arith.constant 0 : i32
    return %arg0, %arg1 : i32, i32
  }
  func.func @transform_1(%arg0: i32, %arg1: i32) -> (i32, i32) {
    %c0_i32 = arith.constant 0 : i32
    %c0_i32_0 = arith.constant 0 : i32
    return %arg1, %c0_i32 : i32, i32
  }
  func.func @transform_2(%arg0: i32, %arg1: i32) -> (i32, i32) {
    %c0_i32 = arith.constant 0 : i32
    %c0_i32_0 = arith.constant 0 : i32
    %c0_i32_1 = arith.constant 0 : i32
    return %c0_i32, %c0_i32_0 : i32, i32
  }
  func.func @transform_3(%arg0: i32, %arg1: i32) -> (i32, i32) {
    %c0_i32 = arith.constant 0 : i32
    %c0_i32_0 = arith.constant 0 : i32
    return %arg0, %c0_i32 : i32, i32
  }
}

module attributes {stable_mosaic.version = 11 : i64} {
  func.func @_gemm_bn_act_kernel(%arg0: i32, %arg1: i32, %arg2: memref<32x128xbf16, #tpu.memory_space<vmem>>, %arg3: memref<128x128xbf16, #tpu.memory_space<vmem>>, %arg4: memref<1x128xf32, #tpu.memory_space<vmem>>, %arg5: memref<32x128xbf16, #tpu.memory_space<vmem>>, %arg6: memref<32x128xf32, #tpu.memory_space<vmem>>) attributes {dimension_semantics = [#tpu.dimension_semantics<parallel>, #tpu.dimension_semantics<arbitrary>], iteration_bounds = array<i64: 1, 3>, scalar_prefetch = 0 : i64, scratch_operands = 1 : i64, tpu.core_type = #tpu.core_type<tc>, window_params = [{transform_indices = @transform_0, window_bounds = array<i64: 32, 128>}, {transform_indices = @transform_1, window_bounds = array<i64: 128, 128>}, {pipeline_mode = #tpu.pipeline_mode<synchronous>, transform_indices = @transform_2, window_bounds = array<i64: 1, 128>}, {transform_indices = @transform_3, window_bounds = array<i64: 32, 128>}]} {
    %c0_i32 = arith.constant 0 : i32
    %0 = arith.cmpi eq, %arg1, %c0_i32 : i32
    %1 = arith.extui %0 : i1 to i32
    %c0_i32_0 = arith.constant 0 : i32
    %2 = arith.cmpi ne, %1, %c0_i32_0 : i32
    scf.if %2 {
      %cst_9 = arith.constant 0.000000e+00 : f32
      %12 = vector.broadcast %cst_9 : f32 to vector<32x128xf32>
      %c0_10 = arith.constant 0 : index
      %c0_11 = arith.constant 0 : index
      %13 = vector.load %arg6[%c0_10, %c0_11] : memref<32x128xf32, #tpu.memory_space<vmem>>, vector<32x128xf32>
      tpu.vector_store %arg6[%c0_10, %c0_11], %12 {strides = array<i32>} : memref<32x128xf32, #tpu.memory_space<vmem>>, vector<32x128xf32>,
    } else {
    }
    %c0 = arith.constant 0 : index
    %c0_1 = arith.constant 0 : index
    %3 = vector.load %arg6[%c0, %c0_1] : memref<32x128xf32, #tpu.memory_space<vmem>>, vector<32x128xf32>
    %c0_2 = arith.constant 0 : index
    %c0_3 = arith.constant 0 : index
    %4 = vector.load %arg2[%c0_2, %c0_3] : memref<32x128xbf16, #tpu.memory_space<vmem>>, vector<32x128xbf16>
    %c0_4 = arith.constant 0 : index
    %c0_5 = arith.constant 0 : index
    %5 = vector.load %arg3[%c0_4, %c0_5] : memref<128x128xbf16, #tpu.memory_space<vmem>>, vector<128x128xbf16>
    %cst = arith.constant dense<0.000000e+00> : vector<32x128xf32>
    %6 = tpu.matmul %4, %5, %cst {dimension_numbers = #tpu.dot_dimension_numbers<[1], [0], [0], [1], [0, 0, 1, 1], [], []>} : vector<32x128xbf16>, vector<128x128xbf16>, vector<32x128xf32> -> vector<32x128xf32>
    %7 = arith.addf %3, %6 : vector<32x128xf32>
    %c0_6 = arith.constant 0 : index
    %c0_7 = arith.constant 0 : index
    %8 = vector.load %arg6[%c0_6, %c0_7] : memref<32x128xf32, #tpu.memory_space<vmem>>, vector<32x128xf32>
    tpu.vector_store %arg6[%c0_6, %c0_7], %7 {strides = array<i32>} : memref<32x128xf32, #tpu.memory_space<vmem>>, vector<32x128xf32>,
    %c2_i32 = arith.constant 2 : i32
    %9 = arith.cmpi eq, %arg1, %c2_i32 : i32
    %10 = arith.extui %9 : i1 to i32
    %c0_i32_8 = arith.constant 0 : i32
    %11 = arith.cmpi ne, %10, %c0_i32_8 : i32
    scf.if %11 {
      %c0_9 = arith.constant 0 : index
      %c0_10 = arith.constant 0 : index
      %12 = vector.load %arg6[%c0_9, %c0_10] : memref<32x128xf32, #tpu.memory_space<vmem>>, vector<32x128xf32>
      %c0_11 = arith.constant 0 : index
      %c0_12 = arith.constant 0 : index
      %13 = vector.load %arg4[%c0_11, %c0_12] : memref<1x128xf32, #tpu.memory_space<vmem>>, vector<1x128xf32>
      %14 = vector.broadcast %13 : vector<1x128xf32> to vector<32x128xf32>
      %15 = arith.addf %12, %14 : vector<32x128xf32>
      %cst_13 = arith.constant 0.000000e+00 : f32
      %16 = vector.broadcast %cst_13 : f32 to vector<32x128xf32>
      %17 = arith.maximumf %15, %16 : vector<32x128xf32>
      %18 = arith.truncf %17 : vector<32x128xf32> to vector<32x128xbf16>
      %c0_14 = arith.constant 0 : index
      %c0_15 = arith.constant 0 : index
      %19 = vector.load %arg5[%c0_14, %c0_15] : memref<32x128xbf16, #tpu.memory_space<vmem>>, vector<32x128xbf16>
      tpu.vector_store %arg5[%c0_14, %c0_15], %18 {strides = array<i32>} : memref<32x128xbf16, #tpu.memory_space<vmem>>, vector<32x128xbf16>,
    } else {
    }
    return
  }
  func.func @transform_0(%arg0: i32, %arg1: i32) -> (i32, i32) {
    %c0_i32 = arith.constant 0 : i32
    return %arg0, %arg1 : i32, i32
  }
  func.func @transform_1(%arg0: i32, %arg1: i32) -> (i32, i32) {
    %c0_i32 = arith.constant 0 : i32
    %c0_i32_0 = arith.constant 0 : i32
    return %arg1, %c0_i32 : i32, i32
  }
  func.func @transform_2(%arg0: i32, %arg1: i32) -> (i32, i32) {
    %c0_i32 = arith.constant 0 : i32
    %c0_i32_0 = arith.constant 0 : i32
    %c0_i32_1 = arith.constant 0 : i32
    return %c0_i32, %c0_i32_0 : i32, i32
  }
  func.func @transform_3(%arg0: i32, %arg1: i32) -> (i32, i32) {
    %c0_i32 = arith.constant 0 : i32
    %c0_i32_0 = arith.constant 0 : i32
    return %arg0, %c0_i32 : i32, i32
  }
}

module attributes {stable_mosaic.version = 11 : i64} {
  func.func @_gemm_bn_act_kernel(%arg0: i32, %arg1: i32, %arg2: memref<32x128xbf16, #tpu.memory_space<vmem>>, %arg3: memref<128x128xbf16, #tpu.memory_space<vmem>>, %arg4: memref<1x128xf32, #tpu.memory_space<vmem>>, %arg5: memref<32x128xbf16, #tpu.memory_space<vmem>>, %arg6: memref<32x128xbf16, #tpu.memory_space<vmem>>, %arg7: memref<32x128xf32, #tpu.memory_space<vmem>>) attributes {dimension_semantics = [#tpu.dimension_semantics<parallel>, #tpu.dimension_semantics<arbitrary>], iteration_bounds = array<i64: 1, 5>, scalar_prefetch = 0 : i64, scratch_operands = 1 : i64, tpu.core_type = #tpu.core_type<tc>, window_params = [{transform_indices = @transform_0, window_bounds = array<i64: 32, 128>}, {transform_indices = @transform_1, window_bounds = array<i64: 128, 128>}, {pipeline_mode = #tpu.pipeline_mode<synchronous>, transform_indices = @transform_2, window_bounds = array<i64: 1, 128>}, {transform_indices = @transform_3, window_bounds = array<i64: 32, 128>}, {transform_indices = @transform_4, window_bounds = array<i64: 32, 128>}]} {
    %c0_i32 = arith.constant 0 : i32
    %0 = arith.cmpi eq, %arg1, %c0_i32 : i32
    %1 = arith.extui %0 : i1 to i32
    %c0_i32_0 = arith.constant 0 : i32
    %2 = arith.cmpi ne, %1, %c0_i32_0 : i32
    scf.if %2 {
      %cst_9 = arith.constant 0.000000e+00 : f32
      %12 = vector.broadcast %cst_9 : f32 to vector<32x128xf32>
      %c0_10 = arith.constant 0 : index
      %c0_11 = arith.constant 0 : index
      %13 = vector.load %arg7[%c0_10, %c0_11] : memref<32x128xf32, #tpu.memory_space<vmem>>, vector<32x128xf32>
      tpu.vector_store %arg7[%c0_10, %c0_11], %12 {strides = array<i32>} : memref<32x128xf32, #tpu.memory_space<vmem>>, vector<32x128xf32>,
    } else {
    }
    %c0 = arith.constant 0 : index
    %c0_1 = arith.constant 0 : index
    %3 = vector.load %arg7[%c0, %c0_1] : memref<32x128xf32, #tpu.memory_space<vmem>>, vector<32x128xf32>
    %c0_2 = arith.constant 0 : index
    %c0_3 = arith.constant 0 : index
    %4 = vector.load %arg2[%c0_2, %c0_3] : memref<32x128xbf16, #tpu.memory_space<vmem>>, vector<32x128xbf16>
    %c0_4 = arith.constant 0 : index
    %c0_5 = arith.constant 0 : index
    %5 = vector.load %arg3[%c0_4, %c0_5] : memref<128x128xbf16, #tpu.memory_space<vmem>>, vector<128x128xbf16>
    %cst = arith.constant dense<0.000000e+00> : vector<32x128xf32>
    %6 = tpu.matmul %4, %5, %cst {dimension_numbers = #tpu.dot_dimension_numbers<[1], [0], [0], [1], [0, 0, 1, 1], [], []>} : vector<32x128xbf16>, vector<128x128xbf16>, vector<32x128xf32> -> vector<32x128xf32>
    %7 = arith.addf %3, %6 : vector<32x128xf32>
    %c0_6 = arith.constant 0 : index
    %c0_7 = arith.constant 0 : index
    %8 = vector.load %arg7[%c0_6, %c0_7] : memref<32x128xf32, #tpu.memory_space<vmem>>, vector<32x128xf32>
    tpu.vector_store %arg7[%c0_6, %c0_7], %7 {strides = array<i32>} : memref<32x128xf32, #tpu.memory_space<vmem>>, vector<32x128xf32>,
    %c4_i32 = arith.constant 4 : i32
    %9 = arith.cmpi eq, %arg1, %c4_i32 : i32
    %10 = arith.extui %9 : i1 to i32
    %c0_i32_8 = arith.constant 0 : i32
    %11 = arith.cmpi ne, %10, %c0_i32_8 : i32
    scf.if %11 {
      %c0_9 = arith.constant 0 : index
      %c0_10 = arith.constant 0 : index
      %12 = vector.load %arg7[%c0_9, %c0_10] : memref<32x128xf32, #tpu.memory_space<vmem>>, vector<32x128xf32>
      %c0_11 = arith.constant 0 : index
      %c0_12 = arith.constant 0 : index
      %13 = vector.load %arg4[%c0_11, %c0_12] : memref<1x128xf32, #tpu.memory_space<vmem>>, vector<1x128xf32>
      %14 = vector.broadcast %13 : vector<1x128xf32> to vector<32x128xf32>
      %15 = arith.addf %12, %14 : vector<32x128xf32>
      %c0_13 = arith.constant 0 : index
      %c0_14 = arith.constant 0 : index
      %16 = vector.load %arg5[%c0_13, %c0_14] : memref<32x128xbf16, #tpu.memory_space<vmem>>, vector<32x128xbf16>
      %17 = arith.extf %16 : vector<32x128xbf16> to vector<32x128xf32>
      %18 = arith.addf %15, %17 : vector<32x128xf32>
      %cst_15 = arith.constant 0.000000e+00 : f32
      %19 = vector.broadcast %cst_15 : f32 to vector<32x128xf32>
      %20 = arith.maximumf %18, %19 : vector<32x128xf32>
      %21 = arith.truncf %20 : vector<32x128xf32> to vector<32x128xbf16>
      %c0_16 = arith.constant 0 : index
      %c0_17 = arith.constant 0 : index
      %22 = vector.load %arg6[%c0_16, %c0_17] : memref<32x128xbf16, #tpu.memory_space<vmem>>, vector<32x128xbf16>
      tpu.vector_store %arg6[%c0_16, %c0_17], %21 {strides = array<i32>} : memref<32x128xbf16, #tpu.memory_space<vmem>>, vector<32x128xbf16>,
    } else {
    }
    return
  }
  func.func @transform_0(%arg0: i32, %arg1: i32) -> (i32, i32) {
    %c0_i32 = arith.constant 0 : i32
    return %arg0, %arg1 : i32, i32
  }
  func.func @transform_1(%arg0: i32, %arg1: i32) -> (i32, i32) {
    %c0_i32 = arith.constant 0 : i32
    %c0_i32_0 = arith.constant 0 : i32
    return %arg1, %c0_i32 : i32, i32
  }
  func.func @transform_2(%arg0: i32, %arg1: i32) -> (i32, i32) {
    %c0_i32 = arith.constant 0 : i32
    %c0_i32_0 = arith.constant 0 : i32
    %c0_i32_1 = arith.constant 0 : i32
    return %c0_i32, %c0_i32_0 : i32, i32
  }
  func.func @transform_3(%arg0: i32, %arg1: i32) -> (i32, i32) {
    %c0_i32 = arith.constant 0 : i32
    %c0_i32_0 = arith.constant 0 : i32
    return %arg0, %c0_i32 : i32, i32
  }
  func.func @transform_4(%arg0: i32, %arg1: i32) -> (i32, i32) {
    %c0_i32 = arith.constant 0 : i32
    %c0_i32_0 = arith.constant 0 : i32
    return %arg0, %c0_i32 : i32, i32
  }
}

module attributes {stable_mosaic.version = 11 : i64} {
  func.func @_gemm_bn_act_kernel(%arg0: i32, %arg1: i32, %arg2: memref<32x128xbf16, #tpu.memory_space<vmem>>, %arg3: memref<128x128xbf16, #tpu.memory_space<vmem>>, %arg4: memref<1x128xf32, #tpu.memory_space<vmem>>, %arg5: memref<32x128xbf16, #tpu.memory_space<vmem>>, %arg6: memref<32x128xf32, #tpu.memory_space<vmem>>) attributes {dimension_semantics = [#tpu.dimension_semantics<parallel>, #tpu.dimension_semantics<arbitrary>], iteration_bounds = array<i64: 1, 5>, scalar_prefetch = 0 : i64, scratch_operands = 1 : i64, tpu.core_type = #tpu.core_type<tc>, window_params = [{transform_indices = @transform_0, window_bounds = array<i64: 32, 128>}, {transform_indices = @transform_1, window_bounds = array<i64: 128, 128>}, {pipeline_mode = #tpu.pipeline_mode<synchronous>, transform_indices = @transform_2, window_bounds = array<i64: 1, 128>}, {transform_indices = @transform_3, window_bounds = array<i64: 32, 128>}]} {
    %c0_i32 = arith.constant 0 : i32
    %0 = arith.cmpi eq, %arg1, %c0_i32 : i32
    %1 = arith.extui %0 : i1 to i32
    %c0_i32_0 = arith.constant 0 : i32
    %2 = arith.cmpi ne, %1, %c0_i32_0 : i32
    scf.if %2 {
      %cst_9 = arith.constant 0.000000e+00 : f32
      %12 = vector.broadcast %cst_9 : f32 to vector<32x128xf32>
      %c0_10 = arith.constant 0 : index
      %c0_11 = arith.constant 0 : index
      %13 = vector.load %arg6[%c0_10, %c0_11] : memref<32x128xf32, #tpu.memory_space<vmem>>, vector<32x128xf32>
      tpu.vector_store %arg6[%c0_10, %c0_11], %12 {strides = array<i32>} : memref<32x128xf32, #tpu.memory_space<vmem>>, vector<32x128xf32>,
    } else {
    }
    %c0 = arith.constant 0 : index
    %c0_1 = arith.constant 0 : index
    %3 = vector.load %arg6[%c0, %c0_1] : memref<32x128xf32, #tpu.memory_space<vmem>>, vector<32x128xf32>
    %c0_2 = arith.constant 0 : index
    %c0_3 = arith.constant 0 : index
    %4 = vector.load %arg2[%c0_2, %c0_3] : memref<32x128xbf16, #tpu.memory_space<vmem>>, vector<32x128xbf16>
    %c0_4 = arith.constant 0 : index
    %c0_5 = arith.constant 0 : index
    %5 = vector.load %arg3[%c0_4, %c0_5] : memref<128x128xbf16, #tpu.memory_space<vmem>>, vector<128x128xbf16>
    %cst = arith.constant dense<0.000000e+00> : vector<32x128xf32>
    %6 = tpu.matmul %4, %5, %cst {dimension_numbers = #tpu.dot_dimension_numbers<[1], [0], [0], [1], [0, 0, 1, 1], [], []>} : vector<32x128xbf16>, vector<128x128xbf16>, vector<32x128xf32> -> vector<32x128xf32>
    %7 = arith.addf %3, %6 : vector<32x128xf32>
    %c0_6 = arith.constant 0 : index
    %c0_7 = arith.constant 0 : index
    %8 = vector.load %arg6[%c0_6, %c0_7] : memref<32x128xf32, #tpu.memory_space<vmem>>, vector<32x128xf32>
    tpu.vector_store %arg6[%c0_6, %c0_7], %7 {strides = array<i32>} : memref<32x128xf32, #tpu.memory_space<vmem>>, vector<32x128xf32>,
    %c4_i32 = arith.constant 4 : i32
    %9 = arith.cmpi eq, %arg1, %c4_i32 : i32
    %10 = arith.extui %9 : i1 to i32
    %c0_i32_8 = arith.constant 0 : i32
    %11 = arith.cmpi ne, %10, %c0_i32_8 : i32
    scf.if %11 {
      %c0_9 = arith.constant 0 : index
      %c0_10 = arith.constant 0 : index
      %12 = vector.load %arg6[%c0_9, %c0_10] : memref<32x128xf32, #tpu.memory_space<vmem>>, vector<32x128xf32>
      %c0_11 = arith.constant 0 : index
      %c0_12 = arith.constant 0 : index
      %13 = vector.load %arg4[%c0_11, %c0_12] : memref<1x128xf32, #tpu.memory_space<vmem>>, vector<1x128xf32>
      %14 = vector.broadcast %13 : vector<1x128xf32> to vector<32x128xf32>
      %15 = arith.addf %12, %14 : vector<32x128xf32>
      %cst_13 = arith.constant 0.000000e+00 : f32
      %16 = vector.broadcast %cst_13 : f32 to vector<32x128xf32>
      %17 = arith.maximumf %15, %16 : vector<32x128xf32>
      %18 = arith.truncf %17 : vector<32x128xf32> to vector<32x128xbf16>
      %c0_14 = arith.constant 0 : index
      %c0_15 = arith.constant 0 : index
      %19 = vector.load %arg5[%c0_14, %c0_15] : memref<32x128xbf16, #tpu.memory_space<vmem>>, vector<32x128xbf16>
      tpu.vector_store %arg5[%c0_14, %c0_15], %18 {strides = array<i32>} : memref<32x128xbf16, #tpu.memory_space<vmem>>, vector<32x128xbf16>,
    } else {
    }
    return
  }
  func.func @transform_0(%arg0: i32, %arg1: i32) -> (i32, i32) {
    %c0_i32 = arith.constant 0 : i32
    return %arg0, %arg1 : i32, i32
  }
  func.func @transform_1(%arg0: i32, %arg1: i32) -> (i32, i32) {
    %c0_i32 = arith.constant 0 : i32
    %c0_i32_0 = arith.constant 0 : i32
    return %arg1, %c0_i32 : i32, i32
  }
  func.func @transform_2(%arg0: i32, %arg1: i32) -> (i32, i32) {
    %c0_i32 = arith.constant 0 : i32
    %c0_i32_0 = arith.constant 0 : i32
    %c0_i32_1 = arith.constant 0 : i32
    return %c0_i32, %c0_i32_0 : i32, i32
  }
  func.func @transform_3(%arg0: i32, %arg1: i32) -> (i32, i32) {
    %c0_i32 = arith.constant 0 : i32
    %c0_i32_0 = arith.constant 0 : i32
    return %arg0, %c0_i32 : i32, i32
  }
}

module attributes {stable_mosaic.version = 11 : i64} {
  func.func @_gemm_bn_act_kernel(%arg0: i32, %arg1: i32, %arg2: memref<16x128xbf16, #tpu.memory_space<vmem>>, %arg3: memref<128x128xbf16, #tpu.memory_space<vmem>>, %arg4: memref<1x128xf32, #tpu.memory_space<vmem>>, %arg5: memref<16x128xbf16, #tpu.memory_space<vmem>>, %arg6: memref<16x128xf32, #tpu.memory_space<vmem>>) attributes {dimension_semantics = [#tpu.dimension_semantics<parallel>, #tpu.dimension_semantics<arbitrary>], iteration_bounds = array<i64: 1, 1>, scalar_prefetch = 0 : i64, scratch_operands = 1 : i64, tpu.core_type = #tpu.core_type<tc>, window_params = [{transform_indices = @transform_0, window_bounds = array<i64: 16, 128>}, {transform_indices = @transform_1, window_bounds = array<i64: 128, 128>}, {pipeline_mode = #tpu.pipeline_mode<synchronous>, transform_indices = @transform_2, window_bounds = array<i64: 1, 128>}, {transform_indices = @transform_3, window_bounds = array<i64: 16, 128>}]} {
    %c0_i32 = arith.constant 0 : i32
    %0 = arith.cmpi eq, %arg1, %c0_i32 : i32
    %1 = arith.extui %0 : i1 to i32
    %c0_i32_0 = arith.constant 0 : i32
    %2 = arith.cmpi ne, %1, %c0_i32_0 : i32
    scf.if %2 {
      %cst_10 = arith.constant 0.000000e+00 : f32
      %12 = vector.broadcast %cst_10 : f32 to vector<16x128xf32>
      %c0_11 = arith.constant 0 : index
      %c0_12 = arith.constant 0 : index
      %13 = vector.load %arg6[%c0_11, %c0_12] : memref<16x128xf32, #tpu.memory_space<vmem>>, vector<16x128xf32>
      tpu.vector_store %arg6[%c0_11, %c0_12], %12 {strides = array<i32>} : memref<16x128xf32, #tpu.memory_space<vmem>>, vector<16x128xf32>,
    } else {
    }
    %c0 = arith.constant 0 : index
    %c0_1 = arith.constant 0 : index
    %3 = vector.load %arg6[%c0, %c0_1] : memref<16x128xf32, #tpu.memory_space<vmem>>, vector<16x128xf32>
    %c0_2 = arith.constant 0 : index
    %c0_3 = arith.constant 0 : index
    %4 = vector.load %arg2[%c0_2, %c0_3] : memref<16x128xbf16, #tpu.memory_space<vmem>>, vector<16x128xbf16>
    %c0_4 = arith.constant 0 : index
    %c0_5 = arith.constant 0 : index
    %5 = vector.load %arg3[%c0_4, %c0_5] : memref<128x128xbf16, #tpu.memory_space<vmem>>, vector<128x128xbf16>
    %cst = arith.constant dense<0.000000e+00> : vector<16x128xf32>
    %6 = tpu.matmul %4, %5, %cst {dimension_numbers = #tpu.dot_dimension_numbers<[1], [0], [0], [1], [0, 0, 1, 1], [], []>} : vector<16x128xbf16>, vector<128x128xbf16>, vector<16x128xf32> -> vector<16x128xf32>
    %7 = arith.addf %3, %6 : vector<16x128xf32>
    %c0_6 = arith.constant 0 : index
    %c0_7 = arith.constant 0 : index
    %8 = vector.load %arg6[%c0_6, %c0_7] : memref<16x128xf32, #tpu.memory_space<vmem>>, vector<16x128xf32>
    tpu.vector_store %arg6[%c0_6, %c0_7], %7 {strides = array<i32>} : memref<16x128xf32, #tpu.memory_space<vmem>>, vector<16x128xf32>,
    %c0_i32_8 = arith.constant 0 : i32
    %9 = arith.cmpi eq, %arg1, %c0_i32_8 : i32
    %10 = arith.extui %9 : i1 to i32
    %c0_i32_9 = arith.constant 0 : i32
    %11 = arith.cmpi ne, %10, %c0_i32_9 : i32
    scf.if %11 {
      %c0_10 = arith.constant 0 : index
      %c0_11 = arith.constant 0 : index
      %12 = vector.load %arg6[%c0_10, %c0_11] : memref<16x128xf32, #tpu.memory_space<vmem>>, vector<16x128xf32>
      %c0_12 = arith.constant 0 : index
      %c0_13 = arith.constant 0 : index
      %13 = vector.load %arg4[%c0_12, %c0_13] : memref<1x128xf32, #tpu.memory_space<vmem>>, vector<1x128xf32>
      %14 = vector.broadcast %13 : vector<1x128xf32> to vector<16x128xf32>
      %15 = arith.addf %12, %14 : vector<16x128xf32>
      %16 = arith.truncf %15 : vector<16x128xf32> to vector<16x128xbf16>
      %c0_14 = arith.constant 0 : index
      %c0_15 = arith.constant 0 : index
      %17 = vector.load %arg5[%c0_14, %c0_15] : memref<16x128xbf16, #tpu.memory_space<vmem>>, vector<16x128xbf16>
      tpu.vector_store %arg5[%c0_14, %c0_15], %16 {strides = array<i32>} : memref<16x128xbf16, #tpu.memory_space<vmem>>, vector<16x128xbf16>,
    } else {
    }
    return
  }
  func.func @transform_0(%arg0: i32, %arg1: i32) -> (i32, i32) {
    %c0_i32 = arith.constant 0 : i32
    return %arg0, %arg1 : i32, i32
  }
  func.func @transform_1(%arg0: i32, %arg1: i32) -> (i32, i32) {
    %c0_i32 = arith.constant 0 : i32
    %c0_i32_0 = arith.constant 0 : i32
    return %arg1, %c0_i32 : i32, i32
  }
  func.func @transform_2(%arg0: i32, %arg1: i32) -> (i32, i32) {
    %c0_i32 = arith.constant 0 : i32
    %c0_i32_0 = arith.constant 0 : i32
    %c0_i32_1 = arith.constant 0 : i32
    return %c0_i32, %c0_i32_0 : i32, i32
  }
  func.func @transform_3(%arg0: i32, %arg1: i32) -> (i32, i32) {
    %c0_i32 = arith.constant 0 : i32
    %c0_i32_0 = arith.constant 0 : i32
    return %arg0, %c0_i32 : i32, i32
  }
}

module attributes {stable_mosaic.version = 11 : i64} {
  func.func @_gemm_bn_act_kernel(%arg0: i32, %arg1: i32, %arg2: memref<16x128xbf16, #tpu.memory_space<vmem>>, %arg3: memref<128x128xbf16, #tpu.memory_space<vmem>>, %arg4: memref<1x128xf32, #tpu.memory_space<vmem>>, %arg5: memref<16x128xbf16, #tpu.memory_space<vmem>>, %arg6: memref<16x128xf32, #tpu.memory_space<vmem>>) attributes {dimension_semantics = [#tpu.dimension_semantics<parallel>, #tpu.dimension_semantics<arbitrary>], iteration_bounds = array<i64: 1, 5>, scalar_prefetch = 0 : i64, scratch_operands = 1 : i64, tpu.core_type = #tpu.core_type<tc>, window_params = [{transform_indices = @transform_0, window_bounds = array<i64: 16, 128>}, {transform_indices = @transform_1, window_bounds = array<i64: 128, 128>}, {pipeline_mode = #tpu.pipeline_mode<synchronous>, transform_indices = @transform_2, window_bounds = array<i64: 1, 128>}, {transform_indices = @transform_3, window_bounds = array<i64: 16, 128>}]} {
    %c0_i32 = arith.constant 0 : i32
    %0 = arith.cmpi eq, %arg1, %c0_i32 : i32
    %1 = arith.extui %0 : i1 to i32
    %c0_i32_0 = arith.constant 0 : i32
    %2 = arith.cmpi ne, %1, %c0_i32_0 : i32
    scf.if %2 {
      %cst_9 = arith.constant 0.000000e+00 : f32
      %12 = vector.broadcast %cst_9 : f32 to vector<16x128xf32>
      %c0_10 = arith.constant 0 : index
      %c0_11 = arith.constant 0 : index
      %13 = vector.load %arg6[%c0_10, %c0_11] : memref<16x128xf32, #tpu.memory_space<vmem>>, vector<16x128xf32>
      tpu.vector_store %arg6[%c0_10, %c0_11], %12 {strides = array<i32>} : memref<16x128xf32, #tpu.memory_space<vmem>>, vector<16x128xf32>,
    } else {
    }
    %c0 = arith.constant 0 : index
    %c0_1 = arith.constant 0 : index
    %3 = vector.load %arg6[%c0, %c0_1] : memref<16x128xf32, #tpu.memory_space<vmem>>, vector<16x128xf32>
    %c0_2 = arith.constant 0 : index
    %c0_3 = arith.constant 0 : index
    %4 = vector.load %arg2[%c0_2, %c0_3] : memref<16x128xbf16, #tpu.memory_space<vmem>>, vector<16x128xbf16>
    %c0_4 = arith.constant 0 : index
    %c0_5 = arith.constant 0 : index
    %5 = vector.load %arg3[%c0_4, %c0_5] : memref<128x128xbf16, #tpu.memory_space<vmem>>, vector<128x128xbf16>
    %cst = arith.constant dense<0.000000e+00> : vector<16x128xf32>
    %6 = tpu.matmul %4, %5, %cst {dimension_numbers = #tpu.dot_dimension_numbers<[1], [0], [0], [1], [0, 0, 1, 1], [], []>} : vector<16x128xbf16>, vector<128x128xbf16>, vector<16x128xf32> -> vector<16x128xf32>
    %7 = arith.addf %3, %6 : vector<16x128xf32>
    %c0_6 = arith.constant 0 : index
    %c0_7 = arith.constant 0 : index
    %8 = vector.load %arg6[%c0_6, %c0_7] : memref<16x128xf32, #tpu.memory_space<vmem>>, vector<16x128xf32>
    tpu.vector_store %arg6[%c0_6, %c0_7], %7 {strides = array<i32>} : memref<16x128xf32, #tpu.memory_space<vmem>>, vector<16x128xf32>,
    %c4_i32 = arith.constant 4 : i32
    %9 = arith.cmpi eq, %arg1, %c4_i32 : i32
    %10 = arith.extui %9 : i1 to i32
    %c0_i32_8 = arith.constant 0 : i32
    %11 = arith.cmpi ne, %10, %c0_i32_8 : i32
    scf.if %11 {
      %c0_9 = arith.constant 0 : index
      %c0_10 = arith.constant 0 : index
      %12 = vector.load %arg6[%c0_9, %c0_10] : memref<16x128xf32, #tpu.memory_space<vmem>>, vector<16x128xf32>
      %c0_11 = arith.constant 0 : index
      %c0_12 = arith.constant 0 : index
      %13 = vector.load %arg4[%c0_11, %c0_12] : memref<1x128xf32, #tpu.memory_space<vmem>>, vector<1x128xf32>
      %14 = vector.broadcast %13 : vector<1x128xf32> to vector<16x128xf32>
      %15 = arith.addf %12, %14 : vector<16x128xf32>
      %cst_13 = arith.constant 0.000000e+00 : f32
      %16 = vector.broadcast %cst_13 : f32 to vector<16x128xf32>
      %17 = arith.maximumf %15, %16 : vector<16x128xf32>
      %18 = arith.truncf %17 : vector<16x128xf32> to vector<16x128xbf16>
      %c0_14 = arith.constant 0 : index
      %c0_15 = arith.constant 0 : index
      %19 = vector.load %arg5[%c0_14, %c0_15] : memref<16x128xbf16, #tpu.memory_space<vmem>>, vector<16x128xbf16>
      tpu.vector_store %arg5[%c0_14, %c0_15], %18 {strides = array<i32>} : memref<16x128xbf16, #tpu.memory_space<vmem>>, vector<16x128xbf16>,
    } else {
    }
    return
  }
  func.func @transform_0(%arg0: i32, %arg1: i32) -> (i32, i32) {
    %c0_i32 = arith.constant 0 : i32
    return %arg0, %arg1 : i32, i32
  }
  func.func @transform_1(%arg0: i32, %arg1: i32) -> (i32, i32) {
    %c0_i32 = arith.constant 0 : i32
    %c0_i32_0 = arith.constant 0 : i32
    return %arg1, %c0_i32 : i32, i32
  }
  func.func @transform_2(%arg0: i32, %arg1: i32) -> (i32, i32) {
    %c0_i32 = arith.constant 0 : i32
    %c0_i32_0 = arith.constant 0 : i32
    %c0_i32_1 = arith.constant 0 : i32
    return %c0_i32, %c0_i32_0 : i32, i32
  }
  func.func @transform_3(%arg0: i32, %arg1: i32) -> (i32, i32) {
    %c0_i32 = arith.constant 0 : i32
    %c0_i32_0 = arith.constant 0 : i32
    return %arg0, %c0_i32 : i32, i32
  }
}

module attributes {stable_mosaic.version = 11 : i64} {
  func.func @_avgpool_kernel(%arg0: memref<2x4x128xbf16, #tpu.memory_space<vmem>>, %arg1: memref<2x128xf32, #tpu.memory_space<vmem>>) attributes {dimension_semantics = [], scalar_prefetch = 0 : i64, scratch_operands = 0 : i64, tpu.core_type = #tpu.core_type<tc>} {
    %c0 = arith.constant 0 : index
    %c0_0 = arith.constant 0 : index
    %c0_1 = arith.constant 0 : index
    %0 = vector.load %arg0[%c0, %c0_0, %c0_1] : memref<2x4x128xbf16, #tpu.memory_space<vmem>>, vector<2x4x128xbf16>
    %1 = arith.extf %0 : vector<2x4x128xbf16> to vector<2x4x128xf32>
    %cst = arith.constant dense<0.000000e+00> : vector<2x128xf32>
    %2 = vector.multi_reduction <add>, %1, %cst [1] : vector<2x4x128xf32> to vector<2x128xf32>
    %cst_2 = arith.constant 4.000000e+00 : f32
    %3 = vector.broadcast %cst_2 : f32 to vector<2x128xf32>
    %4 = arith.divf %2, %3 : vector<2x128xf32>
    %c0_3 = arith.constant 0 : index
    %c0_4 = arith.constant 0 : index
    %5 = vector.load %arg1[%c0_3, %c0_4] : memref<2x128xf32, #tpu.memory_space<vmem>>, vector<2x128xf32>
    tpu.vector_store %arg1[%c0_3, %c0_4], %4 {strides = array<i32>} : memref<2x128xf32, #tpu.memory_space<vmem>>, vector<2x128xf32>,
    return
  }
}

module attributes {stable_mosaic.version = 11 : i64} {
  func.func @_gemm_bn_act_kernel(%arg0: i32, %arg1: i32, %arg2: memref<16x128xbf16, #tpu.memory_space<vmem>>, %arg3: memref<128x128xbf16, #tpu.memory_space<vmem>>, %arg4: memref<1x128xf32, #tpu.memory_space<vmem>>, %arg5: memref<16x128xbf16, #tpu.memory_space<vmem>>, %arg6: memref<16x128xbf16, #tpu.memory_space<vmem>>, %arg7: memref<16x128xf32, #tpu.memory_space<vmem>>) attributes {dimension_semantics = [#tpu.dimension_semantics<parallel>, #tpu.dimension_semantics<arbitrary>], iteration_bounds = array<i64: 1, 9>, scalar_prefetch = 0 : i64, scratch_operands = 1 : i64, tpu.core_type = #tpu.core_type<tc>, window_params = [{transform_indices = @transform_0, window_bounds = array<i64: 16, 128>}, {transform_indices = @transform_1, window_bounds = array<i64: 128, 128>}, {pipeline_mode = #tpu.pipeline_mode<synchronous>, transform_indices = @transform_2, window_bounds = array<i64: 1, 128>}, {transform_indices = @transform_3, window_bounds = array<i64: 16, 128>}, {transform_indices = @transform_4, window_bounds = array<i64: 16, 128>}]} {
    %c0_i32 = arith.constant 0 : i32
    %0 = arith.cmpi eq, %arg1, %c0_i32 : i32
    %1 = arith.extui %0 : i1 to i32
    %c0_i32_0 = arith.constant 0 : i32
    %2 = arith.cmpi ne, %1, %c0_i32_0 : i32
    scf.if %2 {
      %cst_9 = arith.constant 0.000000e+00 : f32
      %12 = vector.broadcast %cst_9 : f32 to vector<16x128xf32>
      %c0_10 = arith.constant 0 : index
      %c0_11 = arith.constant 0 : index
      %13 = vector.load %arg7[%c0_10, %c0_11] : memref<16x128xf32, #tpu.memory_space<vmem>>, vector<16x128xf32>
      tpu.vector_store %arg7[%c0_10, %c0_11], %12 {strides = array<i32>} : memref<16x128xf32, #tpu.memory_space<vmem>>, vector<16x128xf32>,
    } else {
    }
    %c0 = arith.constant 0 : index
    %c0_1 = arith.constant 0 : index
    %3 = vector.load %arg7[%c0, %c0_1] : memref<16x128xf32, #tpu.memory_space<vmem>>, vector<16x128xf32>
    %c0_2 = arith.constant 0 : index
    %c0_3 = arith.constant 0 : index
    %4 = vector.load %arg2[%c0_2, %c0_3] : memref<16x128xbf16, #tpu.memory_space<vmem>>, vector<16x128xbf16>
    %c0_4 = arith.constant 0 : index
    %c0_5 = arith.constant 0 : index
    %5 = vector.load %arg3[%c0_4, %c0_5] : memref<128x128xbf16, #tpu.memory_space<vmem>>, vector<128x128xbf16>
    %cst = arith.constant dense<0.000000e+00> : vector<16x128xf32>
    %6 = tpu.matmul %4, %5, %cst {dimension_numbers = #tpu.dot_dimension_numbers<[1], [0], [0], [1], [0, 0, 1, 1], [], []>} : vector<16x128xbf16>, vector<128x128xbf16>, vector<16x128xf32> -> vector<16x128xf32>
    %7 = arith.addf %3, %6 : vector<16x128xf32>
    %c0_6 = arith.constant 0 : index
    %c0_7 = arith.constant 0 : index
    %8 = vector.load %arg7[%c0_6, %c0_7] : memref<16x128xf32, #tpu.memory_space<vmem>>, vector<16x128xf32>
    tpu.vector_store %arg7[%c0_6, %c0_7], %7 {strides = array<i32>} : memref<16x128xf32, #tpu.memory_space<vmem>>, vector<16x128xf32>,
    %c8_i32 = arith.constant 8 : i32
    %9 = arith.cmpi eq, %arg1, %c8_i32 : i32
    %10 = arith.extui %9 : i1 to i32
    %c0_i32_8 = arith.constant 0 : i32
    %11 = arith.cmpi ne, %10, %c0_i32_8 : i32
    scf.if %11 {
      %c0_9 = arith.constant 0 : index
      %c0_10 = arith.constant 0 : index
      %12 = vector.load %arg7[%c0_9, %c0_10] : memref<16x128xf32, #tpu.memory_space<vmem>>, vector<16x128xf32>
      %c0_11 = arith.constant 0 : index
      %c0_12 = arith.constant 0 : index
      %13 = vector.load %arg4[%c0_11, %c0_12] : memref<1x128xf32, #tpu.memory_space<vmem>>, vector<1x128xf32>
      %14 = vector.broadcast %13 : vector<1x128xf32> to vector<16x128xf32>
      %15 = arith.addf %12, %14 : vector<16x128xf32>
      %c0_13 = arith.constant 0 : index
      %c0_14 = arith.constant 0 : index
      %16 = vector.load %arg5[%c0_13, %c0_14] : memref<16x128xbf16, #tpu.memory_space<vmem>>, vector<16x128xbf16>
      %17 = arith.extf %16 : vector<16x128xbf16> to vector<16x128xf32>
      %18 = arith.addf %15, %17 : vector<16x128xf32>
      %cst_15 = arith.constant 0.000000e+00 : f32
      %19 = vector.broadcast %cst_15 : f32 to vector<16x128xf32>
      %20 = arith.maximumf %18, %19 : vector<16x128xf32>
      %21 = arith.truncf %20 : vector<16x128xf32> to vector<16x128xbf16>
      %c0_16 = arith.constant 0 : index
      %c0_17 = arith.constant 0 : index
      %22 = vector.load %arg6[%c0_16, %c0_17] : memref<16x128xbf16, #tpu.memory_space<vmem>>, vector<16x128xbf16>
      tpu.vector_store %arg6[%c0_16, %c0_17], %21 {strides = array<i32>} : memref<16x128xbf16, #tpu.memory_space<vmem>>, vector<16x128xbf16>,
    } else {
    }
    return
  }
  func.func @transform_0(%arg0: i32, %arg1: i32) -> (i32, i32) {
    %c0_i32 = arith.constant 0 : i32
    return %arg0, %arg1 : i32, i32
  }
  func.func @transform_1(%arg0: i32, %arg1: i32) -> (i32, i32) {
    %c0_i32 = arith.constant 0 : i32
    %c0_i32_0 = arith.constant 0 : i32
    return %arg1, %c0_i32 : i32, i32
  }
  func.func @transform_2(%arg0: i32, %arg1: i32) -> (i32, i32) {
    %c0_i32 = arith.constant 0 : i32
    %c0_i32_0 = arith.constant 0 : i32
    %c0_i32_1 = arith.constant 0 : i32
    return %c0_i32, %c0_i32_0 : i32, i32
  }
  func.func @transform_3(%arg0: i32, %arg1: i32) -> (i32, i32) {
    %c0_i32 = arith.constant 0 : i32
    %c0_i32_0 = arith.constant 0 : i32
    return %arg0, %c0_i32 : i32, i32
  }
  func.func @transform_4(%arg0: i32, %arg1: i32) -> (i32, i32) {
    %c0_i32 = arith.constant 0 : i32
    %c0_i32_0 = arith.constant 0 : i32
    return %arg0, %c0_i32 : i32, i32
  }
}

module attributes {stable_mosaic.version = 11 : i64} {
  func.func @_gemm_bn_act_kernel(%arg0: i32, %arg1: i32, %arg2: memref<16x128xbf16, #tpu.memory_space<vmem>>, %arg3: memref<128x128xbf16, #tpu.memory_space<vmem>>, %arg4: memref<1x128xf32, #tpu.memory_space<vmem>>, %arg5: memref<16x128xbf16, #tpu.memory_space<vmem>>, %arg6: memref<16x128xf32, #tpu.memory_space<vmem>>) attributes {dimension_semantics = [#tpu.dimension_semantics<parallel>, #tpu.dimension_semantics<arbitrary>], iteration_bounds = array<i64: 1, 9>, scalar_prefetch = 0 : i64, scratch_operands = 1 : i64, tpu.core_type = #tpu.core_type<tc>, window_params = [{transform_indices = @transform_0, window_bounds = array<i64: 16, 128>}, {transform_indices = @transform_1, window_bounds = array<i64: 128, 128>}, {pipeline_mode = #tpu.pipeline_mode<synchronous>, transform_indices = @transform_2, window_bounds = array<i64: 1, 128>}, {transform_indices = @transform_3, window_bounds = array<i64: 16, 128>}]} {
    %c0_i32 = arith.constant 0 : i32
    %0 = arith.cmpi eq, %arg1, %c0_i32 : i32
    %1 = arith.extui %0 : i1 to i32
    %c0_i32_0 = arith.constant 0 : i32
    %2 = arith.cmpi ne, %1, %c0_i32_0 : i32
    scf.if %2 {
      %cst_9 = arith.constant 0.000000e+00 : f32
      %12 = vector.broadcast %cst_9 : f32 to vector<16x128xf32>
      %c0_10 = arith.constant 0 : index
      %c0_11 = arith.constant 0 : index
      %13 = vector.load %arg6[%c0_10, %c0_11] : memref<16x128xf32, #tpu.memory_space<vmem>>, vector<16x128xf32>
      tpu.vector_store %arg6[%c0_10, %c0_11], %12 {strides = array<i32>} : memref<16x128xf32, #tpu.memory_space<vmem>>, vector<16x128xf32>,
    } else {
    }
    %c0 = arith.constant 0 : index
    %c0_1 = arith.constant 0 : index
    %3 = vector.load %arg6[%c0, %c0_1] : memref<16x128xf32, #tpu.memory_space<vmem>>, vector<16x128xf32>
    %c0_2 = arith.constant 0 : index
    %c0_3 = arith.constant 0 : index
    %4 = vector.load %arg2[%c0_2, %c0_3] : memref<16x128xbf16, #tpu.memory_space<vmem>>, vector<16x128xbf16>
    %c0_4 = arith.constant 0 : index
    %c0_5 = arith.constant 0 : index
    %5 = vector.load %arg3[%c0_4, %c0_5] : memref<128x128xbf16, #tpu.memory_space<vmem>>, vector<128x128xbf16>
    %cst = arith.constant dense<0.000000e+00> : vector<16x128xf32>
    %6 = tpu.matmul %4, %5, %cst {dimension_numbers = #tpu.dot_dimension_numbers<[1], [0], [0], [1], [0, 0, 1, 1], [], []>} : vector<16x128xbf16>, vector<128x128xbf16>, vector<16x128xf32> -> vector<16x128xf32>
    %7 = arith.addf %3, %6 : vector<16x128xf32>
    %c0_6 = arith.constant 0 : index
    %c0_7 = arith.constant 0 : index
    %8 = vector.load %arg6[%c0_6, %c0_7] : memref<16x128xf32, #tpu.memory_space<vmem>>, vector<16x128xf32>
    tpu.vector_store %arg6[%c0_6, %c0_7], %7 {strides = array<i32>} : memref<16x128xf32, #tpu.memory_space<vmem>>, vector<16x128xf32>,
    %c8_i32 = arith.constant 8 : i32
    %9 = arith.cmpi eq, %arg1, %c8_i32 : i32
    %10 = arith.extui %9 : i1 to i32
    %c0_i32_8 = arith.constant 0 : i32
    %11 = arith.cmpi ne, %10, %c0_i32_8 : i32
    scf.if %11 {
      %c0_9 = arith.constant 0 : index
      %c0_10 = arith.constant 0 : index
      %12 = vector.load %arg6[%c0_9, %c0_10] : memref<16x128xf32, #tpu.memory_space<vmem>>, vector<16x128xf32>
      %c0_11 = arith.constant 0 : index
      %c0_12 = arith.constant 0 : index
      %13 = vector.load %arg4[%c0_11, %c0_12] : memref<1x128xf32, #tpu.memory_space<vmem>>, vector<1x128xf32>
      %14 = vector.broadcast %13 : vector<1x128xf32> to vector<16x128xf32>
      %15 = arith.addf %12, %14 : vector<16x128xf32>
      %cst_13 = arith.constant 0.000000e+00 : f32
      %16 = vector.broadcast %cst_13 : f32 to vector<16x128xf32>
      %17 = arith.maximumf %15, %16 : vector<16x128xf32>
      %18 = arith.truncf %17 : vector<16x128xf32> to vector<16x128xbf16>
      %c0_14 = arith.constant 0 : index
      %c0_15 = arith.constant 0 : index
      %19 = vector.load %arg5[%c0_14, %c0_15] : memref<16x128xbf16, #tpu.memory_space<vmem>>, vector<16x128xbf16>
      tpu.vector_store %arg5[%c0_14, %c0_15], %18 {strides = array<i32>} : memref<16x128xbf16, #tpu.memory_space<vmem>>, vector<16x128xbf16>,
    } else {
    }
    return
  }
  func.func @transform_0(%arg0: i32, %arg1: i32) -> (i32, i32) {
    %c0_i32 = arith.constant 0 : i32
    return %arg0, %arg1 : i32, i32
  }
  func.func @transform_1(%arg0: i32, %arg1: i32) -> (i32, i32) {
    %c0_i32 = arith.constant 0 : i32
    %c0_i32_0 = arith.constant 0 : i32
    return %arg1, %c0_i32 : i32, i32
  }
  func.func @transform_2(%arg0: i32, %arg1: i32) -> (i32, i32) {
    %c0_i32 = arith.constant 0 : i32
    %c0_i32_0 = arith.constant 0 : i32
    %c0_i32_1 = arith.constant 0 : i32
    return %c0_i32, %c0_i32_0 : i32, i32
  }
  func.func @transform_3(%arg0: i32, %arg1: i32) -> (i32, i32) {
    %c0_i32 = arith.constant 0 : i32
    %c0_i32_0 = arith.constant 0 : i32
    return %arg0, %c0_i32 : i32, i32
  }
}

</mosaic_0001>

<bundles_post_ra>
// kernel: resnet_embedder_forward.22
= control target key start
LH: loop header
LB: loop body
LE: loop exit
PB: predicated region body
PF: predicated region fallthrough
CT: control target
= control target key end

     0   :  { %s1544_s12 = smov 0   ;;  %s1546_s13 = smov 0   ;;  %s1753_s0 = inlined_call_operand.vmem [shape: bf16[2048,256], index: 0, kind: input, shape index: {}]   ;;  %s1754_s1 = inlined_call_operand.vmem [shape: bf16[256,128], index: 1, kind: input, shape index: {}]   ;;  %s1755_s2 = inlined_call_operand.vmem [shape: f32[1,128], index: 2, kind: input, shape index: {}]   ;;  %s1756_s3 = inlined_call_operand.vmem [shape: bf16[2048,128], index: 3, kind: output, shape index: {}]  }
   0x1   :  { %s1548_s14 = smov 0  }
   0x2 LB: > { %s25_s15 = sadd.s32 1, %s1518_s13  ;;  %p1115_p0 = scmp.ge.s32.totalorder %s1522_s14, 1  ;;  %s1522_s14 = sphi %s1548_s14, %s13_s14   ;;  %s1518_s13 = sphi %s1546_s13, %s1758_s13   ;;  %s1514_s12 = sphi %s1544_s12, %s1757_s12  }
   0x3   : > { %p27_p1 = scmp.ge.s32.totalorder %s25_s15, 8  ;;  %p169_p2 = scmp.lt.s32.totalorder %s1522_s14, 9 }
   0x5   : > { %s1760_s15 = smov (%p27_p1, %s25_s15), 0  ;;  %p170_p3 = pnand %p1115_p0, %p169_p2 }
   0x6   : > { %s1116_s28 = sshll.u32 (!%p170_p3), %s1514_s12, 5 }
   0x7   : > { %173 = sbr.rel (%p170_p3) target bundleno = 306 (0x132), region = 32  ;;  %p205_p4 = scmp.lt.s32.totalorder (!%p170_p3), %s1116_s28, 255 }
   0xc   : > { %v1355_v0 = vld [vmem:[%s1754_s1 + $0x38] sm:$0xff]  ;;  %v1354_v2 = vld [vmem:[%s1754_s1 + $0x30] sm:$0xff]  ;;  %v1353_v4 = vld [vmem:[%s1754_s1 + $0x28] sm:$0xff]  ;;  %s1762_s28 = smov (!%p205_p4, %s1116_s28), 255 }
   0xd   : > { %v1363_v1 = vld [vmem:[%s1754_s1 + $0x78] sm:$0xff]  ;;  %615 = vmatpush.bf16.msra.mxu0 %v1355_v0  ;;  %1459 = vmatpush.bf16.msra.mxu2 %v1355_v0  ;;  %v1362_v3 = vld [vmem:[%s1754_s1 + $0x70] sm:$0xff]  ;;  %v1361_v5 = vld [vmem:[%s1754_s1 + $0x68] sm:$0xff]  ;;  %s1315_s17 = sshll.u32 %s1762_s28, 3  ;;  %s1120_s5 = sshll.u32 %s1762_s28, 2 }
   0xe   : > { %704 = vmatpush.bf16.msra.mxu1 %v1363_v1  ;;  %1467 = vmatpush.bf16.msra.mxu3 %v1363_v1  ;;  %v1352_v6 = vld [vmem:[%s1754_s1 + $0x20] sm:$0xff]  ;;  %v1351_v8 = vld [vmem:[%s1754_s1 + $0x18] sm:$0xff]  ;;  %v1350_v10 = vld [vmem:[%s1754_s1 + $0x10] sm:$0xff]  ;;  %s1610_s22 = scalar_lea.vmem %s1753_s0, %s1315_s17  ;;  %s1696_s8 = scalar_lea.vmem %s1756_s3, %s1120_s5 }
   0xf   : > { %v1360_v7 = vld [vmem:[%s1754_s1 + $0x60] sm:$0xff]  ;;  %v1359_v9 = vld [vmem:[%s1754_s1 + $0x58] sm:$0xff]  ;;  %v1358_v11 = vld [vmem:[%s1754_s1 + $0x50] sm:$0xff] }
  0x10   : > { %v1349_v12 = vld [vmem:[%s1754_s1 + $0x8] sm:$0xff]  ;;  %v1348_v14 = vld [vmem:[%s1754_s1] sm:$0xff]  ;;  %v1131_v28 = vld [vmem:[%s1610_s22 + $0x10] sm:$0xf] }
  0x11   : > { %616 = vmatpush.bf16.msra.mxu0 %v1354_v2  ;;  %1460 = vmatpush.bf16.msra.mxu2 %v1354_v2  ;;  %v1357_v13 = vld [vmem:[%s1754_s1 + $0x48] sm:$0xff]  ;;  %v1356_v15 = vld [vmem:[%s1754_s1 + $0x40] sm:$0xff]  ;;  %v1319_v29 = vld [vmem:[%s1610_s22 + $0x14] sm:$0xf0] }
  0x12   : > { %705 = vmatpush.bf16.msra.mxu1 %v1362_v3  ;;  %1468 = vmatpush.bf16.msra.mxu3 %v1362_v3  ;;  %v1123_v16 = vld [vmem:[%s1610_s22] sm:$0xf]  ;;  %v1317_v17 = vld [vmem:[%s1610_s22 + $0x4] sm:$0xf0]  ;;  %v1316_v20 = vld [vmem:[%s1610_s22 + $0x4] sm:$0xf]  ;;  %v1132_v36 = vor.u32 %v1319_v29, %v1131_v28 }
  0x13   : > { %v1187_v18 = vld [vmem:[%s1610_s22 + $0x80] sm:$0xf]  ;;  %v1333_v19 = vld [vmem:[%s1610_s22 + $0x84] sm:$0xf0]  ;;  %v1125_v21 = vld [vmem:[%s1610_s22 + $0x8] sm:$0xf0]  ;;  %v1124_v24 = vor.u32 %v1317_v17, %v1123_v16 }
  0x14   : > { %v1332_v22 = vld [vmem:[%s1610_s22 + $0x84] sm:$0xf]  ;;  %v1189_v23 = vld [vmem:[%s1610_s22 + $0x88] sm:$0xf0]  ;;  %v1188_v25 = vor.u32 %v1333_v19, %v1187_v18  ;;  %v1128_v26 = vor.u32 %v1316_v20, %v1125_v21  ;;  %v1195_v30 = vld [vmem:[%s1610_s22 + $0x90] sm:$0xf] }
  0x15   : > { %617 = vmatpush.bf16.msra.mxu0 %v1353_v4  ;;  %1461 = vmatpush.bf16.msra.mxu2 %v1353_v4  ;;  %v1192_v27 = vor.u32 %v1332_v22, %v1189_v23  ;;  %v1335_v31 = vld [vmem:[%s1610_s22 + $0x94] sm:$0xf0]  ;;  %v1318_v32 = vld [vmem:[%s1610_s22 + $0x14] sm:$0xf]  ;;  %v1133_v33 = vld [vmem:[%s1610_s22 + $0x18] sm:$0xf0] }
  0x16   : > { %706 = vmatpush.bf16.msra.mxu1 %v1361_v5  ;;  %1469 = vmatpush.bf16.msra.mxu3 %v1361_v5  ;;  %v1334_v34 = vld [vmem:[%s1610_s22 + $0x94] sm:$0xf]  ;;  %v1197_v35 = vld [vmem:[%s1610_s22 + $0x98] sm:$0xf0]  ;;  %v1196_v37 = vor.u32 %v1335_v31, %v1195_v30  ;;  %v1136_v38 = vor.u32 %v1318_v32, %v1133_v33  ;;  %v1139_v40 = vld [vmem:[%s1610_s22 + $0x20] sm:$0xf] }
  0x17   : > { %v1200_v39 = vor.u32 %v1334_v34, %v1197_v35  ;;  %v1321_v41 = vld [vmem:[%s1610_s22 + $0x24] sm:$0xf0]  ;;  %v1203_v42 = vld [vmem:[%s1610_s22 + $0xa0] sm:$0xf]  ;;  %v1320_v44 = vld [vmem:[%s1610_s22 + $0x24] sm:$0xf] }
  0x18   : > { %v1337_v43 = vld [vmem:[%s1610_s22 + $0xa4] sm:$0xf0]  ;;  %v1141_v45 = vld [vmem:[%s1610_s22 + $0x28] sm:$0xf0]  ;;  %v1336_v46 = vld [vmem:[%s1610_s22 + $0xa4] sm:$0xf]  ;;  %v1140_v48 = vor.u32 %v1321_v41, %v1139_v40 }
  0x19   : > { %618 = vmatpush.bf16.msra.mxu0 %v1352_v6  ;;  %1462 = vmatpush.bf16.msra.mxu2 %v1352_v6  ;;  %v1205_v47 = vld [vmem:[%s1610_s22 + $0xa8] sm:$0xf0]  ;;  %v1204_v49 = vor.u32 %v1337_v43, %v1203_v42  ;;  %v1144_v50 = vor.u32 %v1320_v44, %v1141_v45  ;;  %v1147_v52 = vld [vmem:[%s1610_s22 + $0x30] sm:$0xf]  ;;  %v1323_v53 = vld [vmem:[%s1610_s22 + $0x34] sm:$0xf0] }
  0x1a   : > { %707 = vmatpush.bf16.msra.mxu1 %v1360_v7  ;;  %1470 = vmatpush.bf16.msra.mxu3 %v1360_v7  ;;  %v1208_v51 = vor.u32 %v1336_v46, %v1205_v47  ;;  %v1211_v54 = vld [vmem:[%s1610_s22 + $0xb0] sm:$0xf]  ;;  %v1339_v55 = vld [vmem:[%s1610_s22 + $0xb4] sm:$0xf0]  ;;  %v1322_v56 = vld [vmem:[%s1610_s22 + $0x34] sm:$0xf]  ;;  %v1148_v60 = vor.u32 %v1323_v53, %v1147_v52 }
  0x1b   : > { %v1149_v57 = vld [vmem:[%s1610_s22 + $0x38] sm:$0xf0]  ;;  %v1338_v58 = vld [vmem:[%s1610_s22 + $0xb4] sm:$0xf]  ;;  %v1212_v61 = vor.u32 %v1339_v55, %v1211_v54  ;;  %v1155_v0 = vld [vmem:[%s1610_s22 + $0x40] sm:$0xf] }
  0x1c   : > { %v1213_v59 = vld [vmem:[%s1610_s22 + $0xb8] sm:$0xf0]  ;;  %v1152_v62 = vor.u32 %v1322_v56, %v1149_v57  ;;  %v1325_v1 = vld [vmem:[%s1610_s22 + $0x44] sm:$0xf0]  ;;  %v1219_v2 = vld [vmem:[%s1610_s22 + $0xc0] sm:$0xf] }
  0x1d   : > { %619 = vmatpush.bf16.msra.mxu0 %v1351_v8  ;;  %1463 = vmatpush.bf16.msra.mxu2 %v1351_v8  ;;  %v1216_v63 = vor.u32 %v1338_v58, %v1213_v59  ;;  %v1341_v3 = vld [vmem:[%s1610_s22 + $0xc4] sm:$0xf0]  ;;  %v1324_v4 = vld [vmem:[%s1610_s22 + $0x44] sm:$0xf]  ;;  %v1157_v5 = vld [vmem:[%s1610_s22 + $0x48] sm:$0xf0]  ;;  %v1156_v8 = vor.u32 %v1325_v1, %v1155_v0 }
  0x1e   : > { %708 = vmatpush.bf16.msra.mxu1 %v1359_v9  ;;  %1471 = vmatpush.bf16.msra.mxu3 %v1359_v9  ;;  %v1340_v6 = vld [vmem:[%s1610_s22 + $0xc4] sm:$0xf]  ;;  %v1221_v7 = vld [vmem:[%s1610_s22 + $0xc8] sm:$0xf0]  ;;  %v1220_v9 = vor.u32 %v1341_v3, %v1219_v2  ;;  %v1326_v16 = vld [vmem:[%s1610_s22 + $0x54] sm:$0xf] }
  0x1f   : > { %v1165_v17 = vld [vmem:[%s1610_s22 + $0x58] sm:$0xf0]  ;;  %v1342_v18 = vld [vmem:[%s1610_s22 + $0xd4] sm:$0xf]  ;;  %v1328_v28 = vld [vmem:[%s1610_s22 + $0x64] sm:$0xf] }
  0x20   : > { %v1229_v19 = vld [vmem:[%s1610_s22 + $0xd8] sm:$0xf0]  ;;  %v1168_v22 = vor.u32 %v1326_v16, %v1165_v17  ;;  %v1173_v29 = vld [vmem:[%s1610_s22 + $0x68] sm:$0xf0]  ;;  %v1344_v30 = vld [vmem:[%s1610_s22 + $0xe4] sm:$0xf] }
  0x21   : > { %620 = vmatpush.bf16.msra.mxu0 %v1350_v10  ;;  %1464 = vmatpush.bf16.msra.mxu2 %v1350_v10  ;;  %v1160_v10 = vor.u32 %v1324_v4, %v1157_v5  ;;  %v1232_v23 = vor.u32 %v1342_v18, %v1229_v19  ;;  %v1237_v31 = vld [vmem:[%s1610_s22 + $0xe8] sm:$0xf0]  ;;  %v1176_v34 = vor.u32 %v1328_v28, %v1173_v29  ;;  %v1330_v40 = vld [vmem:[%s1610_s22 + $0x74] sm:$0xf]  ;;  %v1181_v41 = vld [vmem:[%s1610_s22 + $0x78] sm:$0xf0] }
  0x22   : > { %709 = vmatpush.bf16.msra.mxu1 %v1358_v11  ;;  %1472 = vmatpush.bf16.msra.mxu3 %v1358_v11  ;;  %v1224_v11 = vor.u32 %v1340_v6, %v1221_v7  ;;  %v1240_v35 = vor.u32 %v1344_v30, %v1237_v31  ;;  %v1346_v42 = vld [vmem:[%s1610_s22 + $0xf4] sm:$0xf]  ;;  %v1245_v43 = vld [vmem:[%s1610_s22 + $0xf8] sm:$0xf0]  ;;  %v1184_v46 = vor.u32 %v1330_v40, %v1181_v41 }
  0x23   : > { %v1248_v47 = vor.u32 %v1346_v42, %v1245_v43 }
  0x25   : > { %621 = vmatpush.bf16.msra.mxu0 %v1349_v12  ;;  %1465 = vmatpush.bf16.msra.mxu2 %v1349_v12  ;;  %v1163_v12 = vld [vmem:[%s1610_s22 + $0x50] sm:$0xf] }
  0x26   : > { %710 = vmatpush.bf16.msra.mxu1 %v1357_v13  ;;  %1473 = vmatpush.bf16.msra.mxu3 %v1357_v13  ;;  %v1327_v13 = vld [vmem:[%s1610_s22 + $0x54] sm:$0xf0] }
  0x27   : > { %v1164_v20 = vor.u32 %v1327_v13, %v1163_v12 }
  0x29   : > { %622 = vmatpush.bf16.msra.mxu0 %v1348_v14  ;;  %1466 = vmatpush.bf16.msra.mxu2 %v1348_v14  ;;  %v1227_v14 = vld [vmem:[%s1610_s22 + $0xd0] sm:$0xf] }
  0x2a   : > { %711 = vmatpush.bf16.msra.mxu1 %v1356_v15  ;;  %1474 = vmatpush.bf16.msra.mxu3 %v1356_v15  ;;  %v1343_v15 = vld [vmem:[%s1610_s22 + $0xd4] sm:$0xf0] }
  0x2b   : > { %v1228_v21 = vor.u32 %v1343_v15, %v1227_v14 }
  0x2c   : > { %623 = vmatmul.bf16.vlgmr.msra.gmra.mxu0 %v1124_v24  ;;  %663 = vmatmul.bf16.vlgmr.msra.gmra.mxu2 %v1188_v25  ;;  %v1171_v24 = vld [vmem:[%s1610_s22 + $0x60] sm:$0xf]  ;;  %v1329_v25 = vld [vmem:[%s1610_s22 + $0x64] sm:$0xf0] }
  0x2d   : > { %712 = vmatmul.bf16.vlgmr.msra.gmra.mxu1 %v1128_v26  ;;  %752 = vmatmul.bf16.vlgmr.msra.gmra.mxu3 %v1192_v27  ;;  %v1235_v26 = vld [vmem:[%s1610_s22 + $0xe0] sm:$0xf]  ;;  %v1345_v27 = vld [vmem:[%s1610_s22 + $0xe4] sm:$0xf0]  ;;  %v1172_v32 = vor.u32 %v1329_v25, %v1171_v24 }
  0x2e   : > { %v1236_v33 = vor.u32 %v1345_v27, %v1235_v26 }
  0x3c   : > { %628 = vmatmul.bf16.gmra.mxu0 %v1132_v36  ;;  %668 = vmatmul.bf16.gmra.mxu2 %v1196_v37  ;;  %v1179_v36 = vld [vmem:[%s1610_s22 + $0x70] sm:$0xf]  ;;  %v1331_v37 = vld [vmem:[%s1610_s22 + $0x74] sm:$0xf0] }
  0x3d   : > { %717 = vmatmul.bf16.gmra.mxu1 %v1136_v38  ;;  %757 = vmatmul.bf16.gmra.mxu3 %v1200_v39  ;;  %v1243_v38 = vld [vmem:[%s1610_s22 + $0xf0] sm:$0xf]  ;;  %v1347_v39 = vld [vmem:[%s1610_s22 + $0xf4] sm:$0xf0]  ;;  %v1180_v44 = vor.u32 %v1331_v37, %v1179_v36 }
  0x3e   : > { %v1244_v45 = vor.u32 %v1347_v39, %v1243_v38 }
  0x4c   : > { %633 = vmatmul.bf16.gmra.mxu0 %v1140_v48  ;;  %673 = vmatmul.bf16.gmra.mxu2 %v1204_v49 }
  0x4d   : > { %722 = vmatmul.bf16.gmra.mxu1 %v1144_v50  ;;  %762 = vmatmul.bf16.gmra.mxu3 %v1208_v51  ;;  %v1688_v51 = vld [vmem:[%s1755_s2] ss:$0 sm:$0xff] }
  0x5c   : > { %638 = vmatmul.bf16.gmra.mxu0 %v1148_v60  ;;  %678 = vmatmul.bf16.gmra.mxu2 %v1212_v61 }
  0x5d   : > { %727 = vmatmul.bf16.gmra.mxu1 %v1152_v62  ;;  %767 = vmatmul.bf16.gmra.mxu3 %v1216_v63 }
  0x6c   : > { %643 = vmatmul.bf16.gmra.mxu0 %v1156_v8  ;;  %683 = vmatmul.bf16.gmra.mxu2 %v1220_v9 }
  0x6d   : > { %732 = vmatmul.bf16.gmra.mxu1 %v1160_v10  ;;  %772 = vmatmul.bf16.gmra.mxu3 %v1224_v11 }
  0x7c   : > { %648 = vmatmul.bf16.gmra.mxu0 %v1164_v20  ;;  %688 = vmatmul.bf16.gmra.mxu2 %v1228_v21 }
  0x7d   : > { %737 = vmatmul.bf16.gmra.mxu1 %v1168_v22  ;;  %777 = vmatmul.bf16.gmra.mxu3 %v1232_v23 }
  0x8c   : > { %653 = vmatmul.bf16.gmra.mxu0 %v1172_v32  ;;  %693 = vmatmul.bf16.gmra.mxu2 %v1236_v33 }
  0x8d   : > { %742 = vmatmul.bf16.gmra.mxu1 %v1176_v34  ;;  %782 = vmatmul.bf16.gmra.mxu3 %v1240_v35 }
  0x9c   : > { %658 = vmatmul.bf16.gmra.mxu0 %v1180_v44  ;;  %698 = vmatmul.bf16.gmra.mxu2 %v1244_v45 }
  0x9d   : > { %747 = vmatmul.bf16.gmra.mxu1 %v1184_v46  ;;  %787 = vmatmul.bf16.gmra.mxu3 %v1248_v47 }
  0xa9   : > { %v624_v48 = vpop.f32.mrf.mxu0 }
  0xaa   : > { %v713_v49 = vpop.f32.mrf.mxu1 }
  0xab   : > { %v714_v50 = vadd.f32 %v713_v49, %v624_v48 }
  0xad   : > { %v896_v56 = vadd.f32 %v1688_v51, %v714_v50 }
  0xaf   : > { %v664_v52 = vpop.f32.mrf.mxu2  ;;  %v928_v60 = vmax.f32 %v896_v56, 0.0 }
  0xb0   : > { %v753_v53 = vpop.f32.mrf.mxu3 }
  0xb1   : > { %v626_v54 = vpop.f32.mrf.mxu0  ;;  %v754_v58 = vadd.f32 %v753_v53, %v664_v52 }
  0xb2   : > { %v715_v55 = vpop.f32.mrf.mxu1 }
  0xb3   : > { %v716_v57 = vadd.f32 %v715_v55, %v626_v54  ;;  %v912_v0 = vadd.f32 %v1688_v51, %v754_v58 }
  0xb5   : > { %v897_v59 = vadd.f32 %v1688_v51, %v716_v57  ;;  %v944_v6 = vmax.f32 %v912_v0, 0.0 }
  0xb7   : > { %v929_v61 = vmax.f32 %v897_v59, 0.0  ;;  %v666_v62 = vpop.f32.mrf.mxu2 }
  0xb8   : > { %v755_v63 = vpop.f32.mrf.mxu3 }
  0xb9   : > { %v1367_v1 = vpack.c.bf16 %v929_v61, %v928_v60  ;;  %v756_v2 = vadd.f32 %v755_v63, %v666_v62  ;;  %v629_v3 = vpop.f32.mrf.mxu0 }
  0xba   : > { %v718_v4 = vpop.f32.mrf.mxu1 }
  0xbb   : > { %1368 = vst [vmem:[%s1696_s8] sm:$0xff] %v1367_v1   ;;  %v913_v5 = vadd.f32 %v1688_v51, %v756_v2  ;;  %v719_v9 = vadd.f32 %v718_v4, %v629_v3 }
  0xbd   : > { %v945_v7 = vmax.f32 %v913_v5, 0.0  ;;  %v898_v14 = vadd.f32 %v1688_v51, %v719_v9 }
  0xbf   : > { %v1407_v8 = vpack.c.bf16 %v945_v7, %v944_v6  ;;  %v669_v10 = vpop.f32.mrf.mxu2  ;;  %v930_v18 = vmax.f32 %v898_v14, 0.0 }
  0xc0   : > { %v758_v11 = vpop.f32.mrf.mxu3 }
  0xc1   : > { %1451 = vst [vmem:[%s1696_s8 + $0x40] sm:$0xff] %v1407_v8   ;;  %v631_v12 = vpop.f32.mrf.mxu0  ;;  %v759_v16 = vadd.f32 %v758_v11, %v669_v10 }
  0xc2   : > { %v720_v13 = vpop.f32.mrf.mxu1 }
  0xc3   : > { %v721_v15 = vadd.f32 %v720_v13, %v631_v12  ;;  %v914_v22 = vadd.f32 %v1688_v51, %v759_v16 }
  0xc5   : > { %v899_v17 = vadd.f32 %v1688_v51, %v721_v15  ;;  %v946_v28 = vmax.f32 %v914_v22, 0.0 }
  0xc7   : > { %v931_v19 = vmax.f32 %v899_v17, 0.0  ;;  %v671_v20 = vpop.f32.mrf.mxu2 }
  0xc8   : > { %v760_v21 = vpop.f32.mrf.mxu3 }
  0xc9   : > { %v1372_v23 = vpack.c.bf16 %v931_v19, %v930_v18  ;;  %v761_v24 = vadd.f32 %v760_v21, %v671_v20  ;;  %v634_v25 = vpop.f32.mrf.mxu0 }
  0xca   : > { %v723_v26 = vpop.f32.mrf.mxu1 }
  0xcb   : > { %1444 = vst [vmem:[%s1696_s8 + $0x8] sm:$0xff] %v1372_v23   ;;  %v915_v27 = vadd.f32 %v1688_v51, %v761_v24  ;;  %v724_v31 = vadd.f32 %v723_v26, %v634_v25 }
  0xcd   : > { %v947_v29 = vmax.f32 %v915_v27, 0.0  ;;  %v900_v36 = vadd.f32 %v1688_v51, %v724_v31 }
  0xcf   : > { %v1412_v30 = vpack.c.bf16 %v947_v29, %v946_v28  ;;  %v674_v32 = vpop.f32.mrf.mxu2  ;;  %v932_v40 = vmax.f32 %v900_v36, 0.0 }
  0xd0   : > { %v763_v33 = vpop.f32.mrf.mxu3 }
  0xd1   : > { %1452 = vst [vmem:[%s1696_s8 + $0x48] sm:$0xff] %v1412_v30   ;;  %v636_v34 = vpop.f32.mrf.mxu0  ;;  %v764_v38 = vadd.f32 %v763_v33, %v674_v32 }
  0xd2   : > { %v725_v35 = vpop.f32.mrf.mxu1 }
  0xd3   : > { %v726_v37 = vadd.f32 %v725_v35, %v636_v34  ;;  %v916_v44 = vadd.f32 %v1688_v51, %v764_v38 }
  0xd5   : > { %v901_v39 = vadd.f32 %v1688_v51, %v726_v37  ;;  %v948_v50 = vmax.f32 %v916_v44, 0.0 }
  0xd7   : > { %v933_v41 = vmax.f32 %v901_v39, 0.0  ;;  %v676_v42 = vpop.f32.mrf.mxu2 }
  0xd8   : > { %v765_v43 = vpop.f32.mrf.mxu3 }
  0xd9   : > { %v1377_v45 = vpack.c.bf16 %v933_v41, %v932_v40  ;;  %v766_v46 = vadd.f32 %v765_v43, %v676_v42  ;;  %v639_v47 = vpop.f32.mrf.mxu0 }
  0xda   : > { %v728_v48 = vpop.f32.mrf.mxu1 }
  0xdb   : > { %1445 = vst [vmem:[%s1696_s8 + $0x10] sm:$0xff] %v1377_v45   ;;  %v917_v49 = vadd.f32 %v1688_v51, %v766_v46  ;;  %v729_v54 = vadd.f32 %v728_v48, %v639_v47 }
  0xdd   : > { %v949_v52 = vmax.f32 %v917_v49, 0.0  ;;  %v902_v59 = vadd.f32 %v1688_v51, %v729_v54 }
  0xdf   : > { %v1417_v53 = vpack.c.bf16 %v949_v52, %v948_v50  ;;  %v679_v55 = vpop.f32.mrf.mxu2  ;;  %v934_v63 = vmax.f32 %v902_v59, 0.0 }
  0xe0   : > { %v768_v56 = vpop.f32.mrf.mxu3 }
  0xe1   : > { %1453 = vst [vmem:[%s1696_s8 + $0x50] sm:$0xff] %v1417_v53   ;;  %v641_v57 = vpop.f32.mrf.mxu0  ;;  %v769_v61 = vadd.f32 %v768_v56, %v679_v55 }
  0xe2   : > { %v730_v58 = vpop.f32.mrf.mxu1 }
  0xe3   : > { %v731_v60 = vadd.f32 %v730_v58, %v641_v57  ;;  %v918_v3 = vadd.f32 %v1688_v51, %v769_v61 }
  0xe5   : > { %v903_v62 = vadd.f32 %v1688_v51, %v731_v60  ;;  %v950_v9 = vmax.f32 %v918_v3, 0.0 }
  0xe7   : > { %v935_v0 = vmax.f32 %v903_v62, 0.0  ;;  %v681_v1 = vpop.f32.mrf.mxu2 }
  0xe8   : > { %v770_v2 = vpop.f32.mrf.mxu3 }
  0xe9   : > { %v1382_v4 = vpack.c.bf16 %v935_v0, %v934_v63  ;;  %v771_v5 = vadd.f32 %v770_v2, %v681_v1  ;;  %v644_v6 = vpop.f32.mrf.mxu0 }
  0xea   : > { %v733_v7 = vpop.f32.mrf.mxu1 }
  0xeb   : > { %1446 = vst [vmem:[%s1696_s8 + $0x18] sm:$0xff] %v1382_v4   ;;  %v919_v8 = vadd.f32 %v1688_v51, %v771_v5  ;;  %v734_v12 = vadd.f32 %v733_v7, %v644_v6 }
  0xed   : > { %v951_v10 = vmax.f32 %v919_v8, 0.0  ;;  %v904_v17 = vadd.f32 %v1688_v51, %v734_v12 }
  0xef   : > { %v1422_v11 = vpack.c.bf16 %v951_v10, %v950_v9  ;;  %v684_v13 = vpop.f32.mrf.mxu2  ;;  %v936_v21 = vmax.f32 %v904_v17, 0.0 }
  0xf0   : > { %v773_v14 = vpop.f32.mrf.mxu3 }
  0xf1   : > { %1454 = vst [vmem:[%s1696_s8 + $0x58] sm:$0xff] %v1422_v11   ;;  %v646_v15 = vpop.f32.mrf.mxu0  ;;  %v774_v19 = vadd.f32 %v773_v14, %v684_v13 }
  0xf2   : > { %v735_v16 = vpop.f32.mrf.mxu1 }
  0xf3   : > { %v736_v18 = vadd.f32 %v735_v16, %v646_v15  ;;  %v920_v25 = vadd.f32 %v1688_v51, %v774_v19 }
  0xf5   : > { %v905_v20 = vadd.f32 %v1688_v51, %v736_v18  ;;  %v952_v31 = vmax.f32 %v920_v25, 0.0 }
  0xf7   : > { %v937_v22 = vmax.f32 %v905_v20, 0.0  ;;  %v686_v23 = vpop.f32.mrf.mxu2 }
  0xf8   : > { %v775_v24 = vpop.f32.mrf.mxu3 }
  0xf9   : > { %v1387_v26 = vpack.c.bf16 %v937_v22, %v936_v21  ;;  %v776_v27 = vadd.f32 %v775_v24, %v686_v23  ;;  %v649_v28 = vpop.f32.mrf.mxu0 }
  0xfa   : > { %v738_v29 = vpop.f32.mrf.mxu1 }
  0xfb   : > { %1447 = vst [vmem:[%s1696_s8 + $0x20] sm:$0xff] %v1387_v26   ;;  %v921_v30 = vadd.f32 %v1688_v51, %v776_v27  ;;  %v739_v34 = vadd.f32 %v738_v29, %v649_v28 }
  0xfd   : > { %v953_v32 = vmax.f32 %v921_v30, 0.0  ;;  %v906_v39 = vadd.f32 %v1688_v51, %v739_v34 }
  0xff   : > { %v1427_v33 = vpack.c.bf16 %v953_v32, %v952_v31  ;;  %v689_v35 = vpop.f32.mrf.mxu2  ;;  %v938_v43 = vmax.f32 %v906_v39, 0.0 }
 0x100   : > { %v778_v36 = vpop.f32.mrf.mxu3 }
 0x101   : > { %1455 = vst [vmem:[%s1696_s8 + $0x60] sm:$0xff] %v1427_v33   ;;  %v651_v37 = vpop.f32.mrf.mxu0  ;;  %v779_v41 = vadd.f32 %v778_v36, %v689_v35 }
 0x102   : > { %v740_v38 = vpop.f32.mrf.mxu1 }
 0x103   : > { %v741_v40 = vadd.f32 %v740_v38, %v651_v37  ;;  %v922_v47 = vadd.f32 %v1688_v51, %v779_v41 }
 0x105   : > { %v907_v42 = vadd.f32 %v1688_v51, %v741_v40  ;;  %v954_v54 = vmax.f32 %v922_v47, 0.0 }
 0x107   : > { %v939_v44 = vmax.f32 %v907_v42, 0.0  ;;  %v691_v45 = vpop.f32.mrf.mxu2 }
 0x108   : > { %v780_v46 = vpop.f32.mrf.mxu3 }
 0x109   : > { %v1392_v48 = vpack.c.bf16 %v939_v44, %v938_v43  ;;  %v781_v49 = vadd.f32 %v780_v46, %v691_v45  ;;  %v654_v50 = vpop.f32.mrf.mxu0 }
 0x10a   : > { %v743_v52 = vpop.f32.mrf.mxu1 }
 0x10b   : > { %1448 = vst [vmem:[%s1696_s8 + $0x28] sm:$0xff] %v1392_v48   ;;  %v923_v53 = vadd.f32 %v1688_v51, %v781_v49  ;;  %v744_v57 = vadd.f32 %v743_v52, %v654_v50 }
 0x10d   : > { %v955_v55 = vmax.f32 %v923_v53, 0.0  ;;  %v908_v62 = vadd.f32 %v1688_v51, %v744_v57 }
 0x10f   : > { %v1432_v56 = vpack.c.bf16 %v955_v55, %v954_v54  ;;  %v694_v58 = vpop.f32.mrf.mxu2  ;;  %v940_v2 = vmax.f32 %v908_v62, 0.0 }
 0x110   : > { %v783_v59 = vpop.f32.mrf.mxu3 }
 0x111   : > { %1456 = vst [vmem:[%s1696_s8 + $0x68] sm:$0xff] %v1432_v56   ;;  %v656_v60 = vpop.f32.mrf.mxu0  ;;  %v784_v0 = vadd.f32 %v783_v59, %v694_v58 }
 0x112   : > { %v745_v61 = vpop.f32.mrf.mxu1 }
 0x113   : > { %v746_v63 = vadd.f32 %v745_v61, %v656_v60  ;;  %v924_v6 = vadd.f32 %v1688_v51, %v784_v0 }
 0x115   : > { %v909_v1 = vadd.f32 %v1688_v51, %v746_v63  ;;  %v956_v12 = vmax.f32 %v924_v6, 0.0 }
 0x117   : > { %v941_v3 = vmax.f32 %v909_v1, 0.0  ;;  %v696_v4 = vpop.f32.mrf.mxu2 }
 0x118   : > { %v785_v5 = vpop.f32.mrf.mxu3 }
 0x119   : > { %v1397_v7 = vpack.c.bf16 %v941_v3, %v940_v2  ;;  %v786_v8 = vadd.f32 %v785_v5, %v696_v4  ;;  %v659_v9 = vpop.f32.mrf.mxu0 }
 0x11a   : > { %v748_v10 = vpop.f32.mrf.mxu1 }
 0x11b   : > { %1449 = vst [vmem:[%s1696_s8 + $0x30] sm:$0xff] %v1397_v7   ;;  %v925_v11 = vadd.f32 %v1688_v51, %v786_v8  ;;  %v749_v15 = vadd.f32 %v748_v10, %v659_v9 }
 0x11d   : > { %v957_v13 = vmax.f32 %v925_v11, 0.0  ;;  %v910_v20 = vadd.f32 %v1688_v51, %v749_v15 }
 0x11f   : > { %v1437_v14 = vpack.c.bf16 %v957_v13, %v956_v12  ;;  %v699_v16 = vpop.f32.mrf.mxu2  ;;  %v942_v24 = vmax.f32 %v910_v20, 0.0 }
 0x120   : > { %v788_v17 = vpop.f32.mrf.mxu3 }
 0x121   : > { %1457 = vst [vmem:[%s1696_s8 + $0x70] sm:$0xff] %v1437_v14   ;;  %v661_v18 = vpop.f32.mrf.mxu0  ;;  %v789_v22 = vadd.f32 %v788_v17, %v699_v16 }
 0x122   : > { %v750_v19 = vpop.f32.mrf.mxu1 }
 0x123   : > { %v751_v21 = vadd.f32 %v750_v19, %v661_v18  ;;  %v926_v28 = vadd.f32 %v1688_v51, %v789_v22 }
 0x125   : > { %v911_v23 = vadd.f32 %v1688_v51, %v751_v21  ;;  %v958_v32 = vmax.f32 %v926_v28, 0.0 }
 0x127   : > { %v943_v25 = vmax.f32 %v911_v23, 0.0  ;;  %v701_v26 = vpop.f32.mrf.mxu2 }
 0x128   : > { %v790_v27 = vpop.f32.mrf.mxu3 }
 0x129   : > { %v1402_v29 = vpack.c.bf16 %v943_v25, %v942_v24  ;;  %v791_v30 = vadd.f32 %v790_v27, %v701_v26 }
 0x12b   : > { %1450 = vst [vmem:[%s1696_s8 + $0x38] sm:$0xff] %v1402_v29   ;;  %v927_v31 = vadd.f32 %v1688_v51, %v791_v30 }
 0x12d   : > { %v959_v33 = vmax.f32 %v927_v31, 0.0 }
 0x12f   : > { %v1442_v34 = vpack.c.bf16 %v959_v33, %v958_v32 }
 0x131   : > { %1458 = vst [vmem:[%s1696_s8 + $0x78] sm:$0xff] %v1442_v34  }
 0x132 PF: > { %s13_s14 = sadd.s32 1, %s1522_s14   ;;  %s1757_s12 = smov %s1518_s13 }
 0x133   : > { %p10_p5 = scmp.ge.s32.totalorder %s13_s14, 10   ;;  %s1758_s13 = smov %s1760_s15 }
 0x135   :  { %12 = sbr.rel (!%p10_p5) target bundleno = 2 (0x2), region = 73 }

// kernel: resnet_embedder_forward.23
= control target key start
LH: loop header
LB: loop body
LE: loop exit
PB: predicated region body
PF: predicated region fallthrough
CT: control target
= control target key end

     0   :  { %s2095_s15 = smov 0   ;;  %s2469_s0 = inlined_call_operand.vmem [shape: bf16[2,17,17,128], index: 0, kind: input, shape index: {}]   ;;  %s2470_s1 = inlined_call_operand.vmem [shape: bf16[2,17,17,128], index: 1, kind: input, shape index: {}]   ;;  %s2471_s2 = inlined_call_operand.vmem [shape: bf16[2,17,17,128], index: 2, kind: input, shape index: {}]   ;;  %s2472_s3 = inlined_call_operand.vmem [shape: bf16[2,17,17,128], index: 3, kind: input, shape index: {}]   ;;  %s2473_s4 = inlined_call_operand.vmem [shape: bf16[2,16,16,128], index: 4, kind: output, shape index: {}]  }
   0x1 LB: > { %s1778_s16 = sadd.s32 4294967295, %s2068_s15   ;;  %p1782_p0 = scmp.ge.s32.totalorder %s2068_s15, 1  ;;  %s2068_s15 = sphi %s2095_s15, %s14_s15  }
   0x2   : > { %p192_p1 = scmp.lt.s32.totalorder %s2068_s15, 3 }
   0x4   : > { %p193_p2 = pnand %p1782_p0, %p192_p1 }
   0x5   : > { %p233_p3 = scmp.lt.s32.totalorder (!%p193_p2), %s1778_s16, 1 }
   0x6   : > { %196 = sbr.rel (%p193_p2) target bundleno = 175 (0xaf), region = 36 }
   0xb   : > { %s2475_s16 = smov (!%p233_p3, %s1778_s16), 1  ;;  %vm647_vm0 = vcmask 1046528  }
   0xc   : > { %s2053_s17 = smul.u32 204, %s2475_s16  ;;  %s1791_s30 = sshll.u32 %s2475_s16, 7 }
   0xd   : > { %s2195_s7 = scalar_lea.vmem %s2473_s4, %s1791_s30 }
   0xe   : > { %s2109_s20 = scalar_lea.vmem %s2469_s0, %s2053_s17  ;;  %s2114_s23 = scalar_lea.vmem %s2470_s1, %s2053_s17 }
   0xf   : > { %s2119_s26 = scalar_lea.vmem %s2471_s2, %s2053_s17  ;;  %s2124_s29 = scalar_lea.vmem %s2472_s3, %s2053_s17  ;;  %v1793_v0 = vld [vmem:[%s2109_s20] sm:$0xff]   ;;  %v260_v1 = vld [vmem:[%s2109_s20 + $0x8] sm:$0x1]  ;;  %v261_v2 = vld [vmem:[%s2109_s20 + $0xc] sm:$0xff]  }
  0x10   : > { %v1794_v3 = vunpack.c.l.bf16 %v1793_v0  ;;  %v1795_v4 = vunpack.c.h.bf16 %v1793_v0  ;;  %v263_v5 = vld [vmem:[%s2109_s20 + $0x14] sm:$0x1]  ;;  %v1829_v6 = vld [vmem:[%s2114_s23] sm:$0xff]   ;;  %v2132_v7 = vld [vmem:[%s2114_s23 + $0xc] sm:$0xff]   ;;  %v2134_v8 = vunpack.c.l.bf16 %v261_v2  ;;  %v2136_v9 = vunpack.c.h.bf16 %v261_v2 }
  0x11   : > { %v1830_v10 = vunpack.c.l.bf16 %v1829_v6  ;;  %v1831_v11 = vunpack.c.h.bf16 %v1829_v6  ;;  %v1865_v12 = vld [vmem:[%s2119_s26] sm:$0xff]   ;;  %v457_v13 = vunpack.c.l.bf16 %v2132_v7  ;;  %v458_v14 = vunpack.c.h.bf16 %v2132_v7  ;;  %v346_v20 = vld [vmem:[%s2119_s26 + $0xc] sm:$0xff]   ;;  %v345_v33 = vld [vmem:[%s2119_s26 + $0x8] sm:$0x1] }
  0x12   : > { %v1866_v15 = vunpack.c.l.bf16 %v1865_v12  ;;  %v1897_v16 = vld [vmem:[%s2124_s29] sm:$0xff]   ;;  %v583_v17 = vunpack.c.l.bf16 %v260_v1  ;;  %v584_v18 = vunpack.c.l.bf16 %v263_v5  ;;  %v1867_v19 = vunpack.c.h.bf16 %v1865_v12  ;;  %v393_v28 = vld [vmem:[%s2124_s29 + $0xc] sm:$0xff]   ;;  %v2008_v50 = vld [vmem:[%s2109_s20 + $0x18] sm:$0xff]  }
  0x13   : > { %v1898_v21 = vunpack.c.l.bf16 %v1897_v16  ;;  %v487_v22 = vmax.f32 %v1794_v3, %v1830_v10  ;;  %v488_v23 = vmax.f32 %v1795_v4, %v1831_v11  ;;  %v489_v24 = vmax.f32 %v2134_v8, %v457_v13  ;;  %v2165_v55 = vld [vmem:[%s2114_s23 + $0x18] sm:$0xff]   ;;  %v266_v5 = vld [vmem:[%s2109_s20 + $0x20] sm:$0x1] }
  0x14   : > { %v490_v25 = vmax.f32 %v2136_v9, %v458_v14  ;;  %v648_v26 = vrot.slane %v1794_v3, 1  ;;  %v649_v27 = vrot.slane %v1795_v4, 1  ;;  %v651_v29 = vrot.slane %v583_v17, 1  ;;  %v2024_v60 = vld [vmem:[%s2119_s26 + $0x18] sm:$0xff]  }
  0x15   : > { %v653_v30 = vrot.slane %v2134_v8, 1  ;;  %v654_v31 = vrot.slane %v2136_v9, 1  ;;  %v656_v32 = vrot.slane %v584_v18, 1  ;;  %v1899_v34 = vunpack.c.h.bf16 %v1897_v16  ;;  %v2031_v1 = vld [vmem:[%s2124_s29 + $0x18] sm:$0xff]  }
  0x16   : > { %v650_v35 = vsel %vm647_vm0, %v648_v26, %v649_v27  ;;  %v858_v36 = vunpack.c.l.bf16 %v346_v20  ;;  %v859_v37 = vunpack.c.h.bf16 %v346_v20  ;;  %v652_v38 = vsel %vm647_vm0, %v649_v27, %v651_v29  ;;  %v267_v29 = vld [vmem:[%s2109_s20 + $0x24] sm:$0xff]  }
  0x17   : > { %v2156_v39 = vsel %vm647_vm0, %v653_v30, %v654_v31  ;;  %v2159_v40 = vsel %vm647_vm0, %v654_v31, %v656_v32  ;;  %v760_v41 = vmax.f32 %v487_v22, %v650_v35  ;;  %v761_v42 = vmax.f32 %v488_v23, %v652_v38 }
  0x18   : > { %v762_v43 = vmax.f32 %v489_v24, %v2156_v39  ;;  %v763_v44 = vmax.f32 %v490_v25, %v2159_v40  ;;  %v986_v45 = vunpack.c.l.bf16 %v393_v28  ;;  %v1112_v47 = vunpack.c.l.bf16 %v345_v33 }
  0x19   : > { %v888_v46 = vmax.f32 %v760_v41, %v1866_v15  ;;  %v1176_v48 = vrot.slane %v1866_v15, 1  ;;  %v1177_v49 = vrot.slane %v1867_v19, 1  ;;  %v889_v51 = vmax.f32 %v761_v42, %v1867_v19  ;;  %v348_v15 = vld [vmem:[%s2119_s26 + $0x14] sm:$0x1]  ;;  %v269_v41 = vld [vmem:[%s2109_s20 + $0x2c] sm:$0x1] }
  0x1a   : > { %v890_v52 = vmax.f32 %v762_v43, %v858_v36  ;;  %v891_v53 = vmax.f32 %v763_v44, %v859_v37  ;;  %v987_v54 = vunpack.c.h.bf16 %v393_v28  ;;  %v1179_v58 = vrot.slane %v1112_v47, 1 }
  0x1b   : > { %v1016_v56 = vmax.f32 %v888_v46, %v1898_v21  ;;  %v1178_v57 = vsel %vm647_vm0, %v1176_v48, %v1177_v49  ;;  %v1181_v59 = vrot.slane %v858_v36, 1  ;;  %v1017_v61 = vmax.f32 %v889_v51, %v1899_v34 }
  0x1c   : > { %v1018_v62 = vmax.f32 %v890_v52, %v986_v45  ;;  %v1182_v63 = vrot.slane %v859_v37, 1  ;;  %v1798_v0 = vunpack.c.l.bf16 %v2008_v50  ;;  %v1180_v2 = vsel %vm647_vm0, %v1177_v49, %v1179_v58  ;;  %v352_v49 = vld [vmem:[%s2119_s26 + $0x24] sm:$0xff]  }
  0x1d   : > { %v1288_v3 = vmax.f32 %v1016_v56, %v1178_v57  ;;  %v1799_v4 = vunpack.c.h.bf16 %v2008_v50  ;;  %v1834_v6 = vunpack.c.l.bf16 %v2165_v55  ;;  %v1019_v10 = vmax.f32 %v891_v53, %v987_v54  ;;  %v351_v54 = vld [vmem:[%s2119_s26 + $0x20] sm:$0x1] }
  0x1e   : > { %v1289_v11 = vmax.f32 %v1017_v61, %v1180_v2  ;;  %v1835_v12 = vunpack.c.h.bf16 %v2165_v55  ;;  %v1870_v16 = vunpack.c.l.bf16 %v2024_v60  ;;  %v1871_v18 = vunpack.c.h.bf16 %v2024_v60  ;;  %v397_v55 = vld [vmem:[%s2124_s29 + $0x24] sm:$0xff]  }
  0x1f   : > { %v1386_v17 = vmax.f32 %v1288_v3, %v2134_v8  ;;  %v1902_v19 = vunpack.c.l.bf16 %v2031_v1  ;;  %v491_v20 = vmax.f32 %v1798_v0, %v1834_v6  ;;  %v585_v23 = vunpack.c.l.bf16 %v266_v5 }
  0x20   : > { %v1387_v21 = vmax.f32 %v1289_v11, %v2136_v9  ;;  %v492_v22 = vmax.f32 %v1799_v4, %v1835_v12  ;;  %v658_v24 = vrot.slane %v1798_v0, 1  ;;  %v659_v26 = vrot.slane %v1799_v4, 1 }
  0x21   : > { %v1484_v25 = vmax.f32 %v1386_v17, %v457_v13  ;;  %v1113_v27 = vunpack.c.l.bf16 %v348_v15  ;;  %v1183_v28 = vsel %vm647_vm0, %v1181_v59, %v1182_v63  ;;  %v1903_v30 = vunpack.c.h.bf16 %v2031_v1  ;;  %v2187_v13 = vld [vmem:[%s2114_s23 + $0x24] sm:$0xff]  }
  0x22   : > { %v1485_v8 = vmax.f32 %v1387_v21, %v458_v14  ;;  %v661_v31 = vrot.slane %v585_v23, 1  ;;  %v1186_v9 = vrot.slane %v1870_v16, 1  ;;  %v660_v33 = vsel %vm647_vm0, %v658_v24, %v659_v26 }
  0x23   : > { %v1591_v32 = vmax.f32 %v1484_v25, %v2156_v39  ;;  %v1184_v34 = vrot.slane %v1113_v27, 1  ;;  %v1290_v35 = vmax.f32 %v1018_v62, %v1183_v28  ;;  %v764_v38 = vmax.f32 %v491_v20, %v660_v33  ;;  %v2025_v25 = vld [vmem:[%s2119_s26 + $0x30] sm:$0xff]  }
  0x24   : > { %v1592_v36 = vmax.f32 %v1485_v8, %v2159_v40  ;;  %v662_v37 = vsel %vm647_vm0, %v659_v26, %v661_v31  ;;  %v429_v7 = vunpack.c.l.bf16 %v267_v29  ;;  %v430_v43 = vunpack.c.h.bf16 %v267_v29  ;;  %v2032_v8 = vld [vmem:[%s2124_s29 + $0x30] sm:$0xff]  }
  0x25   : > { %v765_v14 = vmax.f32 %v492_v22, %v662_v37  ;;  %v1185_v39 = vsel %vm647_vm0, %v1182_v63, %v1184_v34  ;;  %v1388_v42 = vmax.f32 %v1290_v35, %v1798_v0  ;;  %v892_v44 = vmax.f32 %v764_v38, %v1870_v16 }
  0x26   : > { %v1931_v40 = vpack.c.bf16 %v1592_v36, %v1591_v32  ;;  %v1291_v45 = vmax.f32 %v1019_v10, %v1185_v39  ;;  %v461_v46 = vunpack.c.l.bf16 %v2187_v13  ;;  %v462_v50 = vunpack.c.h.bf16 %v2187_v13  ;;  %v272_v32 = vld [vmem:[%s2109_s20 + $0x38] sm:$0x1]  ;;  %v354_v13 = vld [vmem:[%s2119_s26 + $0x2c] sm:$0x1] }
  0x27   : > { %v893_v47 = vmax.f32 %v765_v14, %v1871_v18  ;;  %v1486_v48 = vmax.f32 %v1388_v42, %v1834_v6  ;;  %v586_v51 = vunpack.c.l.bf16 %v269_v41  ;;  %v1187_v52 = vrot.slane %v1871_v18, 1  ;;  %v2009_v6 = vld [vmem:[%s2109_s20 + $0x30] sm:$0xff]  }
  0x28   : > { %1932 = vst [vmem:[%s2195_s7] sm:$0xff] %v1931_v40   ;;  %v1389_v53 = vmax.f32 %v1291_v45, %v1799_v4  ;;  %v493_v56 = vmax.f32 %v429_v7, %v461_v46  ;;  %v663_v57 = vrot.slane %v429_v7, 1  ;;  %v1020_v58 = vmax.f32 %v892_v44, %v1902_v19 }
  0x29   : > { %v1021_v59 = vmax.f32 %v893_v47, %v1903_v30  ;;  %v494_v60 = vmax.f32 %v430_v43, %v462_v50  ;;  %v664_v61 = vrot.slane %v430_v43, 1  ;;  %v1593_v63 = vmax.f32 %v1486_v48, %v660_v33 }
  0x2a   : > { %v1487_v62 = vmax.f32 %v1389_v53, %v1835_v12  ;;  %v666_v0 = vrot.slane %v586_v51, 1  ;;  %v862_v1 = vunpack.c.l.bf16 %v352_v49  ;;  %v863_v3 = vunpack.c.h.bf16 %v352_v49  ;;  %v2212_v12 = vld [vmem:[%s2114_s23 + $0x30] sm:$0xff]   ;;  %v273_v51 = vld [vmem:[%s2109_s20 + $0x3c] sm:$0xff]  }
  0x2b   : > { %v2205_v2 = vsel %vm647_vm0, %v663_v57, %v664_v61  ;;  %v990_v5 = vunpack.c.l.bf16 %v397_v55  ;;  %v1114_v4 = vunpack.c.l.bf16 %v351_v54  ;;  %v1188_v16 = vsel %vm647_vm0, %v1186_v9, %v1187_v52 }
  0x2c   : > { %v1594_v10 = vmax.f32 %v1487_v62, %v662_v37  ;;  %v667_v11 = vsel %vm647_vm0, %v664_v61, %v666_v0  ;;  %v766_v15 = vmax.f32 %v493_v56, %v2205_v2  ;;  %v991_v18 = vunpack.c.h.bf16 %v397_v55 }
  0x2d   : > { %v767_v17 = vmax.f32 %v494_v60, %v667_v11  ;;  %v1189_v19 = vrot.slane %v1114_v4, 1  ;;  %v1191_v20 = vrot.slane %v862_v1, 1  ;;  %v1292_v23 = vmax.f32 %v1020_v58, %v1188_v16 }
  0x2e   : > { %v1936_v21 = vpack.c.bf16 %v1594_v10, %v1593_v63  ;;  %v894_v22 = vmax.f32 %v766_v15, %v862_v1  ;;  %v1802_v24 = vunpack.c.l.bf16 %v2009_v6  ;;  %v1803_v28 = vunpack.c.h.bf16 %v2009_v6  ;;  %v358_v6 = vld [vmem:[%s2119_s26 + $0x3c] sm:$0xff]  }
  0x2f   : > { %v895_v26 = vmax.f32 %v767_v17, %v863_v3  ;;  %v1190_v27 = vsel %vm647_vm0, %v1187_v52, %v1189_v19  ;;  %v1838_v29 = vunpack.c.l.bf16 %v2212_v12  ;;  %v1192_v30 = vrot.slane %v863_v3, 1  ;;  %v2226_v52 = vld [vmem:[%s2114_s23 + $0x3c] sm:$0xff]   ;;  %v357_v19 = vld [vmem:[%s2119_s26 + $0x38] sm:$0x1] }
  0x30   : > { %2038 = vst [vmem:[%s2195_s7 + $0x8] sm:$0xff] %v1936_v21   ;;  %v1293_v31 = vmax.f32 %v1021_v59, %v1190_v27  ;;  %v1390_v9 = vmax.f32 %v1292_v23, %v429_v7  ;;  %v1839_v33 = vunpack.c.h.bf16 %v2212_v12  ;;  %v1022_v34 = vmax.f32 %v894_v22, %v990_v5  ;;  %v275_v59 = vld [vmem:[%s2109_s20 + $0x44] sm:$0x1] }
  0x31   : > { %v1023_v35 = vmax.f32 %v895_v26, %v991_v18  ;;  %v1874_v36 = vunpack.c.l.bf16 %v2025_v25  ;;  %v1875_v37 = vunpack.c.h.bf16 %v2025_v25  ;;  %v1906_v14 = vunpack.c.l.bf16 %v2032_v8 }
  0x32   : > { %v1391_v38 = vmax.f32 %v1293_v31, %v430_v43  ;;  %v1488_v41 = vmax.f32 %v1390_v9, %v461_v46  ;;  %v495_v39 = vmax.f32 %v1802_v24, %v1838_v29  ;;  %v496_v42 = vmax.f32 %v1803_v28, %v1839_v33 }
  0x33   : > { %v587_v40 = vunpack.c.l.bf16 %v272_v32  ;;  %v668_v44 = vrot.slane %v1802_v24, 1  ;;  %v669_v45 = vrot.slane %v1803_v28, 1  ;;  %v1115_v48 = vunpack.c.l.bf16 %v354_v13 }
  0x34   : > { %v1489_v7 = vmax.f32 %v1391_v38, %v462_v50  ;;  %v1595_v47 = vmax.f32 %v1488_v41, %v2205_v2  ;;  %v1193_v49 = vsel %vm647_vm0, %v1191_v20, %v1192_v30  ;;  %v1907_v53 = vunpack.c.h.bf16 %v2032_v8  ;;  %v401_v20 = vld [vmem:[%s2124_s29 + $0x3c] sm:$0xff]  }
  0x35   : > { %v670_v43 = vsel %vm647_vm0, %v668_v44, %v669_v45  ;;  %v671_v46 = vrot.slane %v587_v40, 1  ;;  %v1196_v54 = vrot.slane %v1874_v36, 1  ;;  %v1194_v57 = vrot.slane %v1115_v48, 1 }
  0x36   : > { %v1596_v55 = vmax.f32 %v1489_v7, %v667_v11  ;;  %v768_v56 = vmax.f32 %v495_v39, %v670_v43  ;;  %v1294_v58 = vmax.f32 %v1022_v34, %v1193_v49  ;;  %v433_v60 = vunpack.c.l.bf16 %v273_v51  ;;  %v2010_v34 = vld [vmem:[%s2109_s20 + $0x48] sm:$0xff]  }
  0x37   : > { %v672_v50 = vsel %vm647_vm0, %v669_v45, %v671_v46  ;;  %v2231_v61 = vunpack.c.h.bf16 %v273_v51  ;;  %v465_v62 = vunpack.c.l.bf16 %v2226_v52  ;;  %v1195_v2 = vsel %vm647_vm0, %v1192_v30, %v1194_v57  ;;  %v2026_v7 = vld [vmem:[%s2119_s26 + $0x48] sm:$0xff]   ;;  %v360_v57 = vld [vmem:[%s2119_s26 + $0x44] sm:$0x1] }
  0x38   : > { %v1941_v63 = vpack.c.bf16 %v1596_v55, %v1595_v47  ;;  %v769_v0 = vmax.f32 %v496_v42, %v672_v50  ;;  %v896_v1 = vmax.f32 %v768_v56, %v1874_v36  ;;  %v1197_v3 = vrot.slane %v1875_v37, 1  ;;  %v2033_v47 = vld [vmem:[%s2124_s29 + $0x48] sm:$0xff]  }
  0x39   : > { %v1295_v5 = vmax.f32 %v1023_v35, %v1195_v2  ;;  %v1392_v4 = vmax.f32 %v1294_v58, %v1802_v24  ;;  %v466_v10 = vunpack.c.h.bf16 %v2226_v52  ;;  %v497_v15 = vmax.f32 %v433_v60, %v465_v62  ;;  %v281_v52 = vld [vmem:[%s2109_s20 + $0x5c] sm:$0x1] }
  0x3a   : > { %2039 = vst [vmem:[%s2195_s7 + $0x10] sm:$0xff] %v1941_v63   ;;  %v897_v11 = vmax.f32 %v769_v0, %v1875_v37  ;;  %v588_v16 = vunpack.c.l.bf16 %v275_v59  ;;  %v673_v12 = vrot.slane %v433_v60, 1  ;;  %v674_v22 = vrot.slane %v2231_v61, 1  ;;  %v2255_v37 = vld [vmem:[%s2114_s23 + $0x48] sm:$0xff]  }
  0x3b   : > { %v1393_v17 = vmax.f32 %v1295_v5, %v1803_v28  ;;  %v1490_v18 = vmax.f32 %v1392_v4, %v1838_v29  ;;  %v498_v21 = vmax.f32 %v2231_v61, %v466_v10  ;;  %v1024_v23 = vmax.f32 %v896_v1, %v1906_v14 }
  0x3c   : > { %v1025_v24 = vmax.f32 %v897_v11, %v1907_v53  ;;  %v676_v25 = vrot.slane %v588_v16, 1  ;;  %v866_v26 = vunpack.c.l.bf16 %v358_v6  ;;  %v2245_v30 = vsel %vm647_vm0, %v673_v12, %v674_v22  ;;  %v278_v53 = vld [vmem:[%s2109_s20 + $0x50] sm:$0x1]  ;;  %v279_v11 = vld [vmem:[%s2109_s20 + $0x54] sm:$0xff]  }
  0x3d   : > { %v1491_v27 = vmax.f32 %v1393_v17, %v1839_v33  ;;  %v1597_v8 = vmax.f32 %v1490_v18, %v670_v43  ;;  %v867_v28 = vunpack.c.h.bf16 %v358_v6  ;;  %v770_v31 = vmax.f32 %v497_v15, %v2245_v30 }
  0x3e   : > { %v2248_v29 = vsel %vm647_vm0, %v674_v22, %v676_v25  ;;  %v994_v9 = vunpack.c.l.bf16 %v401_v20  ;;  %v1116_v32 = vunpack.c.l.bf16 %v357_v19  ;;  %v995_v36 = vunpack.c.h.bf16 %v401_v20  ;;  %v2273_v20 = vld [vmem:[%s2114_s23 + $0x54] sm:$0xff]  }
  0x3f   : > { %v1598_v35 = vmax.f32 %v1491_v27, %v672_v50  ;;  %v771_v13 = vmax.f32 %v498_v21, %v2248_v29  ;;  %v1198_v33 = vsel %vm647_vm0, %v1196_v54, %v1197_v3  ;;  %v898_v38 = vmax.f32 %v770_v31, %v866_v26 }
  0x40   : > { %v1199_v41 = vrot.slane %v1116_v32, 1  ;;  %v1201_v14 = vrot.slane %v866_v26, 1  ;;  %v1296_v39 = vmax.f32 %v1024_v23, %v1198_v33  ;;  %v1202_v44 = vrot.slane %v867_v28, 1  ;;  %v364_v32 = vld [vmem:[%s2119_s26 + $0x54] sm:$0xff]   ;;  %v363_v33 = vld [vmem:[%s2119_s26 + $0x50] sm:$0x1] }
  0x41   : > { %v1946_v42 = vpack.c.bf16 %v1598_v35, %v1597_v8  ;;  %v899_v40 = vmax.f32 %v771_v13, %v867_v28  ;;  %v1806_v45 = vunpack.c.l.bf16 %v2010_v34  ;;  %v1807_v51 = vunpack.c.h.bf16 %v2010_v34 }
  0x42   : > { %v1200_v48 = vsel %vm647_vm0, %v1197_v3, %v1199_v41  ;;  %v1394_v49 = vmax.f32 %v1296_v39, %v433_v60  ;;  %v1842_v43 = vunpack.c.l.bf16 %v2255_v37  ;;  %v1026_v46 = vmax.f32 %v898_v38, %v994_v9 }
  0x43   : > { %2040 = vst [vmem:[%s2195_s7 + $0x18] sm:$0xff] %v1946_v42   ;;  %v1027_v54 = vmax.f32 %v899_v40, %v995_v36  ;;  %v1297_v55 = vmax.f32 %v1025_v24, %v1200_v48  ;;  %v1843_v56 = vunpack.c.h.bf16 %v2255_v37  ;;  %v1878_v50 = vunpack.c.l.bf16 %v2026_v7  ;;  %v405_v37 = vld [vmem:[%s2124_s29 + $0x54] sm:$0xff]  }
  0x44   : > { %v1492_v58 = vmax.f32 %v1394_v49, %v465_v62  ;;  %v1879_v59 = vunpack.c.h.bf16 %v2026_v7  ;;  %v1910_v63 = vunpack.c.l.bf16 %v2033_v47  ;;  %v1911_v1 = vunpack.c.h.bf16 %v2033_v47 }
  0x45   : > { %v1395_v0 = vmax.f32 %v1297_v55, %v2231_v61  ;;  %v499_v60 = vmax.f32 %v1806_v45, %v1842_v43  ;;  %v589_v2 = vunpack.c.l.bf16 %v278_v53  ;;  %v500_v3 = vmax.f32 %v1807_v51, %v1843_v56 }
  0x46   : > { %v678_v5 = vrot.slane %v1806_v45, 1  ;;  %v679_v4 = vrot.slane %v1807_v51, 1  ;;  %v1117_v6 = vunpack.c.l.bf16 %v360_v57  ;;  %v1599_v62 = vmax.f32 %v1492_v58, %v2245_v30 }
  0x47   : > { %v1493_v15 = vmax.f32 %v1395_v0, %v466_v10  ;;  %v681_v16 = vrot.slane %v589_v2, 1  ;;  %v1203_v12 = vsel %vm647_vm0, %v1201_v14, %v1202_v44  ;;  %v1206_v18 = vrot.slane %v1878_v50, 1 }
  0x48   : > { %v680_v61 = vsel %vm647_vm0, %v678_v5, %v679_v4  ;;  %v1204_v17 = vrot.slane %v1117_v6, 1  ;;  %v1298_v19 = vmax.f32 %v1026_v46, %v1203_v12  ;;  %v437_v10 = vunpack.c.l.bf16 %v279_v11 }
  0x49   : > { %v1600_v21 = vmax.f32 %v1493_v15, %v2248_v29  ;;  %v682_v22 = vsel %vm647_vm0, %v679_v4, %v681_v16  ;;  %v772_v23 = vmax.f32 %v499_v60, %v680_v61  ;;  %v438_v27 = vunpack.c.h.bf16 %v279_v11  ;;  %v2034_v15 = vld [vmem:[%s2124_s29 + $0x60] sm:$0xff]  }
  0x4a   : > { %v773_v24 = vmax.f32 %v500_v3, %v682_v22  ;;  %v1205_v25 = vsel %vm647_vm0, %v1202_v44, %v1204_v17  ;;  %v1396_v26 = vmax.f32 %v1298_v19, %v1806_v45  ;;  %v469_v31 = vunpack.c.l.bf16 %v2273_v20  ;;  %v2027_v3 = vld [vmem:[%s2119_s26 + $0x60] sm:$0xff]  }
  0x4b   : > { %v1951_v8 = vpack.c.bf16 %v1600_v21, %v1599_v62  ;;  %v900_v30 = vmax.f32 %v772_v23, %v1878_v50  ;;  %v1299_v28 = vmax.f32 %v1027_v54, %v1205_v25  ;;  %v470_v34 = vunpack.c.h.bf16 %v2273_v20  ;;  %v366_v20 = vld [vmem:[%s2119_s26 + $0x5c] sm:$0x1] }
  0x4c   : > { %v901_v9 = vmax.f32 %v773_v24, %v1879_v59  ;;  %v1494_v29 = vmax.f32 %v1396_v26, %v1842_v43  ;;  %v590_v35 = vunpack.c.l.bf16 %v281_v52  ;;  %v1207_v13 = vrot.slane %v1879_v59, 1  ;;  %v2011_v43 = vld [vmem:[%s2109_s20 + $0x60] sm:$0xff]  }
  0x4d   : > { %2041 = vst [vmem:[%s2195_s7 + $0x20] sm:$0xff] %v1951_v8   ;;  %v1397_v36 = vmax.f32 %v1299_v28, %v1807_v51  ;;  %v501_v38 = vmax.f32 %v437_v10, %v469_v31  ;;  %v683_v41 = vrot.slane %v437_v10, 1  ;;  %v1028_v14 = vmax.f32 %v900_v30, %v1910_v63 }
  0x4e   : > { %v1029_v39 = vmax.f32 %v901_v9, %v1911_v1  ;;  %v502_v42 = vmax.f32 %v438_v27, %v470_v34  ;;  %v684_v40 = vrot.slane %v438_v27, 1  ;;  %v1601_v45 = vmax.f32 %v1494_v29, %v680_v61  ;;  %v284_v61 = vld [vmem:[%s2109_s20 + $0x68] sm:$0x1] }
  0x4f   : > { %v1495_v44 = vmax.f32 %v1397_v36, %v1843_v56  ;;  %v686_v7 = vrot.slane %v590_v35, 1  ;;  %v870_v47 = vunpack.c.l.bf16 %v364_v32  ;;  %v871_v49 = vunpack.c.h.bf16 %v364_v32  ;;  %v2293_v56 = vld [vmem:[%s2114_s23 + $0x60] sm:$0xff]   ;;  %v285_v35 = vld [vmem:[%s2109_s20 + $0x6c] sm:$0xff]  }
  0x50   : > { %v2286_v48 = vsel %vm647_vm0, %v683_v41, %v684_v40  ;;  %v998_v53 = vunpack.c.l.bf16 %v405_v37  ;;  %v1118_v51 = vunpack.c.l.bf16 %v363_v33  ;;  %v1208_v57 = vsel %vm647_vm0, %v1206_v18, %v1207_v13 }
  0x51   : > { %v1602_v46 = vmax.f32 %v1495_v44, %v682_v22  ;;  %v687_v54 = vsel %vm647_vm0, %v684_v40, %v686_v7  ;;  %v774_v55 = vmax.f32 %v501_v38, %v2286_v48  ;;  %v999_v50 = vunpack.c.h.bf16 %v405_v37 }
  0x52   : > { %v775_v58 = vmax.f32 %v502_v42, %v687_v54  ;;  %v1209_v59 = vrot.slane %v1118_v51, 1  ;;  %v1211_v63 = vrot.slane %v870_v47, 1  ;;  %v1300_v60 = vmax.f32 %v1028_v14, %v1208_v57 }
  0x53   : > { %v1956_v0 = vpack.c.bf16 %v1602_v46, %v1601_v45  ;;  %v902_v1 = vmax.f32 %v774_v55, %v870_v47  ;;  %v1810_v2 = vunpack.c.l.bf16 %v2011_v43  ;;  %v1811_v6 = vunpack.c.h.bf16 %v2011_v43  ;;  %v370_v43 = vld [vmem:[%s2119_s26 + $0x6c] sm:$0xff]  }
  0x54   : > { %v903_v5 = vmax.f32 %v775_v58, %v871_v49  ;;  %v1210_v4 = vsel %vm647_vm0, %v1207_v13, %v1209_v59  ;;  %v1846_v11 = vunpack.c.l.bf16 %v2293_v56  ;;  %v1212_v62 = vrot.slane %v871_v49, 1  ;;  %v2307_v13 = vld [vmem:[%s2114_s23 + $0x6c] sm:$0xff]   ;;  %v369_v59 = vld [vmem:[%s2119_s26 + $0x68] sm:$0x1] }
  0x55   : > { %2042 = vst [vmem:[%s2195_s7 + $0x28] sm:$0xff] %v1956_v0   ;;  %v1301_v16 = vmax.f32 %v1029_v39, %v1210_v4  ;;  %v1398_v12 = vmax.f32 %v1300_v60, %v437_v10  ;;  %v1847_v17 = vunpack.c.h.bf16 %v2293_v56  ;;  %v1030_v18 = vmax.f32 %v902_v1, %v998_v53  ;;  %v287_v39 = vld [vmem:[%s2109_s20 + $0x74] sm:$0x1] }
  0x56   : > { %v1031_v19 = vmax.f32 %v903_v5, %v999_v50  ;;  %v1882_v21 = vunpack.c.l.bf16 %v2027_v3  ;;  %v1883_v22 = vunpack.c.h.bf16 %v2027_v3  ;;  %v1914_v24 = vunpack.c.l.bf16 %v2034_v15 }
  0x57   : > { %v1399_v23 = vmax.f32 %v1301_v16, %v438_v27  ;;  %v1496_v52 = vmax.f32 %v1398_v12, %v469_v31  ;;  %v503_v25 = vmax.f32 %v1810_v2, %v1846_v11  ;;  %v504_v26 = vmax.f32 %v1811_v6, %v1847_v17 }
  0x58   : > { %v591_v8 = vunpack.c.l.bf16 %v284_v61  ;;  %v688_v30 = vrot.slane %v1810_v2, 1  ;;  %v689_v28 = vrot.slane %v1811_v6, 1  ;;  %v1119_v29 = vunpack.c.l.bf16 %v366_v20 }
  0x59   : > { %v1497_v10 = vmax.f32 %v1399_v23, %v470_v34  ;;  %v1603_v9 = vmax.f32 %v1496_v52, %v2286_v48  ;;  %v1213_v32 = vsel %vm647_vm0, %v1211_v63, %v1212_v62  ;;  %v1915_v36 = vunpack.c.h.bf16 %v2034_v15  ;;  %v409_v63 = vld [vmem:[%s2124_s29 + $0x6c] sm:$0xff]  }
  0x5a   : > { %v690_v27 = vsel %vm647_vm0, %v688_v30, %v689_v28  ;;  %v691_v31 = vrot.slane %v591_v8, 1  ;;  %v1216_v33 = vrot.slane %v1882_v21, 1  ;;  %v1214_v41 = vrot.slane %v1119_v29, 1 }
  0x5b   : > { %v1604_v37 = vmax.f32 %v1497_v10, %v687_v54  ;;  %v776_v38 = vmax.f32 %v503_v25, %v690_v27  ;;  %v1302_v14 = vmax.f32 %v1030_v18, %v1213_v32  ;;  %v441_v42 = vunpack.c.l.bf16 %v285_v35  ;;  %v2012_v18 = vld [vmem:[%s2109_s20 + $0x78] sm:$0xff]  }
  0x5c   : > { %v692_v34 = vsel %vm647_vm0, %v689_v28, %v691_v31  ;;  %v2312_v40 = vunpack.c.h.bf16 %v285_v35  ;;  %v473_v44 = vunpack.c.l.bf16 %v2307_v13  ;;  %v1215_v48 = vsel %vm647_vm0, %v1212_v62, %v1214_v41  ;;  %v2028_v10 = vld [vmem:[%s2119_s26 + $0x78] sm:$0xff]   ;;  %v372_v41 = vld [vmem:[%s2119_s26 + $0x74] sm:$0x1] }
  0x5d   : > { %v1961_v45 = vpack.c.bf16 %v1604_v37, %v1603_v9  ;;  %v777_v7 = vmax.f32 %v504_v26, %v692_v34  ;;  %v904_v47 = vmax.f32 %v776_v38, %v1882_v21  ;;  %v1217_v49 = vrot.slane %v1883_v22, 1  ;;  %v2035_v9 = vld [vmem:[%s2124_s29 + $0x78] sm:$0xff]  }
  0x5e   : > { %v1303_v53 = vmax.f32 %v1031_v19, %v1215_v48  ;;  %v1400_v51 = vmax.f32 %v1302_v14, %v1810_v2  ;;  %v474_v46 = vunpack.c.h.bf16 %v2307_v13  ;;  %v505_v55 = vmax.f32 %v441_v42, %v473_v44  ;;  %v293_v13 = vld [vmem:[%s2109_s20 + $0x8c] sm:$0x1] }
  0x5f   : > { %2043 = vst [vmem:[%s2195_s7 + $0x30] sm:$0xff] %v1961_v45   ;;  %v905_v54 = vmax.f32 %v777_v7, %v1883_v22  ;;  %v592_v57 = vunpack.c.l.bf16 %v287_v39  ;;  %v693_v56 = vrot.slane %v441_v42, 1  ;;  %v694_v1 = vrot.slane %v2312_v40, 1  ;;  %v2336_v22 = vld [vmem:[%s2114_s23 + $0x78] sm:$0xff]  }
  0x60   : > { %v1401_v58 = vmax.f32 %v1303_v53, %v1811_v6  ;;  %v1498_v50 = vmax.f32 %v1400_v51, %v1846_v11  ;;  %v506_v0 = vmax.f32 %v2312_v40, %v474_v46  ;;  %v1032_v60 = vmax.f32 %v904_v47, %v1914_v24 }
  0x61   : > { %v1033_v2 = vmax.f32 %v905_v54, %v1915_v36  ;;  %v696_v3 = vrot.slane %v592_v57, 1  ;;  %v874_v5 = vunpack.c.l.bf16 %v370_v43  ;;  %v2326_v62 = vsel %vm647_vm0, %v693_v56, %v694_v1  ;;  %v290_v36 = vld [vmem:[%s2109_s20 + $0x80] sm:$0x1]  ;;  %v291_v54 = vld [vmem:[%s2109_s20 + $0x84] sm:$0xff]  }
  0x62   : > { %v1499_v4 = vmax.f32 %v1401_v58, %v1847_v17  ;;  %v1605_v15 = vmax.f32 %v1498_v50, %v690_v27  ;;  %v875_v6 = vunpack.c.h.bf16 %v370_v43  ;;  %v778_v16 = vmax.f32 %v505_v55, %v2326_v62 }
  0x63   : > { %v2329_v11 = vsel %vm647_vm0, %v694_v1, %v696_v3  ;;  %v1002_v12 = vunpack.c.l.bf16 %v409_v63  ;;  %v1120_v61 = vunpack.c.l.bf16 %v369_v59  ;;  %v1003_v21 = vunpack.c.h.bf16 %v409_v63  ;;  %v2354_v63 = vld [vmem:[%s2114_s23 + $0x84] sm:$0xff]  }
  0x64   : > { %v1606_v19 = vmax.f32 %v1499_v4, %v692_v34  ;;  %v779_v20 = vmax.f32 %v506_v0, %v2329_v11  ;;  %v1218_v17 = vsel %vm647_vm0, %v1216_v33, %v1217_v49  ;;  %v906_v23 = vmax.f32 %v778_v16, %v874_v5 }
  0x65   : > { %v1219_v52 = vrot.slane %v1120_v61, 1  ;;  %v1221_v24 = vrot.slane %v874_v5, 1  ;;  %v1304_v25 = vmax.f32 %v1032_v60, %v1218_v17  ;;  %v1222_v30 = vrot.slane %v875_v6, 1  ;;  %v376_v61 = vld [vmem:[%s2119_s26 + $0x84] sm:$0xff]   ;;  %v375_v17 = vld [vmem:[%s2119_s26 + $0x80] sm:$0x1] }
  0x66   : > { %v1966_v26 = vpack.c.bf16 %v1606_v19, %v1605_v15  ;;  %v907_v8 = vmax.f32 %v779_v20, %v875_v6  ;;  %v1814_v28 = vunpack.c.l.bf16 %v2012_v18  ;;  %v1815_v35 = vunpack.c.h.bf16 %v2012_v18 }
  0x67   : > { %v1220_v29 = vsel %vm647_vm0, %v1217_v49, %v1219_v52  ;;  %v1402_v32 = vmax.f32 %v1304_v25, %v441_v42  ;;  %v1850_v27 = vunpack.c.l.bf16 %v2336_v22  ;;  %v1034_v31 = vmax.f32 %v906_v23, %v1002_v12 }
  0x68   : > { %2044 = vst [vmem:[%s2195_s7 + $0x38] sm:$0xff] %v1966_v26   ;;  %v1035_v33 = vmax.f32 %v907_v8, %v1003_v21  ;;  %v1305_v37 = vmax.f32 %v1033_v2, %v1220_v29  ;;  %v1851_v38 = vunpack.c.h.bf16 %v2336_v22  ;;  %v1886_v34 = vunpack.c.l.bf16 %v2028_v10  ;;  %v413_v22 = vld [vmem:[%s2124_s29 + $0x84] sm:$0xff]  }
  0x69   : > { %v1500_v14 = vmax.f32 %v1402_v32, %v473_v44  ;;  %v1887_v39 = vunpack.c.h.bf16 %v2028_v10  ;;  %v1918_v45 = vunpack.c.l.bf16 %v2035_v9  ;;  %v1919_v47 = vunpack.c.h.bf16 %v2035_v9 }
  0x6a   : > { %v1403_v7 = vmax.f32 %v1305_v37, %v2312_v40  ;;  %v507_v42 = vmax.f32 %v1814_v28, %v1850_v27  ;;  %v593_v48 = vunpack.c.l.bf16 %v290_v36  ;;  %v508_v49 = vmax.f32 %v1815_v35, %v1851_v38 }
  0x6b   : > { %v698_v53 = vrot.slane %v1814_v28, 1  ;;  %v699_v51 = vrot.slane %v1815_v35, 1  ;;  %v1121_v43 = vunpack.c.l.bf16 %v372_v41  ;;  %v1607_v44 = vmax.f32 %v1500_v14, %v2326_v62 }
  0x6c   : > { %v1501_v55 = vmax.f32 %v1403_v7, %v474_v46  ;;  %v701_v57 = vrot.slane %v593_v48, 1  ;;  %v1223_v56 = vsel %vm647_vm0, %v1221_v24, %v1222_v30  ;;  %v1226_v50 = vrot.slane %v1886_v34, 1 }
  0x6d   : > { %v700_v40 = vsel %vm647_vm0, %v698_v53, %v699_v51  ;;  %v1224_v58 = vrot.slane %v1121_v43, 1  ;;  %v1306_v59 = vmax.f32 %v1034_v31, %v1223_v56  ;;  %v445_v46 = vunpack.c.l.bf16 %v291_v54 }
  0x6e   : > { %v1608_v0 = vmax.f32 %v1501_v55, %v2329_v11  ;;  %v702_v1 = vsel %vm647_vm0, %v699_v51, %v701_v57  ;;  %v780_v60 = vmax.f32 %v507_v42, %v700_v40  ;;  %v446_v4 = vunpack.c.h.bf16 %v291_v54  ;;  %v2036_v55 = vld [vmem:[%s2124_s29 + $0x90] sm:$0xff]  }
  0x6f   : > { %v781_v2 = vmax.f32 %v508_v49, %v702_v1  ;;  %v1225_v3 = vsel %vm647_vm0, %v1222_v30, %v1224_v58  ;;  %v1404_v5 = vmax.f32 %v1306_v59, %v1814_v28  ;;  %v477_v16 = vunpack.c.l.bf16 %v2354_v63  ;;  %v2029_v49 = vld [vmem:[%s2119_s26 + $0x90] sm:$0xff]  }
  0x70   : > { %v1971_v15 = vpack.c.bf16 %v1608_v0, %v1607_v44  ;;  %v908_v62 = vmax.f32 %v780_v60, %v1886_v34  ;;  %v1307_v6 = vmax.f32 %v1035_v33, %v1225_v3  ;;  %v478_v18 = vunpack.c.h.bf16 %v2354_v63  ;;  %v378_v63 = vld [vmem:[%s2119_s26 + $0x8c] sm:$0x1] }
  0x71   : > { %v909_v12 = vmax.f32 %v781_v2, %v1887_v39  ;;  %v1502_v11 = vmax.f32 %v1404_v5, %v1850_v27  ;;  %v594_v19 = vunpack.c.l.bf16 %v293_v13  ;;  %v1227_v20 = vrot.slane %v1887_v39, 1  ;;  %v2013_v27 = vld [vmem:[%s2109_s20 + $0x90] sm:$0xff]  }
  0x72   : > { %2045 = vst [vmem:[%s2195_s7 + $0x40] sm:$0xff] %v1971_v15   ;;  %v1405_v21 = vmax.f32 %v1307_v6, %v1815_v35  ;;  %v509_v23 = vmax.f32 %v445_v46, %v477_v16  ;;  %v703_v52 = vrot.slane %v445_v46, 1  ;;  %v1036_v24 = vmax.f32 %v908_v62, %v1918_v45 }
  0x73   : > { %v1037_v25 = vmax.f32 %v909_v12, %v1919_v47  ;;  %v510_v26 = vmax.f32 %v446_v4, %v478_v18  ;;  %v704_v8 = vrot.slane %v446_v4, 1  ;;  %v1609_v28 = vmax.f32 %v1502_v11, %v700_v40  ;;  %v296_v40 = vld [vmem:[%s2109_s20 + $0x98] sm:$0x1] }
  0x74   : > { %v1503_v30 = vmax.f32 %v1405_v21, %v1851_v38  ;;  %v706_v10 = vrot.slane %v594_v19, 1  ;;  %v878_v9 = vunpack.c.l.bf16 %v376_v61  ;;  %v879_v32 = vunpack.c.h.bf16 %v376_v61  ;;  %v2374_v38 = vld [vmem:[%s2114_s23 + $0x90] sm:$0xff]   ;;  %v297_v19 = vld [vmem:[%s2109_s20 + $0x9c] sm:$0xff]  }
  0x75   : > { %v2367_v29 = vsel %vm647_vm0, %v703_v52, %v704_v8  ;;  %v1006_v36 = vunpack.c.l.bf16 %v413_v22  ;;  %v1122_v35 = vunpack.c.l.bf16 %v375_v17  ;;  %v1228_v41 = vsel %vm647_vm0, %v1226_v50, %v1227_v20 }
  0x76   : > { %v1610_v31 = vmax.f32 %v1503_v30, %v702_v1  ;;  %v707_v33 = vsel %vm647_vm0, %v704_v8, %v706_v10  ;;  %v782_v37 = vmax.f32 %v509_v23, %v2367_v29  ;;  %v1007_v34 = vunpack.c.h.bf16 %v413_v22 }
  0x77   : > { %v783_v14 = vmax.f32 %v510_v26, %v707_v33  ;;  %v1229_v39 = vrot.slane %v1122_v35, 1  ;;  %v1231_v45 = vrot.slane %v878_v9, 1  ;;  %v1308_v42 = vmax.f32 %v1036_v24, %v1228_v41 }
  0x78   : > { %v1976_v7 = vpack.c.bf16 %v1610_v31, %v1609_v28  ;;  %v910_v47 = vmax.f32 %v782_v37, %v878_v9  ;;  %v1818_v48 = vunpack.c.l.bf16 %v2013_v27  ;;  %v1819_v43 = vunpack.c.h.bf16 %v2013_v27  ;;  %v382_v27 = vld [vmem:[%s2119_s26 + $0x9c] sm:$0xff]  }
  0x79   : > { %v911_v53 = vmax.f32 %v783_v14, %v879_v32  ;;  %v1230_v51 = vsel %vm647_vm0, %v1227_v20, %v1229_v39  ;;  %v1854_v54 = vunpack.c.l.bf16 %v2374_v38  ;;  %v1232_v44 = vrot.slane %v879_v32, 1  ;;  %v2388_v20 = vld [vmem:[%s2114_s23 + $0x9c] sm:$0xff]   ;;  %v381_v39 = vld [vmem:[%s2119_s26 + $0x98] sm:$0x1] }
  0x7a   : > { %2046 = vst [vmem:[%s2195_s7 + $0x48] sm:$0xff] %v1976_v7   ;;  %v1309_v57 = vmax.f32 %v1037_v25, %v1230_v51  ;;  %v1406_v56 = vmax.f32 %v1308_v42, %v445_v46  ;;  %v1855_v58 = vunpack.c.h.bf16 %v2374_v38  ;;  %v1038_v50 = vmax.f32 %v910_v47, %v1006_v36  ;;  %v299_v25 = vld [vmem:[%s2109_s20 + $0xa4] sm:$0x1] }
  0x7b   : > { %v1039_v59 = vmax.f32 %v911_v53, %v1007_v34  ;;  %v1890_v0 = vunpack.c.l.bf16 %v2029_v49  ;;  %v1891_v1 = vunpack.c.h.bf16 %v2029_v49  ;;  %v1922_v2 = vunpack.c.l.bf16 %v2036_v55 }
  0x7c   : > { %v1407_v60 = vmax.f32 %v1309_v57, %v446_v4  ;;  %v1504_v13 = vmax.f32 %v1406_v56, %v477_v16  ;;  %v511_v3 = vmax.f32 %v1818_v48, %v1854_v54  ;;  %v512_v5 = vmax.f32 %v1819_v43, %v1855_v58 }
  0x7d   : > { %v595_v15 = vunpack.c.l.bf16 %v296_v40  ;;  %v708_v62 = vrot.slane %v1818_v48, 1  ;;  %v709_v6 = vrot.slane %v1819_v43, 1  ;;  %v1123_v11 = vunpack.c.l.bf16 %v378_v63 }
  0x7e   : > { %v1505_v46 = vmax.f32 %v1407_v60, %v478_v18  ;;  %v1611_v12 = vmax.f32 %v1504_v13, %v2367_v29  ;;  %v1233_v61 = vsel %vm647_vm0, %v1231_v45, %v1232_v44  ;;  %v1923_v21 = vunpack.c.h.bf16 %v2036_v55  ;;  %v417_v45 = vld [vmem:[%s2124_s29 + $0x9c] sm:$0xff]  }
  0x7f   : > { %v710_v4 = vsel %vm647_vm0, %v708_v62, %v709_v6  ;;  %v711_v16 = vrot.slane %v595_v15, 1  ;;  %v1236_v17 = vrot.slane %v1890_v0, 1  ;;  %v1234_v52 = vrot.slane %v1123_v11, 1 }
  0x80   : > { %v1612_v22 = vmax.f32 %v1505_v46, %v707_v33  ;;  %v784_v23 = vmax.f32 %v511_v3, %v710_v4  ;;  %v1310_v24 = vmax.f32 %v1038_v50, %v1233_v61  ;;  %v449_v26 = vunpack.c.l.bf16 %v297_v19  ;;  %v2014_v50 = vld [vmem:[%s2109_s20 + $0xa8] sm:$0xff]  }
  0x81   : > { %v712_v18 = vsel %vm647_vm0, %v709_v6, %v711_v16  ;;  %v2393_v8 = vunpack.c.h.bf16 %v297_v19  ;;  %v481_v30 = vunpack.c.l.bf16 %v2388_v20  ;;  %v1235_v29 = vsel %vm647_vm0, %v1232_v44, %v1234_v52  ;;  %v2030_v46 = vld [vmem:[%s2119_s26 + $0xa8] sm:$0xff]   ;;  %v384_v52 = vld [vmem:[%s2119_s26 + $0xa4] sm:$0x1] }
  0x82   : > { %v1981_v28 = vpack.c.bf16 %v1612_v22, %v1611_v12  ;;  %v785_v10 = vmax.f32 %v512_v5, %v712_v18  ;;  %v912_v9 = vmax.f32 %v784_v23, %v1890_v0  ;;  %v1237_v32 = vrot.slane %v1891_v1, 1  ;;  %v2421_v12 = vld [vmem:[%s2124_s29 + $0xa8] sm:$0xff]  }
  0x83   : > { %v1311_v36 = vmax.f32 %v1039_v59, %v1235_v29  ;;  %v1408_v35 = vmax.f32 %v1310_v24, %v1818_v48  ;;  %v482_v31 = vunpack.c.h.bf16 %v2388_v20  ;;  %v513_v37 = vmax.f32 %v449_v26, %v481_v30  ;;  %v305_v20 = vld [vmem:[%s2109_s20 + $0xbc] sm:$0x1] }
  0x84   : > { %2047 = vst [vmem:[%s2195_s7 + $0x50] sm:$0xff] %v1981_v28   ;;  %v913_v33 = vmax.f32 %v785_v10, %v1891_v1  ;;  %v596_v41 = vunpack.c.l.bf16 %v299_v25  ;;  %v713_v38 = vrot.slane %v449_v26, 1  ;;  %v714_v47 = vrot.slane %v2393_v8, 1  ;;  %v2417_v1 = vld [vmem:[%s2114_s23 + $0xa8] sm:$0xff]  }
  0x85   : > { %v1409_v14 = vmax.f32 %v1311_v36, %v1819_v43  ;;  %v1506_v34 = vmax.f32 %v1408_v35, %v1854_v54  ;;  %v514_v7 = vmax.f32 %v2393_v8, %v482_v31  ;;  %v1040_v42 = vmax.f32 %v912_v9, %v1922_v2 }
  0x86   : > { %v1041_v48 = vmax.f32 %v913_v33, %v1923_v21  ;;  %v716_v49 = vrot.slane %v596_v41, 1  ;;  %v882_v53 = vunpack.c.l.bf16 %v382_v27  ;;  %v2407_v44 = vsel %vm647_vm0, %v713_v38, %v714_v47  ;;  %v302_v21 = vld [vmem:[%s2109_s20 + $0xb0] sm:$0x1]  ;;  %v303_v33 = vld [vmem:[%s2109_s20 + $0xb4] sm:$0xff]  }
  0x87   : > { %v1507_v51 = vmax.f32 %v1409_v14, %v1855_v58  ;;  %v1613_v55 = vmax.f32 %v1506_v34, %v710_v4  ;;  %v883_v43 = vunpack.c.h.bf16 %v382_v27  ;;  %v786_v57 = vmax.f32 %v513_v37, %v2407_v44 }
  0x88   : > { %v2410_v54 = vsel %vm647_vm0, %v714_v47, %v716_v49  ;;  %v1010_v56 = vunpack.c.l.bf16 %v417_v45  ;;  %v1124_v40 = vunpack.c.l.bf16 %v381_v39  ;;  %v1011_v0 = vunpack.c.h.bf16 %v417_v45  ;;  %v2439_v45 = vld [vmem:[%s2114_s23 + $0xb4] sm:$0xff]  }
  0x89   : > { %v1614_v59 = vmax.f32 %v1507_v51, %v712_v18  ;;  %v787_v63 = vmax.f32 %v514_v7, %v2410_v54  ;;  %v1238_v58 = vsel %vm647_vm0, %v1236_v17, %v1237_v32  ;;  %v914_v60 = vmax.f32 %v786_v57, %v882_v53 }
  0x8a   : > { %v1239_v13 = vrot.slane %v1124_v40, 1  ;;  %v1241_v2 = vrot.slane %v882_v53, 1  ;;  %v1312_v3 = vmax.f32 %v1040_v42, %v1238_v58  ;;  %v1242_v62 = vrot.slane %v883_v43, 1  ;;  %v388_v40 = vld [vmem:[%s2119_s26 + $0xb4] sm:$0xff]   ;;  %v387_v58 = vld [vmem:[%s2119_s26 + $0xb0] sm:$0x1] }
  0x8b   : > { %v1986_v5 = vpack.c.bf16 %v1614_v59, %v1613_v55  ;;  %v915_v15 = vmax.f32 %v787_v63, %v883_v43  ;;  %v1822_v6 = vunpack.c.l.bf16 %v2014_v50  ;;  %v1823_v19 = vunpack.c.h.bf16 %v2014_v50 }
  0x8c   : > { %v1240_v11 = vsel %vm647_vm0, %v1237_v32, %v1239_v13  ;;  %v1410_v61 = vmax.f32 %v1312_v3, %v449_v26  ;;  %v1858_v4 = vunpack.c.l.bf16 %v2417_v1  ;;  %v1042_v16 = vmax.f32 %v914_v60, %v1010_v56 }
  0x8d   : > { %2048 = vst [vmem:[%s2195_s7 + $0x58] sm:$0xff] %v1986_v5   ;;  %v1043_v17 = vmax.f32 %v915_v15, %v1011_v0  ;;  %v1313_v22 = vmax.f32 %v1041_v48, %v1240_v11  ;;  %v1859_v23 = vunpack.c.h.bf16 %v2417_v1  ;;  %v1894_v18 = vunpack.c.l.bf16 %v2030_v46  ;;  %v421_v1 = vld [vmem:[%s2124_s29 + $0xb4] sm:$0xff]  }
  0x8e   : > { %v1508_v24 = vmax.f32 %v1410_v61, %v481_v30  ;;  %v1895_v25 = vunpack.c.h.bf16 %v2030_v46  ;;  %v1926_v28 = vunpack.c.l.bf16 %v2421_v12  ;;  %v1927_v26 = vunpack.c.h.bf16 %v2421_v12 }
  0x8f   : > { %v1411_v10 = vmax.f32 %v1313_v22, %v2393_v8  ;;  %v515_v9 = vmax.f32 %v1822_v6, %v1858_v4  ;;  %v597_v29 = vunpack.c.l.bf16 %v302_v21  ;;  %v516_v32 = vmax.f32 %v1823_v19, %v1859_v23 }
  0x90   : > { %v718_v36 = vrot.slane %v1822_v6, 1  ;;  %v719_v35 = vrot.slane %v1823_v19, 1  ;;  %v1125_v27 = vunpack.c.l.bf16 %v384_v52  ;;  %v1615_v37 = vmax.f32 %v1508_v24, %v2407_v44  ;;  %v2015_v52 = vld [vmem:[%s2109_s20 + $0xc0] sm:$0xff]  }
  0x91   : > { %v1509_v30 = vmax.f32 %v1411_v10, %v482_v31  ;;  %v721_v41 = vrot.slane %v597_v29, 1  ;;  %v1243_v38 = vsel %vm647_vm0, %v1241_v2, %v1242_v62  ;;  %v1246_v34 = vrot.slane %v1894_v18, 1  ;;  %v308_v29 = vld [vmem:[%s2109_s20 + $0xc8] sm:$0x1] }
  0x92   : > { %v720_v8 = vsel %vm647_vm0, %v718_v36, %v719_v35  ;;  %v1244_v14 = vrot.slane %v1125_v27, 1  ;;  %v1314_v39 = vmax.f32 %v1042_v16, %v1243_v38  ;;  %v453_v31 = vunpack.c.l.bf16 %v303_v33  ;;  %v390_v36 = vld [vmem:[%s2119_s26 + $0xbc] sm:$0x1] }
  0x93   : > { %v1616_v7 = vmax.f32 %v1509_v30, %v2410_v54  ;;  %v722_v47 = vsel %vm647_vm0, %v719_v35, %v721_v41  ;;  %v788_v42 = vmax.f32 %v515_v9, %v720_v8  ;;  %v454_v51 = vunpack.c.h.bf16 %v303_v33 }
  0x94   : > { %v789_v48 = vmax.f32 %v516_v32, %v722_v47  ;;  %v1245_v49 = vsel %vm647_vm0, %v1242_v62, %v1244_v14  ;;  %v1412_v53 = vmax.f32 %v1314_v39, %v1822_v6  ;;  %v485_v57 = vunpack.c.l.bf16 %v2439_v45  ;;  %v2023_v32 = vld [vmem:[%s2114_s23 + $0xc0] sm:$0xff]  }
  0x95   : > { %v1991_v55 = vpack.c.bf16 %v1616_v7, %v1615_v37  ;;  %v916_v44 = vmax.f32 %v788_v42, %v1894_v18  ;;  %v1315_v43 = vmax.f32 %v1043_v17, %v1245_v49  ;;  %v486_v50 = vunpack.c.h.bf16 %v2439_v45 }
  0x96   : > { %v917_v56 = vmax.f32 %v789_v48, %v1895_v25  ;;  %v1510_v54 = vmax.f32 %v1412_v53, %v1858_v4  ;;  %v598_v59 = vunpack.c.l.bf16 %v305_v20  ;;  %v1247_v63 = vrot.slane %v1895_v25, 1 }
  0x97   : > { %2049 = vst [vmem:[%s2195_s7 + $0x60] sm:$0xff] %v1991_v55   ;;  %v1413_v0 = vmax.f32 %v1315_v43, %v1823_v19  ;;  %v517_v60 = vmax.f32 %v453_v31, %v485_v57  ;;  %v723_v13 = vrot.slane %v453_v31, 1  ;;  %v1044_v2 = vmax.f32 %v916_v44, %v1926_v28 }
  0x98   : > { %v1617_v3 = vmax.f32 %v1510_v54, %v720_v8  ;;  %v518_v5 = vmax.f32 %v454_v51, %v486_v50  ;;  %v724_v15 = vrot.slane %v454_v51, 1  ;;  %v726_v6 = vrot.slane %v598_v59, 1 }
  0x99   : > { %v1511_v62 = vmax.f32 %v1413_v0, %v1859_v23  ;;  %v886_v46 = vunpack.c.l.bf16 %v388_v40  ;;  %v887_v12 = vunpack.c.h.bf16 %v388_v40  ;;  %v1045_v11 = vmax.f32 %v917_v56, %v1927_v26 }
  0x9a   : > { %v725_v61 = vsel %vm647_vm0, %v723_v13, %v724_v15  ;;  %v1014_v21 = vunpack.c.l.bf16 %v421_v1  ;;  %v1126_v19 = vunpack.c.l.bf16 %v387_v58  ;;  %v727_v16 = vsel %vm647_vm0, %v724_v15, %v726_v6 }
  0x9b   : > { %v1618_v4 = vmax.f32 %v1511_v62, %v722_v47  ;;  %v790_v17 = vmax.f32 %v517_v60, %v725_v61  ;;  %v1248_v22 = vsel %vm647_vm0, %v1246_v34, %v1247_v63  ;;  %v791_v23 = vmax.f32 %v518_v5, %v727_v16 }
  0x9c   : > { %v1249_v24 = vrot.slane %v1126_v19, 1  ;;  %v1251_v18 = vrot.slane %v886_v46, 1  ;;  %v1252_v25 = vrot.slane %v887_v12, 1  ;;  %v1015_v26 = vunpack.c.h.bf16 %v421_v1 }
  0x9d   : > { %v1996_v28 = vpack.c.bf16 %v1618_v4, %v1617_v3  ;;  %v918_v10 = vmax.f32 %v790_v17, %v886_v46  ;;  %v1316_v9 = vmax.f32 %v1044_v2, %v1248_v22  ;;  %v919_v35 = vmax.f32 %v791_v23, %v887_v12 }
  0x9e   : > { %v1250_v27 = vsel %vm647_vm0, %v1247_v63, %v1249_v24  ;;  %v1826_v33 = vunpack.c.l.bf16 %v2015_v52  ;;  %v1827_v30 = vunpack.c.h.bf16 %v2015_v52  ;;  %v1862_v8 = vunpack.c.l.bf16 %v2023_v32 }
  0x9f   : > { %2050 = vst [vmem:[%s2195_s7 + $0x68] sm:$0xff] %v1996_v28   ;;  %v1046_v37 = vmax.f32 %v918_v10, %v1014_v21  ;;  %v1317_v41 = vmax.f32 %v1045_v11, %v1250_v27  ;;  %v1414_v38 = vmax.f32 %v1316_v9, %v453_v31  ;;  %v1127_v14 = vunpack.c.l.bf16 %v390_v36 }
  0xa0   : > { %v1253_v34 = vsel %vm647_vm0, %v1251_v18, %v1252_v25  ;;  %v1580_v39 = vunpack.c.l.bf16 %v308_v29  ;;  %v1047_v45 = vmax.f32 %v919_v35, %v1015_v26  ;;  %v1584_v48 = vrot.slane %v1826_v33, 1 }
  0xa1   : > { %v1415_v7 = vmax.f32 %v1317_v41, %v454_v51  ;;  %v1512_v47 = vmax.f32 %v1414_v38, %v485_v57  ;;  %v1318_v42 = vmax.f32 %v1046_v37, %v1253_v34  ;;  %v1254_v20 = vrot.slane %v1127_v14, 1 }
  0xa2   : > { %v1585_v49 = vrot.slane %v1827_v30, 1  ;;  %v1587_v31 = vrot.slane %v1580_v39, 1  ;;  %v1863_v54 = vunpack.c.h.bf16 %v2023_v32 }
  0xa3   : > { %v1513_v53 = vmax.f32 %v1415_v7, %v486_v50  ;;  %v1619_v55 = vmax.f32 %v1512_v47, %v725_v61  ;;  %v1416_v44 = vmax.f32 %v1318_v42, %v1826_v33  ;;  %v1255_v43 = vsel %vm647_vm0, %v1252_v25, %v1254_v20 }
  0xa4   : > { %v1319_v40 = vmax.f32 %v1047_v45, %v1255_v43  ;;  %v1586_v63 = vsel %vm647_vm0, %v1584_v48, %v1585_v49  ;;  %v1588_v0 = vsel %vm647_vm0, %v1585_v49, %v1587_v31 }
  0xa5   : > { %v1620_v56 = vmax.f32 %v1513_v53, %v727_v16  ;;  %v1514_v59 = vmax.f32 %v1416_v44, %v1862_v8 }
  0xa6   : > { %v1417_v57 = vmax.f32 %v1319_v40, %v1827_v30 }
  0xa7   : > { %v2001_v51 = vpack.c.bf16 %v1620_v56, %v1619_v55  ;;  %v1621_v1 = vmax.f32 %v1514_v59, %v1586_v63 }
  0xa8   : > { %v1515_v58 = vmax.f32 %v1417_v57, %v1863_v54 }
  0xa9   : > { %2051 = vst [vmem:[%s2195_s7 + $0x70] sm:$0xff] %v2001_v51  }
  0xaa   : > { %v1622_v50 = vmax.f32 %v1515_v58, %v1588_v0 }
  0xac   : > { %v2006_v60 = vpack.c.bf16 %v1622_v50, %v1621_v1 }
  0xae   : > { %2052 = vst [vmem:[%s2195_s7 + $0x78] sm:$0xff] %v2006_v60  }
  0xaf PF: > { %s14_s15 = sadd.s32 1, %s2068_s15  }
  0xb0   : > { %p11_p4 = scmp.ge.s32.totalorder %s14_s15, 4  }
  0xb2   :  { %13 = sbr.rel (!%p11_p4) target bundleno = 1 (0x1), region = 75 }

// kernel: resnet_embedder_forward.24
= control target key start
LH: loop header
LB: loop body
LE: loop exit
PB: predicated region body
PF: predicated region fallthrough
CT: control target
= control target key end

     0   :  { %s1544_s12 = smov 0   ;;  %s1546_s13 = smov 0   ;;  %s1753_s0 = inlined_call_operand.vmem [shape: bf16[512,256], index: 0, kind: input, shape index: {}]   ;;  %s1754_s1 = inlined_call_operand.vmem [shape: bf16[256,128], index: 1, kind: input, shape index: {}]   ;;  %s1755_s2 = inlined_call_operand.vmem [shape: f32[1,128], index: 2, kind: input, shape index: {}]   ;;  %s1756_s3 = inlined_call_operand.vmem [shape: bf16[512,128], index: 3, kind: output, shape index: {}]  }
   0x1   :  { %s1548_s14 = smov 0  }
   0x2 LB: > { %s25_s15 = sadd.s32 1, %s1518_s13  ;;  %p1115_p0 = scmp.ge.s32.totalorder %s1522_s14, 1  ;;  %s1522_s14 = sphi %s1548_s14, %s13_s14   ;;  %s1518_s13 = sphi %s1546_s13, %s1758_s13   ;;  %s1514_s12 = sphi %s1544_s12, %s1757_s12  }
   0x3   : > { %p27_p1 = scmp.ge.s32.totalorder %s25_s15, 2  ;;  %p169_p2 = scmp.lt.s32.totalorder %s1522_s14, 3 }
   0x5   : > { %s1760_s15 = smov (%p27_p1, %s25_s15), 0  ;;  %p170_p3 = pnand %p1115_p0, %p169_p2 }
   0x6   : > { %s1116_s28 = sshll.u32 (!%p170_p3), %s1514_s12, 5 }
   0x7   : > { %173 = sbr.rel (%p170_p3) target bundleno = 306 (0x132), region = 32  ;;  %p205_p4 = scmp.lt.s32.totalorder (!%p170_p3), %s1116_s28, 63 }
   0xc   : > { %v1355_v0 = vld [vmem:[%s1754_s1 + $0x38] sm:$0xff]  ;;  %v1354_v2 = vld [vmem:[%s1754_s1 + $0x30] sm:$0xff]  ;;  %v1353_v4 = vld [vmem:[%s1754_s1 + $0x28] sm:$0xff]  ;;  %s1762_s28 = smov (!%p205_p4, %s1116_s28), 63 }
   0xd   : > { %v1363_v1 = vld [vmem:[%s1754_s1 + $0x78] sm:$0xff]  ;;  %615 = vmatpush.bf16.msra.mxu0 %v1355_v0  ;;  %1459 = vmatpush.bf16.msra.mxu2 %v1355_v0  ;;  %v1362_v3 = vld [vmem:[%s1754_s1 + $0x70] sm:$0xff]  ;;  %v1361_v5 = vld [vmem:[%s1754_s1 + $0x68] sm:$0xff]  ;;  %s1315_s17 = sshll.u32 %s1762_s28, 3  ;;  %s1120_s5 = sshll.u32 %s1762_s28, 2 }
   0xe   : > { %704 = vmatpush.bf16.msra.mxu1 %v1363_v1  ;;  %1467 = vmatpush.bf16.msra.mxu3 %v1363_v1  ;;  %v1352_v6 = vld [vmem:[%s1754_s1 + $0x20] sm:$0xff]  ;;  %v1351_v8 = vld [vmem:[%s1754_s1 + $0x18] sm:$0xff]  ;;  %v1350_v10 = vld [vmem:[%s1754_s1 + $0x10] sm:$0xff]  ;;  %s1610_s22 = scalar_lea.vmem %s1753_s0, %s1315_s17  ;;  %s1696_s8 = scalar_lea.vmem %s1756_s3, %s1120_s5 }
   0xf   : > { %v1360_v7 = vld [vmem:[%s1754_s1 + $0x60] sm:$0xff]  ;;  %v1359_v9 = vld [vmem:[%s1754_s1 + $0x58] sm:$0xff]  ;;  %v1358_v11 = vld [vmem:[%s1754_s1 + $0x50] sm:$0xff] }
  0x10   : > { %v1349_v12 = vld [vmem:[%s1754_s1 + $0x8] sm:$0xff]  ;;  %v1348_v14 = vld [vmem:[%s1754_s1] sm:$0xff]  ;;  %v1131_v28 = vld [vmem:[%s1610_s22 + $0x10] sm:$0xf] }
  0x11   : > { %616 = vmatpush.bf16.msra.mxu0 %v1354_v2  ;;  %1460 = vmatpush.bf16.msra.mxu2 %v1354_v2  ;;  %v1357_v13 = vld [vmem:[%s1754_s1 + $0x48] sm:$0xff]  ;;  %v1356_v15 = vld [vmem:[%s1754_s1 + $0x40] sm:$0xff]  ;;  %v1319_v29 = vld [vmem:[%s1610_s22 + $0x14] sm:$0xf0] }
  0x12   : > { %705 = vmatpush.bf16.msra.mxu1 %v1362_v3  ;;  %1468 = vmatpush.bf16.msra.mxu3 %v1362_v3  ;;  %v1123_v16 = vld [vmem:[%s1610_s22] sm:$0xf]  ;;  %v1317_v17 = vld [vmem:[%s1610_s22 + $0x4] sm:$0xf0]  ;;  %v1316_v20 = vld [vmem:[%s1610_s22 + $0x4] sm:$0xf]  ;;  %v1132_v36 = vor.u32 %v1319_v29, %v1131_v28 }
  0x13   : > { %v1187_v18 = vld [vmem:[%s1610_s22 + $0x80] sm:$0xf]  ;;  %v1333_v19 = vld [vmem:[%s1610_s22 + $0x84] sm:$0xf0]  ;;  %v1125_v21 = vld [vmem:[%s1610_s22 + $0x8] sm:$0xf0]  ;;  %v1124_v24 = vor.u32 %v1317_v17, %v1123_v16 }
  0x14   : > { %v1332_v22 = vld [vmem:[%s1610_s22 + $0x84] sm:$0xf]  ;;  %v1189_v23 = vld [vmem:[%s1610_s22 + $0x88] sm:$0xf0]  ;;  %v1188_v25 = vor.u32 %v1333_v19, %v1187_v18  ;;  %v1128_v26 = vor.u32 %v1316_v20, %v1125_v21  ;;  %v1195_v30 = vld [vmem:[%s1610_s22 + $0x90] sm:$0xf] }
  0x15   : > { %617 = vmatpush.bf16.msra.mxu0 %v1353_v4  ;;  %1461 = vmatpush.bf16.msra.mxu2 %v1353_v4  ;;  %v1192_v27 = vor.u32 %v1332_v22, %v1189_v23  ;;  %v1335_v31 = vld [vmem:[%s1610_s22 + $0x94] sm:$0xf0]  ;;  %v1318_v32 = vld [vmem:[%s1610_s22 + $0x14] sm:$0xf]  ;;  %v1133_v33 = vld [vmem:[%s1610_s22 + $0x18] sm:$0xf0] }
  0x16   : > { %706 = vmatpush.bf16.msra.mxu1 %v1361_v5  ;;  %1469 = vmatpush.bf16.msra.mxu3 %v1361_v5  ;;  %v1334_v34 = vld [vmem:[%s1610_s22 + $0x94] sm:$0xf]  ;;  %v1197_v35 = vld [vmem:[%s1610_s22 + $0x98] sm:$0xf0]  ;;  %v1196_v37 = vor.u32 %v1335_v31, %v1195_v30  ;;  %v1136_v38 = vor.u32 %v1318_v32, %v1133_v33  ;;  %v1139_v40 = vld [vmem:[%s1610_s22 + $0x20] sm:$0xf] }
  0x17   : > { %v1200_v39 = vor.u32 %v1334_v34, %v1197_v35  ;;  %v1321_v41 = vld [vmem:[%s1610_s22 + $0x24] sm:$0xf0]  ;;  %v1203_v42 = vld [vmem:[%s1610_s22 + $0xa0] sm:$0xf]  ;;  %v1320_v44 = vld [vmem:[%s1610_s22 + $0x24] sm:$0xf] }
  0x18   : > { %v1337_v43 = vld [vmem:[%s1610_s22 + $0xa4] sm:$0xf0]  ;;  %v1141_v45 = vld [vmem:[%s1610_s22 + $0x28] sm:$0xf0]  ;;  %v1336_v46 = vld [vmem:[%s1610_s22 + $0xa4] sm:$0xf]  ;;  %v1140_v48 = vor.u32 %v1321_v41, %v1139_v40 }
  0x19   : > { %618 = vmatpush.bf16.msra.mxu0 %v1352_v6  ;;  %1462 = vmatpush.bf16.msra.mxu2 %v1352_v6  ;;  %v1205_v47 = vld [vmem:[%s1610_s22 + $0xa8] sm:$0xf0]  ;;  %v1204_v49 = vor.u32 %v1337_v43, %v1203_v42  ;;  %v1144_v50 = vor.u32 %v1320_v44, %v1141_v45  ;;  %v1147_v52 = vld [vmem:[%s1610_s22 + $0x30] sm:$0xf]  ;;  %v1323_v53 = vld [vmem:[%s1610_s22 + $0x34] sm:$0xf0] }
  0x1a   : > { %707 = vmatpush.bf16.msra.mxu1 %v1360_v7  ;;  %1470 = vmatpush.bf16.msra.mxu3 %v1360_v7  ;;  %v1208_v51 = vor.u32 %v1336_v46, %v1205_v47  ;;  %v1211_v54 = vld [vmem:[%s1610_s22 + $0xb0] sm:$0xf]  ;;  %v1339_v55 = vld [vmem:[%s1610_s22 + $0xb4] sm:$0xf0]  ;;  %v1322_v56 = vld [vmem:[%s1610_s22 + $0x34] sm:$0xf]  ;;  %v1148_v60 = vor.u32 %v1323_v53, %v1147_v52 }
  0x1b   : > { %v1149_v57 = vld [vmem:[%s1610_s22 + $0x38] sm:$0xf0]  ;;  %v1338_v58 = vld [vmem:[%s1610_s22 + $0xb4] sm:$0xf]  ;;  %v1212_v61 = vor.u32 %v1339_v55, %v1211_v54  ;;  %v1155_v0 = vld [vmem:[%s1610_s22 + $0x40] sm:$0xf] }
  0x1c   : > { %v1213_v59 = vld [vmem:[%s1610_s22 + $0xb8] sm:$0xf0]  ;;  %v1152_v62 = vor.u32 %v1322_v56, %v1149_v57  ;;  %v1325_v1 = vld [vmem:[%s1610_s22 + $0x44] sm:$0xf0]  ;;  %v1219_v2 = vld [vmem:[%s1610_s22 + $0xc0] sm:$0xf] }
  0x1d   : > { %619 = vmatpush.bf16.msra.mxu0 %v1351_v8  ;;  %1463 = vmatpush.bf16.msra.mxu2 %v1351_v8  ;;  %v1216_v63 = vor.u32 %v1338_v58, %v1213_v59  ;;  %v1341_v3 = vld [vmem:[%s1610_s22 + $0xc4] sm:$0xf0]  ;;  %v1324_v4 = vld [vmem:[%s1610_s22 + $0x44] sm:$0xf]  ;;  %v1157_v5 = vld [vmem:[%s1610_s22 + $0x48] sm:$0xf0]  ;;  %v1156_v8 = vor.u32 %v1325_v1, %v1155_v0 }
  0x1e   : > { %708 = vmatpush.bf16.msra.mxu1 %v1359_v9  ;;  %1471 = vmatpush.bf16.msra.mxu3 %v1359_v9  ;;  %v1340_v6 = vld [vmem:[%s1610_s22 + $0xc4] sm:$0xf]  ;;  %v1221_v7 = vld [vmem:[%s1610_s22 + $0xc8] sm:$0xf0]  ;;  %v1220_v9 = vor.u32 %v1341_v3, %v1219_v2  ;;  %v1326_v16 = vld [vmem:[%s1610_s22 + $0x54] sm:$0xf] }
  0x1f   : > { %v1165_v17 = vld [vmem:[%s1610_s22 + $0x58] sm:$0xf0]  ;;  %v1342_v18 = vld [vmem:[%s1610_s22 + $0xd4] sm:$0xf]  ;;  %v1328_v28 = vld [vmem:[%s1610_s22 + $0x64] sm:$0xf] }
  0x20   : > { %v1229_v19 = vld [vmem:[%s1610_s22 + $0xd8] sm:$0xf0]  ;;  %v1168_v22 = vor.u32 %v1326_v16, %v1165_v17  ;;  %v1173_v29 = vld [vmem:[%s1610_s22 + $0x68] sm:$0xf0]  ;;  %v1344_v30 = vld [vmem:[%s1610_s22 + $0xe4] sm:$0xf] }
  0x21   : > { %620 = vmatpush.bf16.msra.mxu0 %v1350_v10  ;;  %1464 = vmatpush.bf16.msra.mxu2 %v1350_v10  ;;  %v1160_v10 = vor.u32 %v1324_v4, %v1157_v5  ;;  %v1232_v23 = vor.u32 %v1342_v18, %v1229_v19  ;;  %v1237_v31 = vld [vmem:[%s1610_s22 + $0xe8] sm:$0xf0]  ;;  %v1176_v34 = vor.u32 %v1328_v28, %v1173_v29  ;;  %v1330_v40 = vld [vmem:[%s1610_s22 + $0x74] sm:$0xf]  ;;  %v1181_v41 = vld [vmem:[%s1610_s22 + $0x78] sm:$0xf0] }
  0x22   : > { %709 = vmatpush.bf16.msra.mxu1 %v1358_v11  ;;  %1472 = vmatpush.bf16.msra.mxu3 %v1358_v11  ;;  %v1224_v11 = vor.u32 %v1340_v6, %v1221_v7  ;;  %v1240_v35 = vor.u32 %v1344_v30, %v1237_v31  ;;  %v1346_v42 = vld [vmem:[%s1610_s22 + $0xf4] sm:$0xf]  ;;  %v1245_v43 = vld [vmem:[%s1610_s22 + $0xf8] sm:$0xf0]  ;;  %v1184_v46 = vor.u32 %v1330_v40, %v1181_v41 }
  0x23   : > { %v1248_v47 = vor.u32 %v1346_v42, %v1245_v43 }
  0x25   : > { %621 = vmatpush.bf16.msra.mxu0 %v1349_v12  ;;  %1465 = vmatpush.bf16.msra.mxu2 %v1349_v12  ;;  %v1163_v12 = vld [vmem:[%s1610_s22 + $0x50] sm:$0xf] }
  0x26   : > { %710 = vmatpush.bf16.msra.mxu1 %v1357_v13  ;;  %1473 = vmatpush.bf16.msra.mxu3 %v1357_v13  ;;  %v1327_v13 = vld [vmem:[%s1610_s22 + $0x54] sm:$0xf0] }
  0x27   : > { %v1164_v20 = vor.u32 %v1327_v13, %v1163_v12 }
  0x29   : > { %622 = vmatpush.bf16.msra.mxu0 %v1348_v14  ;;  %1466 = vmatpush.bf16.msra.mxu2 %v1348_v14  ;;  %v1227_v14 = vld [vmem:[%s1610_s22 + $0xd0] sm:$0xf] }
  0x2a   : > { %711 = vmatpush.bf16.msra.mxu1 %v1356_v15  ;;  %1474 = vmatpush.bf16.msra.mxu3 %v1356_v15  ;;  %v1343_v15 = vld [vmem:[%s1610_s22 + $0xd4] sm:$0xf0] }
  0x2b   : > { %v1228_v21 = vor.u32 %v1343_v15, %v1227_v14 }
  0x2c   : > { %623 = vmatmul.bf16.vlgmr.msra.gmra.mxu0 %v1124_v24  ;;  %663 = vmatmul.bf16.vlgmr.msra.gmra.mxu2 %v1188_v25  ;;  %v1171_v24 = vld [vmem:[%s1610_s22 + $0x60] sm:$0xf]  ;;  %v1329_v25 = vld [vmem:[%s1610_s22 + $0x64] sm:$0xf0] }
  0x2d   : > { %712 = vmatmul.bf16.vlgmr.msra.gmra.mxu1 %v1128_v26  ;;  %752 = vmatmul.bf16.vlgmr.msra.gmra.mxu3 %v1192_v27  ;;  %v1235_v26 = vld [vmem:[%s1610_s22 + $0xe0] sm:$0xf]  ;;  %v1345_v27 = vld [vmem:[%s1610_s22 + $0xe4] sm:$0xf0]  ;;  %v1172_v32 = vor.u32 %v1329_v25, %v1171_v24 }
  0x2e   : > { %v1236_v33 = vor.u32 %v1345_v27, %v1235_v26 }
  0x3c   : > { %628 = vmatmul.bf16.gmra.mxu0 %v1132_v36  ;;  %668 = vmatmul.bf16.gmra.mxu2 %v1196_v37  ;;  %v1179_v36 = vld [vmem:[%s1610_s22 + $0x70] sm:$0xf]  ;;  %v1331_v37 = vld [vmem:[%s1610_s22 + $0x74] sm:$0xf0] }
  0x3d   : > { %717 = vmatmul.bf16.gmra.mxu1 %v1136_v38  ;;  %757 = vmatmul.bf16.gmra.mxu3 %v1200_v39  ;;  %v1243_v38 = vld [vmem:[%s1610_s22 + $0xf0] sm:$0xf]  ;;  %v1347_v39 = vld [vmem:[%s1610_s22 + $0xf4] sm:$0xf0]  ;;  %v1180_v44 = vor.u32 %v1331_v37, %v1179_v36 }
  0x3e   : > { %v1244_v45 = vor.u32 %v1347_v39, %v1243_v38 }
  0x4c   : > { %633 = vmatmul.bf16.gmra.mxu0 %v1140_v48  ;;  %673 = vmatmul.bf16.gmra.mxu2 %v1204_v49 }
  0x4d   : > { %722 = vmatmul.bf16.gmra.mxu1 %v1144_v50  ;;  %762 = vmatmul.bf16.gmra.mxu3 %v1208_v51  ;;  %v1688_v51 = vld [vmem:[%s1755_s2] ss:$0 sm:$0xff] }
  0x5c   : > { %638 = vmatmul.bf16.gmra.mxu0 %v1148_v60  ;;  %678 = vmatmul.bf16.gmra.mxu2 %v1212_v61 }
  0x5d   : > { %727 = vmatmul.bf16.gmra.mxu1 %v1152_v62  ;;  %767 = vmatmul.bf16.gmra.mxu3 %v1216_v63 }
  0x6c   : > { %643 = vmatmul.bf16.gmra.mxu0 %v1156_v8  ;;  %683 = vmatmul.bf16.gmra.mxu2 %v1220_v9 }
  0x6d   : > { %732 = vmatmul.bf16.gmra.mxu1 %v1160_v10  ;;  %772 = vmatmul.bf16.gmra.mxu3 %v1224_v11 }
  0x7c   : > { %648 = vmatmul.bf16.gmra.mxu0 %v1164_v20  ;;  %688 = vmatmul.bf16.gmra.mxu2 %v1228_v21 }
  0x7d   : > { %737 = vmatmul.bf16.gmra.mxu1 %v1168_v22  ;;  %777 = vmatmul.bf16.gmra.mxu3 %v1232_v23 }
  0x8c   : > { %653 = vmatmul.bf16.gmra.mxu0 %v1172_v32  ;;  %693 = vmatmul.bf16.gmra.mxu2 %v1236_v33 }
  0x8d   : > { %742 = vmatmul.bf16.gmra.mxu1 %v1176_v34  ;;  %782 = vmatmul.bf16.gmra.mxu3 %v1240_v35 }
  0x9c   : > { %658 = vmatmul.bf16.gmra.mxu0 %v1180_v44  ;;  %698 = vmatmul.bf16.gmra.mxu2 %v1244_v45 }
  0x9d   : > { %747 = vmatmul.bf16.gmra.mxu1 %v1184_v46  ;;  %787 = vmatmul.bf16.gmra.mxu3 %v1248_v47 }
  0xa9   : > { %v624_v48 = vpop.f32.mrf.mxu0 }
  0xaa   : > { %v713_v49 = vpop.f32.mrf.mxu1 }
  0xab   : > { %v714_v50 = vadd.f32 %v713_v49, %v624_v48 }
  0xad   : > { %v896_v56 = vadd.f32 %v1688_v51, %v714_v50 }
  0xaf   : > { %v664_v52 = vpop.f32.mrf.mxu2  ;;  %v928_v60 = vmax.f32 %v896_v56, 0.0 }
  0xb0   : > { %v753_v53 = vpop.f32.mrf.mxu3 }
  0xb1   : > { %v626_v54 = vpop.f32.mrf.mxu0  ;;  %v754_v58 = vadd.f32 %v753_v53, %v664_v52 }
  0xb2   : > { %v715_v55 = vpop.f32.mrf.mxu1 }
  0xb3   : > { %v716_v57 = vadd.f32 %v715_v55, %v626_v54  ;;  %v912_v0 = vadd.f32 %v1688_v51, %v754_v58 }
  0xb5   : > { %v897_v59 = vadd.f32 %v1688_v51, %v716_v57  ;;  %v944_v6 = vmax.f32 %v912_v0, 0.0 }
  0xb7   : > { %v929_v61 = vmax.f32 %v897_v59, 0.0  ;;  %v666_v62 = vpop.f32.mrf.mxu2 }
  0xb8   : > { %v755_v63 = vpop.f32.mrf.mxu3 }
  0xb9   : > { %v1367_v1 = vpack.c.bf16 %v929_v61, %v928_v60  ;;  %v756_v2 = vadd.f32 %v755_v63, %v666_v62  ;;  %v629_v3 = vpop.f32.mrf.mxu0 }
  0xba   : > { %v718_v4 = vpop.f32.mrf.mxu1 }
  0xbb   : > { %1368 = vst [vmem:[%s1696_s8] sm:$0xff] %v1367_v1   ;;  %v913_v5 = vadd.f32 %v1688_v51, %v756_v2  ;;  %v719_v9 = vadd.f32 %v718_v4, %v629_v3 }
  0xbd   : > { %v945_v7 = vmax.f32 %v913_v5, 0.0  ;;  %v898_v14 = vadd.f32 %v1688_v51, %v719_v9 }
  0xbf   : > { %v1407_v8 = vpack.c.bf16 %v945_v7, %v944_v6  ;;  %v669_v10 = vpop.f32.mrf.mxu2  ;;  %v930_v18 = vmax.f32 %v898_v14, 0.0 }
  0xc0   : > { %v758_v11 = vpop.f32.mrf.mxu3 }
  0xc1   : > { %1451 = vst [vmem:[%s1696_s8 + $0x40] sm:$0xff] %v1407_v8   ;;  %v631_v12 = vpop.f32.mrf.mxu0  ;;  %v759_v16 = vadd.f32 %v758_v11, %v669_v10 }
  0xc2   : > { %v720_v13 = vpop.f32.mrf.mxu1 }
  0xc3   : > { %v721_v15 = vadd.f32 %v720_v13, %v631_v12  ;;  %v914_v22 = vadd.f32 %v1688_v51, %v759_v16 }
  0xc5   : > { %v899_v17 = vadd.f32 %v1688_v51, %v721_v15  ;;  %v946_v28 = vmax.f32 %v914_v22, 0.0 }
  0xc7   : > { %v931_v19 = vmax.f32 %v899_v17, 0.0  ;;  %v671_v20 = vpop.f32.mrf.mxu2 }
  0xc8   : > { %v760_v21 = vpop.f32.mrf.mxu3 }
  0xc9   : > { %v1372_v23 = vpack.c.bf16 %v931_v19, %v930_v18  ;;  %v761_v24 = vadd.f32 %v760_v21, %v671_v20  ;;  %v634_v25 = vpop.f32.mrf.mxu0 }
  0xca   : > { %v723_v26 = vpop.f32.mrf.mxu1 }
  0xcb   : > { %1444 = vst [vmem:[%s1696_s8 + $0x8] sm:$0xff] %v1372_v23   ;;  %v915_v27 = vadd.f32 %v1688_v51, %v761_v24  ;;  %v724_v31 = vadd.f32 %v723_v26, %v634_v25 }
  0xcd   : > { %v947_v29 = vmax.f32 %v915_v27, 0.0  ;;  %v900_v36 = vadd.f32 %v1688_v51, %v724_v31 }
  0xcf   : > { %v1412_v30 = vpack.c.bf16 %v947_v29, %v946_v28  ;;  %v674_v32 = vpop.f32.mrf.mxu2  ;;  %v932_v40 = vmax.f32 %v900_v36, 0.0 }
  0xd0   : > { %v763_v33 = vpop.f32.mrf.mxu3 }
  0xd1   : > { %1452 = vst [vmem:[%s1696_s8 + $0x48] sm:$0xff] %v1412_v30   ;;  %v636_v34 = vpop.f32.mrf.mxu0  ;;  %v764_v38 = vadd.f32 %v763_v33, %v674_v32 }
  0xd2   : > { %v725_v35 = vpop.f32.mrf.mxu1 }
  0xd3   : > { %v726_v37 = vadd.f32 %v725_v35, %v636_v34  ;;  %v916_v44 = vadd.f32 %v1688_v51, %v764_v38 }
  0xd5   : > { %v901_v39 = vadd.f32 %v1688_v51, %v726_v37  ;;  %v948_v50 = vmax.f32 %v916_v44, 0.0 }
  0xd7   : > { %v933_v41 = vmax.f32 %v901_v39, 0.0  ;;  %v676_v42 = vpop.f32.mrf.mxu2 }
  0xd8   : > { %v765_v43 = vpop.f32.mrf.mxu3 }
  0xd9   : > { %v1377_v45 = vpack.c.bf16 %v933_v41, %v932_v40  ;;  %v766_v46 = vadd.f32 %v765_v43, %v676_v42  ;;  %v639_v47 = vpop.f32.mrf.mxu0 }
  0xda   : > { %v728_v48 = vpop.f32.mrf.mxu1 }
  0xdb   : > { %1445 = vst [vmem:[%s1696_s8 + $0x10] sm:$0xff] %v1377_v45   ;;  %v917_v49 = vadd.f32 %v1688_v51, %v766_v46  ;;  %v729_v54 = vadd.f32 %v728_v48, %v639_v47 }
  0xdd   : > { %v949_v52 = vmax.f32 %v917_v49, 0.0  ;;  %v902_v59 = vadd.f32 %v1688_v51, %v729_v54 }
  0xdf   : > { %v1417_v53 = vpack.c.bf16 %v949_v52, %v948_v50  ;;  %v679_v55 = vpop.f32.mrf.mxu2  ;;  %v934_v63 = vmax.f32 %v902_v59, 0.0 }
  0xe0   : > { %v768_v56 = vpop.f32.mrf.mxu3 }
  0xe1   : > { %1453 = vst [vmem:[%s1696_s8 + $0x50] sm:$0xff] %v1417_v53   ;;  %v641_v57 = vpop.f32.mrf.mxu0  ;;  %v769_v61 = vadd.f32 %v768_v56, %v679_v55 }
  0xe2   : > { %v730_v58 = vpop.f32.mrf.mxu1 }
  0xe3   : > { %v731_v60 = vadd.f32 %v730_v58, %v641_v57  ;;  %v918_v3 = vadd.f32 %v1688_v51, %v769_v61 }
  0xe5   : > { %v903_v62 = vadd.f32 %v1688_v51, %v731_v60  ;;  %v950_v9 = vmax.f32 %v918_v3, 0.0 }
  0xe7   : > { %v935_v0 = vmax.f32 %v903_v62, 0.0  ;;  %v681_v1 = vpop.f32.mrf.mxu2 }
  0xe8   : > { %v770_v2 = vpop.f32.mrf.mxu3 }
  0xe9   : > { %v1382_v4 = vpack.c.bf16 %v935_v0, %v934_v63  ;;  %v771_v5 = vadd.f32 %v770_v2, %v681_v1  ;;  %v644_v6 = vpop.f32.mrf.mxu0 }
  0xea   : > { %v733_v7 = vpop.f32.mrf.mxu1 }
  0xeb   : > { %1446 = vst [vmem:[%s1696_s8 + $0x18] sm:$0xff] %v1382_v4   ;;  %v919_v8 = vadd.f32 %v1688_v51, %v771_v5  ;;  %v734_v12 = vadd.f32 %v733_v7, %v644_v6 }
  0xed   : > { %v951_v10 = vmax.f32 %v919_v8, 0.0  ;;  %v904_v17 = vadd.f32 %v1688_v51, %v734_v12 }
  0xef   : > { %v1422_v11 = vpack.c.bf16 %v951_v10, %v950_v9  ;;  %v684_v13 = vpop.f32.mrf.mxu2  ;;  %v936_v21 = vmax.f32 %v904_v17, 0.0 }
  0xf0   : > { %v773_v14 = vpop.f32.mrf.mxu3 }
  0xf1   : > { %1454 = vst [vmem:[%s1696_s8 + $0x58] sm:$0xff] %v1422_v11   ;;  %v646_v15 = vpop.f32.mrf.mxu0  ;;  %v774_v19 = vadd.f32 %v773_v14, %v684_v13 }
  0xf2   : > { %v735_v16 = vpop.f32.mrf.mxu1 }
  0xf3   : > { %v736_v18 = vadd.f32 %v735_v16, %v646_v15  ;;  %v920_v25 = vadd.f32 %v1688_v51, %v774_v19 }
  0xf5   : > { %v905_v20 = vadd.f32 %v1688_v51, %v736_v18  ;;  %v952_v31 = vmax.f32 %v920_v25, 0.0 }
  0xf7   : > { %v937_v22 = vmax.f32 %v905_v20, 0.0  ;;  %v686_v23 = vpop.f32.mrf.mxu2 }
  0xf8   : > { %v775_v24 = vpop.f32.mrf.mxu3 }
  0xf9   : > { %v1387_v26 = vpack.c.bf16 %v937_v22, %v936_v21  ;;  %v776_v27 = vadd.f32 %v775_v24, %v686_v23  ;;  %v649_v28 = vpop.f32.mrf.mxu0 }
  0xfa   : > { %v738_v29 = vpop.f32.mrf.mxu1 }
  0xfb   : > { %1447 = vst [vmem:[%s1696_s8 + $0x20] sm:$0xff] %v1387_v26   ;;  %v921_v30 = vadd.f32 %v1688_v51, %v776_v27  ;;  %v739_v34 = vadd.f32 %v738_v29, %v649_v28 }
  0xfd   : > { %v953_v32 = vmax.f32 %v921_v30, 0.0  ;;  %v906_v39 = vadd.f32 %v1688_v51, %v739_v34 }
  0xff   : > { %v1427_v33 = vpack.c.bf16 %v953_v32, %v952_v31  ;;  %v689_v35 = vpop.f32.mrf.mxu2  ;;  %v938_v43 = vmax.f32 %v906_v39, 0.0 }
 0x100   : > { %v778_v36 = vpop.f32.mrf.mxu3 }
 0x101   : > { %1455 = vst [vmem:[%s1696_s8 + $0x60] sm:$0xff] %v1427_v33   ;;  %v651_v37 = vpop.f32.mrf.mxu0  ;;  %v779_v41 = vadd.f32 %v778_v36, %v689_v35 }
 0x102   : > { %v740_v38 = vpop.f32.mrf.mxu1 }
 0x103   : > { %v741_v40 = vadd.f32 %v740_v38, %v651_v37  ;;  %v922_v47 = vadd.f32 %v1688_v51, %v779_v41 }
 0x105   : > { %v907_v42 = vadd.f32 %v1688_v51, %v741_v40  ;;  %v954_v54 = vmax.f32 %v922_v47, 0.0 }
 0x107   : > { %v939_v44 = vmax.f32 %v907_v42, 0.0  ;;  %v691_v45 = vpop.f32.mrf.mxu2 }
 0x108   : > { %v780_v46 = vpop.f32.mrf.mxu3 }
 0x109   : > { %v1392_v48 = vpack.c.bf16 %v939_v44, %v938_v43  ;;  %v781_v49 = vadd.f32 %v780_v46, %v691_v45  ;;  %v654_v50 = vpop.f32.mrf.mxu0 }
 0x10a   : > { %v743_v52 = vpop.f32.mrf.mxu1 }
 0x10b   : > { %1448 = vst [vmem:[%s1696_s8 + $0x28] sm:$0xff] %v1392_v48   ;;  %v923_v53 = vadd.f32 %v1688_v51, %v781_v49  ;;  %v744_v57 = vadd.f32 %v743_v52, %v654_v50 }
 0x10d   : > { %v955_v55 = vmax.f32 %v923_v53, 0.0  ;;  %v908_v62 = vadd.f32 %v1688_v51, %v744_v57 }
 0x10f   : > { %v1432_v56 = vpack.c.bf16 %v955_v55, %v954_v54  ;;  %v694_v58 = vpop.f32.mrf.mxu2  ;;  %v940_v2 = vmax.f32 %v908_v62, 0.0 }
 0x110   : > { %v783_v59 = vpop.f32.mrf.mxu3 }
 0x111   : > { %1456 = vst [vmem:[%s1696_s8 + $0x68] sm:$0xff] %v1432_v56   ;;  %v656_v60 = vpop.f32.mrf.mxu0  ;;  %v784_v0 = vadd.f32 %v783_v59, %v694_v58 }
 0x112   : > { %v745_v61 = vpop.f32.mrf.mxu1 }
 0x113   : > { %v746_v63 = vadd.f32 %v745_v61, %v656_v60  ;;  %v924_v6 = vadd.f32 %v1688_v51, %v784_v0 }
 0x115   : > { %v909_v1 = vadd.f32 %v1688_v51, %v746_v63  ;;  %v956_v12 = vmax.f32 %v924_v6, 0.0 }
 0x117   : > { %v941_v3 = vmax.f32 %v909_v1, 0.0  ;;  %v696_v4 = vpop.f32.mrf.mxu2 }
 0x118   : > { %v785_v5 = vpop.f32.mrf.mxu3 }
 0x119   : > { %v1397_v7 = vpack.c.bf16 %v941_v3, %v940_v2  ;;  %v786_v8 = vadd.f32 %v785_v5, %v696_v4  ;;  %v659_v9 = vpop.f32.mrf.mxu0 }
 0x11a   : > { %v748_v10 = vpop.f32.mrf.mxu1 }
 0x11b   : > { %1449 = vst [vmem:[%s1696_s8 + $0x30] sm:$0xff] %v1397_v7   ;;  %v925_v11 = vadd.f32 %v1688_v51, %v786_v8  ;;  %v749_v15 = vadd.f32 %v748_v10, %v659_v9 }
 0x11d   : > { %v957_v13 = vmax.f32 %v925_v11, 0.0  ;;  %v910_v20 = vadd.f32 %v1688_v51, %v749_v15 }
 0x11f   : > { %v1437_v14 = vpack.c.bf16 %v957_v13, %v956_v12  ;;  %v699_v16 = vpop.f32.mrf.mxu2  ;;  %v942_v24 = vmax.f32 %v910_v20, 0.0 }
 0x120   : > { %v788_v17 = vpop.f32.mrf.mxu3 }
 0x121   : > { %1457 = vst [vmem:[%s1696_s8 + $0x70] sm:$0xff] %v1437_v14   ;;  %v661_v18 = vpop.f32.mrf.mxu0  ;;  %v789_v22 = vadd.f32 %v788_v17, %v699_v16 }
 0x122   : > { %v750_v19 = vpop.f32.mrf.mxu1 }
 0x123   : > { %v751_v21 = vadd.f32 %v750_v19, %v661_v18  ;;  %v926_v28 = vadd.f32 %v1688_v51, %v789_v22 }
 0x125   : > { %v911_v23 = vadd.f32 %v1688_v51, %v751_v21  ;;  %v958_v32 = vmax.f32 %v926_v28, 0.0 }
 0x127   : > { %v943_v25 = vmax.f32 %v911_v23, 0.0  ;;  %v701_v26 = vpop.f32.mrf.mxu2 }
 0x128   : > { %v790_v27 = vpop.f32.mrf.mxu3 }
 0x129   : > { %v1402_v29 = vpack.c.bf16 %v943_v25, %v942_v24  ;;  %v791_v30 = vadd.f32 %v790_v27, %v701_v26 }
 0x12b   : > { %1450 = vst [vmem:[%s1696_s8 + $0x38] sm:$0xff] %v1402_v29   ;;  %v927_v31 = vadd.f32 %v1688_v51, %v791_v30 }
 0x12d   : > { %v959_v33 = vmax.f32 %v927_v31, 0.0 }
 0x12f   : > { %v1442_v34 = vpack.c.bf16 %v959_v33, %v958_v32 }
 0x131   : > { %1458 = vst [vmem:[%s1696_s8 + $0x78] sm:$0xff] %v1442_v34  }
 0x132 PF: > { %s13_s14 = sadd.s32 1, %s1522_s14   ;;  %s1757_s12 = smov %s1518_s13 }
 0x133   : > { %p10_p5 = scmp.ge.s32.totalorder %s13_s14, 4   ;;  %s1758_s13 = smov %s1760_s15 }
 0x135   :  { %12 = sbr.rel (!%p10_p5) target bundleno = 2 (0x2), region = 73 }

// kernel: resnet_embedder_forward.25
= control target key start
LH: loop header
LB: loop body
LE: loop exit
PB: predicated region body
PF: predicated region fallthrough
CT: control target
= control target key end

     0   :  { %s1787_s15 = smov 0   ;;  %s1789_s16 = smov 0   ;;  %s2021_s0 = inlined_call_operand.vmem [shape: bf16[512,256], index: 0, kind: input, shape index: {}]   ;;  %s2022_s1 = inlined_call_operand.vmem [shape: bf16[256,128], index: 1, kind: input, shape index: {}]   ;;  %s2023_s2 = inlined_call_operand.vmem [shape: f32[1,128], index: 2, kind: input, shape index: {}]   ;;  %s2024_s3 = inlined_call_operand.vmem [shape: bf16[512,128], index: 3, kind: input, shape index: {}]   ;;  %s2025_s4 = inlined_call_operand.vmem [shape: bf16[512,128], index: 4, kind: output, shape index: {}]  }
   0x1   :  { %s1791_s17 = smov 0  }
   0x2 LB: > { %s26_s18 = sadd.s32 1, %s1756_s16  ;;  %p1272_p0 = scmp.ge.s32.totalorder %s1760_s17, 1  ;;  %s1760_s17 = sphi %s1791_s17, %s14_s17   ;;  %s1756_s16 = sphi %s1789_s16, %s2027_s16   ;;  %s1752_s15 = sphi %s1787_s15, %s2026_s15  }
   0x3   : > { %p28_p1 = scmp.ge.s32.totalorder %s26_s18, 2  ;;  %p205_p2 = scmp.lt.s32.totalorder %s1760_s17, 3 }
   0x5   : > { %s2029_s18 = smov (%p28_p1, %s26_s18), 0  ;;  %p206_p3 = pnand %p1272_p0, %p205_p2 }
   0x6   : > { %s1273_s5 = sshll.u32 (!%p206_p3), %s1752_s15, 5 }
   0x7   : > { %209 = sbr.rel (%p206_p3) target bundleno = 308 (0x134), region = 36  ;;  %p248_p4 = scmp.lt.s32.totalorder (!%p206_p3), %s1273_s5, 63 }
   0xc   : > { %v1514_v0 = vld [vmem:[%s2022_s1 + $0x38] sm:$0xff]  ;;  %v1513_v2 = vld [vmem:[%s2022_s1 + $0x30] sm:$0xff]  ;;  %v1512_v4 = vld [vmem:[%s2022_s1 + $0x28] sm:$0xff]  ;;  %s2031_s5 = smov (!%p248_p4, %s1273_s5), 63 }
   0xd   : > { %v1522_v1 = vld [vmem:[%s2022_s1 + $0x78] sm:$0xff]  ;;  %664 = vmatpush.bf16.msra.mxu0 %v1514_v0  ;;  %1697 = vmatpush.bf16.msra.mxu2 %v1514_v0  ;;  %v1521_v3 = vld [vmem:[%s2022_s1 + $0x70] sm:$0xff]  ;;  %v1520_v5 = vld [vmem:[%s2022_s1 + $0x68] sm:$0xff]  ;;  %s1474_s21 = sshll.u32 %s2031_s5, 3  ;;  %s1277_s8 = sshll.u32 %s2031_s5, 2 }
   0xe   : > { %753 = vmatpush.bf16.msra.mxu1 %v1522_v1  ;;  %1705 = vmatpush.bf16.msra.mxu3 %v1522_v1  ;;  %v1511_v6 = vld [vmem:[%s2022_s1 + $0x20] sm:$0xff]  ;;  %v1510_v8 = vld [vmem:[%s2022_s1 + $0x18] sm:$0xff]  ;;  %v1509_v10 = vld [vmem:[%s2022_s1 + $0x10] sm:$0xff]  ;;  %s1853_s26 = scalar_lea.vmem %s2021_s0, %s1474_s21  ;;  %s1934_s11 = scalar_lea.vmem %s2024_s3, %s1277_s8 }
   0xf   : > { %v1519_v7 = vld [vmem:[%s2022_s1 + $0x60] sm:$0xff]  ;;  %v1518_v9 = vld [vmem:[%s2022_s1 + $0x58] sm:$0xff]  ;;  %v1517_v11 = vld [vmem:[%s2022_s1 + $0x50] sm:$0xff]  ;;  %s1951_s19 = scalar_lea.vmem %s2025_s4, %s1277_s8 }
  0x10   : > { %v1508_v12 = vld [vmem:[%s2022_s1 + $0x8] sm:$0xff]  ;;  %v1507_v14 = vld [vmem:[%s2022_s1] sm:$0xff]  ;;  %v1290_v28 = vld [vmem:[%s1853_s26 + $0x10] sm:$0xf] }
  0x11   : > { %665 = vmatpush.bf16.msra.mxu0 %v1513_v2  ;;  %1698 = vmatpush.bf16.msra.mxu2 %v1513_v2  ;;  %v1516_v13 = vld [vmem:[%s2022_s1 + $0x48] sm:$0xff]  ;;  %v1515_v15 = vld [vmem:[%s2022_s1 + $0x40] sm:$0xff]  ;;  %v1478_v29 = vld [vmem:[%s1853_s26 + $0x14] sm:$0xf0] }
  0x12   : > { %754 = vmatpush.bf16.msra.mxu1 %v1521_v3  ;;  %1706 = vmatpush.bf16.msra.mxu3 %v1521_v3  ;;  %v1282_v16 = vld [vmem:[%s1853_s26] sm:$0xf]  ;;  %v1476_v17 = vld [vmem:[%s1853_s26 + $0x4] sm:$0xf0]  ;;  %v1475_v20 = vld [vmem:[%s1853_s26 + $0x4] sm:$0xf]  ;;  %v1291_v36 = vor.u32 %v1478_v29, %v1290_v28 }
  0x13   : > { %v1346_v18 = vld [vmem:[%s1853_s26 + $0x80] sm:$0xf]  ;;  %v1492_v19 = vld [vmem:[%s1853_s26 + $0x84] sm:$0xf0]  ;;  %v1284_v21 = vld [vmem:[%s1853_s26 + $0x8] sm:$0xf0]  ;;  %v1283_v24 = vor.u32 %v1476_v17, %v1282_v16 }
  0x14   : > { %v1491_v22 = vld [vmem:[%s1853_s26 + $0x84] sm:$0xf]  ;;  %v1348_v23 = vld [vmem:[%s1853_s26 + $0x88] sm:$0xf0]  ;;  %v1347_v25 = vor.u32 %v1492_v19, %v1346_v18  ;;  %v1287_v26 = vor.u32 %v1475_v20, %v1284_v21  ;;  %v1354_v30 = vld [vmem:[%s1853_s26 + $0x90] sm:$0xf] }
  0x15   : > { %666 = vmatpush.bf16.msra.mxu0 %v1512_v4  ;;  %1699 = vmatpush.bf16.msra.mxu2 %v1512_v4  ;;  %v1351_v27 = vor.u32 %v1491_v22, %v1348_v23  ;;  %v1494_v31 = vld [vmem:[%s1853_s26 + $0x94] sm:$0xf0]  ;;  %v1477_v32 = vld [vmem:[%s1853_s26 + $0x14] sm:$0xf]  ;;  %v1292_v33 = vld [vmem:[%s1853_s26 + $0x18] sm:$0xf0] }
  0x16   : > { %755 = vmatpush.bf16.msra.mxu1 %v1520_v5  ;;  %1707 = vmatpush.bf16.msra.mxu3 %v1520_v5  ;;  %v1493_v34 = vld [vmem:[%s1853_s26 + $0x94] sm:$0xf]  ;;  %v1356_v35 = vld [vmem:[%s1853_s26 + $0x98] sm:$0xf0]  ;;  %v1355_v37 = vor.u32 %v1494_v31, %v1354_v30  ;;  %v1295_v38 = vor.u32 %v1477_v32, %v1292_v33  ;;  %v1298_v40 = vld [vmem:[%s1853_s26 + $0x20] sm:$0xf] }
  0x17   : > { %v1359_v39 = vor.u32 %v1493_v34, %v1356_v35  ;;  %v1480_v41 = vld [vmem:[%s1853_s26 + $0x24] sm:$0xf0]  ;;  %v1362_v42 = vld [vmem:[%s1853_s26 + $0xa0] sm:$0xf]  ;;  %v1479_v44 = vld [vmem:[%s1853_s26 + $0x24] sm:$0xf] }
  0x18   : > { %v1496_v43 = vld [vmem:[%s1853_s26 + $0xa4] sm:$0xf0]  ;;  %v1300_v45 = vld [vmem:[%s1853_s26 + $0x28] sm:$0xf0]  ;;  %v1495_v46 = vld [vmem:[%s1853_s26 + $0xa4] sm:$0xf]  ;;  %v1299_v48 = vor.u32 %v1480_v41, %v1298_v40 }
  0x19   : > { %667 = vmatpush.bf16.msra.mxu0 %v1511_v6  ;;  %1700 = vmatpush.bf16.msra.mxu2 %v1511_v6  ;;  %v1364_v47 = vld [vmem:[%s1853_s26 + $0xa8] sm:$0xf0]  ;;  %v1363_v49 = vor.u32 %v1496_v43, %v1362_v42  ;;  %v1303_v50 = vor.u32 %v1479_v44, %v1300_v45  ;;  %v1306_v52 = vld [vmem:[%s1853_s26 + $0x30] sm:$0xf]  ;;  %v1482_v53 = vld [vmem:[%s1853_s26 + $0x34] sm:$0xf0] }
  0x1a   : > { %756 = vmatpush.bf16.msra.mxu1 %v1519_v7  ;;  %1708 = vmatpush.bf16.msra.mxu3 %v1519_v7  ;;  %v1367_v51 = vor.u32 %v1495_v46, %v1364_v47  ;;  %v1370_v54 = vld [vmem:[%s1853_s26 + $0xb0] sm:$0xf]  ;;  %v1498_v55 = vld [vmem:[%s1853_s26 + $0xb4] sm:$0xf0]  ;;  %v1481_v56 = vld [vmem:[%s1853_s26 + $0x34] sm:$0xf]  ;;  %v1307_v60 = vor.u32 %v1482_v53, %v1306_v52 }
  0x1b   : > { %v1308_v57 = vld [vmem:[%s1853_s26 + $0x38] sm:$0xf0]  ;;  %v1497_v58 = vld [vmem:[%s1853_s26 + $0xb4] sm:$0xf]  ;;  %v1371_v61 = vor.u32 %v1498_v55, %v1370_v54  ;;  %v1314_v0 = vld [vmem:[%s1853_s26 + $0x40] sm:$0xf] }
  0x1c   : > { %v1372_v59 = vld [vmem:[%s1853_s26 + $0xb8] sm:$0xf0]  ;;  %v1311_v62 = vor.u32 %v1481_v56, %v1308_v57  ;;  %v1484_v1 = vld [vmem:[%s1853_s26 + $0x44] sm:$0xf0]  ;;  %v1378_v2 = vld [vmem:[%s1853_s26 + $0xc0] sm:$0xf] }
  0x1d   : > { %668 = vmatpush.bf16.msra.mxu0 %v1510_v8  ;;  %1701 = vmatpush.bf16.msra.mxu2 %v1510_v8  ;;  %v1375_v63 = vor.u32 %v1497_v58, %v1372_v59  ;;  %v1500_v3 = vld [vmem:[%s1853_s26 + $0xc4] sm:$0xf0]  ;;  %v1483_v4 = vld [vmem:[%s1853_s26 + $0x44] sm:$0xf]  ;;  %v1316_v5 = vld [vmem:[%s1853_s26 + $0x48] sm:$0xf0]  ;;  %v1315_v8 = vor.u32 %v1484_v1, %v1314_v0 }
  0x1e   : > { %757 = vmatpush.bf16.msra.mxu1 %v1518_v9  ;;  %1709 = vmatpush.bf16.msra.mxu3 %v1518_v9  ;;  %v1499_v6 = vld [vmem:[%s1853_s26 + $0xc4] sm:$0xf]  ;;  %v1380_v7 = vld [vmem:[%s1853_s26 + $0xc8] sm:$0xf0]  ;;  %v1379_v9 = vor.u32 %v1500_v3, %v1378_v2  ;;  %v1485_v16 = vld [vmem:[%s1853_s26 + $0x54] sm:$0xf] }
  0x1f   : > { %v1324_v17 = vld [vmem:[%s1853_s26 + $0x58] sm:$0xf0]  ;;  %v1501_v18 = vld [vmem:[%s1853_s26 + $0xd4] sm:$0xf]  ;;  %v1487_v28 = vld [vmem:[%s1853_s26 + $0x64] sm:$0xf] }
  0x20   : > { %v1388_v19 = vld [vmem:[%s1853_s26 + $0xd8] sm:$0xf0]  ;;  %v1327_v22 = vor.u32 %v1485_v16, %v1324_v17  ;;  %v1332_v29 = vld [vmem:[%s1853_s26 + $0x68] sm:$0xf0]  ;;  %v1503_v30 = vld [vmem:[%s1853_s26 + $0xe4] sm:$0xf] }
  0x21   : > { %669 = vmatpush.bf16.msra.mxu0 %v1509_v10  ;;  %1702 = vmatpush.bf16.msra.mxu2 %v1509_v10  ;;  %v1319_v10 = vor.u32 %v1483_v4, %v1316_v5  ;;  %v1391_v23 = vor.u32 %v1501_v18, %v1388_v19  ;;  %v1396_v31 = vld [vmem:[%s1853_s26 + $0xe8] sm:$0xf0]  ;;  %v1335_v34 = vor.u32 %v1487_v28, %v1332_v29  ;;  %v1489_v40 = vld [vmem:[%s1853_s26 + $0x74] sm:$0xf]  ;;  %v1340_v41 = vld [vmem:[%s1853_s26 + $0x78] sm:$0xf0] }
  0x22   : > { %758 = vmatpush.bf16.msra.mxu1 %v1517_v11  ;;  %1710 = vmatpush.bf16.msra.mxu3 %v1517_v11  ;;  %v1383_v11 = vor.u32 %v1499_v6, %v1380_v7  ;;  %v1399_v35 = vor.u32 %v1503_v30, %v1396_v31  ;;  %v1505_v42 = vld [vmem:[%s1853_s26 + $0xf4] sm:$0xf]  ;;  %v1404_v43 = vld [vmem:[%s1853_s26 + $0xf8] sm:$0xf0]  ;;  %v1343_v46 = vor.u32 %v1489_v40, %v1340_v41  ;;  %v1524_v52 = vld [vmem:[%s1934_s11] sm:$0xff]  }
  0x23   : > { %v1407_v47 = vor.u32 %v1505_v42, %v1404_v43  ;;  %v1525_v56 = vunpack.c.l.bf16 %v1524_v52  ;;  %v1667_v17 = vld [vmem:[%s1934_s11 + $0x8] sm:$0xff]  }
  0x24   : > { %v1530_v29 = vunpack.c.h.bf16 %v1667_v17  ;;  %v1675_v30 = vld [vmem:[%s1934_s11 + $0x48] sm:$0xff]  }
  0x25   : > { %670 = vmatpush.bf16.msra.mxu0 %v1508_v12  ;;  %1703 = vmatpush.bf16.msra.mxu2 %v1508_v12  ;;  %v1322_v12 = vld [vmem:[%s1853_s26 + $0x50] sm:$0xf]  ;;  %v1562_v41 = vunpack.c.h.bf16 %v1675_v30 }
  0x26   : > { %759 = vmatpush.bf16.msra.mxu1 %v1516_v13  ;;  %1711 = vmatpush.bf16.msra.mxu3 %v1516_v13  ;;  %v1486_v13 = vld [vmem:[%s1853_s26 + $0x54] sm:$0xf0] }
  0x27   : > { %v1323_v20 = vor.u32 %v1486_v13, %v1322_v12 }
  0x29   : > { %671 = vmatpush.bf16.msra.mxu0 %v1507_v14  ;;  %1704 = vmatpush.bf16.msra.mxu2 %v1507_v14  ;;  %v1386_v14 = vld [vmem:[%s1853_s26 + $0xd0] sm:$0xf] }
  0x2a   : > { %760 = vmatpush.bf16.msra.mxu1 %v1515_v15  ;;  %1712 = vmatpush.bf16.msra.mxu3 %v1515_v15  ;;  %v1502_v15 = vld [vmem:[%s1853_s26 + $0xd4] sm:$0xf0] }
  0x2b   : > { %v1387_v21 = vor.u32 %v1502_v15, %v1386_v14 }
  0x2c   : > { %672 = vmatmul.bf16.vlgmr.msra.gmra.mxu0 %v1283_v24  ;;  %712 = vmatmul.bf16.vlgmr.msra.gmra.mxu2 %v1347_v25  ;;  %v1330_v24 = vld [vmem:[%s1853_s26 + $0x60] sm:$0xf]  ;;  %v1488_v25 = vld [vmem:[%s1853_s26 + $0x64] sm:$0xf0] }
  0x2d   : > { %761 = vmatmul.bf16.vlgmr.msra.gmra.mxu1 %v1287_v26  ;;  %801 = vmatmul.bf16.vlgmr.msra.gmra.mxu3 %v1351_v27  ;;  %v1394_v26 = vld [vmem:[%s1853_s26 + $0xe0] sm:$0xf]  ;;  %v1504_v27 = vld [vmem:[%s1853_s26 + $0xe4] sm:$0xf0]  ;;  %v1331_v32 = vor.u32 %v1488_v25, %v1330_v24  ;;  %v1529_v24 = vunpack.c.l.bf16 %v1667_v17 }
  0x2e   : > { %v1395_v33 = vor.u32 %v1504_v27, %v1394_v26 }
  0x3c   : > { %677 = vmatmul.bf16.gmra.mxu0 %v1291_v36  ;;  %717 = vmatmul.bf16.gmra.mxu2 %v1355_v37  ;;  %v1338_v36 = vld [vmem:[%s1853_s26 + $0x70] sm:$0xf]  ;;  %v1490_v37 = vld [vmem:[%s1853_s26 + $0x74] sm:$0xf0] }
  0x3d   : > { %766 = vmatmul.bf16.gmra.mxu1 %v1295_v38  ;;  %806 = vmatmul.bf16.gmra.mxu3 %v1359_v39  ;;  %v1402_v38 = vld [vmem:[%s1853_s26 + $0xf0] sm:$0xf]  ;;  %v1506_v39 = vld [vmem:[%s1853_s26 + $0xf4] sm:$0xf0]  ;;  %v1339_v44 = vor.u32 %v1490_v37, %v1338_v36 }
  0x3e   : > { %v1403_v45 = vor.u32 %v1506_v39, %v1402_v38 }
  0x4c   : > { %682 = vmatmul.bf16.gmra.mxu0 %v1299_v48  ;;  %722 = vmatmul.bf16.gmra.mxu2 %v1363_v49 }
  0x4d   : > { %771 = vmatmul.bf16.gmra.mxu1 %v1303_v50  ;;  %811 = vmatmul.bf16.gmra.mxu3 %v1367_v51  ;;  %v1939_v51 = vld [vmem:[%s2023_s2] ss:$0 sm:$0xff] }
  0x5c   : > { %687 = vmatmul.bf16.gmra.mxu0 %v1307_v60  ;;  %727 = vmatmul.bf16.gmra.mxu2 %v1371_v61  ;;  %v1526_v61 = vunpack.c.h.bf16 %v1524_v52 }
  0x5d   : > { %776 = vmatmul.bf16.gmra.mxu1 %v1311_v62  ;;  %816 = vmatmul.bf16.gmra.mxu3 %v1375_v63  ;;  %v1674_v62 = vld [vmem:[%s1934_s11 + $0x40] sm:$0xff]  }
  0x5e   : > { %v1557_v2 = vunpack.c.l.bf16 %v1674_v62 }
  0x6c   : > { %692 = vmatmul.bf16.gmra.mxu0 %v1315_v8  ;;  %732 = vmatmul.bf16.gmra.mxu2 %v1379_v9  ;;  %v1558_v9 = vunpack.c.h.bf16 %v1674_v62 }
  0x6d   : > { %781 = vmatmul.bf16.gmra.mxu1 %v1319_v10  ;;  %821 = vmatmul.bf16.gmra.mxu3 %v1383_v11 }
  0x7c   : > { %697 = vmatmul.bf16.gmra.mxu0 %v1323_v20  ;;  %737 = vmatmul.bf16.gmra.mxu2 %v1387_v21 }
  0x7d   : > { %786 = vmatmul.bf16.gmra.mxu1 %v1327_v22  ;;  %826 = vmatmul.bf16.gmra.mxu3 %v1391_v23 }
  0x8c   : > { %702 = vmatmul.bf16.gmra.mxu0 %v1331_v32  ;;  %742 = vmatmul.bf16.gmra.mxu2 %v1395_v33 }
  0x8d   : > { %791 = vmatmul.bf16.gmra.mxu1 %v1335_v34  ;;  %831 = vmatmul.bf16.gmra.mxu3 %v1399_v35  ;;  %v1561_v34 = vunpack.c.l.bf16 %v1675_v30 }
  0x9c   : > { %707 = vmatmul.bf16.gmra.mxu0 %v1339_v44  ;;  %747 = vmatmul.bf16.gmra.mxu2 %v1403_v45 }
  0x9d   : > { %796 = vmatmul.bf16.gmra.mxu1 %v1343_v46  ;;  %836 = vmatmul.bf16.gmra.mxu3 %v1407_v47 }
  0xa9   : > { %v673_v48 = vpop.f32.mrf.mxu0 }
  0xaa   : > { %v762_v49 = vpop.f32.mrf.mxu1 }
  0xab   : > { %v763_v50 = vadd.f32 %v762_v49, %v673_v48  ;;  %v1668_v49 = vld [vmem:[%s1934_s11 + $0x10] sm:$0xff]  }
  0xac   : > { %v1534_v62 = vunpack.c.h.bf16 %v1668_v49 }
  0xad   : > { %v945_v55 = vadd.f32 %v1939_v51, %v763_v50 }
  0xaf   : > { %v713_v53 = vpop.f32.mrf.mxu2  ;;  %v1041_v63 = vadd.f32 %v1525_v56, %v945_v55 }
  0xb0   : > { %v802_v54 = vpop.f32.mrf.mxu3 }
  0xb1   : > { %v675_v57 = vpop.f32.mrf.mxu0  ;;  %v803_v59 = vadd.f32 %v802_v54, %v713_v53  ;;  %v1073_v6 = vmax.f32 %v1041_v63, 0.0  ;;  %v1676_v63 = vld [vmem:[%s1934_s11 + $0x50] sm:$0xff]  }
  0xb2   : > { %v764_v58 = vpop.f32.mrf.mxu1 }
  0xb3   : > { %v765_v60 = vadd.f32 %v764_v58, %v675_v57  ;;  %v961_v1 = vadd.f32 %v1939_v51, %v803_v59  ;;  %v1533_v57 = vunpack.c.l.bf16 %v1668_v49 }
  0xb5   : > { %v946_v0 = vadd.f32 %v1939_v51, %v765_v60  ;;  %v1057_v12 = vadd.f32 %v1557_v2, %v961_v1 }
  0xb7   : > { %v1042_v3 = vadd.f32 %v1526_v61, %v946_v0  ;;  %v715_v4 = vpop.f32.mrf.mxu2  ;;  %v1089_v18 = vmax.f32 %v1057_v12, 0.0 }
  0xb8   : > { %v804_v5 = vpop.f32.mrf.mxu3 }
  0xb9   : > { %v1074_v7 = vmax.f32 %v1042_v3, 0.0  ;;  %v805_v8 = vadd.f32 %v804_v5, %v715_v4  ;;  %v678_v10 = vpop.f32.mrf.mxu0  ;;  %v1565_v3 = vunpack.c.l.bf16 %v1676_v63 }
  0xba   : > { %v767_v11 = vpop.f32.mrf.mxu1 }
  0xbb   : > { %v1590_v13 = vpack.c.bf16 %v1074_v7, %v1073_v6  ;;  %v962_v14 = vadd.f32 %v1939_v51, %v805_v8  ;;  %v768_v16 = vadd.f32 %v767_v11, %v678_v10  ;;  %v1566_v10 = vunpack.c.h.bf16 %v1676_v63 }
  0xbd   : > { %1591 = vst [vmem:[%s1951_s19] sm:$0xff] %v1590_v13   ;;  %v1058_v15 = vadd.f32 %v1558_v9, %v962_v14  ;;  %v947_v23 = vadd.f32 %v1939_v51, %v768_v16 }
  0xbf   : > { %v1090_v19 = vmax.f32 %v1058_v15, 0.0  ;;  %v718_v20 = vpop.f32.mrf.mxu2  ;;  %v1043_v31 = vadd.f32 %v1529_v24, %v947_v23 }
  0xc0   : > { %v807_v21 = vpop.f32.mrf.mxu3 }
  0xc1   : > { %v1630_v22 = vpack.c.bf16 %v1090_v19, %v1089_v18  ;;  %v680_v25 = vpop.f32.mrf.mxu0  ;;  %v808_v27 = vadd.f32 %v807_v21, %v718_v20  ;;  %v1075_v38 = vmax.f32 %v1043_v31, 0.0  ;;  %v1669_v18 = vld [vmem:[%s1934_s11 + $0x18] sm:$0xff]  }
  0xc2   : > { %v769_v26 = vpop.f32.mrf.mxu1  ;;  %v1538_v30 = vunpack.c.h.bf16 %v1669_v18  ;;  %v1677_v31 = vld [vmem:[%s1934_s11 + $0x58] sm:$0xff]  }
  0xc3   : > { %1689 = vst [vmem:[%s1951_s19 + $0x40] sm:$0xff] %v1630_v22   ;;  %v770_v28 = vadd.f32 %v769_v26, %v680_v25  ;;  %v963_v33 = vadd.f32 %v1939_v51, %v808_v27  ;;  %v1537_v25 = vunpack.c.l.bf16 %v1669_v18 }
  0xc5   : > { %v948_v32 = vadd.f32 %v1939_v51, %v770_v28  ;;  %v1059_v44 = vadd.f32 %v1561_v34, %v963_v33 }
  0xc7   : > { %v1044_v35 = vadd.f32 %v1530_v29, %v948_v32  ;;  %v720_v36 = vpop.f32.mrf.mxu2  ;;  %v1091_v50 = vmax.f32 %v1059_v44, 0.0 }
  0xc8   : > { %v809_v37 = vpop.f32.mrf.mxu3 }
  0xc9   : > { %v1076_v39 = vmax.f32 %v1044_v35, 0.0  ;;  %v810_v40 = vadd.f32 %v809_v37, %v720_v36  ;;  %v683_v42 = vpop.f32.mrf.mxu0  ;;  %v1569_v35 = vunpack.c.l.bf16 %v1677_v31 }
  0xca   : > { %v772_v43 = vpop.f32.mrf.mxu1 }
  0xcb   : > { %v1595_v45 = vpack.c.bf16 %v1076_v39, %v1075_v38  ;;  %v964_v46 = vadd.f32 %v1939_v51, %v810_v40  ;;  %v773_v48 = vadd.f32 %v772_v43, %v683_v42  ;;  %v1570_v42 = vunpack.c.h.bf16 %v1677_v31 }
  0xcd   : > { %1682 = vst [vmem:[%s1951_s19 + $0x8] sm:$0xff] %v1595_v45   ;;  %v1060_v47 = vadd.f32 %v1562_v41, %v964_v46  ;;  %v949_v56 = vadd.f32 %v1939_v51, %v773_v48 }
  0xcf   : > { %v1092_v52 = vmax.f32 %v1060_v47, 0.0  ;;  %v723_v53 = vpop.f32.mrf.mxu2  ;;  %v1045_v0 = vadd.f32 %v1533_v57, %v949_v56 }
  0xd0   : > { %v812_v54 = vpop.f32.mrf.mxu3 }
  0xd1   : > { %v1635_v55 = vpack.c.bf16 %v1092_v52, %v1091_v50  ;;  %v685_v58 = vpop.f32.mrf.mxu0  ;;  %v813_v60 = vadd.f32 %v812_v54, %v723_v53  ;;  %v1077_v7 = vmax.f32 %v1045_v0, 0.0  ;;  %v1670_v50 = vld [vmem:[%s1934_s11 + $0x20] sm:$0xff]  }
  0xd2   : > { %v774_v59 = vpop.f32.mrf.mxu1  ;;  %v1542_v63 = vunpack.c.h.bf16 %v1670_v50  ;;  %v1678_v0 = vld [vmem:[%s1934_s11 + $0x60] sm:$0xff]  }
  0xd3   : > { %1690 = vst [vmem:[%s1951_s19 + $0x48] sm:$0xff] %v1635_v55   ;;  %v775_v61 = vadd.f32 %v774_v59, %v685_v58  ;;  %v965_v2 = vadd.f32 %v1939_v51, %v813_v60  ;;  %v1541_v58 = vunpack.c.l.bf16 %v1670_v50 }
  0xd5   : > { %v950_v1 = vadd.f32 %v1939_v51, %v775_v61  ;;  %v1061_v13 = vadd.f32 %v1565_v3, %v965_v2 }
  0xd7   : > { %v1046_v4 = vadd.f32 %v1534_v62, %v950_v1  ;;  %v725_v5 = vpop.f32.mrf.mxu2  ;;  %v1093_v19 = vmax.f32 %v1061_v13, 0.0 }
  0xd8   : > { %v814_v6 = vpop.f32.mrf.mxu3 }
  0xd9   : > { %v1078_v8 = vmax.f32 %v1046_v4, 0.0  ;;  %v815_v9 = vadd.f32 %v814_v6, %v725_v5  ;;  %v688_v11 = vpop.f32.mrf.mxu0  ;;  %v1573_v4 = vunpack.c.l.bf16 %v1678_v0 }
  0xda   : > { %v777_v12 = vpop.f32.mrf.mxu1 }
  0xdb   : > { %v1600_v14 = vpack.c.bf16 %v1078_v8, %v1077_v7  ;;  %v966_v15 = vadd.f32 %v1939_v51, %v815_v9  ;;  %v778_v17 = vadd.f32 %v777_v12, %v688_v11  ;;  %v1574_v11 = vunpack.c.h.bf16 %v1678_v0 }
  0xdd   : > { %1683 = vst [vmem:[%s1951_s19 + $0x10] sm:$0xff] %v1600_v14   ;;  %v1062_v16 = vadd.f32 %v1566_v10, %v966_v15  ;;  %v951_v24 = vadd.f32 %v1939_v51, %v778_v17 }
  0xdf   : > { %v1094_v20 = vmax.f32 %v1062_v16, 0.0  ;;  %v728_v21 = vpop.f32.mrf.mxu2  ;;  %v1047_v32 = vadd.f32 %v1537_v25, %v951_v24 }
  0xe0   : > { %v817_v22 = vpop.f32.mrf.mxu3 }
  0xe1   : > { %v1640_v23 = vpack.c.bf16 %v1094_v20, %v1093_v19  ;;  %v690_v26 = vpop.f32.mrf.mxu0  ;;  %v818_v28 = vadd.f32 %v817_v22, %v728_v21  ;;  %v1079_v39 = vmax.f32 %v1047_v32, 0.0  ;;  %v1671_v19 = vld [vmem:[%s1934_s11 + $0x28] sm:$0xff]  }
  0xe2   : > { %v779_v27 = vpop.f32.mrf.mxu1  ;;  %v1546_v31 = vunpack.c.h.bf16 %v1671_v19  ;;  %v1679_v32 = vld [vmem:[%s1934_s11 + $0x68] sm:$0xff]  }
  0xe3   : > { %1691 = vst [vmem:[%s1951_s19 + $0x50] sm:$0xff] %v1640_v23   ;;  %v780_v29 = vadd.f32 %v779_v27, %v690_v26  ;;  %v967_v34 = vadd.f32 %v1939_v51, %v818_v28  ;;  %v1545_v26 = vunpack.c.l.bf16 %v1671_v19 }
  0xe5   : > { %v952_v33 = vadd.f32 %v1939_v51, %v780_v29  ;;  %v1063_v45 = vadd.f32 %v1569_v35, %v967_v34 }
  0xe7   : > { %v1048_v36 = vadd.f32 %v1538_v30, %v952_v33  ;;  %v730_v37 = vpop.f32.mrf.mxu2  ;;  %v1095_v52 = vmax.f32 %v1063_v45, 0.0 }
  0xe8   : > { %v819_v38 = vpop.f32.mrf.mxu3 }
  0xe9   : > { %v1080_v40 = vmax.f32 %v1048_v36, 0.0  ;;  %v820_v41 = vadd.f32 %v819_v38, %v730_v37  ;;  %v693_v43 = vpop.f32.mrf.mxu0  ;;  %v1577_v36 = vunpack.c.l.bf16 %v1679_v32 }
  0xea   : > { %v782_v44 = vpop.f32.mrf.mxu1 }
  0xeb   : > { %v1605_v46 = vpack.c.bf16 %v1080_v40, %v1079_v39  ;;  %v968_v47 = vadd.f32 %v1939_v51, %v820_v41  ;;  %v783_v49 = vadd.f32 %v782_v44, %v693_v43  ;;  %v1578_v43 = vunpack.c.h.bf16 %v1679_v32 }
  0xed   : > { %1684 = vst [vmem:[%s1951_s19 + $0x18] sm:$0xff] %v1605_v46   ;;  %v1064_v48 = vadd.f32 %v1570_v42, %v968_v47  ;;  %v953_v57 = vadd.f32 %v1939_v51, %v783_v49 }
  0xef   : > { %v1096_v53 = vmax.f32 %v1064_v48, 0.0  ;;  %v733_v54 = vpop.f32.mrf.mxu2  ;;  %v1049_v1 = vadd.f32 %v1541_v58, %v953_v57 }
  0xf0   : > { %v822_v55 = vpop.f32.mrf.mxu3 }
  0xf1   : > { %v1645_v56 = vpack.c.bf16 %v1096_v53, %v1095_v52  ;;  %v695_v59 = vpop.f32.mrf.mxu0  ;;  %v823_v61 = vadd.f32 %v822_v55, %v733_v54  ;;  %v1081_v8 = vmax.f32 %v1049_v1, 0.0  ;;  %v1672_v52 = vld [vmem:[%s1934_s11 + $0x30] sm:$0xff]  }
  0xf2   : > { %v784_v60 = vpop.f32.mrf.mxu1  ;;  %v1550_v0 = vunpack.c.h.bf16 %v1672_v52  ;;  %v1680_v1 = vld [vmem:[%s1934_s11 + $0x70] sm:$0xff]  }
  0xf3   : > { %1692 = vst [vmem:[%s1951_s19 + $0x58] sm:$0xff] %v1645_v56   ;;  %v785_v62 = vadd.f32 %v784_v60, %v695_v59  ;;  %v969_v3 = vadd.f32 %v1939_v51, %v823_v61  ;;  %v1549_v59 = vunpack.c.l.bf16 %v1672_v52 }
  0xf5   : > { %v954_v2 = vadd.f32 %v1939_v51, %v785_v62  ;;  %v1065_v14 = vadd.f32 %v1573_v4, %v969_v3 }
  0xf7   : > { %v1050_v5 = vadd.f32 %v1542_v63, %v954_v2  ;;  %v735_v6 = vpop.f32.mrf.mxu2  ;;  %v1097_v20 = vmax.f32 %v1065_v14, 0.0 }
  0xf8   : > { %v824_v7 = vpop.f32.mrf.mxu3 }
  0xf9   : > { %v1082_v9 = vmax.f32 %v1050_v5, 0.0  ;;  %v825_v10 = vadd.f32 %v824_v7, %v735_v6  ;;  %v698_v12 = vpop.f32.mrf.mxu0  ;;  %v1581_v5 = vunpack.c.l.bf16 %v1680_v1 }
  0xfa   : > { %v787_v13 = vpop.f32.mrf.mxu1 }
  0xfb   : > { %v1610_v15 = vpack.c.bf16 %v1082_v9, %v1081_v8  ;;  %v970_v16 = vadd.f32 %v1939_v51, %v825_v10  ;;  %v788_v18 = vadd.f32 %v787_v13, %v698_v12  ;;  %v1582_v12 = vunpack.c.h.bf16 %v1680_v1 }
  0xfd   : > { %1685 = vst [vmem:[%s1951_s19 + $0x20] sm:$0xff] %v1610_v15   ;;  %v1066_v17 = vadd.f32 %v1574_v11, %v970_v16  ;;  %v955_v25 = vadd.f32 %v1939_v51, %v788_v18 }
  0xff   : > { %v1098_v21 = vmax.f32 %v1066_v17, 0.0  ;;  %v738_v22 = vpop.f32.mrf.mxu2  ;;  %v1051_v33 = vadd.f32 %v1545_v26, %v955_v25 }
 0x100   : > { %v827_v23 = vpop.f32.mrf.mxu3 }
 0x101   : > { %v1650_v24 = vpack.c.bf16 %v1098_v21, %v1097_v20  ;;  %v700_v27 = vpop.f32.mrf.mxu0  ;;  %v828_v29 = vadd.f32 %v827_v23, %v738_v22  ;;  %v1083_v40 = vmax.f32 %v1051_v33, 0.0  ;;  %v1673_v20 = vld [vmem:[%s1934_s11 + $0x38] sm:$0xff]  }
 0x102   : > { %v789_v28 = vpop.f32.mrf.mxu1  ;;  %v1554_v32 = vunpack.c.h.bf16 %v1673_v20  ;;  %v1681_v33 = vld [vmem:[%s1934_s11 + $0x78] sm:$0xff]  }
 0x103   : > { %1693 = vst [vmem:[%s1951_s19 + $0x60] sm:$0xff] %v1650_v24   ;;  %v790_v30 = vadd.f32 %v789_v28, %v700_v27  ;;  %v971_v35 = vadd.f32 %v1939_v51, %v828_v29  ;;  %v1553_v27 = vunpack.c.l.bf16 %v1673_v20 }
 0x105   : > { %v956_v34 = vadd.f32 %v1939_v51, %v790_v30  ;;  %v1067_v46 = vadd.f32 %v1577_v36, %v971_v35 }
 0x107   : > { %v1052_v37 = vadd.f32 %v1546_v31, %v956_v34  ;;  %v740_v38 = vpop.f32.mrf.mxu2  ;;  %v1099_v53 = vmax.f32 %v1067_v46, 0.0 }
 0x108   : > { %v829_v39 = vpop.f32.mrf.mxu3 }
 0x109   : > { %v1084_v41 = vmax.f32 %v1052_v37, 0.0  ;;  %v830_v42 = vadd.f32 %v829_v39, %v740_v38  ;;  %v703_v44 = vpop.f32.mrf.mxu0  ;;  %v1585_v37 = vunpack.c.l.bf16 %v1681_v33 }
 0x10a   : > { %v792_v45 = vpop.f32.mrf.mxu1 }
 0x10b   : > { %v1615_v47 = vpack.c.bf16 %v1084_v41, %v1083_v40  ;;  %v972_v48 = vadd.f32 %v1939_v51, %v830_v42  ;;  %v793_v50 = vadd.f32 %v792_v45, %v703_v44  ;;  %v1586_v44 = vunpack.c.h.bf16 %v1681_v33 }
 0x10d   : > { %1686 = vst [vmem:[%s1951_s19 + $0x28] sm:$0xff] %v1615_v47   ;;  %v1068_v49 = vadd.f32 %v1578_v43, %v972_v48  ;;  %v957_v58 = vadd.f32 %v1939_v51, %v793_v50 }
 0x10f   : > { %v1100_v54 = vmax.f32 %v1068_v49, 0.0  ;;  %v743_v55 = vpop.f32.mrf.mxu2  ;;  %v1053_v2 = vadd.f32 %v1549_v59, %v957_v58 }
 0x110   : > { %v832_v56 = vpop.f32.mrf.mxu3 }
 0x111   : > { %v1655_v57 = vpack.c.bf16 %v1100_v54, %v1099_v53  ;;  %v705_v60 = vpop.f32.mrf.mxu0  ;;  %v833_v62 = vadd.f32 %v832_v56, %v743_v55  ;;  %v1085_v9 = vmax.f32 %v1053_v2, 0.0 }
 0x112   : > { %v794_v61 = vpop.f32.mrf.mxu1 }
 0x113   : > { %1694 = vst [vmem:[%s1951_s19 + $0x68] sm:$0xff] %v1655_v57   ;;  %v795_v63 = vadd.f32 %v794_v61, %v705_v60  ;;  %v973_v4 = vadd.f32 %v1939_v51, %v833_v62 }
 0x115   : > { %v958_v3 = vadd.f32 %v1939_v51, %v795_v63  ;;  %v1069_v15 = vadd.f32 %v1581_v5, %v973_v4 }
 0x117   : > { %v1054_v6 = vadd.f32 %v1550_v0, %v958_v3  ;;  %v745_v7 = vpop.f32.mrf.mxu2  ;;  %v1101_v21 = vmax.f32 %v1069_v15, 0.0 }
 0x118   : > { %v834_v8 = vpop.f32.mrf.mxu3 }
 0x119   : > { %v1086_v10 = vmax.f32 %v1054_v6, 0.0  ;;  %v835_v11 = vadd.f32 %v834_v8, %v745_v7  ;;  %v708_v13 = vpop.f32.mrf.mxu0 }
 0x11a   : > { %v797_v14 = vpop.f32.mrf.mxu1 }
 0x11b   : > { %v1620_v16 = vpack.c.bf16 %v1086_v10, %v1085_v9  ;;  %v974_v17 = vadd.f32 %v1939_v51, %v835_v11  ;;  %v798_v19 = vadd.f32 %v797_v14, %v708_v13 }
 0x11d   : > { %1687 = vst [vmem:[%s1951_s19 + $0x30] sm:$0xff] %v1620_v16   ;;  %v1070_v18 = vadd.f32 %v1582_v12, %v974_v17  ;;  %v959_v26 = vadd.f32 %v1939_v51, %v798_v19 }
 0x11f   : > { %v1102_v22 = vmax.f32 %v1070_v18, 0.0  ;;  %v748_v23 = vpop.f32.mrf.mxu2  ;;  %v1055_v34 = vadd.f32 %v1553_v27, %v959_v26 }
 0x120   : > { %v837_v24 = vpop.f32.mrf.mxu3 }
 0x121   : > { %v1660_v25 = vpack.c.bf16 %v1102_v22, %v1101_v21  ;;  %v710_v28 = vpop.f32.mrf.mxu0  ;;  %v838_v30 = vadd.f32 %v837_v24, %v748_v23  ;;  %v1087_v41 = vmax.f32 %v1055_v34, 0.0 }
 0x122   : > { %v799_v29 = vpop.f32.mrf.mxu1 }
 0x123   : > { %1695 = vst [vmem:[%s1951_s19 + $0x70] sm:$0xff] %v1660_v25   ;;  %v800_v31 = vadd.f32 %v799_v29, %v710_v28  ;;  %v975_v36 = vadd.f32 %v1939_v51, %v838_v30 }
 0x125   : > { %v960_v35 = vadd.f32 %v1939_v51, %v800_v31  ;;  %v1071_v45 = vadd.f32 %v1585_v37, %v975_v36 }
 0x127   : > { %v1056_v38 = vadd.f32 %v1554_v32, %v960_v35  ;;  %v750_v39 = vpop.f32.mrf.mxu2  ;;  %v1103_v49 = vmax.f32 %v1071_v45, 0.0 }
 0x128   : > { %v839_v40 = vpop.f32.mrf.mxu3 }
 0x129   : > { %v1088_v42 = vmax.f32 %v1056_v38, 0.0  ;;  %v840_v43 = vadd.f32 %v839_v40, %v750_v39 }
 0x12b   : > { %v1625_v46 = vpack.c.bf16 %v1088_v42, %v1087_v41  ;;  %v976_v47 = vadd.f32 %v1939_v51, %v840_v43 }
 0x12d   : > { %1688 = vst [vmem:[%s1951_s19 + $0x38] sm:$0xff] %v1625_v46   ;;  %v1072_v48 = vadd.f32 %v1586_v44, %v976_v47 }
 0x12f   : > { %v1104_v50 = vmax.f32 %v1072_v48, 0.0 }
 0x131   : > { %v1665_v52 = vpack.c.bf16 %v1104_v50, %v1103_v49 }
 0x133   : > { %1696 = vst [vmem:[%s1951_s19 + $0x78] sm:$0xff] %v1665_v52  }
 0x134 PF: > { %s14_s17 = sadd.s32 1, %s1760_s17   ;;  %s2026_s15 = smov %s1756_s16 }
 0x135   : > { %p11_p5 = scmp.ge.s32.totalorder %s14_s17, 4   ;;  %s2027_s16 = smov %s2029_s18 }
 0x137   :  { %13 = sbr.rel (!%p11_p5) target bundleno = 2 (0x2), region = 80 }

// kernel: resnet_embedder_forward.29
= control target key start
LH: loop header
LB: loop body
LE: loop exit
PB: predicated region body
PF: predicated region fallthrough
CT: control target
= control target key end

     0   :  { %s581_s1 = inlined_call_operand.vmem [shape: bf16[128,128], index: 1, kind: input, shape index: {}]   ;;  %s582_s2 = inlined_call_operand.vmem [shape: f32[1,128], index: 2, kind: input, shape index: {}]   ;;  %s583_s0 = inlined_call_operand.vmem [shape: bf16[128,128], index: 0, kind: input, shape index: {}]   ;;  %s584_s3 = inlined_call_operand.vmem [shape: bf16[128,128], index: 3, kind: output, shape index: {}]  }
   0x1   :  { %v413_v0 = vld [vmem:[%s581_s1 + $0x38] sm:$0xff]  ;;  %v412_v1 = vld [vmem:[%s581_s1 + $0x30] sm:$0xff]  ;;  %v411_v2 = vld [vmem:[%s581_s1 + $0x28] sm:$0xff] }
   0x2   :  { %178 = vmatpush.bf16.msra.mxu0 %v413_v0  ;;  %461 = vmatpush.bf16.msra.mxu1 %v413_v0  ;;  %v410_v3 = vld [vmem:[%s581_s1 + $0x20] sm:$0xff]  ;;  %v409_v4 = vld [vmem:[%s581_s1 + $0x18] sm:$0xff]  ;;  %v408_v5 = vld [vmem:[%s581_s1 + $0x10] sm:$0xff] }
   0x3   :  { %462 = vmatpush.bf16.msra.mxu2 %v413_v0  ;;  %463 = vmatpush.bf16.msra.mxu3 %v413_v0  ;;  %v407_v6 = vld [vmem:[%s581_s1 + $0x8] sm:$0xff]  ;;  %v406_v7 = vld [vmem:[%s581_s1] sm:$0xff]  ;;  %v400_v9 = vld [vmem:[%s583_s0 + $0x10] sm:$0xff] }
   0x4   :  { %v398_v8 = vld [vmem:[%s583_s0] sm:$0xff]  ;;  %v404_v11 = vld [vmem:[%s583_s0 + $0x30] sm:$0xff]  ;;  %v399_v12 = vld [vmem:[%s583_s0 + $0x8] sm:$0xff] }
   0x5   :  { %v402_v10 = vld [vmem:[%s583_s0 + $0x20] sm:$0xff]  ;;  %v401_v13 = vld [vmem:[%s583_s0 + $0x18] sm:$0xff]  ;;  %v403_v14 = vld [vmem:[%s583_s0 + $0x28] sm:$0xff] }
   0x6   :  { %179 = vmatpush.bf16.msra.mxu0 %v412_v1  ;;  %464 = vmatpush.bf16.msra.mxu1 %v412_v1  ;;  %v405_v15 = vld [vmem:[%s583_s0 + $0x38] sm:$0xff]  ;;  %v485_v18 = vld [vmem:[%s582_s2] ss:$0 sm:$0xff] }
   0x7   :  { %465 = vmatpush.bf16.msra.mxu2 %v412_v1  ;;  %466 = vmatpush.bf16.msra.mxu3 %v412_v1 }
   0xa   :  { %180 = vmatpush.bf16.msra.mxu0 %v411_v2  ;;  %467 = vmatpush.bf16.msra.mxu1 %v411_v2 }
   0xb   :  { %468 = vmatpush.bf16.msra.mxu2 %v411_v2  ;;  %469 = vmatpush.bf16.msra.mxu3 %v411_v2 }
   0xe   :  { %181 = vmatpush.bf16.msra.mxu0 %v410_v3  ;;  %470 = vmatpush.bf16.msra.mxu1 %v410_v3 }
   0xf   :  { %471 = vmatpush.bf16.msra.mxu2 %v410_v3  ;;  %472 = vmatpush.bf16.msra.mxu3 %v410_v3 }
  0x12   :  { %182 = vmatpush.bf16.msra.mxu0 %v409_v4  ;;  %473 = vmatpush.bf16.msra.mxu1 %v409_v4 }
  0x13   :  { %474 = vmatpush.bf16.msra.mxu2 %v409_v4  ;;  %475 = vmatpush.bf16.msra.mxu3 %v409_v4 }
  0x16   :  { %183 = vmatpush.bf16.msra.mxu0 %v408_v5  ;;  %476 = vmatpush.bf16.msra.mxu1 %v408_v5 }
  0x17   :  { %477 = vmatpush.bf16.msra.mxu2 %v408_v5  ;;  %478 = vmatpush.bf16.msra.mxu3 %v408_v5 }
  0x1a   :  { %184 = vmatpush.bf16.msra.mxu0 %v407_v6  ;;  %479 = vmatpush.bf16.msra.mxu1 %v407_v6 }
  0x1b   :  { %480 = vmatpush.bf16.msra.mxu2 %v407_v6  ;;  %481 = vmatpush.bf16.msra.mxu3 %v407_v6 }
  0x1e   :  { %185 = vmatpush.bf16.msra.mxu0 %v406_v7  ;;  %482 = vmatpush.bf16.msra.mxu1 %v406_v7 }
  0x1f   :  { %483 = vmatpush.bf16.msra.mxu2 %v406_v7  ;;  %484 = vmatpush.bf16.msra.mxu3 %v406_v7 }
  0x21   :  { %186 = vmatmul.bf16.vlgmr.msra.gmra.mxu0 %v398_v8  ;;  %196 = vmatmul.bf16.vlgmr.msra.gmra.mxu1 %v400_v9 }
  0x22   :  { %206 = vmatmul.bf16.vlgmr.msra.gmra.mxu2 %v402_v10  ;;  %216 = vmatmul.bf16.vlgmr.msra.gmra.mxu3 %v404_v11 }
  0x31   :  { %191 = vmatmul.bf16.gmra.mxu0 %v399_v12  ;;  %201 = vmatmul.bf16.gmra.mxu1 %v401_v13 }
  0x32   :  { %211 = vmatmul.bf16.gmra.mxu2 %v403_v14  ;;  %221 = vmatmul.bf16.gmra.mxu3 %v405_v15 }
  0x9e   :  { %v187_v16 = vpop.f32.mrf.mxu0  ;;  %v197_v17 = vpop.f32.mrf.mxu1 }
  0x9f   :  { %v282_v23 = vadd.f32 %v485_v18, %v187_v16  ;;  %v286_v24 = vadd.f32 %v485_v18, %v197_v17 }
  0xa5   :  { %v207_v19 = vpop.f32.mrf.mxu2  ;;  %v217_v20 = vpop.f32.mrf.mxu3 }
  0xa6   :  { %v189_v21 = vpop.f32.mrf.mxu0  ;;  %v199_v22 = vpop.f32.mrf.mxu1  ;;  %v290_v31 = vadd.f32 %v485_v18, %v207_v19  ;;  %v294_v32 = vadd.f32 %v485_v18, %v217_v20 }
  0xa7   :  { %v283_v25 = vadd.f32 %v485_v18, %v189_v21  ;;  %v287_v26 = vadd.f32 %v485_v18, %v199_v22 }
  0xa9   :  { %v417_v27 = vpack.c.bf16 %v283_v25, %v282_v23  ;;  %v427_v28 = vpack.c.bf16 %v287_v26, %v286_v24 }
  0xab   :  { %418 = vst [vmem:[%s584_s3] sm:$0xff] %v417_v27  }
  0xac   :  { %455 = vst [vmem:[%s584_s3 + $0x10] sm:$0xff] %v427_v28  }
  0xad   :  { %v209_v29 = vpop.f32.mrf.mxu2  ;;  %v219_v30 = vpop.f32.mrf.mxu3 }
  0xae   :  { %v291_v33 = vadd.f32 %v485_v18, %v209_v29  ;;  %v295_v34 = vadd.f32 %v485_v18, %v219_v30  ;;  %v192_v35 = vpop.f32.mrf.mxu0  ;;  %v202_v36 = vpop.f32.mrf.mxu1 }
  0xaf   :  { %v284_v43 = vadd.f32 %v485_v18, %v192_v35  ;;  %v288_v44 = vadd.f32 %v485_v18, %v202_v36 }
  0xb0   :  { %v437_v37 = vpack.c.bf16 %v291_v33, %v290_v31  ;;  %v447_v38 = vpack.c.bf16 %v295_v34, %v294_v32 }
  0xb2   :  { %457 = vst [vmem:[%s584_s3 + $0x20] sm:$0xff] %v437_v37  }
  0xb3   :  { %459 = vst [vmem:[%s584_s3 + $0x30] sm:$0xff] %v447_v38  }
  0xb5   :  { %v212_v39 = vpop.f32.mrf.mxu2  ;;  %v222_v40 = vpop.f32.mrf.mxu3 }
  0xb6   :  { %v194_v41 = vpop.f32.mrf.mxu0  ;;  %v204_v42 = vpop.f32.mrf.mxu1  ;;  %v292_v51 = vadd.f32 %v485_v18, %v212_v39  ;;  %v296_v52 = vadd.f32 %v485_v18, %v222_v40 }
  0xb7   :  { %v285_v45 = vadd.f32 %v485_v18, %v194_v41  ;;  %v289_v46 = vadd.f32 %v485_v18, %v204_v42 }
  0xb9   :  { %v422_v47 = vpack.c.bf16 %v285_v45, %v284_v43  ;;  %v432_v48 = vpack.c.bf16 %v289_v46, %v288_v44 }
  0xbb   :  { %454 = vst [vmem:[%s584_s3 + $0x8] sm:$0xff] %v422_v47  }
  0xbc   :  { %456 = vst [vmem:[%s584_s3 + $0x18] sm:$0xff] %v432_v48  }
  0xbd   :  { %v214_v49 = vpop.f32.mrf.mxu2  ;;  %v224_v50 = vpop.f32.mrf.mxu3 }
  0xbe   :  { %v293_v53 = vadd.f32 %v485_v18, %v214_v49  ;;  %v297_v54 = vadd.f32 %v485_v18, %v224_v50 }
  0xc0   :  { %v442_v55 = vpack.c.bf16 %v293_v53, %v292_v51  ;;  %v452_v56 = vpack.c.bf16 %v297_v54, %v296_v52 }
  0xc2   :  { %458 = vst [vmem:[%s584_s3 + $0x28] sm:$0xff] %v442_v55  }
  0xc3   :  { %460 = vst [vmem:[%s584_s3 + $0x38] sm:$0xff] %v452_v56  }

// kernel: resnet_embedder_forward.28
= control target key start
LH: loop header
LB: loop body
LE: loop exit
PB: predicated region body
PF: predicated region fallthrough
CT: control target
= control target key end

     0   :  { %s928_s1 = inlined_call_operand.vmem [shape: bf16[256,128], index: 1, kind: input, shape index: {}]   ;;  %s929_s0 = inlined_call_operand.vmem [shape: bf16[128,256], index: 0, kind: input, shape index: {}]   ;;  %s930_s2 = inlined_call_operand.vmem [shape: f32[1,128], index: 2, kind: input, shape index: {}]   ;;  %s931_s3 = inlined_call_operand.vmem [shape: bf16[128,128], index: 3, kind: output, shape index: {}]  }
   0x1   :  { %v646_v0 = vld [vmem:[%s928_s1 + $0x38] sm:$0xff]  ;;  %v645_v2 = vld [vmem:[%s928_s1 + $0x30] sm:$0xff]  ;;  %v644_v4 = vld [vmem:[%s928_s1 + $0x28] sm:$0xff] }
   0x2   :  { %v654_v1 = vld [vmem:[%s928_s1 + $0x78] sm:$0xff]  ;;  %274 = vmatpush.bf16.msra.mxu0 %v646_v0  ;;  %702 = vmatpush.bf16.msra.mxu2 %v646_v0  ;;  %v653_v3 = vld [vmem:[%s928_s1 + $0x70] sm:$0xff]  ;;  %v652_v5 = vld [vmem:[%s928_s1 + $0x68] sm:$0xff] }
   0x3   :  { %323 = vmatpush.bf16.msra.mxu1 %v654_v1  ;;  %710 = vmatpush.bf16.msra.mxu3 %v654_v1  ;;  %v643_v6 = vld [vmem:[%s928_s1 + $0x20] sm:$0xff]  ;;  %v642_v8 = vld [vmem:[%s928_s1 + $0x18] sm:$0xff]  ;;  %v641_v10 = vld [vmem:[%s928_s1 + $0x10] sm:$0xff] }
   0x4   :  { %v651_v7 = vld [vmem:[%s928_s1 + $0x60] sm:$0xff]  ;;  %v650_v9 = vld [vmem:[%s928_s1 + $0x58] sm:$0xff]  ;;  %v649_v11 = vld [vmem:[%s928_s1 + $0x50] sm:$0xff] }
   0x5   :  { %v640_v12 = vld [vmem:[%s928_s1 + $0x8] sm:$0xff]  ;;  %v639_v14 = vld [vmem:[%s928_s1] sm:$0xff]  ;;  %v505_v28 = vld [vmem:[%s929_s0 + $0x10] sm:$0xf] }
   0x6   :  { %275 = vmatpush.bf16.msra.mxu0 %v645_v2  ;;  %703 = vmatpush.bf16.msra.mxu2 %v645_v2  ;;  %v648_v13 = vld [vmem:[%s928_s1 + $0x48] sm:$0xff]  ;;  %v647_v15 = vld [vmem:[%s928_s1 + $0x40] sm:$0xff]  ;;  %v626_v29 = vld [vmem:[%s929_s0 + $0x14] sm:$0xf0] }
   0x7   :  { %324 = vmatpush.bf16.msra.mxu1 %v653_v3  ;;  %711 = vmatpush.bf16.msra.mxu3 %v653_v3  ;;  %v497_v16 = vld [vmem:[%s929_s0] sm:$0xf]  ;;  %v624_v17 = vld [vmem:[%s929_s0 + $0x4] sm:$0xf0]  ;;  %v623_v20 = vld [vmem:[%s929_s0 + $0x4] sm:$0xf]  ;;  %v506_v36 = vor.u32 %v626_v29, %v505_v28 }
   0x8   :  { %v529_v18 = vld [vmem:[%s929_s0 + $0x40] sm:$0xf]  ;;  %v632_v19 = vld [vmem:[%s929_s0 + $0x44] sm:$0xf0]  ;;  %v499_v21 = vld [vmem:[%s929_s0 + $0x8] sm:$0xf0]  ;;  %v498_v24 = vor.u32 %v624_v17, %v497_v16 }
   0x9   :  { %v631_v22 = vld [vmem:[%s929_s0 + $0x44] sm:$0xf]  ;;  %v531_v23 = vld [vmem:[%s929_s0 + $0x48] sm:$0xf0]  ;;  %v530_v25 = vor.u32 %v632_v19, %v529_v18  ;;  %v502_v26 = vor.u32 %v623_v20, %v499_v21  ;;  %v537_v30 = vld [vmem:[%s929_s0 + $0x50] sm:$0xf] }
   0xa   :  { %276 = vmatpush.bf16.msra.mxu0 %v644_v4  ;;  %704 = vmatpush.bf16.msra.mxu2 %v644_v4  ;;  %v534_v27 = vor.u32 %v631_v22, %v531_v23  ;;  %v634_v31 = vld [vmem:[%s929_s0 + $0x54] sm:$0xf0]  ;;  %v625_v32 = vld [vmem:[%s929_s0 + $0x14] sm:$0xf]  ;;  %v507_v33 = vld [vmem:[%s929_s0 + $0x18] sm:$0xf0] }
   0xb   :  { %325 = vmatpush.bf16.msra.mxu1 %v652_v5  ;;  %712 = vmatpush.bf16.msra.mxu3 %v652_v5  ;;  %v633_v34 = vld [vmem:[%s929_s0 + $0x54] sm:$0xf]  ;;  %v539_v35 = vld [vmem:[%s929_s0 + $0x58] sm:$0xf0]  ;;  %v538_v37 = vor.u32 %v634_v31, %v537_v30  ;;  %v510_v38 = vor.u32 %v625_v32, %v507_v33  ;;  %v513_v40 = vld [vmem:[%s929_s0 + $0x20] sm:$0xf] }
   0xc   :  { %v542_v39 = vor.u32 %v633_v34, %v539_v35  ;;  %v628_v41 = vld [vmem:[%s929_s0 + $0x24] sm:$0xf0]  ;;  %v545_v42 = vld [vmem:[%s929_s0 + $0x60] sm:$0xf]  ;;  %v627_v44 = vld [vmem:[%s929_s0 + $0x24] sm:$0xf] }
   0xd   :  { %v636_v43 = vld [vmem:[%s929_s0 + $0x64] sm:$0xf0]  ;;  %v515_v45 = vld [vmem:[%s929_s0 + $0x28] sm:$0xf0]  ;;  %v635_v46 = vld [vmem:[%s929_s0 + $0x64] sm:$0xf]  ;;  %v514_v48 = vor.u32 %v628_v41, %v513_v40 }
   0xe   :  { %277 = vmatpush.bf16.msra.mxu0 %v643_v6  ;;  %705 = vmatpush.bf16.msra.mxu2 %v643_v6  ;;  %v547_v47 = vld [vmem:[%s929_s0 + $0x68] sm:$0xf0]  ;;  %v546_v49 = vor.u32 %v636_v43, %v545_v42  ;;  %v518_v50 = vor.u32 %v627_v44, %v515_v45  ;;  %v521_v52 = vld [vmem:[%s929_s0 + $0x30] sm:$0xf]  ;;  %v630_v53 = vld [vmem:[%s929_s0 + $0x34] sm:$0xf0] }
   0xf   :  { %326 = vmatpush.bf16.msra.mxu1 %v651_v7  ;;  %713 = vmatpush.bf16.msra.mxu3 %v651_v7  ;;  %v550_v51 = vor.u32 %v635_v46, %v547_v47  ;;  %v553_v54 = vld [vmem:[%s929_s0 + $0x70] sm:$0xf]  ;;  %v638_v55 = vld [vmem:[%s929_s0 + $0x74] sm:$0xf0]  ;;  %v629_v56 = vld [vmem:[%s929_s0 + $0x34] sm:$0xf]  ;;  %v522_v60 = vor.u32 %v630_v53, %v521_v52 }
  0x10   :  { %v523_v57 = vld [vmem:[%s929_s0 + $0x38] sm:$0xf0]  ;;  %v637_v58 = vld [vmem:[%s929_s0 + $0x74] sm:$0xf]  ;;  %v554_v61 = vor.u32 %v638_v55, %v553_v54  ;;  %v886_v3 = vld [vmem:[%s930_s2] ss:$0 sm:$0xff] }
  0x11   :  { %v555_v59 = vld [vmem:[%s929_s0 + $0x78] sm:$0xf0]  ;;  %v526_v62 = vor.u32 %v629_v56, %v523_v57 }
  0x12   :  { %278 = vmatpush.bf16.msra.mxu0 %v642_v8  ;;  %706 = vmatpush.bf16.msra.mxu2 %v642_v8  ;;  %v558_v63 = vor.u32 %v637_v58, %v555_v59 }
  0x13   :  { %327 = vmatpush.bf16.msra.mxu1 %v650_v9  ;;  %714 = vmatpush.bf16.msra.mxu3 %v650_v9 }
  0x16   :  { %279 = vmatpush.bf16.msra.mxu0 %v641_v10  ;;  %707 = vmatpush.bf16.msra.mxu2 %v641_v10 }
  0x17   :  { %328 = vmatpush.bf16.msra.mxu1 %v649_v11  ;;  %715 = vmatpush.bf16.msra.mxu3 %v649_v11 }
  0x1a   :  { %280 = vmatpush.bf16.msra.mxu0 %v640_v12  ;;  %708 = vmatpush.bf16.msra.mxu2 %v640_v12 }
  0x1b   :  { %329 = vmatpush.bf16.msra.mxu1 %v648_v13  ;;  %716 = vmatpush.bf16.msra.mxu3 %v648_v13 }
  0x1e   :  { %281 = vmatpush.bf16.msra.mxu0 %v639_v14  ;;  %709 = vmatpush.bf16.msra.mxu2 %v639_v14 }
  0x1f   :  { %330 = vmatpush.bf16.msra.mxu1 %v647_v15  ;;  %717 = vmatpush.bf16.msra.mxu3 %v647_v15 }
  0x21   :  { %282 = vmatmul.bf16.vlgmr.msra.gmra.mxu0 %v498_v24  ;;  %302 = vmatmul.bf16.vlgmr.msra.gmra.mxu2 %v530_v25 }
  0x22   :  { %331 = vmatmul.bf16.vlgmr.msra.gmra.mxu1 %v502_v26  ;;  %351 = vmatmul.bf16.vlgmr.msra.gmra.mxu3 %v534_v27 }
  0x31   :  { %287 = vmatmul.bf16.gmra.mxu0 %v506_v36  ;;  %307 = vmatmul.bf16.gmra.mxu2 %v538_v37 }
  0x32   :  { %336 = vmatmul.bf16.gmra.mxu1 %v510_v38  ;;  %356 = vmatmul.bf16.gmra.mxu3 %v542_v39 }
  0x41   :  { %292 = vmatmul.bf16.gmra.mxu0 %v514_v48  ;;  %312 = vmatmul.bf16.gmra.mxu2 %v546_v49 }
  0x42   :  { %341 = vmatmul.bf16.gmra.mxu1 %v518_v50  ;;  %361 = vmatmul.bf16.gmra.mxu3 %v550_v51 }
  0x51   :  { %297 = vmatmul.bf16.gmra.mxu0 %v522_v60  ;;  %317 = vmatmul.bf16.gmra.mxu2 %v554_v61 }
  0x52   :  { %346 = vmatmul.bf16.gmra.mxu1 %v526_v62  ;;  %366 = vmatmul.bf16.gmra.mxu3 %v558_v63 }
  0x9e   :  { %v283_v0 = vpop.f32.mrf.mxu0 }
  0x9f   :  { %v332_v1 = vpop.f32.mrf.mxu1 }
  0xa0   :  { %v333_v2 = vadd.f32 %v332_v1, %v283_v0 }
  0xa2   :  { %v427_v8 = vadd.f32 %v886_v3, %v333_v2 }
  0xa4   :  { %v303_v4 = vpop.f32.mrf.mxu2  ;;  %v443_v12 = vmax.f32 %v427_v8, 0.0 }
  0xa5   :  { %v352_v5 = vpop.f32.mrf.mxu3 }
  0xa6   :  { %v285_v6 = vpop.f32.mrf.mxu0  ;;  %v353_v10 = vadd.f32 %v352_v5, %v303_v4 }
  0xa7   :  { %v334_v7 = vpop.f32.mrf.mxu1 }
  0xa8   :  { %v335_v9 = vadd.f32 %v334_v7, %v285_v6  ;;  %v435_v16 = vadd.f32 %v886_v3, %v353_v10 }
  0xaa   :  { %v428_v11 = vadd.f32 %v886_v3, %v335_v9  ;;  %v451_v22 = vmax.f32 %v435_v16, 0.0 }
  0xac   :  { %v444_v13 = vmax.f32 %v428_v11, 0.0  ;;  %v305_v14 = vpop.f32.mrf.mxu2 }
  0xad   :  { %v354_v15 = vpop.f32.mrf.mxu3 }
  0xae   :  { %v658_v17 = vpack.c.bf16 %v444_v13, %v443_v12  ;;  %v355_v18 = vadd.f32 %v354_v15, %v305_v14  ;;  %v288_v19 = vpop.f32.mrf.mxu0 }
  0xaf   :  { %v337_v20 = vpop.f32.mrf.mxu1 }
  0xb0   :  { %659 = vst [vmem:[%s931_s3] sm:$0xff] %v658_v17   ;;  %v436_v21 = vadd.f32 %v886_v3, %v355_v18  ;;  %v338_v25 = vadd.f32 %v337_v20, %v288_v19 }
  0xb2   :  { %v452_v23 = vmax.f32 %v436_v21, 0.0  ;;  %v429_v30 = vadd.f32 %v886_v3, %v338_v25 }
  0xb4   :  { %v678_v24 = vpack.c.bf16 %v452_v23, %v451_v22  ;;  %v308_v26 = vpop.f32.mrf.mxu2  ;;  %v445_v34 = vmax.f32 %v429_v30, 0.0 }
  0xb5   :  { %v357_v27 = vpop.f32.mrf.mxu3 }
  0xb6   :  { %698 = vst [vmem:[%s931_s3 + $0x20] sm:$0xff] %v678_v24   ;;  %v290_v28 = vpop.f32.mrf.mxu0  ;;  %v358_v32 = vadd.f32 %v357_v27, %v308_v26 }
  0xb7   :  { %v339_v29 = vpop.f32.mrf.mxu1 }
  0xb8   :  { %v340_v31 = vadd.f32 %v339_v29, %v290_v28  ;;  %v437_v38 = vadd.f32 %v886_v3, %v358_v32 }
  0xba   :  { %v430_v33 = vadd.f32 %v886_v3, %v340_v31  ;;  %v453_v44 = vmax.f32 %v437_v38, 0.0 }
  0xbc   :  { %v446_v35 = vmax.f32 %v430_v33, 0.0  ;;  %v310_v36 = vpop.f32.mrf.mxu2 }
  0xbd   :  { %v359_v37 = vpop.f32.mrf.mxu3 }
  0xbe   :  { %v663_v39 = vpack.c.bf16 %v446_v35, %v445_v34  ;;  %v360_v40 = vadd.f32 %v359_v37, %v310_v36  ;;  %v293_v41 = vpop.f32.mrf.mxu0 }
  0xbf   :  { %v342_v42 = vpop.f32.mrf.mxu1 }
  0xc0   :  { %695 = vst [vmem:[%s931_s3 + $0x8] sm:$0xff] %v663_v39   ;;  %v438_v43 = vadd.f32 %v886_v3, %v360_v40  ;;  %v343_v47 = vadd.f32 %v342_v42, %v293_v41 }
  0xc2   :  { %v454_v45 = vmax.f32 %v438_v43, 0.0  ;;  %v431_v52 = vadd.f32 %v886_v3, %v343_v47 }
  0xc4   :  { %v683_v46 = vpack.c.bf16 %v454_v45, %v453_v44  ;;  %v313_v48 = vpop.f32.mrf.mxu2  ;;  %v447_v56 = vmax.f32 %v431_v52, 0.0 }
  0xc5   :  { %v362_v49 = vpop.f32.mrf.mxu3 }
  0xc6   :  { %699 = vst [vmem:[%s931_s3 + $0x28] sm:$0xff] %v683_v46   ;;  %v295_v50 = vpop.f32.mrf.mxu0  ;;  %v363_v54 = vadd.f32 %v362_v49, %v313_v48 }
  0xc7   :  { %v344_v51 = vpop.f32.mrf.mxu1 }
  0xc8   :  { %v345_v53 = vadd.f32 %v344_v51, %v295_v50  ;;  %v439_v60 = vadd.f32 %v886_v3, %v363_v54 }
  0xca   :  { %v432_v55 = vadd.f32 %v886_v3, %v345_v53  ;;  %v455_v2 = vmax.f32 %v439_v60, 0.0 }
  0xcc   :  { %v448_v57 = vmax.f32 %v432_v55, 0.0  ;;  %v315_v58 = vpop.f32.mrf.mxu2 }
  0xcd   :  { %v364_v59 = vpop.f32.mrf.mxu3 }
  0xce   :  { %v668_v61 = vpack.c.bf16 %v448_v57, %v447_v56  ;;  %v365_v62 = vadd.f32 %v364_v59, %v315_v58  ;;  %v298_v63 = vpop.f32.mrf.mxu0 }
  0xcf   :  { %v347_v0 = vpop.f32.mrf.mxu1 }
  0xd0   :  { %696 = vst [vmem:[%s931_s3 + $0x10] sm:$0xff] %v668_v61   ;;  %v440_v1 = vadd.f32 %v886_v3, %v365_v62  ;;  %v348_v6 = vadd.f32 %v347_v0, %v298_v63 }
  0xd2   :  { %v456_v4 = vmax.f32 %v440_v1, 0.0  ;;  %v433_v11 = vadd.f32 %v886_v3, %v348_v6 }
  0xd4   :  { %v688_v5 = vpack.c.bf16 %v456_v4, %v455_v2  ;;  %v318_v7 = vpop.f32.mrf.mxu2  ;;  %v449_v15 = vmax.f32 %v433_v11, 0.0 }
  0xd5   :  { %v367_v8 = vpop.f32.mrf.mxu3 }
  0xd6   :  { %700 = vst [vmem:[%s931_s3 + $0x30] sm:$0xff] %v688_v5   ;;  %v300_v9 = vpop.f32.mrf.mxu0  ;;  %v368_v13 = vadd.f32 %v367_v8, %v318_v7 }
  0xd7   :  { %v349_v10 = vpop.f32.mrf.mxu1 }
  0xd8   :  { %v350_v12 = vadd.f32 %v349_v10, %v300_v9  ;;  %v441_v19 = vadd.f32 %v886_v3, %v368_v13 }
  0xda   :  { %v434_v14 = vadd.f32 %v886_v3, %v350_v12  ;;  %v457_v23 = vmax.f32 %v441_v19, 0.0 }
  0xdc   :  { %v450_v16 = vmax.f32 %v434_v14, 0.0  ;;  %v320_v17 = vpop.f32.mrf.mxu2 }
  0xdd   :  { %v369_v18 = vpop.f32.mrf.mxu3 }
  0xde   :  { %v673_v20 = vpack.c.bf16 %v450_v16, %v449_v15  ;;  %v370_v21 = vadd.f32 %v369_v18, %v320_v17 }
  0xe0   :  { %697 = vst [vmem:[%s931_s3 + $0x18] sm:$0xff] %v673_v20   ;;  %v442_v22 = vadd.f32 %v886_v3, %v370_v21 }
  0xe2   :  { %v458_v24 = vmax.f32 %v442_v22, 0.0 }
  0xe4   :  { %v693_v25 = vpack.c.bf16 %v458_v24, %v457_v23 }
  0xe6   :  { %701 = vst [vmem:[%s931_s3 + $0x38] sm:$0xff] %v693_v25  }

// kernel: resnet_embedder_forward.34
= control target key start
LH: loop header
LB: loop body
LE: loop exit
PB: predicated region body
PF: predicated region fallthrough
CT: control target
= control target key end

     0   :  { %s289_s1 = inlined_call_operand.vmem [shape: bf16[128,128], index: 1, kind: input, shape index: {}]   ;;  %s290_s2 = inlined_call_operand.vmem [shape: f32[1,128], index: 2, kind: input, shape index: {}]   ;;  %s291_s0 = inlined_call_operand.vmem [shape: bf16[32,128], index: 0, kind: input, shape index: {}]   ;;  %s292_s3 = inlined_call_operand.vmem [shape: bf16[32,128], index: 3, kind: output, shape index: {}]  }
   0x1   :  { %v209_v0 = vld [vmem:[%s289_s1 + $0x38] sm:$0xff]  ;;  %v208_v1 = vld [vmem:[%s289_s1 + $0x30] sm:$0xff]  ;;  %v207_v2 = vld [vmem:[%s289_s1 + $0x28] sm:$0xff] }
   0x2   :  { %106 = vmatpush.bf16.msra.mxu0 %v209_v0  ;;  %221 = vmatpush.bf16.msra.mxu1 %v209_v0  ;;  %v206_v3 = vld [vmem:[%s289_s1 + $0x20] sm:$0xff]  ;;  %v205_v4 = vld [vmem:[%s289_s1 + $0x18] sm:$0xff]  ;;  %v204_v5 = vld [vmem:[%s289_s1 + $0x10] sm:$0xff] }
   0x3   :  { %v203_v6 = vld [vmem:[%s289_s1 + $0x8] sm:$0xff]  ;;  %v202_v7 = vld [vmem:[%s289_s1] sm:$0xff] }
   0x4   :  { %v200_v8 = vld [vmem:[%s291_s0] sm:$0xff]  ;;  %v201_v9 = vld [vmem:[%s291_s0 + $0x8] sm:$0xff] }
   0x5   :  { %v229_v12 = vld [vmem:[%s290_s2] ss:$0 sm:$0xff] }
   0x6   :  { %107 = vmatpush.bf16.msra.mxu0 %v208_v1  ;;  %222 = vmatpush.bf16.msra.mxu1 %v208_v1 }
   0xa   :  { %108 = vmatpush.bf16.msra.mxu0 %v207_v2  ;;  %223 = vmatpush.bf16.msra.mxu1 %v207_v2 }
   0xe   :  { %109 = vmatpush.bf16.msra.mxu0 %v206_v3  ;;  %224 = vmatpush.bf16.msra.mxu1 %v206_v3 }
  0x12   :  { %110 = vmatpush.bf16.msra.mxu0 %v205_v4  ;;  %225 = vmatpush.bf16.msra.mxu1 %v205_v4 }
  0x16   :  { %111 = vmatpush.bf16.msra.mxu0 %v204_v5  ;;  %226 = vmatpush.bf16.msra.mxu1 %v204_v5 }
  0x1a   :  { %112 = vmatpush.bf16.msra.mxu0 %v203_v6  ;;  %227 = vmatpush.bf16.msra.mxu1 %v203_v6 }
  0x1e   :  { %113 = vmatpush.bf16.msra.mxu0 %v202_v7  ;;  %228 = vmatpush.bf16.msra.mxu1 %v202_v7 }
  0x21   :  { %114 = vmatmul.bf16.vlgmr.msra.gmra.mxu0 %v200_v8  ;;  %119 = vmatmul.bf16.vlgmr.msra.gmra.mxu1 %v201_v9 }
  0x9e   :  { %v115_v10 = vpop.f32.mrf.mxu0  ;;  %v120_v11 = vpop.f32.mrf.mxu1 }
  0x9f   :  { %v144_v15 = vadd.f32 %v229_v12, %v115_v10  ;;  %v146_v16 = vadd.f32 %v229_v12, %v120_v11 }
  0xa6   :  { %v117_v13 = vpop.f32.mrf.mxu0  ;;  %v122_v14 = vpop.f32.mrf.mxu1 }
  0xa7   :  { %v145_v17 = vadd.f32 %v229_v12, %v117_v13  ;;  %v147_v18 = vadd.f32 %v229_v12, %v122_v14 }
  0xa9   :  { %v213_v19 = vpack.c.bf16 %v145_v17, %v144_v15  ;;  %v218_v20 = vpack.c.bf16 %v147_v18, %v146_v16 }
  0xab   :  { %214 = vst [vmem:[%s292_s3] sm:$0xff] %v213_v19  }
  0xac   :  { %220 = vst [vmem:[%s292_s3 + $0x8] sm:$0xff] %v218_v20  }

// kernel: resnet_embedder_forward.30
= control target key start
LH: loop header
LB: loop body
LE: loop exit
PB: predicated region body
PF: predicated region fallthrough
CT: control target
= control target key end

     0   :  { %s1156_s15 = smov 0   ;;  %s1158_s16 = smov 0   ;;  %s1330_s0 = inlined_call_operand.vmem [shape: bf16[128,384], index: 0, kind: input, shape index: {}]   ;;  %s1331_s1 = inlined_call_operand.vmem [shape: bf16[384,128], index: 1, kind: input, shape index: {}]   ;;  %s1332_s2 = inlined_call_operand.vmem [shape: f32[1,128], index: 2, kind: input, shape index: {}]   ;;  %s1333_s3 = inlined_call_operand.vmem [shape: bf16[128,128], index: 3, kind: input, shape index: {}]   ;;  %s1334_s4 = inlined_call_operand.vmem [shape: bf16[128,128], index: 4, kind: output, shape index: {}]  }
   0x1   :  { %s1160_s17 = smov 0   ;;  %s1162_s18 = smov 0  }
   0x2   :  { %s1164_s19 = smov 0  }
   0x3 LB: > { %s23_s20 = sadd.s32 1, %s1124_s18  ;;  %p42_p1 = scmp.ne.s32.totalorder %s1116_s16, %s1112_s15  ;;  %s1128_s19 = sphi %s1164_s19, %s14_s19   ;;  %s1124_s18 = sphi %s1162_s18, %s1338_s18   ;;  %s1120_s17 = sphi %s1160_s17, %s1337_s17   ;;  %s1116_s16 = sphi %s1158_s16, %s1336_s16   ;;  %s1112_s15 = sphi %s1156_s15, %s1335_s15  }
   0x4   : > { %p24_p0 = scmp.ge.s32.totalorder %s23_s20, 3  ;;  %p43_p2 = scmp.eq.s32.totalorder %s1128_s19, 0 }
   0x5   : > { %s35_s22 = sadd.s32 1, %s1116_s16  ;;  %p845_p5 = scmp.ge.s32.totalorder %s1128_s19, 3 }
   0x6   : > { %s1340_s20 = smov (%p24_p0, %s23_s20), 0  ;;  %p44_p3 = por %p43_p2, %p42_p1 }
   0x7   : > { %s31_s21 = ssub.s32 %s1124_s18, %s1340_s20  ;;  %179 = sbr.rel (%p845_p5) target bundleno = 32 (0x20), region = 24 }
   0x8   : > { %p33_p4 = scmp.eq.s32.totalorder %s31_s21, 0 }
   0xa   : > { %s1191_s23 = scalar_select %p33_p4, %s1116_s16, %s35_s22  }
   0xc   : > { %182 = sbr.rel (!%p44_p3) target bundleno = 32 (0x20), region = 28  ;;  %s184_s24 = sand.u32 (%p44_p3), 1, %s1116_s16  }
   0xd   : > { %s847_s25 = sshll.u32 (%p44_p3), %s1124_s18, 2  ;;  %s846_s26 = sshll.u32 (%p44_p3), %s184_s24, 6 }
   0xe   : > { %s1199_s29 = scalar_lea.vmem (%p44_p3), %s1330_s0, %s847_s25  ;;  %s186_s30 = scalar_lea.vmem (%p44_p3), [#allocation3], %s846_s26 }
   0xf   : > { %v208_v0 = vld [vmem:[%s1199_s29] sm:$0xf] (%p44_p3)  ;;  %v210_v1 = vld [vmem:[%s1199_s29 + $0xc] sm:$0xf] (%p44_p3)  ;;  %v212_v2 = vld [vmem:[%s1199_s29 + $0x18] sm:$0xf] (%p44_p3) }
  0x10   : > { %209 = vst [vmem:[%s186_s30] sm:$0xf] (%p44_p3), %v208_v0  ;;  %v214_v3 = vld [vmem:[%s1199_s29 + $0x24] sm:$0xf] (%p44_p3)  ;;  %v216_v4 = vld [vmem:[%s1199_s29 + $0x30] sm:$0xf] (%p44_p3) }
  0x11   : > { %211 = vst [vmem:[%s186_s30 + $0x4] sm:$0xf] %v210_v1  ;;  %v218_v5 = vld [vmem:[%s1199_s29 + $0x3c] sm:$0xf]  ;;  %v220_v6 = vld [vmem:[%s1199_s29 + $0x48] sm:$0xf] }
  0x12   : > { %213 = vst [vmem:[%s186_s30 + $0x8] sm:$0xf] %v212_v2  ;;  %v222_v7 = vld [vmem:[%s1199_s29 + $0x54] sm:$0xf]  ;;  %v224_v8 = vld [vmem:[%s1199_s29 + $0x60] sm:$0xf] }
  0x13   : > { %215 = vst [vmem:[%s186_s30 + $0xc] sm:$0xf] %v214_v3  ;;  %v226_v9 = vld [vmem:[%s1199_s29 + $0x6c] sm:$0xf]  ;;  %v228_v10 = vld [vmem:[%s1199_s29 + $0x78] sm:$0xf] }
  0x14   : > { %217 = vst [vmem:[%s186_s30 + $0x10] sm:$0xf] %v216_v4  ;;  %v230_v11 = vld [vmem:[%s1199_s29 + $0x84] sm:$0xf]  ;;  %v232_v12 = vld [vmem:[%s1199_s29 + $0x90] sm:$0xf] }
  0x15   : > { %219 = vst [vmem:[%s186_s30 + $0x14] sm:$0xf] %v218_v5  ;;  %v234_v13 = vld [vmem:[%s1199_s29 + $0x9c] sm:$0xf]  ;;  %v236_v14 = vld [vmem:[%s1199_s29 + $0xa8] sm:$0xf] }
  0x16   : > { %221 = vst [vmem:[%s186_s30 + $0x18] sm:$0xf] %v220_v6  ;;  %v238_v15 = vld [vmem:[%s1199_s29 + $0xb4] sm:$0xf] }
  0x17   : > { %223 = vst [vmem:[%s186_s30 + $0x1c] sm:$0xf] %v222_v7 }
  0x18   : > { %225 = vst [vmem:[%s186_s30 + $0x20] sm:$0xf] %v224_v8 }
  0x19   : > { %227 = vst [vmem:[%s186_s30 + $0x24] sm:$0xf] %v226_v9 }
  0x1a   : > { %229 = vst [vmem:[%s186_s30 + $0x28] sm:$0xf] %v228_v10 }
  0x1b   : > { %231 = vst [vmem:[%s186_s30 + $0x2c] sm:$0xf] %v230_v11 }
  0x1c   : > { %233 = vst [vmem:[%s186_s30 + $0x30] sm:$0xf] %v232_v12 }
  0x1d   : > { %235 = vst [vmem:[%s186_s30 + $0x34] sm:$0xf] %v234_v13 }
  0x1e   : > { %237 = vst [vmem:[%s186_s30 + $0x38] sm:$0xf] %v236_v14 }
  0x1f   : > { %239 = vst [vmem:[%s186_s30 + $0x3c] sm:$0xf] %v238_v15 }
  0x20 PF: > { %p848_p6 = scmp.ge.s32.totalorder %s1128_s19, 1  ;;  %p303_p7 = scmp.lt.s32.totalorder %s1128_s19, 4 }
  0x22   : > { %p304_p8 = pnand %p848_p6, %p303_p7 }
  0x23   : > { %s310_s5 = sand.u32 (!%p304_p8), 1, %s1112_s15   ;;  %s850_s6 = sshll.u32 (!%p304_p8), %s1120_s17, 4 }
  0x24   : > { %307 = sbr.rel (%p304_p8) target bundleno = 282 (0x11a), region = 73  ;;  %s849_s7 = sshll.u32 (!%p304_p8), %s310_s5, 6 }
  0x25   : > { %p347_p9 = scmp.lt.s32.totalorder (!%p304_p8), %s850_s6, 47  ;;  %s1226_s12 = scalar_lea.vmem (!%p304_p8), [#allocation3], %s849_s7 }
  0x26   : > { %p852_p10 = scmp.ne.s32.totalorder (!%p304_p8), %s1120_s17, 0 }
  0x29   : > { %s1342_s6 = smov (!%p347_p9, %s850_s6), 47  ;;  %367 = sbr.rel (%p852_p10) target bundleno = 63 (0x3f), region = 81 }
  0x2a   : > { %s851_s8 = sshll.u32 %s1342_s6, 2 }
  0x2b   : > { %s1224_s11 = scalar_lea.vmem %s1331_s1, %s851_s8 }
  0x2e   : > { %v1130_v16 = vmov 0.0  }
  0x2f   : > { %368 = vst [vmem:[#allocation2 + $0x30] sm:$0xff] %v1130_v16 }
  0x30   : > { %369 = vst [vmem:[#allocation2] sm:$0xff] %v1130_v16 }
  0x31   : > { %370 = vst [vmem:[#allocation2 + $0x58] sm:$0xff] %v1130_v16 }
  0x32   : > { %371 = vst [vmem:[#allocation2 + $0x18] sm:$0xff] %v1130_v16 }
  0x33   : > { %372 = vst [vmem:[#allocation2 + $0x50] sm:$0xff] %v1130_v16 }
  0x34   : > { %373 = vst [vmem:[#allocation2 + $0x68] sm:$0xff] %v1130_v16 }
  0x35   : > { %374 = vst [vmem:[#allocation2 + $0x8] sm:$0xff] %v1130_v16 }
  0x36   : > { %375 = vst [vmem:[#allocation2 + $0x48] sm:$0xff] %v1130_v16 }
  0x37   : > { %376 = vst [vmem:[#allocation2 + $0x40] sm:$0xff] %v1130_v16 }
  0x38   : > { %377 = vst [vmem:[#allocation2 + $0x20] sm:$0xff] %v1130_v16 }
  0x39   : > { %378 = vst [vmem:[#allocation2 + $0x10] sm:$0xff] %v1130_v16 }
  0x3a   : > { %379 = vst [vmem:[#allocation2 + $0x38] sm:$0xff] %v1130_v16 }
  0x3b   : > { %380 = vst [vmem:[#allocation2 + $0x60] sm:$0xff] %v1130_v16 }
  0x3c   : > { %381 = vst [vmem:[#allocation2 + $0x70] sm:$0xff] %v1130_v16 }
  0x3d   : > { %382 = vst [vmem:[#allocation2 + $0x78] sm:$0xff] %v1130_v16 }
  0x3e   : > { %383 = vst [vmem:[#allocation2 + $0x28] sm:$0xff] %v1130_v16 }
  0x3f PF: > { %v937_v17 = vld [vmem:[%s1224_s11 + $0x38] sm:$0xff]  ;;  %v936_v18 = vld [vmem:[%s1224_s11 + $0x30] sm:$0xff]  ;;  %v935_v19 = vld [vmem:[%s1224_s11 + $0x28] sm:$0xff]  ;;  %p917_p11 = scmp.ne.s32.totalorder %s1120_s17, 2 }
  0x40   : > { %528 = vmatpush.bf16.msra.mxu0 %v937_v17  ;;  %1024 = vmatpush.bf16.msra.mxu1 %v937_v17  ;;  %v934_v20 = vld [vmem:[%s1224_s11 + $0x20] sm:$0xff]  ;;  %v933_v21 = vld [vmem:[%s1224_s11 + $0x18] sm:$0xff]  ;;  %v932_v22 = vld [vmem:[%s1224_s11 + $0x10] sm:$0xff] }
  0x41   : > { %1025 = vmatpush.bf16.msra.mxu2 %v937_v17  ;;  %1026 = vmatpush.bf16.msra.mxu3 %v937_v17  ;;  %v931_v23 = vld [vmem:[%s1224_s11 + $0x8] sm:$0xff]  ;;  %v930_v24 = vld [vmem:[%s1224_s11] sm:$0xff]  ;;  %v924_v26 = vld [vmem:[%s1226_s12 + $0x10] sm:$0xff] }
  0x42   : > { %v922_v25 = vld [vmem:[%s1226_s12] sm:$0xff]  ;;  %v928_v28 = vld [vmem:[%s1226_s12 + $0x30] sm:$0xff]  ;;  %v923_v29 = vld [vmem:[%s1226_s12 + $0x8] sm:$0xff] }
  0x43   : > { %v926_v27 = vld [vmem:[%s1226_s12 + $0x20] sm:$0xff]  ;;  %v925_v30 = vld [vmem:[%s1226_s12 + $0x18] sm:$0xff]  ;;  %v927_v31 = vld [vmem:[%s1226_s12 + $0x28] sm:$0xff] }
  0x44   : > { %529 = vmatpush.bf16.msra.mxu0 %v936_v18  ;;  %1027 = vmatpush.bf16.msra.mxu1 %v936_v18  ;;  %v929_v32 = vld [vmem:[%s1226_s12 + $0x38] sm:$0xff]  ;;  %v384_v33 = vld [vmem:[#allocation2 + $0x30] sm:$0xff]  ;;  %v392_v39 = vld [vmem:[#allocation2 + $0x40] sm:$0xff] }
  0x45   : > { %1028 = vmatpush.bf16.msra.mxu2 %v936_v18  ;;  %1029 = vmatpush.bf16.msra.mxu3 %v936_v18  ;;  %v388_v34 = vld [vmem:[#allocation2 + $0x50] sm:$0xff]  ;;  %v396_v40 = vld [vmem:[#allocation2 + $0x60] sm:$0xff]  ;;  %v389_v42 = vld [vmem:[#allocation2 + $0x68] sm:$0xff] }
  0x46   : > { %v385_v41 = vld [vmem:[#allocation2] sm:$0xff]  ;;  %v397_v52 = vld [vmem:[#allocation2 + $0x70] sm:$0xff]  ;;  %v386_v53 = vld [vmem:[#allocation2 + $0x58] sm:$0xff] }
  0x47   : > { %v393_v51 = vld [vmem:[#allocation2 + $0x20] sm:$0xff]  ;;  %v390_v54 = vld [vmem:[#allocation2 + $0x8] sm:$0xff]  ;;  %v394_v63 = vld [vmem:[#allocation2 + $0x10] sm:$0xff] }
  0x48   : > { %530 = vmatpush.bf16.msra.mxu0 %v935_v19  ;;  %1030 = vmatpush.bf16.msra.mxu1 %v935_v19  ;;  %v398_v0 = vld [vmem:[#allocation2 + $0x78] sm:$0xff]  ;;  %v391_v2 = vld [vmem:[#allocation2 + $0x48] sm:$0xff] }
  0x49   : > { %1031 = vmatpush.bf16.msra.mxu2 %v935_v19  ;;  %1032 = vmatpush.bf16.msra.mxu3 %v935_v19  ;;  %v387_v1 = vld [vmem:[#allocation2 + $0x18] sm:$0xff]  ;;  %v399_v12 = vld [vmem:[#allocation2 + $0x28] sm:$0xff] }
  0x4a   : > { %v395_v11 = vld [vmem:[#allocation2 + $0x38] sm:$0xff] }
  0x4c   : > { %531 = vmatpush.bf16.msra.mxu0 %v934_v20  ;;  %1033 = vmatpush.bf16.msra.mxu1 %v934_v20 }
  0x4d   : > { %1034 = vmatpush.bf16.msra.mxu2 %v934_v20  ;;  %1035 = vmatpush.bf16.msra.mxu3 %v934_v20 }
  0x50   : > { %532 = vmatpush.bf16.msra.mxu0 %v933_v21  ;;  %1036 = vmatpush.bf16.msra.mxu1 %v933_v21 }
  0x51   : > { %1037 = vmatpush.bf16.msra.mxu2 %v933_v21  ;;  %1038 = vmatpush.bf16.msra.mxu3 %v933_v21 }
  0x54   : > { %533 = vmatpush.bf16.msra.mxu0 %v932_v22  ;;  %1039 = vmatpush.bf16.msra.mxu1 %v932_v22 }
  0x55   : > { %1040 = vmatpush.bf16.msra.mxu2 %v932_v22  ;;  %1041 = vmatpush.bf16.msra.mxu3 %v932_v22 }
  0x58   : > { %534 = vmatpush.bf16.msra.mxu0 %v931_v23  ;;  %1042 = vmatpush.bf16.msra.mxu1 %v931_v23 }
  0x59   : > { %1043 = vmatpush.bf16.msra.mxu2 %v931_v23  ;;  %1044 = vmatpush.bf16.msra.mxu3 %v931_v23 }
  0x5c   : > { %535 = vmatpush.bf16.msra.mxu0 %v930_v24  ;;  %1045 = vmatpush.bf16.msra.mxu1 %v930_v24 }
  0x5d   : > { %1046 = vmatpush.bf16.msra.mxu2 %v930_v24  ;;  %1047 = vmatpush.bf16.msra.mxu3 %v930_v24 }
  0x5f   : > { %536 = vmatmul.bf16.vlgmr.msra.gmra.mxu0 %v922_v25  ;;  %546 = vmatmul.bf16.vlgmr.msra.gmra.mxu1 %v924_v26 }
  0x60   : > { %556 = vmatmul.bf16.vlgmr.msra.gmra.mxu2 %v926_v27  ;;  %566 = vmatmul.bf16.vlgmr.msra.gmra.mxu3 %v928_v28 }
  0x6f   : > { %541 = vmatmul.bf16.gmra.mxu0 %v923_v29  ;;  %551 = vmatmul.bf16.gmra.mxu1 %v925_v30 }
  0x70   : > { %561 = vmatmul.bf16.gmra.mxu2 %v927_v31  ;;  %571 = vmatmul.bf16.gmra.mxu3 %v929_v32 }
  0xdc   : > { %v537_v35 = vpop.f32.mrf.mxu0  ;;  %v547_v36 = vpop.f32.mrf.mxu1 }
  0xdd   : > { %v577_v37 = vadd.f32 %v537_v35, %v384_v33  ;;  %v581_v38 = vadd.f32 %v547_v36, %v388_v34 }
  0xdf   : > { %593 = vst [vmem:[#allocation2 + $0x30] sm:$0xff] %v577_v37 }
  0xe0   : > { %597 = vst [vmem:[#allocation2 + $0x50] sm:$0xff] %v581_v38 }
  0xe3   : > { %v557_v43 = vpop.f32.mrf.mxu2  ;;  %v567_v44 = vpop.f32.mrf.mxu3 }
  0xe4   : > { %v585_v45 = vadd.f32 %v557_v43, %v392_v39  ;;  %v589_v46 = vadd.f32 %v567_v44, %v396_v40  ;;  %v539_v47 = vpop.f32.mrf.mxu0  ;;  %v549_v48 = vpop.f32.mrf.mxu1 }
  0xe5   : > { %v578_v49 = vadd.f32 %v539_v47, %v385_v41  ;;  %v582_v50 = vadd.f32 %v549_v48, %v389_v42 }
  0xe6   : > { %601 = vst [vmem:[#allocation2 + $0x40] sm:$0xff] %v585_v45 }
  0xe7   : > { %605 = vst [vmem:[#allocation2 + $0x60] sm:$0xff] %v589_v46 }
  0xe8   : > { %594 = vst [vmem:[#allocation2] sm:$0xff] %v578_v49 }
  0xe9   : > { %598 = vst [vmem:[#allocation2 + $0x68] sm:$0xff] %v582_v50 }
  0xeb   : > { %v559_v55 = vpop.f32.mrf.mxu2  ;;  %v569_v56 = vpop.f32.mrf.mxu3 }
  0xec   : > { %v586_v57 = vadd.f32 %v559_v55, %v393_v51  ;;  %v590_v58 = vadd.f32 %v569_v56, %v397_v52  ;;  %v542_v59 = vpop.f32.mrf.mxu0  ;;  %v552_v60 = vpop.f32.mrf.mxu1 }
  0xed   : > { %v579_v61 = vadd.f32 %v542_v59, %v386_v53  ;;  %v583_v62 = vadd.f32 %v552_v60, %v390_v54 }
  0xee   : > { %602 = vst [vmem:[#allocation2 + $0x20] sm:$0xff] %v586_v57 }
  0xef   : > { %606 = vst [vmem:[#allocation2 + $0x70] sm:$0xff] %v590_v58 }
  0xf0   : > { %595 = vst [vmem:[#allocation2 + $0x58] sm:$0xff] %v579_v61 }
  0xf1   : > { %599 = vst [vmem:[#allocation2 + $0x8] sm:$0xff] %v583_v62 }
  0xf3   : > { %v562_v3 = vpop.f32.mrf.mxu2  ;;  %v572_v4 = vpop.f32.mrf.mxu3 }
  0xf4   : > { %v587_v5 = vadd.f32 %v562_v3, %v394_v63  ;;  %v591_v6 = vadd.f32 %v572_v4, %v398_v0  ;;  %v544_v7 = vpop.f32.mrf.mxu0  ;;  %v554_v8 = vpop.f32.mrf.mxu1 }
  0xf5   : > { %v580_v9 = vadd.f32 %v544_v7, %v387_v1  ;;  %v584_v10 = vadd.f32 %v554_v8, %v391_v2 }
  0xf6   : > { %603 = vst [vmem:[#allocation2 + $0x10] sm:$0xff] %v587_v5 }
  0xf7   : > { %607 = vst [vmem:[#allocation2 + $0x78] sm:$0xff] %v591_v6 }
  0xf8   : > { %596 = vst [vmem:[#allocation2 + $0x18] sm:$0xff] %v580_v9 }
  0xf9   : > { %600 = vst [vmem:[#allocation2 + $0x48] sm:$0xff] %v584_v10 }
  0xfb   : > { %v564_v13 = vpop.f32.mrf.mxu2  ;;  %v574_v14 = vpop.f32.mrf.mxu3  ;;  %612 = sbr.rel (%p917_p11) target bundleno = 282 (0x11a), region = 85 }
  0xfc   : > { %v588_v15 = vadd.f32 %v564_v13, %v395_v11  ;;  %v592_v16 = vadd.f32 %v574_v14, %v399_v12 }
  0xfe   : > { %604 = vst [vmem:[#allocation2 + $0x38] sm:$0xff] %v588_v15 }
  0xff   : > { %608 = vst [vmem:[#allocation2 + $0x28] sm:$0xff] %v592_v16 }
 0x100   : > { %v613_v17 = vld [vmem:[#allocation2 + $0x30] sm:$0xff]  ;;  %v614_v18 = vld [vmem:[#allocation2] sm:$0xff]  ;;  %v615_v21 = vld [vmem:[#allocation2 + $0x58] sm:$0xff] }
 0x101   : > { %v1249_v19 = vld [vmem:[%s1332_s2] ss:$0 sm:$0xff]  ;;  %v616_v24 = vld [vmem:[#allocation2 + $0x18] sm:$0xff]  ;;  %v1010_v25 = vld [vmem:[%s1333_s3 + $0x8] sm:$0xff]  }
 0x102   : > { %v939_v20 = vld [vmem:[%s1333_s3] sm:$0xff]   ;;  %v617_v26 = vld [vmem:[#allocation2 + $0x50] sm:$0xff]  ;;  %v633_v27 = vadd.f32 %v1249_v19, %v613_v17  ;;  %v634_v28 = vadd.f32 %v1249_v19, %v614_v18  ;;  %v635_v29 = vadd.f32 %v1249_v19, %v615_v21  ;;  %v636_v30 = vadd.f32 %v1249_v19, %v616_v24  ;;  %v618_v31 = vld [vmem:[#allocation2 + $0x68] sm:$0xff] }
 0x103   : > { %v940_v22 = vunpack.c.l.bf16 %v939_v20  ;;  %v941_v23 = vunpack.c.h.bf16 %v939_v20  ;;  %v1011_v32 = vld [vmem:[%s1333_s3 + $0x10] sm:$0xff]   ;;  %v619_v33 = vld [vmem:[#allocation2 + $0x8] sm:$0xff]  ;;  %v944_v34 = vunpack.c.l.bf16 %v1010_v25  ;;  %v945_v35 = vunpack.c.h.bf16 %v1010_v25  ;;  %v1012_v43 = vld [vmem:[%s1333_s3 + $0x18] sm:$0xff]  }
 0x104   : > { %v637_v36 = vadd.f32 %v1249_v19, %v617_v26  ;;  %v638_v37 = vadd.f32 %v1249_v19, %v618_v31  ;;  %v620_v38 = vld [vmem:[#allocation2 + $0x48] sm:$0xff]  ;;  %v948_v41 = vunpack.c.l.bf16 %v1011_v32  ;;  %v949_v42 = vunpack.c.h.bf16 %v1011_v32  ;;  %v621_v48 = vld [vmem:[#allocation2 + $0x40] sm:$0xff]  ;;  %v623_v59 = vld [vmem:[#allocation2 + $0x10] sm:$0xff] }
 0x105   : > { %v681_v39 = vadd.f32 %v940_v22, %v633_v27  ;;  %v682_v40 = vadd.f32 %v941_v23, %v634_v28  ;;  %v683_v44 = vadd.f32 %v944_v34, %v635_v29  ;;  %v684_v45 = vadd.f32 %v945_v35, %v636_v30  ;;  %v622_v53 = vld [vmem:[#allocation2 + $0x20] sm:$0xff]  ;;  %v624_v0 = vld [vmem:[#allocation2 + $0x38] sm:$0xff]  ;;  %v1014_v1 = vld [vmem:[%s1333_s3 + $0x28] sm:$0xff]  }
 0x106   : > { %v639_v46 = vadd.f32 %v1249_v19, %v619_v33  ;;  %v640_v47 = vadd.f32 %v1249_v19, %v620_v38  ;;  %v685_v51 = vadd.f32 %v948_v41, %v637_v36  ;;  %v686_v52 = vadd.f32 %v949_v42, %v638_v37  ;;  %v1013_v58 = vld [vmem:[%s1333_s3 + $0x20] sm:$0xff]   ;;  %v626_v11 = vld [vmem:[#allocation2 + $0x70] sm:$0xff]  ;;  %v627_v22 = vld [vmem:[#allocation2 + $0x78] sm:$0xff] }
 0x107   : > { %v697_v49 = vmax.f32 %v681_v39, 0.0  ;;  %v698_v50 = vmax.f32 %v682_v40, 0.0  ;;  %v699_v54 = vmax.f32 %v683_v44, 0.0  ;;  %v700_v55 = vmax.f32 %v684_v45, 0.0  ;;  %v625_v6 = vld [vmem:[#allocation2 + $0x60] sm:$0xff]  ;;  %v1015_v12 = vld [vmem:[%s1333_s3 + $0x30] sm:$0xff]  }
 0x108   : > { %v952_v56 = vunpack.c.l.bf16 %v1012_v43  ;;  %v953_v57 = vunpack.c.h.bf16 %v1012_v43  ;;  %v701_v61 = vmax.f32 %v685_v51, 0.0  ;;  %v702_v62 = vmax.f32 %v686_v52, 0.0  ;;  %v628_v23 = vld [vmem:[#allocation2 + $0x28] sm:$0xff]  ;;  %v1016_v28 = vld [vmem:[%s1333_s3 + $0x38] sm:$0xff]  }
 0x109   : > { %v973_v60 = vpack.c.bf16 %v698_v50, %v697_v49  ;;  %v641_v63 = vadd.f32 %v1249_v19, %v621_v48  ;;  %v978_v2 = vpack.c.bf16 %v700_v55, %v699_v54  ;;  %v642_v5 = vadd.f32 %v1249_v19, %v622_v53 }
 0x10a   : > { %v687_v3 = vadd.f32 %v952_v56, %v639_v46  ;;  %v688_v4 = vadd.f32 %v953_v57, %v640_v47  ;;  %v983_v7 = vpack.c.bf16 %v702_v62, %v701_v61  ;;  %v956_v8 = vunpack.c.l.bf16 %v1013_v58 }
 0x10b   : > { %974 = vst [vmem:[%s1334_s4] sm:$0xff] %v973_v60   ;;  %v957_v9 = vunpack.c.h.bf16 %v1013_v58  ;;  %v643_v10 = vadd.f32 %v1249_v19, %v623_v59  ;;  %v644_v15 = vadd.f32 %v1249_v19, %v624_v0  ;;  %v960_v16 = vunpack.c.l.bf16 %v1014_v1 }
 0x10c   : > { %1017 = vst [vmem:[%s1334_s4 + $0x8] sm:$0xff] %v978_v2   ;;  %v703_v13 = vmax.f32 %v687_v3, 0.0  ;;  %v704_v14 = vmax.f32 %v688_v4, 0.0  ;;  %v689_v17 = vadd.f32 %v956_v8, %v641_v63  ;;  %v961_v20 = vunpack.c.h.bf16 %v1014_v1 }
 0x10d   : > { %1018 = vst [vmem:[%s1334_s4 + $0x10] sm:$0xff] %v983_v7   ;;  %v690_v18 = vadd.f32 %v957_v9, %v642_v5  ;;  %v645_v21 = vadd.f32 %v1249_v19, %v625_v6  ;;  %v691_v25 = vadd.f32 %v960_v16, %v643_v10  ;;  %v646_v26 = vadd.f32 %v1249_v19, %v626_v11 }
 0x10e   : > { %v988_v24 = vpack.c.bf16 %v704_v14, %v703_v13  ;;  %v964_v27 = vunpack.c.l.bf16 %v1015_v12  ;;  %v705_v29 = vmax.f32 %v689_v17, 0.0  ;;  %v692_v31 = vadd.f32 %v961_v20, %v644_v15 }
 0x10f   : > { %v706_v30 = vmax.f32 %v690_v18, 0.0  ;;  %v965_v32 = vunpack.c.h.bf16 %v1015_v12  ;;  %v707_v33 = vmax.f32 %v691_v25, 0.0  ;;  %v647_v35 = vadd.f32 %v1249_v19, %v627_v22 }
 0x110   : > { %1019 = vst [vmem:[%s1334_s4 + $0x18] sm:$0xff] %v988_v24   ;;  %v693_v34 = vadd.f32 %v964_v27, %v645_v21  ;;  %v648_v36 = vadd.f32 %v1249_v19, %v628_v23  ;;  %v708_v38 = vmax.f32 %v692_v31, 0.0  ;;  %v968_v40 = vunpack.c.l.bf16 %v1016_v28 }
 0x111   : > { %v993_v37 = vpack.c.bf16 %v706_v30, %v705_v29  ;;  %v694_v39 = vadd.f32 %v965_v32, %v646_v26  ;;  %v969_v42 = vunpack.c.h.bf16 %v1016_v28 }
 0x112   : > { %v709_v41 = vmax.f32 %v693_v34, 0.0  ;;  %v998_v43 = vpack.c.bf16 %v708_v38, %v707_v33  ;;  %v695_v45 = vadd.f32 %v968_v40, %v647_v35 }
 0x113   : > { %1020 = vst [vmem:[%s1334_s4 + $0x20] sm:$0xff] %v993_v37   ;;  %v710_v44 = vmax.f32 %v694_v39, 0.0  ;;  %v696_v46 = vadd.f32 %v969_v42, %v648_v36 }
 0x114   : > { %1021 = vst [vmem:[%s1334_s4 + $0x28] sm:$0xff] %v998_v43   ;;  %v711_v19 = vmax.f32 %v695_v45, 0.0 }
 0x115   : > { %v1003_v47 = vpack.c.bf16 %v710_v44, %v709_v41  ;;  %v712_v48 = vmax.f32 %v696_v46, 0.0 }
 0x117   : > { %1022 = vst [vmem:[%s1334_s4 + $0x30] sm:$0xff] %v1003_v47   ;;  %v1008_v49 = vpack.c.bf16 %v712_v48, %v711_v19 }
 0x119   : > { %1023 = vst [vmem:[%s1334_s4 + $0x38] sm:$0xff] %v1008_v49  }
 0x11a PF: > { %s14_s19 = sadd.s32 1, %s1128_s19   ;;  %s1335_s15 = smov %s1116_s16 }
 0x11b   : > { %p11_p12 = scmp.ge.s32.totalorder %s14_s19, 5   ;;  %s1336_s16 = smov %s1191_s23 }
 0x11c   : > { %s1337_s17 = smov %s1124_s18  ;;  %s1338_s18 = smov %s1340_s20 }
 0x11d   :  { %13 = sbr.rel (!%p11_p12) target bundleno = 3 (0x3), region = 126 }

// kernel: resnet_embedder_forward.31
= control target key start
LH: loop header
LB: loop body
LE: loop exit
PB: predicated region body
PF: predicated region fallthrough
CT: control target
= control target key end

     0   :  { %s999_s12 = smov 0   ;;  %s1001_s13 = smov 0   ;;  %s1131_s0 = inlined_call_operand.vmem [shape: bf16[128,384], index: 0, kind: input, shape index: {}]   ;;  %s1132_s1 = inlined_call_operand.vmem [shape: bf16[384,128], index: 1, kind: input, shape index: {}]   ;;  %s1133_s2 = inlined_call_operand.vmem [shape: f32[1,128], index: 2, kind: input, shape index: {}]   ;;  %s1134_s3 = inlined_call_operand.vmem [shape: bf16[128,128], index: 3, kind: output, shape index: {}]  }
   0x1   :  { %s1003_s14 = smov 0   ;;  %s1005_s15 = smov 0  }
   0x2   :  { %s1007_s16 = smov 0  }
   0x3 LB: > { %s22_s17 = sadd.s32 1, %s972_s15  ;;  %p41_p1 = scmp.ne.s32.totalorder %s964_s13, %s960_s12  ;;  %s976_s16 = sphi %s1007_s16, %s13_s16   ;;  %s972_s15 = sphi %s1005_s15, %s1138_s15   ;;  %s968_s14 = sphi %s1003_s14, %s1137_s14   ;;  %s964_s13 = sphi %s1001_s13, %s1136_s13   ;;  %s960_s12 = sphi %s999_s12, %s1135_s12  }
   0x4   : > { %p23_p0 = scmp.ge.s32.totalorder %s22_s17, 3  ;;  %p42_p2 = scmp.eq.s32.totalorder %s976_s16, 0 }
   0x5   : > { %s34_s19 = sadd.s32 1, %s964_s13  ;;  %p732_p5 = scmp.ge.s32.totalorder %s976_s16, 3 }
   0x6   : > { %s1140_s17 = smov (%p23_p0, %s22_s17), 0  ;;  %p43_p3 = por %p42_p2, %p41_p1 }
   0x7   : > { %s30_s18 = ssub.s32 %s972_s15, %s1140_s17  ;;  %143 = sbr.rel (%p732_p5) target bundleno = 32 (0x20), region = 20 }
   0x8   : > { %p32_p4 = scmp.eq.s32.totalorder %s30_s18, 0 }
   0xa   : > { %s1034_s20 = scalar_select %p32_p4, %s964_s13, %s34_s19  }
   0xc   : > { %146 = sbr.rel (!%p43_p3) target bundleno = 32 (0x20), region = 24  ;;  %s148_s21 = sand.u32 (%p43_p3), 1, %s964_s13  }
   0xd   : > { %s734_s22 = sshll.u32 (%p43_p3), %s972_s15, 2  ;;  %s733_s23 = sshll.u32 (%p43_p3), %s148_s21, 6 }
   0xe   : > { %s1042_s26 = scalar_lea.vmem (%p43_p3), %s1131_s0, %s734_s22  ;;  %s150_s27 = scalar_lea.vmem (%p43_p3), [#allocation3], %s733_s23 }
   0xf   : > { %v172_v0 = vld [vmem:[%s1042_s26] sm:$0xf] (%p43_p3)  ;;  %v174_v1 = vld [vmem:[%s1042_s26 + $0xc] sm:$0xf] (%p43_p3)  ;;  %v176_v2 = vld [vmem:[%s1042_s26 + $0x18] sm:$0xf] (%p43_p3) }
  0x10   : > { %173 = vst [vmem:[%s150_s27] sm:$0xf] (%p43_p3), %v172_v0  ;;  %v178_v3 = vld [vmem:[%s1042_s26 + $0x24] sm:$0xf] (%p43_p3)  ;;  %v180_v4 = vld [vmem:[%s1042_s26 + $0x30] sm:$0xf] (%p43_p3) }
  0x11   : > { %175 = vst [vmem:[%s150_s27 + $0x4] sm:$0xf] %v174_v1  ;;  %v182_v5 = vld [vmem:[%s1042_s26 + $0x3c] sm:$0xf]  ;;  %v184_v6 = vld [vmem:[%s1042_s26 + $0x48] sm:$0xf] }
  0x12   : > { %177 = vst [vmem:[%s150_s27 + $0x8] sm:$0xf] %v176_v2  ;;  %v186_v7 = vld [vmem:[%s1042_s26 + $0x54] sm:$0xf]  ;;  %v188_v8 = vld [vmem:[%s1042_s26 + $0x60] sm:$0xf] }
  0x13   : > { %179 = vst [vmem:[%s150_s27 + $0xc] sm:$0xf] %v178_v3  ;;  %v190_v9 = vld [vmem:[%s1042_s26 + $0x6c] sm:$0xf]  ;;  %v192_v10 = vld [vmem:[%s1042_s26 + $0x78] sm:$0xf] }
  0x14   : > { %181 = vst [vmem:[%s150_s27 + $0x10] sm:$0xf] %v180_v4  ;;  %v194_v11 = vld [vmem:[%s1042_s26 + $0x84] sm:$0xf]  ;;  %v196_v12 = vld [vmem:[%s1042_s26 + $0x90] sm:$0xf] }
  0x15   : > { %183 = vst [vmem:[%s150_s27 + $0x14] sm:$0xf] %v182_v5  ;;  %v198_v13 = vld [vmem:[%s1042_s26 + $0x9c] sm:$0xf]  ;;  %v200_v14 = vld [vmem:[%s1042_s26 + $0xa8] sm:$0xf] }
  0x16   : > { %185 = vst [vmem:[%s150_s27 + $0x18] sm:$0xf] %v184_v6  ;;  %v202_v15 = vld [vmem:[%s1042_s26 + $0xb4] sm:$0xf] }
  0x17   : > { %187 = vst [vmem:[%s150_s27 + $0x1c] sm:$0xf] %v186_v7 }
  0x18   : > { %189 = vst [vmem:[%s150_s27 + $0x20] sm:$0xf] %v188_v8 }
  0x19   : > { %191 = vst [vmem:[%s150_s27 + $0x24] sm:$0xf] %v190_v9 }
  0x1a   : > { %193 = vst [vmem:[%s150_s27 + $0x28] sm:$0xf] %v192_v10 }
  0x1b   : > { %195 = vst [vmem:[%s150_s27 + $0x2c] sm:$0xf] %v194_v11 }
  0x1c   : > { %197 = vst [vmem:[%s150_s27 + $0x30] sm:$0xf] %v196_v12 }
  0x1d   : > { %199 = vst [vmem:[%s150_s27 + $0x34] sm:$0xf] %v198_v13 }
  0x1e   : > { %201 = vst [vmem:[%s150_s27 + $0x38] sm:$0xf] %v200_v14 }
  0x1f   : > { %203 = vst [vmem:[%s150_s27 + $0x3c] sm:$0xf] %v202_v15 }
  0x20 PF: > { %p735_p6 = scmp.ge.s32.totalorder %s976_s16, 1  ;;  %p267_p7 = scmp.lt.s32.totalorder %s976_s16, 4 }
  0x22   : > { %p268_p8 = pnand %p735_p6, %p267_p7 }
  0x23   : > { %s274_s28 = sand.u32 (!%p268_p8), 1, %s960_s12   ;;  %s737_s29 = sshll.u32 (!%p268_p8), %s968_s14, 4 }
  0x24   : > { %271 = sbr.rel (%p268_p8) target bundleno = 272 (0x110), region = 69  ;;  %s736_s30 = sshll.u32 (!%p268_p8), %s274_s28, 6 }
  0x25   : > { %p304_p9 = scmp.lt.s32.totalorder (!%p268_p8), %s737_s29, 47  ;;  %s1069_s8 = scalar_lea.vmem (!%p268_p8), [#allocation3], %s736_s30 }
  0x26   : > { %p739_p10 = scmp.ne.s32.totalorder (!%p268_p8), %s968_s14, 0 }
  0x29   : > { %s1142_s29 = smov (!%p304_p9, %s737_s29), 47  ;;  %318 = sbr.rel (%p739_p10) target bundleno = 63 (0x3f), region = 77 }
  0x2a   : > { %s738_s4 = sshll.u32 %s1142_s29, 2 }
  0x2b   : > { %s1067_s7 = scalar_lea.vmem %s1132_s1, %s738_s4 }
  0x2e   : > { %v978_v16 = vmov 0.0  }
  0x2f   : > { %319 = vst [vmem:[#allocation2 + $0x30] sm:$0xff] %v978_v16 }
  0x30   : > { %320 = vst [vmem:[#allocation2] sm:$0xff] %v978_v16 }
  0x31   : > { %321 = vst [vmem:[#allocation2 + $0x58] sm:$0xff] %v978_v16 }
  0x32   : > { %322 = vst [vmem:[#allocation2 + $0x18] sm:$0xff] %v978_v16 }
  0x33   : > { %323 = vst [vmem:[#allocation2 + $0x50] sm:$0xff] %v978_v16 }
  0x34   : > { %324 = vst [vmem:[#allocation2 + $0x68] sm:$0xff] %v978_v16 }
  0x35   : > { %325 = vst [vmem:[#allocation2 + $0x8] sm:$0xff] %v978_v16 }
  0x36   : > { %326 = vst [vmem:[#allocation2 + $0x48] sm:$0xff] %v978_v16 }
  0x37   : > { %327 = vst [vmem:[#allocation2 + $0x40] sm:$0xff] %v978_v16 }
  0x38   : > { %328 = vst [vmem:[#allocation2 + $0x20] sm:$0xff] %v978_v16 }
  0x39   : > { %329 = vst [vmem:[#allocation2 + $0x10] sm:$0xff] %v978_v16 }
  0x3a   : > { %330 = vst [vmem:[#allocation2 + $0x38] sm:$0xff] %v978_v16 }
  0x3b   : > { %331 = vst [vmem:[#allocation2 + $0x60] sm:$0xff] %v978_v16 }
  0x3c   : > { %332 = vst [vmem:[#allocation2 + $0x70] sm:$0xff] %v978_v16 }
  0x3d   : > { %333 = vst [vmem:[#allocation2 + $0x78] sm:$0xff] %v978_v16 }
  0x3e   : > { %334 = vst [vmem:[#allocation2 + $0x28] sm:$0xff] %v978_v16 }
  0x3f PF: > { %v824_v17 = vld [vmem:[%s1067_s7 + $0x38] sm:$0xff]  ;;  %v823_v18 = vld [vmem:[%s1067_s7 + $0x30] sm:$0xff]  ;;  %v822_v19 = vld [vmem:[%s1067_s7 + $0x28] sm:$0xff]  ;;  %p804_p11 = scmp.ne.s32.totalorder %s968_s14, 2 }
  0x40   : > { %479 = vmatpush.bf16.msra.mxu0 %v824_v17  ;;  %872 = vmatpush.bf16.msra.mxu1 %v824_v17  ;;  %v821_v20 = vld [vmem:[%s1067_s7 + $0x20] sm:$0xff]  ;;  %v820_v21 = vld [vmem:[%s1067_s7 + $0x18] sm:$0xff]  ;;  %v819_v22 = vld [vmem:[%s1067_s7 + $0x10] sm:$0xff] }
  0x41   : > { %873 = vmatpush.bf16.msra.mxu2 %v824_v17  ;;  %874 = vmatpush.bf16.msra.mxu3 %v824_v17  ;;  %v818_v23 = vld [vmem:[%s1067_s7 + $0x8] sm:$0xff]  ;;  %v817_v24 = vld [vmem:[%s1067_s7] sm:$0xff]  ;;  %v811_v26 = vld [vmem:[%s1069_s8 + $0x10] sm:$0xff] }
  0x42   : > { %v809_v25 = vld [vmem:[%s1069_s8] sm:$0xff]  ;;  %v815_v28 = vld [vmem:[%s1069_s8 + $0x30] sm:$0xff]  ;;  %v810_v29 = vld [vmem:[%s1069_s8 + $0x8] sm:$0xff] }
  0x43   : > { %v813_v27 = vld [vmem:[%s1069_s8 + $0x20] sm:$0xff]  ;;  %v812_v30 = vld [vmem:[%s1069_s8 + $0x18] sm:$0xff]  ;;  %v814_v31 = vld [vmem:[%s1069_s8 + $0x28] sm:$0xff] }
  0x44   : > { %480 = vmatpush.bf16.msra.mxu0 %v823_v18  ;;  %875 = vmatpush.bf16.msra.mxu1 %v823_v18  ;;  %v816_v32 = vld [vmem:[%s1069_s8 + $0x38] sm:$0xff]  ;;  %v335_v33 = vld [vmem:[#allocation2 + $0x30] sm:$0xff]  ;;  %v343_v39 = vld [vmem:[#allocation2 + $0x40] sm:$0xff] }
  0x45   : > { %876 = vmatpush.bf16.msra.mxu2 %v823_v18  ;;  %877 = vmatpush.bf16.msra.mxu3 %v823_v18  ;;  %v339_v34 = vld [vmem:[#allocation2 + $0x50] sm:$0xff]  ;;  %v347_v40 = vld [vmem:[#allocation2 + $0x60] sm:$0xff]  ;;  %v340_v42 = vld [vmem:[#allocation2 + $0x68] sm:$0xff] }
  0x46   : > { %v336_v41 = vld [vmem:[#allocation2] sm:$0xff]  ;;  %v348_v52 = vld [vmem:[#allocation2 + $0x70] sm:$0xff]  ;;  %v337_v53 = vld [vmem:[#allocation2 + $0x58] sm:$0xff] }
  0x47   : > { %v344_v51 = vld [vmem:[#allocation2 + $0x20] sm:$0xff]  ;;  %v341_v54 = vld [vmem:[#allocation2 + $0x8] sm:$0xff]  ;;  %v345_v63 = vld [vmem:[#allocation2 + $0x10] sm:$0xff] }
  0x48   : > { %481 = vmatpush.bf16.msra.mxu0 %v822_v19  ;;  %878 = vmatpush.bf16.msra.mxu1 %v822_v19  ;;  %v349_v0 = vld [vmem:[#allocation2 + $0x78] sm:$0xff]  ;;  %v342_v2 = vld [vmem:[#allocation2 + $0x48] sm:$0xff] }
  0x49   : > { %879 = vmatpush.bf16.msra.mxu2 %v822_v19  ;;  %880 = vmatpush.bf16.msra.mxu3 %v822_v19  ;;  %v338_v1 = vld [vmem:[#allocation2 + $0x18] sm:$0xff]  ;;  %v350_v12 = vld [vmem:[#allocation2 + $0x28] sm:$0xff] }
  0x4a   : > { %v346_v11 = vld [vmem:[#allocation2 + $0x38] sm:$0xff] }
  0x4c   : > { %482 = vmatpush.bf16.msra.mxu0 %v821_v20  ;;  %881 = vmatpush.bf16.msra.mxu1 %v821_v20 }
  0x4d   : > { %882 = vmatpush.bf16.msra.mxu2 %v821_v20  ;;  %883 = vmatpush.bf16.msra.mxu3 %v821_v20 }
  0x50   : > { %483 = vmatpush.bf16.msra.mxu0 %v820_v21  ;;  %884 = vmatpush.bf16.msra.mxu1 %v820_v21 }
  0x51   : > { %885 = vmatpush.bf16.msra.mxu2 %v820_v21  ;;  %886 = vmatpush.bf16.msra.mxu3 %v820_v21 }
  0x54   : > { %484 = vmatpush.bf16.msra.mxu0 %v819_v22  ;;  %887 = vmatpush.bf16.msra.mxu1 %v819_v22 }
  0x55   : > { %888 = vmatpush.bf16.msra.mxu2 %v819_v22  ;;  %889 = vmatpush.bf16.msra.mxu3 %v819_v22 }
  0x58   : > { %485 = vmatpush.bf16.msra.mxu0 %v818_v23  ;;  %890 = vmatpush.bf16.msra.mxu1 %v818_v23 }
  0x59   : > { %891 = vmatpush.bf16.msra.mxu2 %v818_v23  ;;  %892 = vmatpush.bf16.msra.mxu3 %v818_v23 }
  0x5c   : > { %486 = vmatpush.bf16.msra.mxu0 %v817_v24  ;;  %893 = vmatpush.bf16.msra.mxu1 %v817_v24 }
  0x5d   : > { %894 = vmatpush.bf16.msra.mxu2 %v817_v24  ;;  %895 = vmatpush.bf16.msra.mxu3 %v817_v24 }
  0x5f   : > { %487 = vmatmul.bf16.vlgmr.msra.gmra.mxu0 %v809_v25  ;;  %497 = vmatmul.bf16.vlgmr.msra.gmra.mxu1 %v811_v26 }
  0x60   : > { %507 = vmatmul.bf16.vlgmr.msra.gmra.mxu2 %v813_v27  ;;  %517 = vmatmul.bf16.vlgmr.msra.gmra.mxu3 %v815_v28 }
  0x6f   : > { %492 = vmatmul.bf16.gmra.mxu0 %v810_v29  ;;  %502 = vmatmul.bf16.gmra.mxu1 %v812_v30 }
  0x70   : > { %512 = vmatmul.bf16.gmra.mxu2 %v814_v31  ;;  %522 = vmatmul.bf16.gmra.mxu3 %v816_v32 }
  0xdc   : > { %v488_v35 = vpop.f32.mrf.mxu0  ;;  %v498_v36 = vpop.f32.mrf.mxu1 }
  0xdd   : > { %v528_v37 = vadd.f32 %v488_v35, %v335_v33  ;;  %v532_v38 = vadd.f32 %v498_v36, %v339_v34 }
  0xdf   : > { %544 = vst [vmem:[#allocation2 + $0x30] sm:$0xff] %v528_v37 }
  0xe0   : > { %548 = vst [vmem:[#allocation2 + $0x50] sm:$0xff] %v532_v38 }
  0xe3   : > { %v508_v43 = vpop.f32.mrf.mxu2  ;;  %v518_v44 = vpop.f32.mrf.mxu3 }
  0xe4   : > { %v536_v45 = vadd.f32 %v508_v43, %v343_v39  ;;  %v540_v46 = vadd.f32 %v518_v44, %v347_v40  ;;  %v490_v47 = vpop.f32.mrf.mxu0  ;;  %v500_v48 = vpop.f32.mrf.mxu1 }
  0xe5   : > { %v529_v49 = vadd.f32 %v490_v47, %v336_v41  ;;  %v533_v50 = vadd.f32 %v500_v48, %v340_v42 }
  0xe6   : > { %552 = vst [vmem:[#allocation2 + $0x40] sm:$0xff] %v536_v45 }
  0xe7   : > { %556 = vst [vmem:[#allocation2 + $0x60] sm:$0xff] %v540_v46 }
  0xe8   : > { %545 = vst [vmem:[#allocation2] sm:$0xff] %v529_v49 }
  0xe9   : > { %549 = vst [vmem:[#allocation2 + $0x68] sm:$0xff] %v533_v50 }
  0xeb   : > { %v510_v55 = vpop.f32.mrf.mxu2  ;;  %v520_v56 = vpop.f32.mrf.mxu3 }
  0xec   : > { %v537_v57 = vadd.f32 %v510_v55, %v344_v51  ;;  %v541_v58 = vadd.f32 %v520_v56, %v348_v52  ;;  %v493_v59 = vpop.f32.mrf.mxu0  ;;  %v503_v60 = vpop.f32.mrf.mxu1 }
  0xed   : > { %v530_v61 = vadd.f32 %v493_v59, %v337_v53  ;;  %v534_v62 = vadd.f32 %v503_v60, %v341_v54 }
  0xee   : > { %553 = vst [vmem:[#allocation2 + $0x20] sm:$0xff] %v537_v57 }
  0xef   : > { %557 = vst [vmem:[#allocation2 + $0x70] sm:$0xff] %v541_v58 }
  0xf0   : > { %546 = vst [vmem:[#allocation2 + $0x58] sm:$0xff] %v530_v61 }
  0xf1   : > { %550 = vst [vmem:[#allocation2 + $0x8] sm:$0xff] %v534_v62 }
  0xf3   : > { %v513_v3 = vpop.f32.mrf.mxu2  ;;  %v523_v4 = vpop.f32.mrf.mxu3 }
  0xf4   : > { %v538_v5 = vadd.f32 %v513_v3, %v345_v63  ;;  %v542_v6 = vadd.f32 %v523_v4, %v349_v0  ;;  %v495_v7 = vpop.f32.mrf.mxu0  ;;  %v505_v8 = vpop.f32.mrf.mxu1 }
  0xf5   : > { %v531_v9 = vadd.f32 %v495_v7, %v338_v1  ;;  %v535_v10 = vadd.f32 %v505_v8, %v342_v2 }
  0xf6   : > { %554 = vst [vmem:[#allocation2 + $0x10] sm:$0xff] %v538_v5 }
  0xf7   : > { %558 = vst [vmem:[#allocation2 + $0x78] sm:$0xff] %v542_v6 }
  0xf8   : > { %547 = vst [vmem:[#allocation2 + $0x18] sm:$0xff] %v531_v9 }
  0xf9   : > { %551 = vst [vmem:[#allocation2 + $0x48] sm:$0xff] %v535_v10 }
  0xfb   : > { %v515_v13 = vpop.f32.mrf.mxu2  ;;  %v525_v14 = vpop.f32.mrf.mxu3  ;;  %563 = sbr.rel (%p804_p11) target bundleno = 272 (0x110), region = 81 }
  0xfc   : > { %v539_v15 = vadd.f32 %v515_v13, %v346_v11  ;;  %v543_v16 = vadd.f32 %v525_v14, %v350_v12 }
  0xfe   : > { %555 = vst [vmem:[#allocation2 + $0x38] sm:$0xff] %v539_v15 }
  0xff   : > { %559 = vst [vmem:[#allocation2 + $0x28] sm:$0xff] %v543_v16 }
 0x100   : > { %v564_v17 = vld [vmem:[#allocation2 + $0x30] sm:$0xff]  ;;  %v565_v18 = vld [vmem:[#allocation2] sm:$0xff]  ;;  %v566_v20 = vld [vmem:[#allocation2 + $0x58] sm:$0xff] }
 0x101   : > { %v937_v19 = vld [vmem:[%s1133_s2] ss:$0 sm:$0xff]  ;;  %v567_v21 = vld [vmem:[#allocation2 + $0x18] sm:$0xff]  ;;  %v568_v22 = vld [vmem:[#allocation2 + $0x50] sm:$0xff] }
 0x102   : > { %v569_v23 = vld [vmem:[#allocation2 + $0x68] sm:$0xff]  ;;  %v584_v25 = vadd.f32 %v937_v19, %v564_v17  ;;  %v585_v26 = vadd.f32 %v937_v19, %v565_v18  ;;  %v586_v27 = vadd.f32 %v937_v19, %v566_v20  ;;  %v587_v28 = vadd.f32 %v937_v19, %v567_v21  ;;  %v572_v34 = vld [vmem:[#allocation2 + $0x40] sm:$0xff]  ;;  %v574_v40 = vld [vmem:[#allocation2 + $0x10] sm:$0xff] }
 0x103   : > { %v570_v24 = vld [vmem:[#allocation2 + $0x8] sm:$0xff]  ;;  %v588_v30 = vadd.f32 %v937_v19, %v568_v22  ;;  %v589_v31 = vadd.f32 %v937_v19, %v569_v23  ;;  %v573_v35 = vld [vmem:[#allocation2 + $0x20] sm:$0xff]  ;;  %v577_v47 = vld [vmem:[#allocation2 + $0x70] sm:$0xff]  ;;  %v592_v50 = vadd.f32 %v937_v19, %v572_v34  ;;  %v594_v56 = vadd.f32 %v937_v19, %v574_v40 }
 0x104   : > { %v571_v29 = vld [vmem:[#allocation2 + $0x48] sm:$0xff]  ;;  %v590_v32 = vadd.f32 %v937_v19, %v570_v24  ;;  %v600_v36 = vmax.f32 %v584_v25, 0.0  ;;  %v601_v37 = vmax.f32 %v585_v26, 0.0  ;;  %v602_v38 = vmax.f32 %v586_v27, 0.0  ;;  %v576_v46 = vld [vmem:[#allocation2 + $0x60] sm:$0xff]  ;;  %v578_v52 = vld [vmem:[#allocation2 + $0x78] sm:$0xff] }
 0x105   : > { %v591_v33 = vadd.f32 %v937_v19, %v571_v29  ;;  %v603_v39 = vmax.f32 %v587_v28, 0.0  ;;  %v575_v41 = vld [vmem:[#allocation2 + $0x38] sm:$0xff]  ;;  %v604_v42 = vmax.f32 %v588_v30, 0.0  ;;  %v605_v43 = vmax.f32 %v589_v31, 0.0 }
 0x106   : > { %v606_v44 = vmax.f32 %v590_v32, 0.0  ;;  %v828_v48 = vpack.c.bf16 %v601_v37, %v600_v36  ;;  %v593_v51 = vadd.f32 %v937_v19, %v573_v35  ;;  %v579_v53 = vld [vmem:[#allocation2 + $0x28] sm:$0xff]  ;;  %v595_v57 = vadd.f32 %v937_v19, %v575_v41 }
 0x107   : > { %v607_v45 = vmax.f32 %v591_v33, 0.0  ;;  %v833_v49 = vpack.c.bf16 %v603_v39, %v602_v38  ;;  %v838_v54 = vpack.c.bf16 %v605_v43, %v604_v42  ;;  %v608_v58 = vmax.f32 %v592_v50, 0.0 }
 0x108   : > { %829 = vst [vmem:[%s1134_s3] sm:$0xff] %v828_v48   ;;  %v609_v59 = vmax.f32 %v593_v51, 0.0  ;;  %v596_v60 = vadd.f32 %v937_v19, %v576_v46  ;;  %v597_v61 = vadd.f32 %v937_v19, %v577_v47  ;;  %v610_v62 = vmax.f32 %v594_v56, 0.0 }
 0x109   : > { %v843_v55 = vpack.c.bf16 %v607_v45, %v606_v44  ;;  %865 = vst [vmem:[%s1134_s3 + $0x8] sm:$0xff] %v833_v49   ;;  %v611_v63 = vmax.f32 %v595_v57, 0.0  ;;  %v598_v0 = vadd.f32 %v937_v19, %v578_v52  ;;  %v599_v1 = vadd.f32 %v937_v19, %v579_v53 }
 0x10a   : > { %866 = vst [vmem:[%s1134_s3 + $0x10] sm:$0xff] %v838_v54   ;;  %v848_v2 = vpack.c.bf16 %v609_v59, %v608_v58  ;;  %v612_v3 = vmax.f32 %v596_v60, 0.0  ;;  %v613_v4 = vmax.f32 %v597_v61, 0.0 }
 0x10b   : > { %867 = vst [vmem:[%s1134_s3 + $0x18] sm:$0xff] %v843_v55   ;;  %v853_v5 = vpack.c.bf16 %v611_v63, %v610_v62  ;;  %v614_v6 = vmax.f32 %v598_v0, 0.0  ;;  %v615_v7 = vmax.f32 %v599_v1, 0.0 }
 0x10c   : > { %868 = vst [vmem:[%s1134_s3 + $0x20] sm:$0xff] %v848_v2   ;;  %v858_v8 = vpack.c.bf16 %v613_v4, %v612_v3 }
 0x10d   : > { %869 = vst [vmem:[%s1134_s3 + $0x28] sm:$0xff] %v853_v5   ;;  %v863_v9 = vpack.c.bf16 %v615_v7, %v614_v6 }
 0x10e   : > { %870 = vst [vmem:[%s1134_s3 + $0x30] sm:$0xff] %v858_v8  }
 0x10f   : > { %871 = vst [vmem:[%s1134_s3 + $0x38] sm:$0xff] %v863_v9  }
 0x110 PF: > { %s13_s16 = sadd.s32 1, %s976_s16   ;;  %s1135_s12 = smov %s964_s13 }
 0x111   : > { %p10_p12 = scmp.ge.s32.totalorder %s13_s16, 5   ;;  %s1136_s13 = smov %s1034_s20 }
 0x112   : > { %s1137_s14 = smov %s972_s15  ;;  %s1138_s15 = smov %s1140_s17 }
 0x113   :  { %12 = sbr.rel (!%p10_p12) target bundleno = 3 (0x3), region = 119 }

// kernel: resnet_embedder_forward.33
= control target key start
LH: loop header
LB: loop body
LE: loop exit
PB: predicated region body
PF: predicated region fallthrough
CT: control target
= control target key end

     0   :  { %s683_s12 = smov 0   ;;  %s685_s13 = smov 0   ;;  %s776_s0 = inlined_call_operand.vmem [shape: bf16[32,384], index: 0, kind: input, shape index: {}]   ;;  %s777_s1 = inlined_call_operand.vmem [shape: bf16[384,128], index: 1, kind: input, shape index: {}]   ;;  %s778_s2 = inlined_call_operand.vmem [shape: f32[1,128], index: 2, kind: input, shape index: {}]   ;;  %s779_s3 = inlined_call_operand.vmem [shape: bf16[32,128], index: 3, kind: output, shape index: {}]  }
   0x1   :  { %s687_s14 = smov 0   ;;  %s689_s15 = smov 0  }
   0x2   :  { %s691_s16 = smov 0  }
   0x3 LB: > { %s22_s17 = sadd.s32 1, %s656_s15  ;;  %p41_p1 = scmp.ne.s32.totalorder %s648_s13, %s644_s12  ;;  %s660_s16 = sphi %s691_s16, %s13_s16   ;;  %s656_s15 = sphi %s689_s15, %s783_s15   ;;  %s652_s14 = sphi %s687_s14, %s782_s14   ;;  %s648_s13 = sphi %s685_s13, %s781_s13   ;;  %s644_s12 = sphi %s683_s12, %s780_s12  }
   0x4   : > { %p23_p0 = scmp.ge.s32.totalorder %s22_s17, 3  ;;  %p42_p2 = scmp.eq.s32.totalorder %s660_s16, 0 }
   0x5   : > { %s34_s19 = sadd.s32 1, %s648_s13  ;;  %p498_p5 = scmp.ge.s32.totalorder %s660_s16, 3 }
   0x6   : > { %s785_s17 = smov (%p23_p0, %s22_s17), 0  ;;  %p43_p3 = por %p42_p2, %p41_p1 }
   0x7   : > { %s30_s18 = ssub.s32 %s656_s15, %s785_s17  ;;  %143 = sbr.rel (%p498_p5) target bundleno = 20 (0x14), region = 20 }
   0x8   : > { %p32_p4 = scmp.eq.s32.totalorder %s30_s18, 0 }
   0xa   : > { %s718_s20 = scalar_select %p32_p4, %s648_s13, %s34_s19  }
   0xc   : > { %146 = sbr.rel (!%p43_p3) target bundleno = 20 (0x14), region = 24  ;;  %s148_s21 = sand.u32 (%p43_p3), 1, %s648_s13  }
   0xd   : > { %s500_s22 = sshll.u32 (%p43_p3), %s656_s15, 2  ;;  %s499_s23 = sshll.u32 (%p43_p3), %s148_s21, 4 }
   0xe   : > { %s155_s26 = scalar_lea.vmem (%p43_p3), %s776_s0, %s500_s22  ;;  %s150_s27 = scalar_lea.vmem (%p43_p3), [#allocation3], %s499_s23 }
   0xf   : > { %v172_v0 = vld [vmem:[%s155_s26] sm:$0xf] (%p43_p3)  ;;  %v174_v1 = vld [vmem:[%s155_s26 + $0xc] sm:$0xf] (%p43_p3)  ;;  %v176_v2 = vld [vmem:[%s155_s26 + $0x18] sm:$0xf] (%p43_p3) }
  0x10   : > { %173 = vst [vmem:[%s150_s27] sm:$0xf] (%p43_p3), %v172_v0  ;;  %v178_v3 = vld [vmem:[%s155_s26 + $0x24] sm:$0xf] (%p43_p3) }
  0x11   : > { %175 = vst [vmem:[%s150_s27 + $0x4] sm:$0xf] %v174_v1 }
  0x12   : > { %177 = vst [vmem:[%s150_s27 + $0x8] sm:$0xf] %v176_v2 }
  0x13   : > { %179 = vst [vmem:[%s150_s27 + $0xc] sm:$0xf] %v178_v3 }
  0x14 PF: > { %p501_p6 = scmp.ge.s32.totalorder %s660_s16, 1  ;;  %p219_p7 = scmp.lt.s32.totalorder %s660_s16, 4 }
  0x16   : > { %p220_p8 = pnand %p501_p6, %p219_p7 }
  0x17   : > { %s226_s28 = sand.u32 (!%p220_p8), 1, %s644_s12   ;;  %s503_s29 = sshll.u32 (!%p220_p8), %s652_s14, 4 }
  0x18   : > { %223 = sbr.rel (%p220_p8) target bundleno = 223 (0xdf), region = 69  ;;  %s730_s30 = sshll.u32 (!%p220_p8), %s226_s28, 4 }
  0x19   : > { %p256_p9 = scmp.lt.s32.totalorder (!%p220_p8), %s503_s29, 47  ;;  %s228_s8 = scalar_lea.vmem (!%p220_p8), [#allocation3], %s730_s30 }
  0x1a   : > { %p505_p10 = scmp.ne.s32.totalorder (!%p220_p8), %s652_s14, 0 }
  0x1d   : > { %s787_s29 = smov (!%p256_p9, %s503_s29), 47  ;;  %270 = sbr.rel (%p505_p10) target bundleno = 39 (0x27), region = 77 }
  0x1e   : > { %s504_s4 = sshll.u32 %s787_s29, 2 }
  0x1f   : > { %s735_s7 = scalar_lea.vmem %s777_s1, %s504_s4 }
  0x22   : > { %v662_v4 = vmov 0.0  }
  0x23   : > { %271 = vst [vmem:[#allocation2 + $0x10] sm:$0xff] %v662_v4 }
  0x24   : > { %272 = vst [vmem:[#allocation2] sm:$0xff] %v662_v4 }
  0x25   : > { %273 = vst [vmem:[#allocation2 + $0x18] sm:$0xff] %v662_v4 }
  0x26   : > { %274 = vst [vmem:[#allocation2 + $0x8] sm:$0xff] %v662_v4 }
  0x27 PF: > { %v560_v5 = vld [vmem:[%s735_s7 + $0x38] sm:$0xff]  ;;  %v559_v6 = vld [vmem:[%s735_s7 + $0x30] sm:$0xff]  ;;  %v558_v7 = vld [vmem:[%s735_s7 + $0x28] sm:$0xff]  ;;  %p546_p11 = scmp.ne.s32.totalorder %s652_s14, 2 }
  0x28   : > { %359 = vmatpush.bf16.msra.mxu0 %v560_v5  ;;  %572 = vmatpush.bf16.msra.mxu1 %v560_v5  ;;  %v557_v8 = vld [vmem:[%s735_s7 + $0x20] sm:$0xff]  ;;  %v556_v9 = vld [vmem:[%s735_s7 + $0x18] sm:$0xff]  ;;  %v555_v10 = vld [vmem:[%s735_s7 + $0x10] sm:$0xff] }
  0x29   : > { %v554_v11 = vld [vmem:[%s735_s7 + $0x8] sm:$0xff]  ;;  %v553_v12 = vld [vmem:[%s735_s7] sm:$0xff] }
  0x2a   : > { %v551_v13 = vld [vmem:[%s228_s8] sm:$0xff]  ;;  %v552_v14 = vld [vmem:[%s228_s8 + $0x8] sm:$0xff] }
  0x2b   : > { %v275_v15 = vld [vmem:[#allocation2 + $0x10] sm:$0xff]  ;;  %v276_v21 = vld [vmem:[#allocation2] sm:$0xff] }
  0x2c   : > { %360 = vmatpush.bf16.msra.mxu0 %v559_v6  ;;  %573 = vmatpush.bf16.msra.mxu1 %v559_v6  ;;  %v277_v16 = vld [vmem:[#allocation2 + $0x18] sm:$0xff] }
  0x2d   : > { %v278_v22 = vld [vmem:[#allocation2 + $0x8] sm:$0xff] }
  0x30   : > { %361 = vmatpush.bf16.msra.mxu0 %v558_v7  ;;  %574 = vmatpush.bf16.msra.mxu1 %v558_v7 }
  0x34   : > { %362 = vmatpush.bf16.msra.mxu0 %v557_v8  ;;  %575 = vmatpush.bf16.msra.mxu1 %v557_v8 }
  0x38   : > { %363 = vmatpush.bf16.msra.mxu0 %v556_v9  ;;  %576 = vmatpush.bf16.msra.mxu1 %v556_v9 }
  0x3c   : > { %364 = vmatpush.bf16.msra.mxu0 %v555_v10  ;;  %577 = vmatpush.bf16.msra.mxu1 %v555_v10 }
  0x40   : > { %365 = vmatpush.bf16.msra.mxu0 %v554_v11  ;;  %578 = vmatpush.bf16.msra.mxu1 %v554_v11 }
  0x44   : > { %366 = vmatpush.bf16.msra.mxu0 %v553_v12  ;;  %579 = vmatpush.bf16.msra.mxu1 %v553_v12 }
  0x47   : > { %367 = vmatmul.bf16.vlgmr.msra.gmra.mxu0 %v551_v13  ;;  %372 = vmatmul.bf16.vlgmr.msra.gmra.mxu1 %v552_v14 }
  0xc4   : > { %v368_v17 = vpop.f32.mrf.mxu0  ;;  %v373_v18 = vpop.f32.mrf.mxu1 }
  0xc5   : > { %v378_v19 = vadd.f32 %v368_v17, %v275_v15  ;;  %v380_v20 = vadd.f32 %v373_v18, %v277_v16 }
  0xc7   : > { %382 = vst [vmem:[#allocation2 + $0x10] sm:$0xff] %v378_v19 }
  0xc8   : > { %384 = vst [vmem:[#allocation2 + $0x18] sm:$0xff] %v380_v20 }
  0xcc   : > { %v370_v23 = vpop.f32.mrf.mxu0  ;;  %v375_v24 = vpop.f32.mrf.mxu1  ;;  %389 = sbr.rel (%p546_p11) target bundleno = 223 (0xdf), region = 81 }
  0xcd   : > { %v379_v25 = vadd.f32 %v370_v23, %v276_v21  ;;  %v381_v26 = vadd.f32 %v375_v24, %v278_v22 }
  0xcf   : > { %383 = vst [vmem:[#allocation2] sm:$0xff] %v379_v25 }
  0xd0   : > { %385 = vst [vmem:[#allocation2 + $0x8] sm:$0xff] %v381_v26 }
  0xd1   : > { %v390_v27 = vld [vmem:[#allocation2 + $0x10] sm:$0xff]  ;;  %v621_v29 = vld [vmem:[%s778_s2] ss:$0 sm:$0xff]  ;;  %v392_v30 = vld [vmem:[#allocation2 + $0x18] sm:$0xff] }
  0xd2   : > { %v398_v32 = vadd.f32 %v621_v29, %v390_v27  ;;  %v400_v34 = vadd.f32 %v621_v29, %v392_v30 }
  0xd4   : > { %v402_v36 = vmax.f32 %v398_v32, 0.0  ;;  %v404_v38 = vmax.f32 %v400_v34, 0.0 }
  0xd6   : > { %v391_v28 = vld [vmem:[#allocation2] sm:$0xff] }
  0xd7   : > { %v393_v31 = vld [vmem:[#allocation2 + $0x8] sm:$0xff]  ;;  %v399_v33 = vadd.f32 %v621_v29, %v391_v28 }
  0xd8   : > { %v401_v35 = vadd.f32 %v621_v29, %v393_v31 }
  0xd9   : > { %v403_v37 = vmax.f32 %v399_v33, 0.0 }
  0xda   : > { %v405_v39 = vmax.f32 %v401_v35, 0.0 }
  0xdb   : > { %v564_v40 = vpack.c.bf16 %v403_v37, %v402_v36 }
  0xdc   : > { %v569_v41 = vpack.c.bf16 %v405_v39, %v404_v38 }
  0xdd   : > { %565 = vst [vmem:[%s779_s3] sm:$0xff] %v564_v40  }
  0xde   : > { %571 = vst [vmem:[%s779_s3 + $0x8] sm:$0xff] %v569_v41  }
  0xdf PF: > { %s13_s16 = sadd.s32 1, %s660_s16   ;;  %s780_s12 = smov %s648_s13 }
  0xe0   : > { %p10_p12 = scmp.ge.s32.totalorder %s13_s16, 5   ;;  %s781_s13 = smov %s718_s20 }
  0xe1   : > { %s782_s14 = smov %s656_s15  ;;  %s783_s15 = smov %s785_s17 }
  0xe2   :  { %12 = sbr.rel (!%p10_p12) target bundleno = 3 (0x3), region = 119 }

// kernel: resnet_embedder_forward.35
= control target key start
LH: loop header
LB: loop body
LE: loop exit
PB: predicated region body
PF: predicated region fallthrough
CT: control target
= control target key end

     0   :  { %s774_s15 = smov 0   ;;  %s776_s16 = smov 0   ;;  %s873_s0 = inlined_call_operand.vmem [shape: bf16[32,640], index: 0, kind: input, shape index: {}]   ;;  %s874_s1 = inlined_call_operand.vmem [shape: bf16[640,128], index: 1, kind: input, shape index: {}]   ;;  %s875_s2 = inlined_call_operand.vmem [shape: f32[1,128], index: 2, kind: input, shape index: {}]   ;;  %s876_s3 = inlined_call_operand.vmem [shape: bf16[32,128], index: 3, kind: input, shape index: {}]   ;;  %s877_s4 = inlined_call_operand.vmem [shape: bf16[32,128], index: 4, kind: output, shape index: {}]  }
   0x1   :  { %s778_s17 = smov 0   ;;  %s780_s18 = smov 0  }
   0x2   :  { %s782_s19 = smov 0  }
   0x3 LB: > { %s23_s20 = sadd.s32 1, %s742_s18  ;;  %p42_p1 = scmp.ne.s32.totalorder %s734_s16, %s730_s15  ;;  %s746_s19 = sphi %s782_s19, %s14_s19   ;;  %s742_s18 = sphi %s780_s18, %s881_s18   ;;  %s738_s17 = sphi %s778_s17, %s880_s17   ;;  %s734_s16 = sphi %s776_s16, %s879_s16   ;;  %s730_s15 = sphi %s774_s15, %s878_s15  }
   0x4   : > { %p24_p0 = scmp.ge.s32.totalorder %s23_s20, 5  ;;  %p43_p2 = scmp.eq.s32.totalorder %s746_s19, 0 }
   0x5   : > { %s35_s22 = sadd.s32 1, %s734_s16  ;;  %p575_p5 = scmp.ge.s32.totalorder %s746_s19, 5 }
   0x6   : > { %s883_s20 = smov (%p24_p0, %s23_s20), 0  ;;  %p44_p3 = por %p43_p2, %p42_p1 }
   0x7   : > { %s31_s21 = ssub.s32 %s742_s18, %s883_s20  ;;  %179 = sbr.rel (%p575_p5) target bundleno = 20 (0x14), region = 24 }
   0x8   : > { %p33_p4 = scmp.eq.s32.totalorder %s31_s21, 0 }
   0xa   : > { %s809_s23 = scalar_select %p33_p4, %s734_s16, %s35_s22  }
   0xc   : > { %182 = sbr.rel (!%p44_p3) target bundleno = 20 (0x14), region = 28  ;;  %s184_s24 = sand.u32 (%p44_p3), 1, %s734_s16  }
   0xd   : > { %s577_s25 = sshll.u32 (%p44_p3), %s742_s18, 2  ;;  %s576_s26 = sshll.u32 (%p44_p3), %s184_s24, 4 }
   0xe   : > { %s191_s29 = scalar_lea.vmem (%p44_p3), %s873_s0, %s577_s25  ;;  %s186_s30 = scalar_lea.vmem (%p44_p3), [#allocation3], %s576_s26 }
   0xf   : > { %v208_v0 = vld [vmem:[%s191_s29] sm:$0xf] (%p44_p3)  ;;  %v210_v1 = vld [vmem:[%s191_s29 + $0x14] sm:$0xf] (%p44_p3)  ;;  %v212_v2 = vld [vmem:[%s191_s29 + $0x28] sm:$0xf] (%p44_p3) }
  0x10   : > { %209 = vst [vmem:[%s186_s30] sm:$0xf] (%p44_p3), %v208_v0  ;;  %v214_v3 = vld [vmem:[%s191_s29 + $0x3c] sm:$0xf] (%p44_p3) }
  0x11   : > { %211 = vst [vmem:[%s186_s30 + $0x4] sm:$0xf] %v210_v1 }
  0x12   : > { %213 = vst [vmem:[%s186_s30 + $0x8] sm:$0xf] %v212_v2 }
  0x13   : > { %215 = vst [vmem:[%s186_s30 + $0xc] sm:$0xf] %v214_v3 }
  0x14 PF: > { %p578_p6 = scmp.ge.s32.totalorder %s746_s19, 1  ;;  %p255_p7 = scmp.lt.s32.totalorder %s746_s19, 6 }
  0x16   : > { %p256_p8 = pnand %p578_p6, %p255_p7 }
  0x17   : > { %s262_s5 = sand.u32 (!%p256_p8), 1, %s730_s15   ;;  %s580_s6 = sshll.u32 (!%p256_p8), %s738_s17, 4 }
  0x18   : > { %259 = sbr.rel (%p256_p8) target bundleno = 225 (0xe1), region = 73  ;;  %s821_s7 = sshll.u32 (!%p256_p8), %s262_s5, 4 }
  0x19   : > { %p299_p9 = scmp.lt.s32.totalorder (!%p256_p8), %s580_s6, 79  ;;  %s264_s12 = scalar_lea.vmem (!%p256_p8), [#allocation3], %s821_s7 }
  0x1a   : > { %p582_p10 = scmp.ne.s32.totalorder (!%p256_p8), %s738_s17, 0 }
  0x1d   : > { %s885_s6 = smov (!%p299_p9, %s580_s6), 79  ;;  %319 = sbr.rel (%p582_p10) target bundleno = 39 (0x27), region = 81 }
  0x1e   : > { %s581_s8 = sshll.u32 %s885_s6, 2 }
  0x1f   : > { %s826_s11 = scalar_lea.vmem %s874_s1, %s581_s8 }
  0x22   : > { %v748_v4 = vmov 0.0  }
  0x23   : > { %320 = vst [vmem:[#allocation2 + $0x10] sm:$0xff] %v748_v4 }
  0x24   : > { %321 = vst [vmem:[#allocation2] sm:$0xff] %v748_v4 }
  0x25   : > { %322 = vst [vmem:[#allocation2 + $0x18] sm:$0xff] %v748_v4 }
  0x26   : > { %323 = vst [vmem:[#allocation2 + $0x8] sm:$0xff] %v748_v4 }
  0x27 PF: > { %v637_v5 = vld [vmem:[%s826_s11 + $0x38] sm:$0xff]  ;;  %v636_v6 = vld [vmem:[%s826_s11 + $0x30] sm:$0xff]  ;;  %v635_v7 = vld [vmem:[%s826_s11 + $0x28] sm:$0xff]  ;;  %p623_p11 = scmp.ne.s32.totalorder %s738_s17, 4 }
  0x28   : > { %408 = vmatpush.bf16.msra.mxu0 %v637_v5  ;;  %658 = vmatpush.bf16.msra.mxu1 %v637_v5  ;;  %v634_v8 = vld [vmem:[%s826_s11 + $0x20] sm:$0xff]  ;;  %v633_v9 = vld [vmem:[%s826_s11 + $0x18] sm:$0xff]  ;;  %v632_v10 = vld [vmem:[%s826_s11 + $0x10] sm:$0xff] }
  0x29   : > { %v631_v11 = vld [vmem:[%s826_s11 + $0x8] sm:$0xff]  ;;  %v630_v12 = vld [vmem:[%s826_s11] sm:$0xff] }
  0x2a   : > { %v628_v13 = vld [vmem:[%s264_s12] sm:$0xff]  ;;  %v629_v14 = vld [vmem:[%s264_s12 + $0x8] sm:$0xff] }
  0x2b   : > { %v324_v15 = vld [vmem:[#allocation2 + $0x10] sm:$0xff]  ;;  %v325_v21 = vld [vmem:[#allocation2] sm:$0xff] }
  0x2c   : > { %409 = vmatpush.bf16.msra.mxu0 %v636_v6  ;;  %659 = vmatpush.bf16.msra.mxu1 %v636_v6  ;;  %v326_v16 = vld [vmem:[#allocation2 + $0x18] sm:$0xff] }
  0x2d   : > { %v327_v22 = vld [vmem:[#allocation2 + $0x8] sm:$0xff] }
  0x30   : > { %410 = vmatpush.bf16.msra.mxu0 %v635_v7  ;;  %660 = vmatpush.bf16.msra.mxu1 %v635_v7 }
  0x34   : > { %411 = vmatpush.bf16.msra.mxu0 %v634_v8  ;;  %661 = vmatpush.bf16.msra.mxu1 %v634_v8 }
  0x38   : > { %412 = vmatpush.bf16.msra.mxu0 %v633_v9  ;;  %662 = vmatpush.bf16.msra.mxu1 %v633_v9 }
  0x3c   : > { %413 = vmatpush.bf16.msra.mxu0 %v632_v10  ;;  %663 = vmatpush.bf16.msra.mxu1 %v632_v10 }
  0x40   : > { %414 = vmatpush.bf16.msra.mxu0 %v631_v11  ;;  %664 = vmatpush.bf16.msra.mxu1 %v631_v11 }
  0x44   : > { %415 = vmatpush.bf16.msra.mxu0 %v630_v12  ;;  %665 = vmatpush.bf16.msra.mxu1 %v630_v12 }
  0x47   : > { %416 = vmatmul.bf16.vlgmr.msra.gmra.mxu0 %v628_v13  ;;  %421 = vmatmul.bf16.vlgmr.msra.gmra.mxu1 %v629_v14 }
  0xc4   : > { %v417_v17 = vpop.f32.mrf.mxu0  ;;  %v422_v18 = vpop.f32.mrf.mxu1 }
  0xc5   : > { %v427_v19 = vadd.f32 %v417_v17, %v324_v15  ;;  %v429_v20 = vadd.f32 %v422_v18, %v326_v16 }
  0xc7   : > { %431 = vst [vmem:[#allocation2 + $0x10] sm:$0xff] %v427_v19 }
  0xc8   : > { %433 = vst [vmem:[#allocation2 + $0x18] sm:$0xff] %v429_v20 }
  0xcc   : > { %v419_v23 = vpop.f32.mrf.mxu0  ;;  %v424_v24 = vpop.f32.mrf.mxu1  ;;  %438 = sbr.rel (%p623_p11) target bundleno = 225 (0xe1), region = 85 }
  0xcd   : > { %v428_v25 = vadd.f32 %v419_v23, %v325_v21  ;;  %v430_v26 = vadd.f32 %v424_v24, %v327_v22 }
  0xcf   : > { %432 = vst [vmem:[#allocation2] sm:$0xff] %v428_v25 }
  0xd0   : > { %434 = vst [vmem:[#allocation2 + $0x8] sm:$0xff] %v430_v26 }
  0xd1   : > { %v439_v27 = vld [vmem:[#allocation2 + $0x10] sm:$0xff]  ;;  %v707_v29 = vld [vmem:[%s875_s2] ss:$0 sm:$0xff]  ;;  %v441_v31 = vld [vmem:[#allocation2 + $0x18] sm:$0xff] }
  0xd2   : > { %v639_v30 = vld [vmem:[%s876_s3] sm:$0xff]   ;;  %v656_v35 = vld [vmem:[%s876_s3 + $0x8] sm:$0xff]   ;;  %v447_v36 = vadd.f32 %v707_v29, %v439_v27  ;;  %v449_v38 = vadd.f32 %v707_v29, %v441_v31 }
  0xd3   : > { %v640_v32 = vunpack.c.l.bf16 %v639_v30  ;;  %v641_v33 = vunpack.c.h.bf16 %v639_v30  ;;  %v644_v40 = vunpack.c.l.bf16 %v656_v35  ;;  %v645_v41 = vunpack.c.h.bf16 %v656_v35 }
  0xd5   : > { %v459_v42 = vadd.f32 %v640_v32, %v447_v36  ;;  %v461_v44 = vadd.f32 %v644_v40, %v449_v38 }
  0xd6   : > { %v440_v28 = vld [vmem:[#allocation2] sm:$0xff] }
  0xd7   : > { %v442_v34 = vld [vmem:[#allocation2 + $0x8] sm:$0xff]  ;;  %v448_v37 = vadd.f32 %v707_v29, %v440_v28  ;;  %v463_v46 = vmax.f32 %v459_v42, 0.0  ;;  %v465_v48 = vmax.f32 %v461_v44, 0.0 }
  0xd8   : > { %v450_v39 = vadd.f32 %v707_v29, %v442_v34 }
  0xd9   : > { %v460_v43 = vadd.f32 %v641_v33, %v448_v37 }
  0xda   : > { %v462_v45 = vadd.f32 %v645_v41, %v450_v39 }
  0xdb   : > { %v464_v47 = vmax.f32 %v460_v43, 0.0 }
  0xdc   : > { %v466_v49 = vmax.f32 %v462_v45, 0.0 }
  0xdd   : > { %v649_v50 = vpack.c.bf16 %v464_v47, %v463_v46 }
  0xde   : > { %v654_v51 = vpack.c.bf16 %v466_v49, %v465_v48 }
  0xdf   : > { %650 = vst [vmem:[%s877_s4] sm:$0xff] %v649_v50  }
  0xe0   : > { %657 = vst [vmem:[%s877_s4 + $0x8] sm:$0xff] %v654_v51  }
  0xe1 PF: > { %s14_s19 = sadd.s32 1, %s746_s19   ;;  %s878_s15 = smov %s734_s16 }
  0xe2   : > { %p11_p12 = scmp.ge.s32.totalorder %s14_s19, 7   ;;  %s879_s16 = smov %s809_s23 }
  0xe3   : > { %s880_s17 = smov %s742_s18  ;;  %s881_s18 = smov %s883_s20 }
  0xe4   :  { %13 = sbr.rel (!%p11_p12) target bundleno = 3 (0x3), region = 126 }

// kernel: resnet_embedder_forward.36
= control target key start
LH: loop header
LB: loop body
LE: loop exit
PB: predicated region body
PF: predicated region fallthrough
CT: control target
= control target key end

     0   :  { %s683_s12 = smov 0   ;;  %s685_s13 = smov 0   ;;  %s776_s0 = inlined_call_operand.vmem [shape: bf16[32,640], index: 0, kind: input, shape index: {}]   ;;  %s777_s1 = inlined_call_operand.vmem [shape: bf16[640,128], index: 1, kind: input, shape index: {}]   ;;  %s778_s2 = inlined_call_operand.vmem [shape: f32[1,128], index: 2, kind: input, shape index: {}]   ;;  %s779_s3 = inlined_call_operand.vmem [shape: bf16[32,128], index: 3, kind: output, shape index: {}]  }
   0x1   :  { %s687_s14 = smov 0   ;;  %s689_s15 = smov 0  }
   0x2   :  { %s691_s16 = smov 0  }
   0x3 LB: > { %s22_s17 = sadd.s32 1, %s656_s15  ;;  %p41_p1 = scmp.ne.s32.totalorder %s648_s13, %s644_s12  ;;  %s660_s16 = sphi %s691_s16, %s13_s16   ;;  %s656_s15 = sphi %s689_s15, %s783_s15   ;;  %s652_s14 = sphi %s687_s14, %s782_s14   ;;  %s648_s13 = sphi %s685_s13, %s781_s13   ;;  %s644_s12 = sphi %s683_s12, %s780_s12  }
   0x4   : > { %p23_p0 = scmp.ge.s32.totalorder %s22_s17, 5  ;;  %p42_p2 = scmp.eq.s32.totalorder %s660_s16, 0 }
   0x5   : > { %s34_s19 = sadd.s32 1, %s648_s13  ;;  %p498_p5 = scmp.ge.s32.totalorder %s660_s16, 5 }
   0x6   : > { %s785_s17 = smov (%p23_p0, %s22_s17), 0  ;;  %p43_p3 = por %p42_p2, %p41_p1 }
   0x7   : > { %s30_s18 = ssub.s32 %s656_s15, %s785_s17  ;;  %143 = sbr.rel (%p498_p5) target bundleno = 20 (0x14), region = 20 }
   0x8   : > { %p32_p4 = scmp.eq.s32.totalorder %s30_s18, 0 }
   0xa   : > { %s718_s20 = scalar_select %p32_p4, %s648_s13, %s34_s19  }
   0xc   : > { %146 = sbr.rel (!%p43_p3) target bundleno = 20 (0x14), region = 24  ;;  %s148_s21 = sand.u32 (%p43_p3), 1, %s648_s13  }
   0xd   : > { %s500_s22 = sshll.u32 (%p43_p3), %s656_s15, 2  ;;  %s499_s23 = sshll.u32 (%p43_p3), %s148_s21, 4 }
   0xe   : > { %s155_s26 = scalar_lea.vmem (%p43_p3), %s776_s0, %s500_s22  ;;  %s150_s27 = scalar_lea.vmem (%p43_p3), [#allocation3], %s499_s23 }
   0xf   : > { %v172_v0 = vld [vmem:[%s155_s26] sm:$0xf] (%p43_p3)  ;;  %v174_v1 = vld [vmem:[%s155_s26 + $0x14] sm:$0xf] (%p43_p3)  ;;  %v176_v2 = vld [vmem:[%s155_s26 + $0x28] sm:$0xf] (%p43_p3) }
  0x10   : > { %173 = vst [vmem:[%s150_s27] sm:$0xf] (%p43_p3), %v172_v0  ;;  %v178_v3 = vld [vmem:[%s155_s26 + $0x3c] sm:$0xf] (%p43_p3) }
  0x11   : > { %175 = vst [vmem:[%s150_s27 + $0x4] sm:$0xf] %v174_v1 }
  0x12   : > { %177 = vst [vmem:[%s150_s27 + $0x8] sm:$0xf] %v176_v2 }
  0x13   : > { %179 = vst [vmem:[%s150_s27 + $0xc] sm:$0xf] %v178_v3 }
  0x14 PF: > { %p501_p6 = scmp.ge.s32.totalorder %s660_s16, 1  ;;  %p219_p7 = scmp.lt.s32.totalorder %s660_s16, 6 }
  0x16   : > { %p220_p8 = pnand %p501_p6, %p219_p7 }
  0x17   : > { %s226_s28 = sand.u32 (!%p220_p8), 1, %s644_s12   ;;  %s503_s29 = sshll.u32 (!%p220_p8), %s652_s14, 4 }
  0x18   : > { %223 = sbr.rel (%p220_p8) target bundleno = 223 (0xdf), region = 69  ;;  %s730_s30 = sshll.u32 (!%p220_p8), %s226_s28, 4 }
  0x19   : > { %p256_p9 = scmp.lt.s32.totalorder (!%p220_p8), %s503_s29, 79  ;;  %s228_s8 = scalar_lea.vmem (!%p220_p8), [#allocation3], %s730_s30 }
  0x1a   : > { %p505_p10 = scmp.ne.s32.totalorder (!%p220_p8), %s652_s14, 0 }
  0x1d   : > { %s787_s29 = smov (!%p256_p9, %s503_s29), 79  ;;  %270 = sbr.rel (%p505_p10) target bundleno = 39 (0x27), region = 77 }
  0x1e   : > { %s504_s4 = sshll.u32 %s787_s29, 2 }
  0x1f   : > { %s735_s7 = scalar_lea.vmem %s777_s1, %s504_s4 }
  0x22   : > { %v662_v4 = vmov 0.0  }
  0x23   : > { %271 = vst [vmem:[#allocation2 + $0x10] sm:$0xff] %v662_v4 }
  0x24   : > { %272 = vst [vmem:[#allocation2] sm:$0xff] %v662_v4 }
  0x25   : > { %273 = vst [vmem:[#allocation2 + $0x18] sm:$0xff] %v662_v4 }
  0x26   : > { %274 = vst [vmem:[#allocation2 + $0x8] sm:$0xff] %v662_v4 }
  0x27 PF: > { %v560_v5 = vld [vmem:[%s735_s7 + $0x38] sm:$0xff]  ;;  %v559_v6 = vld [vmem:[%s735_s7 + $0x30] sm:$0xff]  ;;  %v558_v7 = vld [vmem:[%s735_s7 + $0x28] sm:$0xff]  ;;  %p546_p11 = scmp.ne.s32.totalorder %s652_s14, 4 }
  0x28   : > { %359 = vmatpush.bf16.msra.mxu0 %v560_v5  ;;  %572 = vmatpush.bf16.msra.mxu1 %v560_v5  ;;  %v557_v8 = vld [vmem:[%s735_s7 + $0x20] sm:$0xff]  ;;  %v556_v9 = vld [vmem:[%s735_s7 + $0x18] sm:$0xff]  ;;  %v555_v10 = vld [vmem:[%s735_s7 + $0x10] sm:$0xff] }
  0x29   : > { %v554_v11 = vld [vmem:[%s735_s7 + $0x8] sm:$0xff]  ;;  %v553_v12 = vld [vmem:[%s735_s7] sm:$0xff] }
  0x2a   : > { %v551_v13 = vld [vmem:[%s228_s8] sm:$0xff]  ;;  %v552_v14 = vld [vmem:[%s228_s8 + $0x8] sm:$0xff] }
  0x2b   : > { %v275_v15 = vld [vmem:[#allocation2 + $0x10] sm:$0xff]  ;;  %v276_v21 = vld [vmem:[#allocation2] sm:$0xff] }
  0x2c   : > { %360 = vmatpush.bf16.msra.mxu0 %v559_v6  ;;  %573 = vmatpush.bf16.msra.mxu1 %v559_v6  ;;  %v277_v16 = vld [vmem:[#allocation2 + $0x18] sm:$0xff] }
  0x2d   : > { %v278_v22 = vld [vmem:[#allocation2 + $0x8] sm:$0xff] }
  0x30   : > { %361 = vmatpush.bf16.msra.mxu0 %v558_v7  ;;  %574 = vmatpush.bf16.msra.mxu1 %v558_v7 }
  0x34   : > { %362 = vmatpush.bf16.msra.mxu0 %v557_v8  ;;  %575 = vmatpush.bf16.msra.mxu1 %v557_v8 }
  0x38   : > { %363 = vmatpush.bf16.msra.mxu0 %v556_v9  ;;  %576 = vmatpush.bf16.msra.mxu1 %v556_v9 }
  0x3c   : > { %364 = vmatpush.bf16.msra.mxu0 %v555_v10  ;;  %577 = vmatpush.bf16.msra.mxu1 %v555_v10 }
  0x40   : > { %365 = vmatpush.bf16.msra.mxu0 %v554_v11  ;;  %578 = vmatpush.bf16.msra.mxu1 %v554_v11 }
  0x44   : > { %366 = vmatpush.bf16.msra.mxu0 %v553_v12  ;;  %579 = vmatpush.bf16.msra.mxu1 %v553_v12 }
  0x47   : > { %367 = vmatmul.bf16.vlgmr.msra.gmra.mxu0 %v551_v13  ;;  %372 = vmatmul.bf16.vlgmr.msra.gmra.mxu1 %v552_v14 }
  0xc4   : > { %v368_v17 = vpop.f32.mrf.mxu0  ;;  %v373_v18 = vpop.f32.mrf.mxu1 }
  0xc5   : > { %v378_v19 = vadd.f32 %v368_v17, %v275_v15  ;;  %v380_v20 = vadd.f32 %v373_v18, %v277_v16 }
  0xc7   : > { %382 = vst [vmem:[#allocation2 + $0x10] sm:$0xff] %v378_v19 }
  0xc8   : > { %384 = vst [vmem:[#allocation2 + $0x18] sm:$0xff] %v380_v20 }
  0xcc   : > { %v370_v23 = vpop.f32.mrf.mxu0  ;;  %v375_v24 = vpop.f32.mrf.mxu1  ;;  %389 = sbr.rel (%p546_p11) target bundleno = 223 (0xdf), region = 81 }
  0xcd   : > { %v379_v25 = vadd.f32 %v370_v23, %v276_v21  ;;  %v381_v26 = vadd.f32 %v375_v24, %v278_v22 }
  0xcf   : > { %383 = vst [vmem:[#allocation2] sm:$0xff] %v379_v25 }
  0xd0   : > { %385 = vst [vmem:[#allocation2 + $0x8] sm:$0xff] %v381_v26 }
  0xd1   : > { %v390_v27 = vld [vmem:[#allocation2 + $0x10] sm:$0xff]  ;;  %v621_v29 = vld [vmem:[%s778_s2] ss:$0 sm:$0xff]  ;;  %v392_v30 = vld [vmem:[#allocation2 + $0x18] sm:$0xff] }
  0xd2   : > { %v398_v32 = vadd.f32 %v621_v29, %v390_v27  ;;  %v400_v34 = vadd.f32 %v621_v29, %v392_v30 }
  0xd4   : > { %v402_v36 = vmax.f32 %v398_v32, 0.0  ;;  %v404_v38 = vmax.f32 %v400_v34, 0.0 }
  0xd6   : > { %v391_v28 = vld [vmem:[#allocation2] sm:$0xff] }
  0xd7   : > { %v393_v31 = vld [vmem:[#allocation2 + $0x8] sm:$0xff]  ;;  %v399_v33 = vadd.f32 %v621_v29, %v391_v28 }
  0xd8   : > { %v401_v35 = vadd.f32 %v621_v29, %v393_v31 }
  0xd9   : > { %v403_v37 = vmax.f32 %v399_v33, 0.0 }
  0xda   : > { %v405_v39 = vmax.f32 %v401_v35, 0.0 }
  0xdb   : > { %v564_v40 = vpack.c.bf16 %v403_v37, %v402_v36 }
  0xdc   : > { %v569_v41 = vpack.c.bf16 %v405_v39, %v404_v38 }
  0xdd   : > { %565 = vst [vmem:[%s779_s3] sm:$0xff] %v564_v40  }
  0xde   : > { %571 = vst [vmem:[%s779_s3 + $0x8] sm:$0xff] %v569_v41  }
  0xdf PF: > { %s13_s16 = sadd.s32 1, %s660_s16   ;;  %s780_s12 = smov %s648_s13 }
  0xe0   : > { %p10_p12 = scmp.ge.s32.totalorder %s13_s16, 7   ;;  %s781_s13 = smov %s718_s20 }
  0xe1   : > { %s782_s14 = smov %s656_s15  ;;  %s783_s15 = smov %s785_s17 }
  0xe2   :  { %12 = sbr.rel (!%p10_p12) target bundleno = 3 (0x3), region = 119 }

// kernel: resnet_embedder_forward.39
= control target key start
LH: loop header
LB: loop body
LE: loop exit
PB: predicated region body
PF: predicated region fallthrough
CT: control target
= control target key end

     0   :  { %s235_s1 = inlined_call_operand.vmem [shape: bf16[128,128], index: 1, kind: input, shape index: {}]   ;;  %s236_s2 = inlined_call_operand.vmem [shape: f32[1,128], index: 2, kind: input, shape index: {}]   ;;  %s237_s0 = inlined_call_operand.vmem [shape: bf16[16,128], index: 0, kind: input, shape index: {}]   ;;  %s238_s3 = inlined_call_operand.vmem [shape: bf16[16,128], index: 3, kind: output, shape index: {}]  }
   0x1   :  { %v175_v0 = vld [vmem:[%s235_s1 + $0x38] sm:$0xff]  ;;  %v174_v1 = vld [vmem:[%s235_s1 + $0x30] sm:$0xff]  ;;  %v173_v2 = vld [vmem:[%s235_s1 + $0x28] sm:$0xff] }
   0x2   :  { %94 = vmatpush.bf16.msra.mxu0 %v175_v0  ;;  %v172_v3 = vld [vmem:[%s235_s1 + $0x20] sm:$0xff]  ;;  %v171_v4 = vld [vmem:[%s235_s1 + $0x18] sm:$0xff]  ;;  %v170_v5 = vld [vmem:[%s235_s1 + $0x10] sm:$0xff] }
   0x3   :  { %v169_v6 = vld [vmem:[%s235_s1 + $0x8] sm:$0xff]  ;;  %v168_v7 = vld [vmem:[%s235_s1] sm:$0xff] }
   0x4   :  { %v167_v8 = vld [vmem:[%s237_s0] sm:$0xff] }
   0x5   :  { %v181_v10 = vld [vmem:[%s236_s2] ss:$0 sm:$0xff] }
   0x6   :  { %95 = vmatpush.bf16.msra.mxu0 %v174_v1 }
   0xa   :  { %96 = vmatpush.bf16.msra.mxu0 %v173_v2 }
   0xe   :  { %97 = vmatpush.bf16.msra.mxu0 %v172_v3 }
  0x12   :  { %98 = vmatpush.bf16.msra.mxu0 %v171_v4 }
  0x16   :  { %99 = vmatpush.bf16.msra.mxu0 %v170_v5 }
  0x1a   :  { %100 = vmatpush.bf16.msra.mxu0 %v169_v6 }
  0x1e   :  { %101 = vmatpush.bf16.msra.mxu0 %v168_v7 }
  0x21   :  { %102 = vmatmul.bf16.vlgmr.msra.gmra.mxu0 %v167_v8 }
  0x9e   :  { %v103_v9 = vpop.f32.mrf.mxu0 }
  0x9f   :  { %v121_v12 = vadd.f32 %v181_v10, %v103_v9 }
  0xa6   :  { %v105_v11 = vpop.f32.mrf.mxu0 }
  0xa7   :  { %v122_v13 = vadd.f32 %v181_v10, %v105_v11 }
  0xa9   :  { %v179_v14 = vpack.c.bf16 %v122_v13, %v121_v12 }
  0xab   :  { %180 = vst [vmem:[%s238_s3] sm:$0xff] %v179_v14  }

// kernel: resnet_embedder_forward.38
= control target key start
LH: loop header
LB: loop body
LE: loop exit
PB: predicated region body
PF: predicated region fallthrough
CT: control target
= control target key end

     0   :  { %s625_s12 = smov 0   ;;  %s627_s13 = smov 0   ;;  %s698_s0 = inlined_call_operand.vmem [shape: bf16[16,640], index: 0, kind: input, shape index: {}]   ;;  %s699_s1 = inlined_call_operand.vmem [shape: bf16[640,128], index: 1, kind: input, shape index: {}]   ;;  %s700_s2 = inlined_call_operand.vmem [shape: f32[1,128], index: 2, kind: input, shape index: {}]   ;;  %s701_s3 = inlined_call_operand.vmem [shape: bf16[16,128], index: 3, kind: output, shape index: {}]  }
   0x1   :  { %s629_s14 = smov 0   ;;  %s631_s15 = smov 0  }
   0x2   :  { %s633_s16 = smov 0  }
   0x3 LB: > { %s22_s17 = sadd.s32 1, %s598_s15  ;;  %p41_p1 = scmp.ne.s32.totalorder %s590_s13, %s586_s12  ;;  %s602_s16 = sphi %s633_s16, %s13_s16   ;;  %s598_s15 = sphi %s631_s15, %s705_s15   ;;  %s594_s14 = sphi %s629_s14, %s704_s14   ;;  %s590_s13 = sphi %s627_s13, %s703_s13   ;;  %s586_s12 = sphi %s625_s12, %s702_s12  }
   0x4   : > { %p23_p0 = scmp.ge.s32.totalorder %s22_s17, 5  ;;  %p42_p2 = scmp.eq.s32.totalorder %s602_s16, 0 }
   0x5   : > { %s34_s19 = sadd.s32 1, %s590_s13  ;;  %p459_p5 = scmp.ge.s32.totalorder %s602_s16, 5 }
   0x6   : > { %s707_s17 = smov (%p23_p0, %s22_s17), 0  ;;  %p43_p3 = por %p42_p2, %p41_p1 }
   0x7   : > { %s30_s18 = ssub.s32 %s598_s15, %s707_s17  ;;  %143 = sbr.rel (%p459_p5) target bundleno = 18 (0x12), region = 20 }
   0x8   : > { %p32_p4 = scmp.eq.s32.totalorder %s30_s18, 0 }
   0xa   : > { %s660_s20 = scalar_select %p32_p4, %s590_s13, %s34_s19  }
   0xc   : > { %146 = sbr.rel (!%p43_p3) target bundleno = 18 (0x12), region = 24  ;;  %s148_s21 = sand.u32 (%p43_p3), 1, %s590_s13  }
   0xd   : > { %s461_s22 = sshll.u32 (%p43_p3), %s598_s15, 2  ;;  %s460_s23 = sshll.u32 (%p43_p3), %s148_s21, 3 }
   0xe   : > { %s155_s26 = scalar_lea.vmem (%p43_p3), %s698_s0, %s461_s22  ;;  %s150_s27 = scalar_lea.vmem (%p43_p3), [#allocation3], %s460_s23 }
   0xf   : > { %v172_v0 = vld [vmem:[%s155_s26] sm:$0xf] (%p43_p3)  ;;  %v174_v1 = vld [vmem:[%s155_s26 + $0x14] sm:$0xf] (%p43_p3) }
  0x10   : > { %173 = vst [vmem:[%s150_s27] sm:$0xf] (%p43_p3), %v172_v0 }
  0x11   : > { %175 = vst [vmem:[%s150_s27 + $0x4] sm:$0xf] %v174_v1 }
  0x12 PF: > { %p462_p6 = scmp.ge.s32.totalorder %s602_s16, 1  ;;  %p211_p7 = scmp.lt.s32.totalorder %s602_s16, 6 }
  0x14   : > { %p212_p8 = pnand %p462_p6, %p211_p7 }
  0x15   : > { %s218_s28 = sand.u32 (!%p212_p8), 1, %s586_s12   ;;  %s464_s29 = sshll.u32 (!%p212_p8), %s594_s14, 4 }
  0x16   : > { %215 = sbr.rel (%p212_p8) target bundleno = 218 (0xda), region = 69  ;;  %s463_s30 = sshll.u32 (!%p212_p8), %s218_s28, 3 }
  0x17   : > { %p248_p9 = scmp.lt.s32.totalorder (!%p212_p8), %s464_s29, 79  ;;  %s220_s8 = scalar_lea.vmem (!%p212_p8), [#allocation3], %s463_s30 }
  0x18   : > { %p466_p10 = scmp.ne.s32.totalorder (!%p212_p8), %s594_s14, 0 }
  0x1b   : > { %s709_s29 = smov (!%p248_p9, %s464_s29), 79  ;;  %262 = sbr.rel (%p466_p10) target bundleno = 35 (0x23), region = 77 }
  0x1c   : > { %s465_s4 = sshll.u32 %s709_s29, 2 }
  0x1d   : > { %s251_s7 = scalar_lea.vmem %s699_s1, %s465_s4 }
  0x20   : > { %v604_v2 = vmov 0.0  }
  0x21   : > { %263 = vst [vmem:[#allocation2] sm:$0xff] %v604_v2 }
  0x22   : > { %264 = vst [vmem:[#allocation2 + $0x8] sm:$0xff] %v604_v2 }
  0x23 PF: > { %v516_v3 = vld [vmem:[%s251_s7 + $0x38] sm:$0xff]  ;;  %v515_v4 = vld [vmem:[%s251_s7 + $0x30] sm:$0xff]  ;;  %v514_v5 = vld [vmem:[%s251_s7 + $0x28] sm:$0xff]  ;;  %p503_p11 = scmp.ne.s32.totalorder %s594_s14, 4 }
  0x24   : > { %339 = vmatpush.bf16.msra.mxu0 %v516_v3  ;;  %v513_v6 = vld [vmem:[%s251_s7 + $0x20] sm:$0xff]  ;;  %v512_v7 = vld [vmem:[%s251_s7 + $0x18] sm:$0xff]  ;;  %v511_v8 = vld [vmem:[%s251_s7 + $0x10] sm:$0xff] }
  0x25   : > { %v510_v9 = vld [vmem:[%s251_s7 + $0x8] sm:$0xff]  ;;  %v509_v10 = vld [vmem:[%s251_s7] sm:$0xff]  ;;  %v508_v11 = vld [vmem:[%s220_s8] sm:$0xff] }
  0x28   : > { %340 = vmatpush.bf16.msra.mxu0 %v515_v4  ;;  %v265_v12 = vld [vmem:[#allocation2] sm:$0xff] }
  0x29   : > { %v266_v15 = vld [vmem:[#allocation2 + $0x8] sm:$0xff] }
  0x2c   : > { %341 = vmatpush.bf16.msra.mxu0 %v514_v5 }
  0x30   : > { %342 = vmatpush.bf16.msra.mxu0 %v513_v6 }
  0x34   : > { %343 = vmatpush.bf16.msra.mxu0 %v512_v7 }
  0x38   : > { %344 = vmatpush.bf16.msra.mxu0 %v511_v8 }
  0x3c   : > { %345 = vmatpush.bf16.msra.mxu0 %v510_v9 }
  0x40   : > { %346 = vmatpush.bf16.msra.mxu0 %v509_v10 }
  0x43   : > { %347 = vmatmul.bf16.vlgmr.msra.gmra.mxu0 %v508_v11 }
  0xc0   : > { %v348_v13 = vpop.f32.mrf.mxu0 }
  0xc1   : > { %v353_v14 = vadd.f32 %v348_v13, %v265_v12 }
  0xc3   : > { %355 = vst [vmem:[#allocation2] sm:$0xff] %v353_v14 }
  0xc7   : > { %360 = sbr.rel (%p503_p11) target bundleno = 218 (0xda), region = 81 }
  0xc8   : > { %v350_v16 = vpop.f32.mrf.mxu0 }
  0xc9   : > { %v354_v17 = vadd.f32 %v350_v16, %v266_v15 }
  0xcb   : > { %356 = vst [vmem:[#allocation2 + $0x8] sm:$0xff] %v354_v17 }
  0xcc   : > { %v361_v18 = vld [vmem:[#allocation2] sm:$0xff] }
  0xcd   : > { %v563_v20 = vld [vmem:[%s700_s2] ss:$0 sm:$0xff] }
  0xce   : > { %v367_v21 = vadd.f32 %v563_v20, %v361_v18 }
  0xd0   : > { %v369_v23 = vmax.f32 %v367_v21, 0.0 }
  0xd2   : > { %v362_v19 = vld [vmem:[#allocation2 + $0x8] sm:$0xff] }
  0xd3   : > { %v368_v22 = vadd.f32 %v563_v20, %v362_v19 }
  0xd5   : > { %v370_v24 = vmax.f32 %v368_v22, 0.0 }
  0xd7   : > { %v520_v25 = vpack.c.bf16 %v370_v24, %v369_v23 }
  0xd9   : > { %521 = vst [vmem:[%s701_s3] sm:$0xff] %v520_v25  }
  0xda PF: > { %s13_s16 = sadd.s32 1, %s602_s16   ;;  %s702_s12 = smov %s590_s13 }
  0xdb   : > { %p10_p12 = scmp.ge.s32.totalorder %s13_s16, 7   ;;  %s703_s13 = smov %s660_s20 }
  0xdc   : > { %s704_s14 = smov %s598_s15  ;;  %s705_s15 = smov %s707_s17 }
  0xdd   :  { %12 = sbr.rel (!%p10_p12) target bundleno = 3 (0x3), region = 119 }

// kernel: resnet_embedder_forward.43
= control target key start
LH: loop header
LB: loop body
LE: loop exit
PB: predicated region body
PF: predicated region fallthrough
CT: control target
= control target key end

     0   :  { %vm13_vm0 = vcmask 1043456   ;;  %v89_v4 = vmov 4.0   ;;  %s110_s0 = inlined_call_operand.vmem [shape: bf16[2,4,128], index: 0, kind: input, shape index: {}]   ;;  %s111_s1 = inlined_call_operand.hbm [shape: f32[2,128], index: 1, kind: output, shape index: {}]  }
   0x1   :  { %v9_v0 = vld [vmem:[%s110_s0] sm:$0x3]  ;;  %v10_v1 = vld [vmem:[%s110_s0 + $0x2] sm:$0x3]  ;;  %61 = vrcp.f32 %v89_v4 }
   0x2   :  { %v11_v2 = vunpack.c.l.bf16 %v9_v0  ;;  %v12_v3 = vunpack.c.l.bf16 %v10_v1 }
   0x3   :  { %6 = vsyncpa [#allocation3], 0  ;;  %s90_s0 = smov [#allocation2]   ;;  %s50_s13 = sshll.u32 %s111_s1, 4  ;;  %vm39_vm2 = vcmask 1041409   ;;  %s51_s13 = int_to_ptr.hbm [resolvable:$true] %s50_s13 }
   0x4   :  { %v14_v5 = vsel %vm13_vm0, %v11_v2, 0.0  ;;  %v21_v6 = vsel %vm13_vm0, %v12_v3, 0.0  ;;  %s48_s10 = sshll.u32 %s90_s0, 4  ;;  %s49_s10 = int_to_ptr.vmem [resolvable:$true] %s48_s10 }
   0x5   :  { %v15_v7 = vrot.slane %v14_v5, 4  ;;  %v22_v8 = vrot.slane %v21_v6, 4 }
   0x7   :  { %v16_v9 = vadd.f32 %v15_v7, %v14_v5  ;;  %v23_v10 = vadd.f32 %v22_v8, %v21_v6  ;;  %v62_v11 = vpop.eup %61 }
   0x8   :  { %v29_v14 = vmul.f32 4.0, %v62_v11  ;;  %vm33_vm1 = vweird.f32 %v62_v11 }
   0x9   :  { %v17_v12 = vrot.slane %v16_v9, 2  ;;  %v24_v13 = vrot.slane %v23_v10, 2 }
   0xa   :  { %v30_v17 = vsub.f32 1.0, %v29_v14 }
   0xb   :  { %v18_v15 = vadd.f32 %v17_v12, %v16_v9  ;;  %v25_v16 = vadd.f32 %v24_v13, %v23_v10 }
   0xc   :  { %v31_v20 = vmul.f32 %v62_v11, %v30_v17 }
   0xd   :  { %v19_v18 = vrot.slane %v18_v15, 1  ;;  %v26_v19 = vrot.slane %v25_v16, 1 }
   0xe   :  { %v32_v23 = vadd.f32 %v62_v11, %v31_v20 }
   0xf   :  { %v20_v21 = vadd.f32 %v19_v18, %v18_v15  ;;  %v27_v22 = vadd.f32 %v26_v19, %v25_v16 }
  0x10   :  { %v34_v24 = vsel %vm33_vm1, %v62_v11, %v32_v23 }
  0x11   :  { %v35_v25 = vmul.f32 %v34_v24, %v20_v21  ;;  %v36_v26 = vmul.f32 %v34_v24, %v27_v22 }
  0x13   :  { %v40_v27 = vsel %vm39_vm2, %v36_v26, %v35_v25 }
  0x14   :  { %42 = vst [vmem:[#allocation2] sm:$0x3] %v40_v27 }
  0x15   :  { %53 = dma.vmem_to_hbm [thread:$0]  %s49_s10, 32, %s51_s13, [#allocation3]  }
  0x16   :  { %87 = dma.done.wait [#allocation3], 32  }
  0x17   :  { %88 = vsyncadd [#allocation3], 4294967264 }
  0x18   :  { %58 = vsyncpa [#allocation3], 1 }

// kernel: resnet_embedder_forward.40
= control target key start
LH: loop header
LB: loop body
LE: loop exit
PB: predicated region body
PF: predicated region fallthrough
CT: control target
= control target key end

     0   :  { %s705_s15 = smov 0   ;;  %s707_s16 = smov 0   ;;  %s781_s0 = inlined_call_operand.vmem [shape: bf16[16,1152], index: 0, kind: input, shape index: {}]   ;;  %s782_s1 = inlined_call_operand.vmem [shape: bf16[1152,128], index: 1, kind: input, shape index: {}]   ;;  %s783_s2 = inlined_call_operand.vmem [shape: f32[1,128], index: 2, kind: input, shape index: {}]   ;;  %s784_s3 = inlined_call_operand.vmem [shape: bf16[16,128], index: 3, kind: input, shape index: {}]   ;;  %s785_s4 = inlined_call_operand.vmem [shape: bf16[16,128], index: 4, kind: output, shape index: {}]  }
   0x1   :  { %s709_s17 = smov 0   ;;  %s711_s18 = smov 0  }
   0x2   :  { %s713_s19 = smov 0  }
   0x3 LB: > { %s23_s20 = sadd.s32 1, %s673_s18  ;;  %p42_p1 = scmp.ne.s32.totalorder %s665_s16, %s661_s15  ;;  %s677_s19 = sphi %s713_s19, %s14_s19   ;;  %s673_s18 = sphi %s711_s18, %s789_s18   ;;  %s669_s17 = sphi %s709_s17, %s788_s17   ;;  %s665_s16 = sphi %s707_s16, %s787_s16   ;;  %s661_s15 = sphi %s705_s15, %s786_s15  }
   0x4   : > { %p24_p0 = scmp.ge.s32.totalorder %s23_s20, 9  ;;  %p43_p2 = scmp.eq.s32.totalorder %s677_s19, 0 }
   0x5   : > { %s35_s22 = sadd.s32 1, %s665_s16  ;;  %p530_p5 = scmp.ge.s32.totalorder %s677_s19, 9 }
   0x6   : > { %s791_s20 = smov (%p24_p0, %s23_s20), 0  ;;  %p44_p3 = por %p43_p2, %p42_p1 }
   0x7   : > { %s31_s21 = ssub.s32 %s673_s18, %s791_s20  ;;  %179 = sbr.rel (%p530_p5) target bundleno = 18 (0x12), region = 24 }
   0x8   : > { %p33_p4 = scmp.eq.s32.totalorder %s31_s21, 0 }
   0xa   : > { %s740_s23 = scalar_select %p33_p4, %s665_s16, %s35_s22  }
   0xc   : > { %182 = sbr.rel (!%p44_p3) target bundleno = 18 (0x12), region = 28  ;;  %s184_s24 = sand.u32 (%p44_p3), 1, %s665_s16  }
   0xd   : > { %s532_s25 = sshll.u32 (%p44_p3), %s673_s18, 2  ;;  %s531_s26 = sshll.u32 (%p44_p3), %s184_s24, 3 }
   0xe   : > { %s191_s29 = scalar_lea.vmem (%p44_p3), %s781_s0, %s532_s25  ;;  %s186_s30 = scalar_lea.vmem (%p44_p3), [#allocation3], %s531_s26 }
   0xf   : > { %v208_v0 = vld [vmem:[%s191_s29] sm:$0xf] (%p44_p3)  ;;  %v210_v1 = vld [vmem:[%s191_s29 + $0x24] sm:$0xf] (%p44_p3) }
  0x10   : > { %209 = vst [vmem:[%s186_s30] sm:$0xf] (%p44_p3), %v208_v0 }
  0x11   : > { %211 = vst [vmem:[%s186_s30 + $0x4] sm:$0xf] %v210_v1 }
  0x12 PF: > { %p533_p6 = scmp.ge.s32.totalorder %s677_s19, 1  ;;  %p247_p7 = scmp.lt.s32.totalorder %s677_s19, 10 }
  0x14   : > { %p248_p8 = pnand %p533_p6, %p247_p7 }
  0x15   : > { %s254_s5 = sand.u32 (!%p248_p8), 1, %s661_s15   ;;  %s535_s6 = sshll.u32 (!%p248_p8), %s669_s17, 4 }
  0x16   : > { %251 = sbr.rel (%p248_p8) target bundleno = 220 (0xdc), region = 73  ;;  %s534_s7 = sshll.u32 (!%p248_p8), %s254_s5, 3 }
  0x17   : > { %p291_p9 = scmp.lt.s32.totalorder (!%p248_p8), %s535_s6, 143  ;;  %s256_s12 = scalar_lea.vmem (!%p248_p8), [#allocation3], %s534_s7 }
  0x18   : > { %p537_p10 = scmp.ne.s32.totalorder (!%p248_p8), %s669_s17, 0 }
  0x1b   : > { %s793_s6 = smov (!%p291_p9, %s535_s6), 143  ;;  %311 = sbr.rel (%p537_p10) target bundleno = 35 (0x23), region = 81 }
  0x1c   : > { %s536_s8 = sshll.u32 %s793_s6, 2 }
  0x1d   : > { %s294_s11 = scalar_lea.vmem %s782_s1, %s536_s8 }
  0x20   : > { %v679_v2 = vmov 0.0  }
  0x21   : > { %312 = vst [vmem:[#allocation2] sm:$0xff] %v679_v2 }
  0x22   : > { %313 = vst [vmem:[#allocation2 + $0x8] sm:$0xff] %v679_v2 }
  0x23 PF: > { %v587_v3 = vld [vmem:[%s294_s11 + $0x38] sm:$0xff]  ;;  %v586_v4 = vld [vmem:[%s294_s11 + $0x30] sm:$0xff]  ;;  %v585_v5 = vld [vmem:[%s294_s11 + $0x28] sm:$0xff]  ;;  %p574_p11 = scmp.ne.s32.totalorder %s669_s17, 8 }
  0x24   : > { %388 = vmatpush.bf16.msra.mxu0 %v587_v3  ;;  %v584_v6 = vld [vmem:[%s294_s11 + $0x20] sm:$0xff]  ;;  %v583_v7 = vld [vmem:[%s294_s11 + $0x18] sm:$0xff]  ;;  %v582_v8 = vld [vmem:[%s294_s11 + $0x10] sm:$0xff] }
  0x25   : > { %v581_v9 = vld [vmem:[%s294_s11 + $0x8] sm:$0xff]  ;;  %v580_v10 = vld [vmem:[%s294_s11] sm:$0xff]  ;;  %v579_v11 = vld [vmem:[%s256_s12] sm:$0xff] }
  0x28   : > { %389 = vmatpush.bf16.msra.mxu0 %v586_v4  ;;  %v314_v12 = vld [vmem:[#allocation2] sm:$0xff] }
  0x29   : > { %v315_v15 = vld [vmem:[#allocation2 + $0x8] sm:$0xff] }
  0x2c   : > { %390 = vmatpush.bf16.msra.mxu0 %v585_v5 }
  0x30   : > { %391 = vmatpush.bf16.msra.mxu0 %v584_v6 }
  0x34   : > { %392 = vmatpush.bf16.msra.mxu0 %v583_v7 }
  0x38   : > { %393 = vmatpush.bf16.msra.mxu0 %v582_v8 }
  0x3c   : > { %394 = vmatpush.bf16.msra.mxu0 %v581_v9 }
  0x40   : > { %395 = vmatpush.bf16.msra.mxu0 %v580_v10 }
  0x43   : > { %396 = vmatmul.bf16.vlgmr.msra.gmra.mxu0 %v579_v11 }
  0xc0   : > { %v397_v13 = vpop.f32.mrf.mxu0 }
  0xc1   : > { %v402_v14 = vadd.f32 %v397_v13, %v314_v12 }
  0xc3   : > { %404 = vst [vmem:[#allocation2] sm:$0xff] %v402_v14 }
  0xc7   : > { %409 = sbr.rel (%p574_p11) target bundleno = 220 (0xdc), region = 85 }
  0xc8   : > { %v399_v16 = vpop.f32.mrf.mxu0 }
  0xc9   : > { %v403_v17 = vadd.f32 %v399_v16, %v315_v15 }
  0xcb   : > { %405 = vst [vmem:[#allocation2 + $0x8] sm:$0xff] %v403_v17 }
  0xcc   : > { %v410_v18 = vld [vmem:[#allocation2] sm:$0xff] }
  0xcd   : > { %v638_v20 = vld [vmem:[%s783_s2] ss:$0 sm:$0xff] }
  0xce   : > { %v589_v21 = vld [vmem:[%s784_s3] sm:$0xff]   ;;  %v416_v24 = vadd.f32 %v638_v20, %v410_v18 }
  0xcf   : > { %v590_v22 = vunpack.c.l.bf16 %v589_v21  ;;  %v591_v23 = vunpack.c.h.bf16 %v589_v21 }
  0xd1   : > { %v422_v26 = vadd.f32 %v590_v22, %v416_v24 }
  0xd2   : > { %v411_v19 = vld [vmem:[#allocation2 + $0x8] sm:$0xff] }
  0xd3   : > { %v417_v25 = vadd.f32 %v638_v20, %v411_v19  ;;  %v424_v28 = vmax.f32 %v422_v26, 0.0 }
  0xd5   : > { %v423_v27 = vadd.f32 %v591_v23, %v417_v25 }
  0xd7   : > { %v425_v29 = vmax.f32 %v423_v27, 0.0 }
  0xd9   : > { %v595_v30 = vpack.c.bf16 %v425_v29, %v424_v28 }
  0xdb   : > { %596 = vst [vmem:[%s785_s4] sm:$0xff] %v595_v30  }
  0xdc PF: > { %s14_s19 = sadd.s32 1, %s677_s19   ;;  %s786_s15 = smov %s665_s16 }
  0xdd   : > { %p11_p12 = scmp.ge.s32.totalorder %s14_s19, 11   ;;  %s787_s16 = smov %s740_s23 }
  0xde   : > { %s788_s17 = smov %s673_s18  ;;  %s789_s18 = smov %s791_s20 }
  0xdf   :  { %13 = sbr.rel (!%p11_p12) target bundleno = 3 (0x3), region = 126 }

// kernel: resnet_embedder_forward.41
= control target key start
LH: loop header
LB: loop body
LE: loop exit
PB: predicated region body
PF: predicated region fallthrough
CT: control target
= control target key end

     0   :  { %s625_s12 = smov 0   ;;  %s627_s13 = smov 0   ;;  %s698_s0 = inlined_call_operand.vmem [shape: bf16[16,1152], index: 0, kind: input, shape index: {}]   ;;  %s699_s1 = inlined_call_operand.vmem [shape: bf16[1152,128], index: 1, kind: input, shape index: {}]   ;;  %s700_s2 = inlined_call_operand.vmem [shape: f32[1,128], index: 2, kind: input, shape index: {}]   ;;  %s701_s3 = inlined_call_operand.vmem [shape: bf16[16,128], index: 3, kind: output, shape index: {}]  }
   0x1   :  { %s629_s14 = smov 0   ;;  %s631_s15 = smov 0  }
   0x2   :  { %s633_s16 = smov 0  }
   0x3 LB: > { %s22_s17 = sadd.s32 1, %s598_s15  ;;  %p41_p1 = scmp.ne.s32.totalorder %s590_s13, %s586_s12  ;;  %s602_s16 = sphi %s633_s16, %s13_s16   ;;  %s598_s15 = sphi %s631_s15, %s705_s15   ;;  %s594_s14 = sphi %s629_s14, %s704_s14   ;;  %s590_s13 = sphi %s627_s13, %s703_s13   ;;  %s586_s12 = sphi %s625_s12, %s702_s12  }
   0x4   : > { %p23_p0 = scmp.ge.s32.totalorder %s22_s17, 9  ;;  %p42_p2 = scmp.eq.s32.totalorder %s602_s16, 0 }
   0x5   : > { %s34_s19 = sadd.s32 1, %s590_s13  ;;  %p459_p5 = scmp.ge.s32.totalorder %s602_s16, 9 }
   0x6   : > { %s707_s17 = smov (%p23_p0, %s22_s17), 0  ;;  %p43_p3 = por %p42_p2, %p41_p1 }
   0x7   : > { %s30_s18 = ssub.s32 %s598_s15, %s707_s17  ;;  %143 = sbr.rel (%p459_p5) target bundleno = 18 (0x12), region = 20 }
   0x8   : > { %p32_p4 = scmp.eq.s32.totalorder %s30_s18, 0 }
   0xa   : > { %s660_s20 = scalar_select %p32_p4, %s590_s13, %s34_s19  }
   0xc   : > { %146 = sbr.rel (!%p43_p3) target bundleno = 18 (0x12), region = 24  ;;  %s148_s21 = sand.u32 (%p43_p3), 1, %s590_s13  }
   0xd   : > { %s461_s22 = sshll.u32 (%p43_p3), %s598_s15, 2  ;;  %s460_s23 = sshll.u32 (%p43_p3), %s148_s21, 3 }
   0xe   : > { %s155_s26 = scalar_lea.vmem (%p43_p3), %s698_s0, %s461_s22  ;;  %s150_s27 = scalar_lea.vmem (%p43_p3), [#allocation3], %s460_s23 }
   0xf   : > { %v172_v0 = vld [vmem:[%s155_s26] sm:$0xf] (%p43_p3)  ;;  %v174_v1 = vld [vmem:[%s155_s26 + $0x24] sm:$0xf] (%p43_p3) }
  0x10   : > { %173 = vst [vmem:[%s150_s27] sm:$0xf] (%p43_p3), %v172_v0 }
  0x11   : > { %175 = vst [vmem:[%s150_s27 + $0x4] sm:$0xf] %v174_v1 }
  0x12 PF: > { %p462_p6 = scmp.ge.s32.totalorder %s602_s16, 1  ;;  %p211_p7 = scmp.lt.s32.totalorder %s602_s16, 10 }
  0x14   : > { %p212_p8 = pnand %p462_p6, %p211_p7 }
  0x15   : > { %s218_s28 = sand.u32 (!%p212_p8), 1, %s586_s12   ;;  %s464_s29 = sshll.u32 (!%p212_p8), %s594_s14, 4 }
  0x16   : > { %215 = sbr.rel (%p212_p8) target bundleno = 218 (0xda), region = 69  ;;  %s463_s30 = sshll.u32 (!%p212_p8), %s218_s28, 3 }
  0x17   : > { %p248_p9 = scmp.lt.s32.totalorder (!%p212_p8), %s464_s29, 143  ;;  %s220_s8 = scalar_lea.vmem (!%p212_p8), [#allocation3], %s463_s30 }
  0x18   : > { %p466_p10 = scmp.ne.s32.totalorder (!%p212_p8), %s594_s14, 0 }
  0x1b   : > { %s709_s29 = smov (!%p248_p9, %s464_s29), 143  ;;  %262 = sbr.rel (%p466_p10) target bundleno = 35 (0x23), region = 77 }
  0x1c   : > { %s465_s4 = sshll.u32 %s709_s29, 2 }
  0x1d   : > { %s251_s7 = scalar_lea.vmem %s699_s1, %s465_s4 }
  0x20   : > { %v604_v2 = vmov 0.0  }
  0x21   : > { %263 = vst [vmem:[#allocation2] sm:$0xff] %v604_v2 }
  0x22   : > { %264 = vst [vmem:[#allocation2 + $0x8] sm:$0xff] %v604_v2 }
  0x23 PF: > { %v516_v3 = vld [vmem:[%s251_s7 + $0x38] sm:$0xff]  ;;  %v515_v4 = vld [vmem:[%s251_s7 + $0x30] sm:$0xff]  ;;  %v514_v5 = vld [vmem:[%s251_s7 + $0x28] sm:$0xff]  ;;  %p503_p11 = scmp.ne.s32.totalorder %s594_s14, 8 }
  0x24   : > { %339 = vmatpush.bf16.msra.mxu0 %v516_v3  ;;  %v513_v6 = vld [vmem:[%s251_s7 + $0x20] sm:$0xff]  ;;  %v512_v7 = vld [vmem:[%s251_s7 + $0x18] sm:$0xff]  ;;  %v511_v8 = vld [vmem:[%s251_s7 + $0x10] sm:$0xff] }
  0x25   : > { %v510_v9 = vld [vmem:[%s251_s7 + $0x8] sm:$0xff]  ;;  %v509_v10 = vld [vmem:[%s251_s7] sm:$0xff]  ;;  %v508_v11 = vld [vmem:[%s220_s8] sm:$0xff] }
  0x28   : > { %340 = vmatpush.bf16.msra.mxu0 %v515_v4  ;;  %v265_v12 = vld [vmem:[#allocation2] sm:$0xff] }
  0x29   : > { %v266_v15 = vld [vmem:[#allocation2 + $0x8] sm:$0xff] }
  0x2c   : > { %341 = vmatpush.bf16.msra.mxu0 %v514_v5 }
  0x30   : > { %342 = vmatpush.bf16.msra.mxu0 %v513_v6 }
  0x34   : > { %343 = vmatpush.bf16.msra.mxu0 %v512_v7 }
  0x38   : > { %344 = vmatpush.bf16.msra.mxu0 %v511_v8 }
  0x3c   : > { %345 = vmatpush.bf16.msra.mxu0 %v510_v9 }
  0x40   : > { %346 = vmatpush.bf16.msra.mxu0 %v509_v10 }
  0x43   : > { %347 = vmatmul.bf16.vlgmr.msra.gmra.mxu0 %v508_v11 }
  0xc0   : > { %v348_v13 = vpop.f32.mrf.mxu0 }
  0xc1   : > { %v353_v14 = vadd.f32 %v348_v13, %v265_v12 }
  0xc3   : > { %355 = vst [vmem:[#allocation2] sm:$0xff] %v353_v14 }
  0xc7   : > { %360 = sbr.rel (%p503_p11) target bundleno = 218 (0xda), region = 81 }
  0xc8   : > { %v350_v16 = vpop.f32.mrf.mxu0 }
  0xc9   : > { %v354_v17 = vadd.f32 %v350_v16, %v266_v15 }
  0xcb   : > { %356 = vst [vmem:[#allocation2 + $0x8] sm:$0xff] %v354_v17 }
  0xcc   : > { %v361_v18 = vld [vmem:[#allocation2] sm:$0xff] }
  0xcd   : > { %v563_v20 = vld [vmem:[%s700_s2] ss:$0 sm:$0xff] }
  0xce   : > { %v367_v21 = vadd.f32 %v563_v20, %v361_v18 }
  0xd0   : > { %v369_v23 = vmax.f32 %v367_v21, 0.0 }
  0xd2   : > { %v362_v19 = vld [vmem:[#allocation2 + $0x8] sm:$0xff] }
  0xd3   : > { %v368_v22 = vadd.f32 %v563_v20, %v362_v19 }
  0xd5   : > { %v370_v24 = vmax.f32 %v368_v22, 0.0 }
  0xd7   : > { %v520_v25 = vpack.c.bf16 %v370_v24, %v369_v23 }
  0xd9   : > { %521 = vst [vmem:[%s701_s3] sm:$0xff] %v520_v25  }
  0xda PF: > { %s13_s16 = sadd.s32 1, %s602_s16   ;;  %s702_s12 = smov %s590_s13 }
  0xdb   : > { %p10_p12 = scmp.ge.s32.totalorder %s13_s16, 11   ;;  %s703_s13 = smov %s660_s20 }
  0xdc   : > { %s704_s14 = smov %s598_s15  ;;  %s705_s15 = smov %s707_s17 }
  0xdd   :  { %12 = sbr.rel (!%p10_p12) target bundleno = 3 (0x3), region = 119 }

</bundles_post_ra>
